<compile_context>
chip_gen: v7x
topology: tpu7x:2x2x1
jax: 0.10.0
libtpu: 0.0.40
codegen_flags: <defaults>
</compile_context>

<pallas_src>
import jax
import jax.numpy as jnp
from jax.experimental import pallas as pl
from jax.experimental.pallas import tpu as pltpu

KH, KW = 3, 5      # pooling kernel
PH, PW = 1, 2      # pooling padding
SH, SW = 2, 1      # pooling stride
LN_EPS = 1e-5
N_BLK_CAP = 8      # images per grid step; ~0.6 MB/image (f32, double-buffered)
                   # -> comfortably inside v7x's 64 MiB VMEM (v5e/v6e: 128 MiB).


def _round_up(v, m):
    return (v + m - 1) // m * m


def _subsample_kernel(x_ref, w_ref, p_ref, o_ref, hs_buf, hm_buf):
    # x_ref : (nb, H, W, C)      f32, channels-last, UNpadded
    # w_ref : (C, D)             bf16 projection weight (Linear.weight.T)
    # p_ref : (3, D)             f32, rows = [bias, ln_gamma, ln_beta]
    # o_ref : (nb, H_out, W, D)  f32
    # hs_buf/hm_buf : (H_out, wpad, C) f32 scratch; cols >= W stay 0 / -inf and
    #   act as the avg / max pooling halo (wpad = round_up(W+4, 8)).
    nb, H, W, C = x_ref.shape
    h_out = H // 2
    D = w_ref.shape[1]
    wpad = hs_buf.shape[1]

    # Pad columns: 0 for the avg path (count_include_pad=True), -inf for max.
    hs_buf[...] = jnp.zeros((h_out, wpad, C), jnp.float32)
    hm_buf[...] = jnp.full((h_out, wpad, C), -jnp.inf, jnp.float32)

    col = jax.lax.broadcasted_iota(jnp.int32, (wpad, 1), 0)
    valid_col = col < W
    top_sum = jnp.zeros((1, W, C), jnp.float32)
    top_max = jnp.full((1, W, C), -jnp.inf, jnp.float32)

    x_rows = []
    for i in range(nb):                                   # static unroll, nb <= 8
        xi = x_ref[i].astype(jnp.float32)                 # (H, W, C)
        x4 = xi.reshape(h_out, 2, W, C)
        even, odd = x4[:, 0], x4[:, 1]                    # input rows 2r / 2r+1

        # H direction (3 taps) fused with the stride-2 row subsample: output
        # row r pools input rows {2r-1, 2r, 2r+1}; r=0 uses the top halo row.
        prev = odd[:h_out - 1]
        h_sum = even + odd + jnp.concatenate([top_sum, prev], axis=0)
        h_max = jnp.maximum(jnp.maximum(even, odd),
                            jnp.concatenate([top_max, prev], axis=0))

        # Stage into the W-padded scratch (prefix store: sublane offsets kept,
        # pad columns untouched).
        hs_buf[:, :W, :] = h_sum
        hm_buf[:, :W, :] = h_max
        hs = hs_buf[...]
        hm = hm_buf[...]

        # W direction (5 taps, stride 1, pad 2) via symmetric +/-1, +/-2 rolls:
        # the wrap-around makes the trailing pad columns double as the left
        # halo, so there are no unaligned sublane slices anywhere.
        w_sum, w_max = hs, hm
        for d in (1, 2):
            for s in (d, wpad - d):
                w_sum = w_sum + pltpu.roll(hs, s, axis=1)
                w_max = jnp.maximum(w_max, pltpu.roll(hm, s, axis=1))

        # (avg + max) * 0.5 with the scalars folded into one combine; columns
        # >= W are wrap garbage (can be -inf) -> zero them so the spare MXU
        # rows stay finite, then flatten tile-aligned (wpad % 8 == 0 => free).
        pooled = w_sum * (0.5 / (KH * KW)) + w_max * 0.5  # (h_out, wpad, C)
        pooled = jnp.where(valid_col, pooled, 0.0)
        x_rows.append(pooled.reshape(h_out * wpad, C).astype(w_ref.dtype))

    # One MXU matmul for the whole block: M = nb * h_out * wpad rows,
    # bf16 operands, f32 accumulation.
    x_lc = x_rows[0] if nb == 1 else jnp.concatenate(x_rows, axis=0)
    p = p_ref[...]
    y = jnp.dot(x_lc, w_ref[...], preferred_element_type=jnp.float32) + p[0:1]

    # LayerNorm over D (single pass, variance clamped >= 0), affine.
    mean = jnp.mean(y, axis=-1, keepdims=True)
    var = jnp.maximum(jnp.mean(y * y, axis=-1, keepdims=True) - mean * mean, 0.0)
    y = (y - mean) * jax.lax.rsqrt(var + LN_EPS) * p[1:2] + p[2:3]

    # Drop the wpad-W garbage columns with a prefix slice (offsets preserved,
    # no relayout) and store lane-dense (D >= 128 in SVTR configs).
    o_ref[...] = y.reshape(nb, h_out, wpad, D)[:, :, :W, :]


def subsample_pool_nhwc(x_nhwc, w_proj, b_proj, gamma, beta):
    """Core entry: x_nhwc (N, H, W, C) f32 channels-last (no extra HBM copies).
    Returns (N, (H//2)*W, C_out) f32 matching SubSample(types='Pool')."""
    N, H, W, C = x_nhwc.shape
    D = w_proj.shape[0]
    assert H % 2 == 0, "even H expected for the stride-2 row subsample"
    # TODO(synk): support odd H (extra tail output row) like the PyTorch module.
    h_out = H // 2
    wpad = _round_up(W + 2 * PW, 8)

    n_blk = min(N, N_BLK_CAP)
    grid = pl.cdiv(N, n_blk)
    n_pad = grid * n_blk
    if n_pad != N:
        x_nhwc = jnp.pad(x_nhwc, ((0, n_pad - N), (0, 0), (0, 0), (0, 0)))

    wt = jnp.asarray(w_proj).T.astype(jnp.bfloat16)                   # (C, D)
    params = jnp.stack([b_proj, gamma, beta]).astype(jnp.float32)     # (3, D)

    out = pl.pallas_call(
        _subsample_kernel,
        out_shape=jax.ShapeDtypeStruct((n_pad, h_out, W, D), jnp.float32),
        grid_spec=pltpu.PrefetchScalarGridSpec(
            num_scalar_prefetch=0,
            grid=(grid,),
            in_specs=[
                pl.BlockSpec((n_blk, H, W, C), lambda n: (n, 0, 0, 0)),
                pl.BlockSpec((C, D), lambda n: (0, 0)),
                pl.BlockSpec((3, D), lambda n: (0, 0)),
            ],
            out_specs=pl.BlockSpec((n_blk, h_out, W, D), lambda n: (n, 0, 0, 0)),
            scratch_shapes=[
                pltpu.VMEM((h_out, wpad, C), jnp.float32),
                pltpu.VMEM((h_out, wpad, C), jnp.float32),
            ],
        ),
        # TODO(synk): add a second "parallel" grid axis over H_out halo blocks
        # so N=1 inference can occupy both v7x TensorCores, and optionally ship
        # x as bf16 to halve the input DMA when the surrounding blocks are bf16.
        compiler_params=pltpu.CompilerParams(dimension_semantics=("parallel",)),
    )(x_nhwc, wt, params)
    return out[:N].reshape(N, h_out * W, D)


def subsample_pool_tokens(x_nlc, hw, w_proj, b_proj, gamma, beta):
    """Zero-copy entry for the upstream SVTR token layout: x_nlc (N, H*W, C)."""
    N, L, C = x_nlc.shape
    H, W = hw
    return subsample_pool_nhwc(x_nlc.reshape(N, H, W, C),
                               w_proj, b_proj, gamma, beta)


def subsample_pool(x_nchw, w_proj, b_proj, gamma, beta):
    """PyTorch-parity entry: x (N, C, H, W).  The NCHW->NHWC transpose is the
    only wrapper-side copy (use subsample_pool_tokens upstream to skip it)."""
    return subsample_pool_nhwc(jnp.transpose(x_nchw, (0, 2, 3, 1)),
                               w_proj, b_proj, gamma, beta)


def _reference(x, w_proj, b_proj, gamma, beta):
    """Pure-JAX (all-f32) reference matching the PyTorch module."""
    pads = [(0, 0), (0, 0), (PH, PH), (PW, PW)]
    s = jax.lax.reduce_window(x, 0.0, jax.lax.add, (1, 1, KH, KW), (1, 1, SH, SW), pads)
    x1 = s / float(KH * KW)
    x2 = jax.lax.reduce_window(x, -jnp.inf, jax.lax.max, (1, 1, KH, KW), (1, 1, SH, SW), pads)
    xp = (x1 + x2) * 0.5
    N, C, Ho, Wo = xp.shape
    flat = xp.reshape(N, C, Ho * Wo).transpose(0, 2, 1)
    y = flat @ w_proj.T + b_proj
    mean = y.mean(-1, keepdims=True)
    var = ((y - mean) ** 2).mean(-1, keepdims=True)
    return (y - mean) / jnp.sqrt(var + LN_EPS) * gamma + beta


if __name__ == "__main__":
    # Mirrors sub_sample1 of the default SVTRNet config: img_size=[48,100],
    # sub_num=2 -> feature map H=12, W=25; embed_dim 64 -> 128.
    N, C_in, C_out, H, W = 4, 64, 128, 12, 25

    key = jax.random.PRNGKey(0)
    kx, kw = jax.random.split(key, 2)
    x = jax.random.normal(kx, (N, C_in, H, W), dtype=jnp.float32)

    # SVTRNet._init_weights: Linear weight ~ trunc_normal(std=0.02), bias zeros;
    # LayerNorm weight ones, bias zeros.
    w_proj = 0.02 * jax.random.truncated_normal(kw, -2.0, 2.0, (C_out, C_in)).astype(jnp.float32)
    b_proj = jnp.zeros((C_out,), jnp.float32)
    gamma = jnp.ones((C_out,), jnp.float32)
    beta = jnp.zeros((C_out,), jnp.float32)

    out = jax.block_until_ready(subsample_pool(x, w_proj, b_proj, gamma, beta))
    ref = jax.block_until_ready(_reference(x, w_proj, b_proj, gamma, beta))

    assert out.shape == (N, (H // 2) * W, C_out), out.shape
    err = float(jnp.max(jnp.abs(out - ref)))
    # bf16 MXU operands / f32 accumulation vs the all-f32 reference on
    # LayerNorm-normalized (O(1)) outputs: observed max error ~1e-2.
    assert err < 3e-2, err
    print("KERNEL_OK")
</pallas_src>

<mosaic_0001>
module attributes {stable_mosaic.version = 11 : i64} {
  func.func @_subsample_kernel(%arg0: i32, %arg1: memref<4x12x25x64xf32, #tpu.memory_space<vmem>>, %arg2: memref<64x128xbf16, #tpu.memory_space<vmem>>, %arg3: memref<3x128xf32, #tpu.memory_space<vmem>>, %arg4: memref<4x6x25x128xf32, #tpu.memory_space<vmem>>, %arg5: memref<6x32x64xf32, #tpu.memory_space<vmem>>, %arg6: memref<6x32x64xf32, #tpu.memory_space<vmem>>) attributes {dimension_semantics = [#tpu.dimension_semantics<parallel>], iteration_bounds = array<i64: 1>, scalar_prefetch = 0 : i64, scratch_operands = 2 : i64, tpu.core_type = #tpu.core_type<tc>, window_params = [{transform_indices = @transform_0, window_bounds = array<i64: 4, 12, 25, 64>}, {pipeline_mode = #tpu.pipeline_mode<synchronous>, transform_indices = @transform_1, window_bounds = array<i64: 64, 128>}, {pipeline_mode = #tpu.pipeline_mode<synchronous>, transform_indices = @transform_2, window_bounds = array<i64: 3, 128>}, {transform_indices = @transform_3, window_bounds = array<i64: 4, 6, 25, 128>}]} {
    %cst = arith.constant 0.000000e+00 : f32
    %0 = vector.broadcast %cst : f32 to vector<6x32x64xf32>
    %c0 = arith.constant 0 : index
    %c0_0 = arith.constant 0 : index
    %c0_1 = arith.constant 0 : index
    %1 = vector.load %arg5[%c0, %c0_0, %c0_1] : memref<6x32x64xf32, #tpu.memory_space<vmem>>, vector<6x32x64xf32>
    tpu.vector_store %arg5[%c0, %c0_0, %c0_1], %0 {strides = array<i32>} : memref<6x32x64xf32, #tpu.memory_space<vmem>>, vector<6x32x64xf32>,
    %cst_2 = arith.constant 0xFF800000 : f32
    %2 = vector.broadcast %cst_2 : f32 to vector<6x32x64xf32>
    %c0_3 = arith.constant 0 : index
    %c0_4 = arith.constant 0 : index
    %c0_5 = arith.constant 0 : index
    %3 = vector.load %arg6[%c0_3, %c0_4, %c0_5] : memref<6x32x64xf32, #tpu.memory_space<vmem>>, vector<6x32x64xf32>
    tpu.vector_store %arg6[%c0_3, %c0_4, %c0_5], %2 {strides = array<i32>} : memref<6x32x64xf32, #tpu.memory_space<vmem>>, vector<6x32x64xf32>,
    %4 = tpu.iota {dimensions = array<i32: 0>} : vector<32x1xi32>
    %c25_i32 = arith.constant 25 : i32
    %5 = vector.broadcast %c25_i32 : i32 to vector<32x1xi32>
    %6 = arith.cmpi slt, %4, %5 : vector<32x1xi32>
    %cst_6 = arith.constant 0.000000e+00 : f32
    %7 = vector.broadcast %cst_6 : f32 to vector<1x25x64xf32>
    %cst_7 = arith.constant 0xFF800000 : f32
    %8 = vector.broadcast %cst_7 : f32 to vector<1x25x64xf32>
    %c0_8 = arith.constant 0 : index
    %c0_9 = arith.constant 0 : index
    %c0_10 = arith.constant 0 : index
    %c0_11 = arith.constant 0 : index
    %9 = vector.load %arg1[%c0_8, %c0_9, %c0_10, %c0_11] : memref<4x12x25x64xf32, #tpu.memory_space<vmem>>, vector<1x12x25x64xf32>
    %10 = vector.shape_cast %9 : vector<1x12x25x64xf32> to vector<12x25x64xf32>
    %11 = vector.shape_cast %10 : vector<12x25x64xf32> to vector<6x2x25x64xf32>
    %12 = vector.extract_strided_slice %11 {offsets = [0, 0, 0, 0], sizes = [6, 1, 25, 64], strides = [1, 1, 1, 1]} : vector<6x2x25x64xf32> to vector<6x1x25x64xf32>
    %13 = vector.shape_cast %12 : vector<6x1x25x64xf32> to vector<6x25x64xf32>
    %14 = vector.extract_strided_slice %11 {offsets = [0, 1, 0, 0], sizes = [6, 1, 25, 64], strides = [1, 1, 1, 1]} : vector<6x2x25x64xf32> to vector<6x1x25x64xf32>
    %15 = vector.shape_cast %14 : vector<6x1x25x64xf32> to vector<6x25x64xf32>
    %16 = vector.extract_strided_slice %15 {offsets = [0, 0, 0], sizes = [5, 25, 64], strides = [1, 1, 1]} : vector<6x25x64xf32> to vector<5x25x64xf32>
    %17 = arith.addf %13, %15 : vector<6x25x64xf32>
    %18 = tpu.concatenate %7, %16 in 0 : vector<1x25x64xf32>, vector<5x25x64xf32> -> vector<6x25x64xf32>
    %19 = arith.addf %17, %18 : vector<6x25x64xf32>
    %20 = arith.maximumf %13, %15 : vector<6x25x64xf32>
    %21 = tpu.concatenate %8, %16 in 0 : vector<1x25x64xf32>, vector<5x25x64xf32> -> vector<6x25x64xf32>
    %22 = arith.maximumf %20, %21 : vector<6x25x64xf32>
    %c0_12 = arith.constant 0 : index
    %c0_13 = arith.constant 0 : index
    %c0_14 = arith.constant 0 : index
    %23 = vector.load %arg5[%c0_12, %c0_13, %c0_14] : memref<6x32x64xf32, #tpu.memory_space<vmem>>, vector<6x25x64xf32>
    tpu.vector_store %arg5[%c0_12, %c0_13, %c0_14], %19 {strides = array<i32>} : memref<6x32x64xf32, #tpu.memory_space<vmem>>, vector<6x25x64xf32>,
    %c0_15 = arith.constant 0 : index
    %c0_16 = arith.constant 0 : index
    %c0_17 = arith.constant 0 : index
    %24 = vector.load %arg6[%c0_15, %c0_16, %c0_17] : memref<6x32x64xf32, #tpu.memory_space<vmem>>, vector<6x25x64xf32>
    tpu.vector_store %arg6[%c0_15, %c0_16, %c0_17], %22 {strides = array<i32>} : memref<6x32x64xf32, #tpu.memory_space<vmem>>, vector<6x25x64xf32>,
    %c0_18 = arith.constant 0 : index
    %c0_19 = arith.constant 0 : index
    %c0_20 = arith.constant 0 : index
    %25 = vector.load %arg5[%c0_18, %c0_19, %c0_20] : memref<6x32x64xf32, #tpu.memory_space<vmem>>, vector<6x32x64xf32>
    %c0_21 = arith.constant 0 : index
    %c0_22 = arith.constant 0 : index
    %c0_23 = arith.constant 0 : index
    %26 = vector.load %arg6[%c0_21, %c0_22, %c0_23] : memref<6x32x64xf32, #tpu.memory_space<vmem>>, vector<6x32x64xf32>
    %c1_i32 = arith.constant 1 : i32
    %27 = tpu.dynamic_rotate %25 by %c1_i32 dim 1 : vector<6x32x64xf32>, i32 -> vector<6x32x64xf32>
    %28 = arith.addf %25, %27 : vector<6x32x64xf32>
    %c1_i32_24 = arith.constant 1 : i32
    %29 = tpu.dynamic_rotate %26 by %c1_i32_24 dim 1 : vector<6x32x64xf32>, i32 -> vector<6x32x64xf32>
    %30 = arith.maximumf %26, %29 : vector<6x32x64xf32>
    %c31_i32 = arith.constant 31 : i32
    %31 = tpu.dynamic_rotate %25 by %c31_i32 dim 1 : vector<6x32x64xf32>, i32 -> vector<6x32x64xf32>
    %32 = arith.addf %28, %31 : vector<6x32x64xf32>
    %c31_i32_25 = arith.constant 31 : i32
    %33 = tpu.dynamic_rotate %26 by %c31_i32_25 dim 1 : vector<6x32x64xf32>, i32 -> vector<6x32x64xf32>
    %34 = arith.maximumf %30, %33 : vector<6x32x64xf32>
    %c2_i32 = arith.constant 2 : i32
    %35 = tpu.dynamic_rotate %25 by %c2_i32 dim 1 : vector<6x32x64xf32>, i32 -> vector<6x32x64xf32>
    %36 = arith.addf %32, %35 : vector<6x32x64xf32>
    %c2_i32_26 = arith.constant 2 : i32
    %37 = tpu.dynamic_rotate %26 by %c2_i32_26 dim 1 : vector<6x32x64xf32>, i32 -> vector<6x32x64xf32>
    %38 = arith.maximumf %34, %37 : vector<6x32x64xf32>
    %c30_i32 = arith.constant 30 : i32
    %39 = tpu.dynamic_rotate %25 by %c30_i32 dim 1 : vector<6x32x64xf32>, i32 -> vector<6x32x64xf32>
    %40 = arith.addf %36, %39 : vector<6x32x64xf32>
    %c30_i32_27 = arith.constant 30 : i32
    %41 = tpu.dynamic_rotate %26 by %c30_i32_27 dim 1 : vector<6x32x64xf32>, i32 -> vector<6x32x64xf32>
    %42 = arith.maximumf %38, %41 : vector<6x32x64xf32>
    %cst_28 = arith.constant 0.0333333351 : f32
    %43 = vector.broadcast %cst_28 : f32 to vector<6x32x64xf32>
    %44 = arith.mulf %40, %43 : vector<6x32x64xf32>
    %cst_29 = arith.constant 5.000000e-01 : f32
    %45 = vector.broadcast %cst_29 : f32 to vector<6x32x64xf32>
    %46 = arith.mulf %42, %45 : vector<6x32x64xf32>
    %47 = arith.addf %44, %46 : vector<6x32x64xf32>
    %cst_30 = arith.constant 0.000000e+00 : f32
    %48 = vector.shape_cast %6 : vector<32x1xi1> to vector<1x32x1xi1>
    %49 = vector.broadcast %48 : vector<1x32x1xi1> to vector<6x32x64xi1>
    %50 = vector.broadcast %cst_30 : f32 to vector<6x32x64xf32>
    %51 = arith.select %49, %47, %50 : vector<6x32x64xi1>, vector<6x32x64xf32>
    %52 = vector.shape_cast %51 : vector<6x32x64xf32> to vector<192x64xf32>
    %53 = arith.truncf %52 : vector<192x64xf32> to vector<192x64xbf16>
    %c1 = arith.constant 1 : index
    %c0_31 = arith.constant 0 : index
    %c0_32 = arith.constant 0 : index
    %c0_33 = arith.constant 0 : index
    %54 = vector.load %arg1[%c1, %c0_31, %c0_32, %c0_33] : memref<4x12x25x64xf32, #tpu.memory_space<vmem>>, vector<1x12x25x64xf32>
    %55 = vector.shape_cast %54 : vector<1x12x25x64xf32> to vector<12x25x64xf32>
    %56 = vector.shape_cast %55 : vector<12x25x64xf32> to vector<6x2x25x64xf32>
    %57 = vector.extract_strided_slice %56 {offsets = [0, 0, 0, 0], sizes = [6, 1, 25, 64], strides = [1, 1, 1, 1]} : vector<6x2x25x64xf32> to vector<6x1x25x64xf32>
    %58 = vector.shape_cast %57 : vector<6x1x25x64xf32> to vector<6x25x64xf32>
    %59 = vector.extract_strided_slice %56 {offsets = [0, 1, 0, 0], sizes = [6, 1, 25, 64], strides = [1, 1, 1, 1]} : vector<6x2x25x64xf32> to vector<6x1x25x64xf32>
    %60 = vector.shape_cast %59 : vector<6x1x25x64xf32> to vector<6x25x64xf32>
    %61 = vector.extract_strided_slice %60 {offsets = [0, 0, 0], sizes = [5, 25, 64], strides = [1, 1, 1]} : vector<6x25x64xf32> to vector<5x25x64xf32>
    %62 = arith.addf %58, %60 : vector<6x25x64xf32>
    %63 = tpu.concatenate %7, %61 in 0 : vector<1x25x64xf32>, vector<5x25x64xf32> -> vector<6x25x64xf32>
    %64 = arith.addf %62, %63 : vector<6x25x64xf32>
    %65 = arith.maximumf %58, %60 : vector<6x25x64xf32>
    %66 = tpu.concatenate %8, %61 in 0 : vector<1x25x64xf32>, vector<5x25x64xf32> -> vector<6x25x64xf32>
    %67 = arith.maximumf %65, %66 : vector<6x25x64xf32>
    %c0_34 = arith.constant 0 : index
    %c0_35 = arith.constant 0 : index
    %c0_36 = arith.constant 0 : index
    %68 = vector.load %arg5[%c0_34, %c0_35, %c0_36] : memref<6x32x64xf32, #tpu.memory_space<vmem>>, vector<6x25x64xf32>
    tpu.vector_store %arg5[%c0_34, %c0_35, %c0_36], %64 {strides = array<i32>} : memref<6x32x64xf32, #tpu.memory_space<vmem>>, vector<6x25x64xf32>,
    %c0_37 = arith.constant 0 : index
    %c0_38 = arith.constant 0 : index
    %c0_39 = arith.constant 0 : index
    %69 = vector.load %arg6[%c0_37, %c0_38, %c0_39] : memref<6x32x64xf32, #tpu.memory_space<vmem>>, vector<6x25x64xf32>
    tpu.vector_store %arg6[%c0_37, %c0_38, %c0_39], %67 {strides = array<i32>} : memref<6x32x64xf32, #tpu.memory_space<vmem>>, vector<6x25x64xf32>,
    %c0_40 = arith.constant 0 : index
    %c0_41 = arith.constant 0 : index
    %c0_42 = arith.constant 0 : index
    %70 = vector.load %arg5[%c0_40, %c0_41, %c0_42] : memref<6x32x64xf32, #tpu.memory_space<vmem>>, vector<6x32x64xf32>
    %c0_43 = arith.constant 0 : index
    %c0_44 = arith.constant 0 : index
    %c0_45 = arith.constant 0 : index
    %71 = vector.load %arg6[%c0_43, %c0_44, %c0_45] : memref<6x32x64xf32, #tpu.memory_space<vmem>>, vector<6x32x64xf32>
    %c1_i32_46 = arith.constant 1 : i32
    %72 = tpu.dynamic_rotate %70 by %c1_i32_46 dim 1 : vector<6x32x64xf32>, i32 -> vector<6x32x64xf32>
    %73 = arith.addf %70, %72 : vector<6x32x64xf32>
    %c1_i32_47 = arith.constant 1 : i32
    %74 = tpu.dynamic_rotate %71 by %c1_i32_47 dim 1 : vector<6x32x64xf32>, i32 -> vector<6x32x64xf32>
    %75 = arith.maximumf %71, %74 : vector<6x32x64xf32>
    %c31_i32_48 = arith.constant 31 : i32
    %76 = tpu.dynamic_rotate %70 by %c31_i32_48 dim 1 : vector<6x32x64xf32>, i32 -> vector<6x32x64xf32>
    %77 = arith.addf %73, %76 : vector<6x32x64xf32>
    %c31_i32_49 = arith.constant 31 : i32
    %78 = tpu.dynamic_rotate %71 by %c31_i32_49 dim 1 : vector<6x32x64xf32>, i32 -> vector<6x32x64xf32>
    %79 = arith.maximumf %75, %78 : vector<6x32x64xf32>
    %c2_i32_50 = arith.constant 2 : i32
    %80 = tpu.dynamic_rotate %70 by %c2_i32_50 dim 1 : vector<6x32x64xf32>, i32 -> vector<6x32x64xf32>
    %81 = arith.addf %77, %80 : vector<6x32x64xf32>
    %c2_i32_51 = arith.constant 2 : i32
    %82 = tpu.dynamic_rotate %71 by %c2_i32_51 dim 1 : vector<6x32x64xf32>, i32 -> vector<6x32x64xf32>
    %83 = arith.maximumf %79, %82 : vector<6x32x64xf32>
    %c30_i32_52 = arith.constant 30 : i32
    %84 = tpu.dynamic_rotate %70 by %c30_i32_52 dim 1 : vector<6x32x64xf32>, i32 -> vector<6x32x64xf32>
    %85 = arith.addf %81, %84 : vector<6x32x64xf32>
    %c30_i32_53 = arith.constant 30 : i32
    %86 = tpu.dynamic_rotate %71 by %c30_i32_53 dim 1 : vector<6x32x64xf32>, i32 -> vector<6x32x64xf32>
    %87 = arith.maximumf %83, %86 : vector<6x32x64xf32>
    %cst_54 = arith.constant 0.0333333351 : f32
    %88 = vector.broadcast %cst_54 : f32 to vector<6x32x64xf32>
    %89 = arith.mulf %85, %88 : vector<6x32x64xf32>
    %cst_55 = arith.constant 5.000000e-01 : f32
    %90 = vector.broadcast %cst_55 : f32 to vector<6x32x64xf32>
    %91 = arith.mulf %87, %90 : vector<6x32x64xf32>
    %92 = arith.addf %89, %91 : vector<6x32x64xf32>
    %cst_56 = arith.constant 0.000000e+00 : f32
    %93 = vector.shape_cast %6 : vector<32x1xi1> to vector<1x32x1xi1>
    %94 = vector.broadcast %93 : vector<1x32x1xi1> to vector<6x32x64xi1>
    %95 = vector.broadcast %cst_56 : f32 to vector<6x32x64xf32>
    %96 = arith.select %94, %92, %95 : vector<6x32x64xi1>, vector<6x32x64xf32>
    %97 = vector.shape_cast %96 : vector<6x32x64xf32> to vector<192x64xf32>
    %98 = arith.truncf %97 : vector<192x64xf32> to vector<192x64xbf16>
    %c2 = arith.constant 2 : index
    %c0_57 = arith.constant 0 : index
    %c0_58 = arith.constant 0 : index
    %c0_59 = arith.constant 0 : index
    %99 = vector.load %arg1[%c2, %c0_57, %c0_58, %c0_59] : memref<4x12x25x64xf32, #tpu.memory_space<vmem>>, vector<1x12x25x64xf32>
    %100 = vector.shape_cast %99 : vector<1x12x25x64xf32> to vector<12x25x64xf32>
    %101 = vector.shape_cast %100 : vector<12x25x64xf32> to vector<6x2x25x64xf32>
    %102 = vector.extract_strided_slice %101 {offsets = [0, 0, 0, 0], sizes = [6, 1, 25, 64], strides = [1, 1, 1, 1]} : vector<6x2x25x64xf32> to vector<6x1x25x64xf32>
    %103 = vector.shape_cast %102 : vector<6x1x25x64xf32> to vector<6x25x64xf32>
    %104 = vector.extract_strided_slice %101 {offsets = [0, 1, 0, 0], sizes = [6, 1, 25, 64], strides = [1, 1, 1, 1]} : vector<6x2x25x64xf32> to vector<6x1x25x64xf32>
    %105 = vector.shape_cast %104 : vector<6x1x25x64xf32> to vector<6x25x64xf32>
    %106 = vector.extract_strided_slice %105 {offsets = [0, 0, 0], sizes = [5, 25, 64], strides = [1, 1, 1]} : vector<6x25x64xf32> to vector<5x25x64xf32>
    %107 = arith.addf %103, %105 : vector<6x25x64xf32>
    %108 = tpu.concatenate %7, %106 in 0 : vector<1x25x64xf32>, vector<5x25x64xf32> -> vector<6x25x64xf32>
    %109 = arith.addf %107, %108 : vector<6x25x64xf32>
    %110 = arith.maximumf %103, %105 : vector<6x25x64xf32>
    %111 = tpu.concatenate %8, %106 in 0 : vector<1x25x64xf32>, vector<5x25x64xf32> -> vector<6x25x64xf32>
    %112 = arith.maximumf %110, %111 : vector<6x25x64xf32>
    %c0_60 = arith.constant 0 : index
    %c0_61 = arith.constant 0 : index
    %c0_62 = arith.constant 0 : index
    %113 = vector.load %arg5[%c0_60, %c0_61, %c0_62] : memref<6x32x64xf32, #tpu.memory_space<vmem>>, vector<6x25x64xf32>
    tpu.vector_store %arg5[%c0_60, %c0_61, %c0_62], %109 {strides = array<i32>} : memref<6x32x64xf32, #tpu.memory_space<vmem>>, vector<6x25x64xf32>,
    %c0_63 = arith.constant 0 : index
    %c0_64 = arith.constant 0 : index
    %c0_65 = arith.constant 0 : index
    %114 = vector.load %arg6[%c0_63, %c0_64, %c0_65] : memref<6x32x64xf32, #tpu.memory_space<vmem>>, vector<6x25x64xf32>
    tpu.vector_store %arg6[%c0_63, %c0_64, %c0_65], %112 {strides = array<i32>} : memref<6x32x64xf32, #tpu.memory_space<vmem>>, vector<6x25x64xf32>,
    %c0_66 = arith.constant 0 : index
    %c0_67 = arith.constant 0 : index
    %c0_68 = arith.constant 0 : index
    %115 = vector.load %arg5[%c0_66, %c0_67, %c0_68] : memref<6x32x64xf32, #tpu.memory_space<vmem>>, vector<6x32x64xf32>
    %c0_69 = arith.constant 0 : index
    %c0_70 = arith.constant 0 : index
    %c0_71 = arith.constant 0 : index
    %116 = vector.load %arg6[%c0_69, %c0_70, %c0_71] : memref<6x32x64xf32, #tpu.memory_space<vmem>>, vector<6x32x64xf32>
    %c1_i32_72 = arith.constant 1 : i32
    %117 = tpu.dynamic_rotate %115 by %c1_i32_72 dim 1 : vector<6x32x64xf32>, i32 -> vector<6x32x64xf32>
    %118 = arith.addf %115, %117 : vector<6x32x64xf32>
    %c1_i32_73 = arith.constant 1 : i32
    %119 = tpu.dynamic_rotate %116 by %c1_i32_73 dim 1 : vector<6x32x64xf32>, i32 -> vector<6x32x64xf32>
    %120 = arith.maximumf %116, %119 : vector<6x32x64xf32>
    %c31_i32_74 = arith.constant 31 : i32
    %121 = tpu.dynamic_rotate %115 by %c31_i32_74 dim 1 : vector<6x32x64xf32>, i32 -> vector<6x32x64xf32>
    %122 = arith.addf %118, %121 : vector<6x32x64xf32>
    %c31_i32_75 = arith.constant 31 : i32
    %123 = tpu.dynamic_rotate %116 by %c31_i32_75 dim 1 : vector<6x32x64xf32>, i32 -> vector<6x32x64xf32>
    %124 = arith.maximumf %120, %123 : vector<6x32x64xf32>
    %c2_i32_76 = arith.constant 2 : i32
    %125 = tpu.dynamic_rotate %115 by %c2_i32_76 dim 1 : vector<6x32x64xf32>, i32 -> vector<6x32x64xf32>
    %126 = arith.addf %122, %125 : vector<6x32x64xf32>
    %c2_i32_77 = arith.constant 2 : i32
    %127 = tpu.dynamic_rotate %116 by %c2_i32_77 dim 1 : vector<6x32x64xf32>, i32 -> vector<6x32x64xf32>
    %128 = arith.maximumf %124, %127 : vector<6x32x64xf32>
    %c30_i32_78 = arith.constant 30 : i32
    %129 = tpu.dynamic_rotate %115 by %c30_i32_78 dim 1 : vector<6x32x64xf32>, i32 -> vector<6x32x64xf32>
    %130 = arith.addf %126, %129 : vector<6x32x64xf32>
    %c30_i32_79 = arith.constant 30 : i32
    %131 = tpu.dynamic_rotate %116 by %c30_i32_79 dim 1 : vector<6x32x64xf32>, i32 -> vector<6x32x64xf32>
    %132 = arith.maximumf %128, %131 : vector<6x32x64xf32>
    %cst_80 = arith.constant 0.0333333351 : f32
    %133 = vector.broadcast %cst_80 : f32 to vector<6x32x64xf32>
    %134 = arith.mulf %130, %133 : vector<6x32x64xf32>
    %cst_81 = arith.constant 5.000000e-01 : f32
    %135 = vector.broadcast %cst_81 : f32 to vector<6x32x64xf32>
    %136 = arith.mulf %132, %135 : vector<6x32x64xf32>
    %137 = arith.addf %134, %136 : vector<6x32x64xf32>
    %cst_82 = arith.constant 0.000000e+00 : f32
    %138 = vector.shape_cast %6 : vector<32x1xi1> to vector<1x32x1xi1>
    %139 = vector.broadcast %138 : vector<1x32x1xi1> to vector<6x32x64xi1>
    %140 = vector.broadcast %cst_82 : f32 to vector<6x32x64xf32>
    %141 = arith.select %139, %137, %140 : vector<6x32x64xi1>, vector<6x32x64xf32>
    %142 = vector.shape_cast %141 : vector<6x32x64xf32> to vector<192x64xf32>
    %143 = arith.truncf %142 : vector<192x64xf32> to vector<192x64xbf16>
    %c3 = arith.constant 3 : index
    %c0_83 = arith.constant 0 : index
    %c0_84 = arith.constant 0 : index
    %c0_85 = arith.constant 0 : index
    %144 = vector.load %arg1[%c3, %c0_83, %c0_84, %c0_85] : memref<4x12x25x64xf32, #tpu.memory_space<vmem>>, vector<1x12x25x64xf32>
    %145 = vector.shape_cast %144 : vector<1x12x25x64xf32> to vector<12x25x64xf32>
    %146 = vector.shape_cast %145 : vector<12x25x64xf32> to vector<6x2x25x64xf32>
    %147 = vector.extract_strided_slice %146 {offsets = [0, 0, 0, 0], sizes = [6, 1, 25, 64], strides = [1, 1, 1, 1]} : vector<6x2x25x64xf32> to vector<6x1x25x64xf32>
    %148 = vector.shape_cast %147 : vector<6x1x25x64xf32> to vector<6x25x64xf32>
    %149 = vector.extract_strided_slice %146 {offsets = [0, 1, 0, 0], sizes = [6, 1, 25, 64], strides = [1, 1, 1, 1]} : vector<6x2x25x64xf32> to vector<6x1x25x64xf32>
    %150 = vector.shape_cast %149 : vector<6x1x25x64xf32> to vector<6x25x64xf32>
    %151 = vector.extract_strided_slice %150 {offsets = [0, 0, 0], sizes = [5, 25, 64], strides = [1, 1, 1]} : vector<6x25x64xf32> to vector<5x25x64xf32>
    %152 = arith.addf %148, %150 : vector<6x25x64xf32>
    %153 = tpu.concatenate %7, %151 in 0 : vector<1x25x64xf32>, vector<5x25x64xf32> -> vector<6x25x64xf32>
    %154 = arith.addf %152, %153 : vector<6x25x64xf32>
    %155 = arith.maximumf %148, %150 : vector<6x25x64xf32>
    %156 = tpu.concatenate %8, %151 in 0 : vector<1x25x64xf32>, vector<5x25x64xf32> -> vector<6x25x64xf32>
    %157 = arith.maximumf %155, %156 : vector<6x25x64xf32>
    %c0_86 = arith.constant 0 : index
    %c0_87 = arith.constant 0 : index
    %c0_88 = arith.constant 0 : index
    %158 = vector.load %arg5[%c0_86, %c0_87, %c0_88] : memref<6x32x64xf32, #tpu.memory_space<vmem>>, vector<6x25x64xf32>
    tpu.vector_store %arg5[%c0_86, %c0_87, %c0_88], %154 {strides = array<i32>} : memref<6x32x64xf32, #tpu.memory_space<vmem>>, vector<6x25x64xf32>,
    %c0_89 = arith.constant 0 : index
    %c0_90 = arith.constant 0 : index
    %c0_91 = arith.constant 0 : index
    %159 = vector.load %arg6[%c0_89, %c0_90, %c0_91] : memref<6x32x64xf32, #tpu.memory_space<vmem>>, vector<6x25x64xf32>
    tpu.vector_store %arg6[%c0_89, %c0_90, %c0_91], %157 {strides = array<i32>} : memref<6x32x64xf32, #tpu.memory_space<vmem>>, vector<6x25x64xf32>,
    %c0_92 = arith.constant 0 : index
    %c0_93 = arith.constant 0 : index
    %c0_94 = arith.constant 0 : index
    %160 = vector.load %arg5[%c0_92, %c0_93, %c0_94] : memref<6x32x64xf32, #tpu.memory_space<vmem>>, vector<6x32x64xf32>
    %c0_95 = arith.constant 0 : index
    %c0_96 = arith.constant 0 : index
    %c0_97 = arith.constant 0 : index
    %161 = vector.load %arg6[%c0_95, %c0_96, %c0_97] : memref<6x32x64xf32, #tpu.memory_space<vmem>>, vector<6x32x64xf32>
    %c1_i32_98 = arith.constant 1 : i32
    %162 = tpu.dynamic_rotate %160 by %c1_i32_98 dim 1 : vector<6x32x64xf32>, i32 -> vector<6x32x64xf32>
    %163 = arith.addf %160, %162 : vector<6x32x64xf32>
    %c1_i32_99 = arith.constant 1 : i32
    %164 = tpu.dynamic_rotate %161 by %c1_i32_99 dim 1 : vector<6x32x64xf32>, i32 -> vector<6x32x64xf32>
    %165 = arith.maximumf %161, %164 : vector<6x32x64xf32>
    %c31_i32_100 = arith.constant 31 : i32
    %166 = tpu.dynamic_rotate %160 by %c31_i32_100 dim 1 : vector<6x32x64xf32>, i32 -> vector<6x32x64xf32>
    %167 = arith.addf %163, %166 : vector<6x32x64xf32>
    %c31_i32_101 = arith.constant 31 : i32
    %168 = tpu.dynamic_rotate %161 by %c31_i32_101 dim 1 : vector<6x32x64xf32>, i32 -> vector<6x32x64xf32>
    %169 = arith.maximumf %165, %168 : vector<6x32x64xf32>
    %c2_i32_102 = arith.constant 2 : i32
    %170 = tpu.dynamic_rotate %160 by %c2_i32_102 dim 1 : vector<6x32x64xf32>, i32 -> vector<6x32x64xf32>
    %171 = arith.addf %167, %170 : vector<6x32x64xf32>
    %c2_i32_103 = arith.constant 2 : i32
    %172 = tpu.dynamic_rotate %161 by %c2_i32_103 dim 1 : vector<6x32x64xf32>, i32 -> vector<6x32x64xf32>
    %173 = arith.maximumf %169, %172 : vector<6x32x64xf32>
    %c30_i32_104 = arith.constant 30 : i32
    %174 = tpu.dynamic_rotate %160 by %c30_i32_104 dim 1 : vector<6x32x64xf32>, i32 -> vector<6x32x64xf32>
    %175 = arith.addf %171, %174 : vector<6x32x64xf32>
    %c30_i32_105 = arith.constant 30 : i32
    %176 = tpu.dynamic_rotate %161 by %c30_i32_105 dim 1 : vector<6x32x64xf32>, i32 -> vector<6x32x64xf32>
    %177 = arith.maximumf %173, %176 : vector<6x32x64xf32>
    %cst_106 = arith.constant 0.0333333351 : f32
    %178 = vector.broadcast %cst_106 : f32 to vector<6x32x64xf32>
    %179 = arith.mulf %175, %178 : vector<6x32x64xf32>
    %cst_107 = arith.constant 5.000000e-01 : f32
    %180 = vector.broadcast %cst_107 : f32 to vector<6x32x64xf32>
    %181 = arith.mulf %177, %180 : vector<6x32x64xf32>
    %182 = arith.addf %179, %181 : vector<6x32x64xf32>
    %cst_108 = arith.constant 0.000000e+00 : f32
    %183 = vector.shape_cast %6 : vector<32x1xi1> to vector<1x32x1xi1>
    %184 = vector.broadcast %183 : vector<1x32x1xi1> to vector<6x32x64xi1>
    %185 = vector.broadcast %cst_108 : f32 to vector<6x32x64xf32>
    %186 = arith.select %184, %182, %185 : vector<6x32x64xi1>, vector<6x32x64xf32>
    %187 = vector.shape_cast %186 : vector<6x32x64xf32> to vector<192x64xf32>
    %188 = arith.truncf %187 : vector<192x64xf32> to vector<192x64xbf16>
    %189 = tpu.concatenate %53, %98, %143, %188 in 0 : vector<192x64xbf16>, vector<192x64xbf16>, vector<192x64xbf16>, vector<192x64xbf16> -> vector<768x64xbf16>
    %c0_109 = arith.constant 0 : index
    %c0_110 = arith.constant 0 : index
    %190 = vector.load %arg3[%c0_109, %c0_110] : memref<3x128xf32, #tpu.memory_space<vmem>>, vector<3x128xf32>
    %c0_111 = arith.constant 0 : index
    %c0_112 = arith.constant 0 : index
    %191 = vector.load %arg2[%c0_111, %c0_112] : memref<64x128xbf16, #tpu.memory_space<vmem>>, vector<64x128xbf16>
    %cst_113 = arith.constant dense<0.000000e+00> : vector<768x128xf32>
    %192 = tpu.matmul %189, %191, %cst_113 {dimension_numbers = #tpu.dot_dimension_numbers<[1], [0], [0], [1], [0, 0, 1, 1], [], []>} : vector<768x64xbf16>, vector<64x128xbf16>, vector<768x128xf32> -> vector<768x128xf32>
    %193 = vector.extract_strided_slice %190 {offsets = [0, 0], sizes = [1, 128], strides = [1, 1]} : vector<3x128xf32> to vector<1x128xf32>
    %194 = vector.broadcast %193 : vector<1x128xf32> to vector<768x128xf32>
    %195 = arith.addf %192, %194 : vector<768x128xf32>
    %cst_114 = arith.constant dense<0.000000e+00> : vector<768xf32>
    %196 = vector.multi_reduction <add>, %195, %cst_114 [1] : vector<768x128xf32> to vector<768xf32>
    %197 = vector.shape_cast %196 : vector<768xf32> to vector<768x1xf32>
    %cst_115 = arith.constant 1.280000e+02 : f32
    %198 = vector.broadcast %cst_115 : f32 to vector<768x1xf32>
    %199 = arith.divf %197, %198 : vector<768x1xf32>
    %200 = arith.mulf %195, %195 : vector<768x128xf32>
    %cst_116 = arith.constant dense<0.000000e+00> : vector<768xf32>
    %201 = vector.multi_reduction <add>, %200, %cst_116 [1] : vector<768x128xf32> to vector<768xf32>
    %202 = vector.shape_cast %201 : vector<768xf32> to vector<768x1xf32>
    %cst_117 = arith.constant 1.280000e+02 : f32
    %203 = vector.broadcast %cst_117 : f32 to vector<768x1xf32>
    %204 = arith.divf %202, %203 : vector<768x1xf32>
    %205 = arith.mulf %199, %199 : vector<768x1xf32>
    %206 = arith.subf %204, %205 : vector<768x1xf32>
    %cst_118 = arith.constant 0.000000e+00 : f32
    %207 = vector.broadcast %cst_118 : f32 to vector<768x1xf32>
    %208 = arith.maximumf %206, %207 : vector<768x1xf32>
    %209 = vector.broadcast %199 : vector<768x1xf32> to vector<768x128xf32>
    %210 = arith.subf %195, %209 : vector<768x128xf32>
    %cst_119 = arith.constant 9.99999974E-6 : f32
    %211 = vector.broadcast %cst_119 : f32 to vector<768x1xf32>
    %212 = arith.addf %208, %211 : vector<768x1xf32>
    %213 = math.rsqrt %212 : vector<768x1xf32>
    %214 = vector.broadcast %213 : vector<768x1xf32> to vector<768x128xf32>
    %215 = arith.mulf %210, %214 : vector<768x128xf32>
    %216 = vector.extract_strided_slice %190 {offsets = [1, 0], sizes = [1, 128], strides = [1, 1]} : vector<3x128xf32> to vector<1x128xf32>
    %217 = vector.broadcast %216 : vector<1x128xf32> to vector<768x128xf32>
    %218 = arith.mulf %215, %217 : vector<768x128xf32>
    %219 = vector.extract_strided_slice %190 {offsets = [2, 0], sizes = [1, 128], strides = [1, 1]} : vector<3x128xf32> to vector<1x128xf32>
    %220 = vector.broadcast %219 : vector<1x128xf32> to vector<768x128xf32>
    %221 = arith.addf %218, %220 : vector<768x128xf32>
    %222 = vector.shape_cast %221 : vector<768x128xf32> to vector<4x6x32x128xf32>
    %223 = vector.extract_strided_slice %222 {offsets = [0, 0, 0, 0], sizes = [4, 6, 25, 128], strides = [1, 1, 1, 1]} : vector<4x6x32x128xf32> to vector<4x6x25x128xf32>
    %c0_120 = arith.constant 0 : index
    %c0_121 = arith.constant 0 : index
    %c0_122 = arith.constant 0 : index
    %c0_123 = arith.constant 0 : index
    %224 = vector.load %arg4[%c0_120, %c0_121, %c0_122, %c0_123] : memref<4x6x25x128xf32, #tpu.memory_space<vmem>>, vector<4x6x25x128xf32>
    tpu.vector_store %arg4[%c0_120, %c0_121, %c0_122, %c0_123], %223 {strides = array<i32>} : memref<4x6x25x128xf32, #tpu.memory_space<vmem>>, vector<4x6x25x128xf32>,
    return
  }
  func.func @transform_0(%arg0: i32) -> (i32, i32, i32, i32) {
    %c0_i32 = arith.constant 0 : i32
    %c0_i32_0 = arith.constant 0 : i32
    %c0_i32_1 = arith.constant 0 : i32
    %c0_i32_2 = arith.constant 0 : i32
    return %arg0, %c0_i32, %c0_i32_0, %c0_i32_1 : i32, i32, i32, i32
  }
  func.func @transform_1(%arg0: i32) -> (i32, i32) {
    %c0_i32 = arith.constant 0 : i32
    %c0_i32_0 = arith.constant 0 : i32
    %c0_i32_1 = arith.constant 0 : i32
    return %c0_i32, %c0_i32_0 : i32, i32
  }
  func.func @transform_2(%arg0: i32) -> (i32, i32) {
    %c0_i32 = arith.constant 0 : i32
    %c0_i32_0 = arith.constant 0 : i32
    %c0_i32_1 = arith.constant 0 : i32
    return %c0_i32, %c0_i32_0 : i32, i32
  }
  func.func @transform_3(%arg0: i32) -> (i32, i32, i32, i32) {
    %c0_i32 = arith.constant 0 : i32
    %c0_i32_0 = arith.constant 0 : i32
    %c0_i32_1 = arith.constant 0 : i32
    %c0_i32_2 = arith.constant 0 : i32
    return %arg0, %c0_i32, %c0_i32_0, %c0_i32_1 : i32, i32, i32, i32
  }
}

</mosaic_0001>

<bundles_post_ra>
// kernel: tpu_custom_call.1
= control target key start
LH: loop header
LB: loop body
LE: loop exit
PB: predicated region body
PF: predicated region fallthrough
CT: control target
= control target key end

     0   :  { %vm15_vm0 = vcmask 523264   ;;  %v6583_v1 = vmov 0.0   ;;  %v6584_v2 = vmov -inf   ;;  %v64_v3 = vlaneseq  ;;  %s14555_s1 = inlined_call_operand.vmem [shape: bf16[64,128], index: 1, kind: input, shape index: {}]   ;;  %s14556_s0 = inlined_call_operand.vmem [shape: f32[4,12,25,64], index: 0, kind: input, shape index: {}]   ;;  %s14557_s2 = inlined_call_operand.vmem [shape: f32[3,128], index: 2, kind: input, shape index: {}]   ;;  %s14558_s3 = inlined_call_operand.vmem [shape: f32[4,6,25,128], index: 3, kind: output, shape index: {}]  }
   0x1   :  { %v6374_v0 = vld [vmem:[%s14555_s1] sm:$0xff]   ;;  %16 = vst.msk [vmem:[#allocation2] sm:$0xff] %vm15_vm0, %v6583_v1  ;;  %17 = vst.msk [vmem:[#allocation2 + $0x8] sm:$0xff] %vm15_vm0, %v6583_v1  ;;  %v6375_v4 = vld [vmem:[%s14555_s1 + $0x8] sm:$0xff]   ;;  %vm216_vm1 = vcmask 516096  }
   0x2   :  { %18 = vst.msk [vmem:[#allocation2 + $0x10] sm:$0xff] %vm15_vm0, %v6583_v1  ;;  %19 = vst.msk [vmem:[#allocation2 + $0x18] sm:$0xff] %vm15_vm0, %v6583_v1  ;;  %6260 = vmatprep.subr.bf16.mxu0 %v6374_v0  ;;  %6364 = vmatprep.subr.bf16.mxu1 %v6374_v0  ;;  %v6662_v5 = vld [vmem:[%s14555_s1 + $0x10] sm:$0xff]   ;;  %v6664_v6 = vshrl.u32 %v64_v3, 7  ;;  %v73_v7 = vld [vmem:[%s14556_s0] sm:$0xff] }
   0x3   :  { %40 = vst.msk [vmem:[#allocation3] sm:$0xff] %vm15_vm0, %v6584_v2  ;;  %41 = vst.msk [vmem:[#allocation3 + $0x8] sm:$0xff] %vm15_vm0, %v6584_v2  ;;  %6261 = vmatpush3.bf16.msra.mxu0 %v6374_v0  ;;  %6368 = vmatpush3.bf16.msra.mxu1 %v6374_v0  ;;  %v74_v8 = vld [vmem:[%s14556_s0 + $0x8] sm:$0xff]  ;;  %v75_v9 = vld [vmem:[%s14556_s0 + $0x10] sm:$0xff] }
   0x4   :  { %42 = vst.msk [vmem:[#allocation3 + $0x10] sm:$0xff] %vm15_vm0, %v6584_v2  ;;  %43 = vst.msk [vmem:[#allocation3 + $0x18] sm:$0xff] %vm15_vm0, %v6584_v2  ;;  %6262 = vmatprep.subr.bf16.mxu0 %v6375_v4  ;;  %6365 = vmatprep.subr.bf16.mxu1 %v6375_v4  ;;  %v76_v10 = vld [vmem:[%s14556_s0 + $0x18] sm:$0x1]  ;;  %v6681_v11 = vld [vmem:[%s14556_s0 + $0x20] sm:$0xff]  ;;  %vm334_vm2 = vcmp.lt.s32.totalorder %v6664_v6, 1 }
   0x5   :  { %20 = vst.msk [vmem:[#allocation2 + $0x20] sm:$0xff] %vm15_vm0, %v6583_v1  ;;  %21 = vst.msk [vmem:[#allocation2 + $0x28] sm:$0xff] %vm15_vm0, %v6583_v1  ;;  %v6686_v12 = vld [vmem:[%s14556_s0 + $0x28] sm:$0xff]  ;;  %v6691_v13 = vld [vmem:[%s14555_s1 + $0x18] sm:$0xff]   ;;  %v121_v16 = vadd.f32 %v6681_v11, %v73_v7  ;;  %v169_v18 = vmax.f32 %v73_v7, %v6681_v11  ;;  %vm479_vm3 = vcmp.lt.s32.totalorder %v6664_v6, 7  ;;  %v6767_v34 = vadd.s32 24, %v6664_v6 }
   0x6   :  { %22 = vst.msk [vmem:[#allocation2 + $0x30] sm:$0xff] %vm15_vm0, %v6583_v1  ;;  %23 = vst.msk [vmem:[#allocation2 + $0x38] sm:$0xff] %vm15_vm0, %v6583_v1  ;;  %v6696_v14 = vld [vmem:[%s14556_s0 + $0x30] sm:$0xff]  ;;  %v6701_v15 = vld [vmem:[%s14556_s0 + $0x38] sm:$0x1]  ;;  %v122_v17 = vadd.f32 %v6686_v12, %v74_v8  ;;  %v170_v19 = vmax.f32 %v74_v8, %v6686_v12  ;;  %vm624_vm4 = vcmp.lt.s32.totalorder %v6664_v6, 2 }
   0x7   :  { %24 = vst.msk [vmem:[#allocation2 + $0x40] sm:$0xff] %vm15_vm0, %v6583_v1  ;;  %25 = vst.msk [vmem:[#allocation2 + $0x48] sm:$0xff] %vm15_vm0, %v6583_v1  ;;  %v6710_v20 = vld [vmem:[%s14556_s0 + $0x180] sm:$0xff]  ;;  %6263 = vmatpush3.bf16.msra.mxu0 %v6375_v4  ;;  %v123_v21 = vadd.f32 %v6696_v14, %v75_v9  ;;  %v124_v22 = vadd.f32 %v6701_v15, %v76_v10  ;;  %v171_v23 = vmax.f32 %v75_v9, %v6696_v14  ;;  %v6719_v25 = vld [vmem:[%s14556_s0 + $0x188] sm:$0xff] }
   0x8   :  { %26 = vst.msk [vmem:[#allocation2 + $0x50] sm:$0xff] %vm15_vm0, %v6583_v1  ;;  %27 = vst.msk [vmem:[#allocation2 + $0x58] sm:$0xff] %vm15_vm0, %v6583_v1  ;;  %v172_v24 = vmax.f32 %v76_v10, %v6701_v15  ;;  %v6724_v26 = vld [vmem:[%s14556_s0 + $0x190] sm:$0xff]  ;;  %v6729_v27 = vld [vmem:[%s14556_s0 + $0x198] sm:$0x1]  ;;  %6264 = vmatprep.subr.bf16.mxu0 %v6662_v5  ;;  %6369 = vmatpush3.bf16.msra.mxu1 %v6375_v4  ;;  %vm769_vm5 = vcmp.lt.s32.totalorder %v6664_v6, 6 }
   0x9   :  { %28 = vst.msk [vmem:[#allocation2 + $0x60] sm:$0xff] %vm15_vm0, %v6583_v1  ;;  %29 = vst.msk [vmem:[#allocation2 + $0x68] sm:$0xff] %vm15_vm0, %v6583_v1  ;;  %v6740_v28 = vld [vmem:[%s14556_s0 + $0x1a0] sm:$0xff]  ;;  %v6745_v29 = vld [vmem:[%s14556_s0 + $0x1a8] sm:$0xff]  ;;  %6366 = vmatprep.subr.bf16.mxu1 %v6662_v5  ;;  %vm72_vm6 = vcmp.lt.s32.totalorder %v6767_v34, 25 }
   0xa   :  { %30 = vst.msk [vmem:[#allocation2 + $0x70] sm:$0xff] %vm15_vm0, %v6583_v1  ;;  %31 = vst.msk [vmem:[#allocation2 + $0x78] sm:$0xff] %vm15_vm0, %v6583_v1  ;;  %v6750_v30 = vld [vmem:[%s14556_s0 + $0x1b0] sm:$0xff]  ;;  %v6760_v31 = vld [vmem:[%s14556_s0 + $0x1b8] sm:$0x1]  ;;  %v1055_v32 = vadd.f32 %v6740_v28, %v6710_v20  ;;  %v1056_v33 = vadd.f32 %v6745_v29, %v6719_v25  ;;  %v1103_v39 = vmax.f32 %v6710_v20, %v6740_v28 }
   0xb   :  { %32 = vst.msk [vmem:[#allocation2 + $0x80] sm:$0xff] %vm15_vm0, %v6583_v1  ;;  %33 = vst.msk [vmem:[#allocation2 + $0x88] sm:$0xff] %vm15_vm0, %v6583_v1  ;;  %v81_v35 = vld [vmem:[%s14556_s0 + $0x40] sm:$0xff]  ;;  %v82_v36 = vld [vmem:[%s14556_s0 + $0x48] sm:$0xff]  ;;  %v6778_v37 = vadd.f32 %v6750_v30, %v6724_v26  ;;  %v6782_v38 = vadd.f32 %v6760_v31, %v6729_v27  ;;  %v1104_v40 = vmax.f32 %v6719_v25, %v6745_v29  ;;  %6265 = vmatpush3.bf16.msra.mxu0 %v6662_v5 }
   0xc   :  { %34 = vst.msk [vmem:[#allocation2 + $0x90] sm:$0xff] %vm15_vm0, %v6583_v1  ;;  %35 = vst.msk [vmem:[#allocation2 + $0x98] sm:$0xff] %vm15_vm0, %v6583_v1  ;;  %v83_v41 = vld [vmem:[%s14556_s0 + $0x50] sm:$0xff]  ;;  %v84_v42 = vld [vmem:[%s14556_s0 + $0x58] sm:$0x1]  ;;  %v1105_v44 = vmax.f32 %v6724_v26, %v6750_v30  ;;  %v1106_v45 = vmax.f32 %v6729_v27, %v6760_v31  ;;  %6266 = vmatprep.subr.bf16.mxu0 %v6691_v13  ;;  %6370 = vmatpush3.bf16.msra.mxu1 %v6662_v5 }
   0xd   :  { %36 = vst.msk [vmem:[#allocation2 + $0xa0] sm:$0xff] %vm15_vm0, %v6583_v1  ;;  %37 = vst.msk [vmem:[#allocation2 + $0xa8] sm:$0xff] %vm15_vm0, %v6583_v1  ;;  %v6797_v43 = vld [vmem:[%s14556_s0 + $0x60] sm:$0xff]  ;;  %v6807_v46 = vld [vmem:[%s14556_s0 + $0x68] sm:$0xff]  ;;  %6367 = vmatprep.subr.bf16.mxu1 %v6691_v13 }
   0xe   :  { %38 = vst.msk [vmem:[#allocation2 + $0xb0] sm:$0xff] %vm15_vm0, %v6583_v1  ;;  %39 = vst.msk [vmem:[#allocation2 + $0xb8] sm:$0xff] %vm15_vm0, %v6583_v1  ;;  %v6812_v47 = vld [vmem:[%s14556_s0 + $0x70] sm:$0xff]  ;;  %v6817_v48 = vld [vmem:[%s14556_s0 + $0x78] sm:$0x1]  ;;  %v125_v49 = vadd.f32 %v6797_v43, %v81_v35  ;;  %v173_v50 = vmax.f32 %v81_v35, %v6797_v43  ;;  %v126_v51 = vadd.f32 %v6807_v46, %v82_v36 }
   0xf   :  { %44 = vst.msk [vmem:[#allocation3 + $0x20] sm:$0xff] %vm15_vm0, %v6584_v2  ;;  %45 = vst.msk [vmem:[#allocation3 + $0x28] sm:$0xff] %vm15_vm0, %v6584_v2  ;;  %v127_v52 = vadd.f32 %v6812_v47, %v83_v41  ;;  %v128_v53 = vadd.f32 %v6817_v48, %v84_v42  ;;  %v174_v54 = vmax.f32 %v82_v36, %v6807_v46  ;;  %v6829_v55 = vld [vmem:[%s14556_s0 + $0x1c0] sm:$0xff]  ;;  %v6834_v56 = vld [vmem:[%s14556_s0 + $0x1c8] sm:$0xff]  ;;  %6267 = vmatpush3.bf16.msra.mxu0 %v6691_v13 }
  0x10   :  { %46 = vst.msk [vmem:[#allocation3 + $0x30] sm:$0xff] %vm15_vm0, %v6584_v2  ;;  %47 = vst.msk [vmem:[#allocation3 + $0x38] sm:$0xff] %vm15_vm0, %v6584_v2  ;;  %v149_v57 = vadd.f32 %v125_v49, %v6681_v11  ;;  %v175_v58 = vmax.f32 %v83_v41, %v6812_v47  ;;  %v176_v59 = vmax.f32 %v84_v42, %v6817_v48  ;;  %v6844_v61 = vld [vmem:[%s14556_s0 + $0x1d0] sm:$0xff]  ;;  %v6849_v62 = vld [vmem:[%s14556_s0 + $0x1e0] sm:$0xff]  ;;  %6371 = vmatpush3.bf16.msra.mxu1 %v6691_v13 }
  0x11   :  { %48 = vst.msk [vmem:[#allocation3 + $0x40] sm:$0xff] %vm15_vm0, %v6584_v2  ;;  %49 = vst.msk [vmem:[#allocation3 + $0x48] sm:$0xff] %vm15_vm0, %v6584_v2  ;;  %v193_v60 = vmax.f32 %v173_v50, %v6681_v11  ;;  %v6854_v63 = vld [vmem:[%s14556_s0 + $0x1e8] sm:$0xff]  ;;  %v150_v0 = vadd.f32 %v126_v51, %v6686_v12  ;;  %v151_v1 = vadd.f32 %v127_v52, %v6696_v14  ;;  %v6864_v4 = vld [vmem:[%s14556_s0 + $0x1f0] sm:$0xff] }
  0x12   :  { %50 = vst.msk [vmem:[#allocation3 + $0x50] sm:$0xff] %vm15_vm0, %v6584_v2  ;;  %51 = vst.msk [vmem:[#allocation3 + $0x58] sm:$0xff] %vm15_vm0, %v6584_v2  ;;  %v194_v3 = vmax.f32 %v174_v54, %v6686_v12  ;;  %v195_v9 = vmax.f32 %v175_v58, %v6696_v14  ;;  %v196_v10 = vmax.f32 %v176_v59, %v6701_v15 }
  0x13   :  { %52 = vst.msk [vmem:[#allocation3 + $0x60] sm:$0xff] %vm15_vm0, %v6584_v2  ;;  %53 = vst.msk [vmem:[#allocation3 + $0x68] sm:$0xff] %vm15_vm0, %v6584_v2  ;;  %v6880_v11 = vadd.f32 %v6849_v62, %v6829_v55  ;;  %v6884_v12 = vadd.f32 %v6854_v63, %v6834_v56  ;;  %v6904_v20 = vadd.f32 %v6864_v4, %v6844_v61 }
  0x14   :  { %54 = vst.msk [vmem:[#allocation3 + $0x70] sm:$0xff] %vm15_vm0, %v6584_v2  ;;  %55 = vst.msk [vmem:[#allocation3 + $0x78] sm:$0xff] %vm15_vm0, %v6584_v2 }
  0x15   :  { %56 = vst.msk [vmem:[#allocation3 + $0x80] sm:$0xff] %vm15_vm0, %v6584_v2  ;;  %57 = vst.msk [vmem:[#allocation3 + $0x88] sm:$0xff] %vm15_vm0, %v6584_v2 }
  0x16   :  { %58 = vst.msk [vmem:[#allocation3 + $0x90] sm:$0xff] %vm15_vm0, %v6584_v2  ;;  %59 = vst.msk [vmem:[#allocation3 + $0x98] sm:$0xff] %vm15_vm0, %v6584_v2 }
  0x17   :  { %60 = vst.msk [vmem:[#allocation3 + $0xa0] sm:$0xff] %vm15_vm0, %v6584_v2  ;;  %61 = vst.msk [vmem:[#allocation3 + $0xa8] sm:$0xff] %vm15_vm0, %v6584_v2 }
  0x18   :  { %62 = vst.msk [vmem:[#allocation3 + $0xb0] sm:$0xff] %vm15_vm0, %v6584_v2  ;;  %63 = vst.msk [vmem:[#allocation3 + $0xb8] sm:$0xff] %vm15_vm0, %v6584_v2  ;;  %v152_v2 = vadd.f32 %v128_v53, %v6701_v15 }
  0x19   :  { %213 = vst.msk [vmem:[#allocation2] sm:$0xff] %vm15_vm0, %v121_v16  ;;  %214 = vst.msk [vmem:[#allocation2 + $0x8] sm:$0xff] %vm15_vm0, %v122_v17 }
  0x1a   :  { %238 = vst.msk [vmem:[#allocation3] sm:$0xff] %vm15_vm0, %v169_v18  ;;  %239 = vst.msk [vmem:[#allocation3 + $0x8] sm:$0xff] %vm15_vm0, %v170_v19 }
  0x1b   :  { %215 = vst.msk [vmem:[#allocation2 + $0x10] sm:$0xff] %vm15_vm0, %v123_v21  ;;  %240 = vst.msk [vmem:[#allocation3 + $0x10] sm:$0xff] %vm15_vm0, %v171_v23 }
  0x1c   :  { %217 = vst.msk [vmem:[#allocation2 + $0x18] sm:$0x1] %vm216_vm1, %v124_v22  ;;  %241 = vst.msk [vmem:[#allocation3 + $0x18] sm:$0x1] %vm216_vm1, %v172_v24 }
  0x1d   :  { %218 = vst.msk [vmem:[#allocation2 + $0x20] sm:$0xff] %vm15_vm0, %v149_v57  ;;  %242 = vst.msk [vmem:[#allocation3 + $0x20] sm:$0xff] %vm15_vm0, %v193_v60 }
  0x1e   :  { %219 = vst.msk [vmem:[#allocation2 + $0x28] sm:$0xff] %vm15_vm0, %v150_v0  ;;  %220 = vst.msk [vmem:[#allocation2 + $0x30] sm:$0xff] %vm15_vm0, %v151_v1 }
  0x1f   :  { %221 = vst.msk [vmem:[#allocation2 + $0x38] sm:$0x1] %vm216_vm1, %v152_v2  ;;  %245 = vst.msk [vmem:[#allocation3 + $0x38] sm:$0x1] %vm216_vm1, %v196_v10 }
  0x20   :  { %v6868_v7 = vld [vmem:[#allocation2] sm:$0xff]  ;;  %v6870_v5 = vld [vmem:[#allocation2 + $0x8] sm:$0xff]  ;;  %243 = vst.msk [vmem:[#allocation3 + $0x28] sm:$0xff] %vm15_vm0, %v194_v3  ;;  %244 = vst.msk [vmem:[#allocation3 + $0x30] sm:$0xff] %vm15_vm0, %v195_v9 }
  0x21   :  { %v6872_v8 = vld [vmem:[#allocation3] sm:$0xff]  ;;  %v6890_v18 = vld [vmem:[#allocation3 + $0x8] sm:$0xff]  ;;  %v310_v14 = vrot.slane %v6868_v7, 7  ;;  %v316_v15 = vrot.slane %v6870_v5, 7  ;;  %1147 = vst.msk [vmem:[#allocation2] sm:$0xff] %vm15_vm0, %v1055_v32  ;;  %1148 = vst.msk [vmem:[#allocation2 + $0x8] sm:$0xff] %vm15_vm0, %v1056_v33 }
  0x22   :  { %v6886_v16 = vld [vmem:[#allocation2 + $0x10] sm:$0xff]  ;;  %v383_v19 = vrot.slane %v6872_v8, 7  ;;  %1171 = vst.msk [vmem:[#allocation3] sm:$0xff] %vm15_vm0, %v1103_v39  ;;  %v389_v24 = vrot.slane %v6890_v18, 7  ;;  %v455_v32 = vrot.slane %v6868_v7, 1  ;;  %v461_v33 = vrot.slane %v6870_v5, 1 }
  0x23   :  { %v6888_v17 = vld [vmem:[#allocation2 + $0x18] sm:$0xff]  ;;  %v6906_v21 = vld [vmem:[#allocation3 + $0x10] sm:$0xff]  ;;  %1149 = vst.msk [vmem:[#allocation2 + $0x10] sm:$0xff] %vm15_vm0, %v6778_v37  ;;  %1172 = vst.msk [vmem:[#allocation3 + $0x8] sm:$0xff] %vm15_vm0, %v1104_v40  ;;  %v347_v35 = vsel %vm334_vm2, %v310_v14, %v316_v15  ;;  %v467_v37 = vrot.slane %v6886_v16, 1  ;;  %v534_v49 = vrot.slane %v6890_v18, 1 }
  0x24   :  { %v6908_v22 = vld [vmem:[#allocation3 + $0x18] sm:$0xff]  ;;  %v328_v23 = vrot.slane %v6888_v17, 7  ;;  %1150 = vst.msk [vmem:[#allocation2 + $0x18] sm:$0x1] %vm216_vm1, %v6782_v38  ;;  %v528_v38 = vrot.slane %v6872_v8, 1  ;;  %v360_v25 = vadd.f32 %v347_v35, %v6870_v5  ;;  %v419_v39 = vsel %vm334_vm2, %v383_v19, %v389_v24 }
  0x25   :  { %v401_v36 = vrot.slane %v6908_v22, 7  ;;  %1173 = vst.msk [vmem:[#allocation3 + $0x10] sm:$0xff] %vm15_vm0, %v1105_v44  ;;  %v492_v26 = vsel %vm479_vm3, %v455_v32, %v461_v33  ;;  %v432_v41 = vmax.f32 %v6890_v18, %v419_v39  ;;  %v486_v42 = vsel %vm479_vm3, %v461_v33, %v467_v37 }
  0x26   :  { %1174 = vst.msk [vmem:[#allocation3 + $0x18] sm:$0x1] %vm216_vm1, %v1106_v45  ;;  %v353_v13 = vsel %vm334_vm2, %v328_v23, %v310_v14  ;;  %v505_v45 = vadd.f32 %v486_v42, %v360_v25  ;;  %v540_v50 = vrot.slane %v6906_v21, 1  ;;  %v600_v52 = vrot.slane %v6868_v7, 6 }
  0x27   :  { %v359_v27 = vadd.f32 %v353_v13, %v6868_v7  ;;  %v425_v40 = vsel %vm334_vm2, %v401_v36, %v383_v19  ;;  %v606_v53 = vrot.slane %v6870_v5, 6  ;;  %v618_v54 = vrot.slane %v6888_v17, 6 }
  0x28   :  { %v431_v44 = vmax.f32 %v6872_v8, %v425_v40  ;;  %v558_v57 = vsel %vm479_vm3, %v534_v49, %v540_v50  ;;  %v564_v58 = vsel %vm479_vm3, %v528_v38, %v534_v49  ;;  %v673_v59 = vrot.slane %v6872_v8, 6 }
  0x29   :  { %v504_v51 = vadd.f32 %v492_v26, %v359_v27  ;;  %v679_v60 = vrot.slane %v6890_v18, 6  ;;  %v577_v1 = vmax.f32 %v432_v41, %v558_v57  ;;  %v637_v2 = vsel %vm624_vm4, %v600_v52, %v606_v53 }
  0x2a   :  { %v576_v0 = vmax.f32 %v431_v44, %v564_v58  ;;  %v643_v3 = vsel %vm624_vm4, %v618_v54, %v600_v52  ;;  %v650_v10 = vadd.f32 %v637_v2, %v505_v45  ;;  %v691_v14 = vrot.slane %v6908_v22, 6 }
  0x2b   :  { %v649_v9 = vadd.f32 %v643_v3, %v504_v51  ;;  %v709_v19 = vsel %vm624_vm4, %v673_v59, %v679_v60  ;;  %v745_v35 = vrot.slane %v6868_v7, 2  ;;  %v751_v13 = vrot.slane %v6870_v5, 2 }
  0x2c   :  { %v722_v33 = vmax.f32 %v577_v1, %v709_v19  ;;  %v757_v25 = vrot.slane %v6886_v16, 2  ;;  %v715_v39 = vsel %vm624_vm4, %v691_v14, %v673_v59  ;;  %v818_v26 = vrot.slane %v6872_v8, 2 }
  0x2d   :  { %v824_v27 = vrot.slane %v6890_v18, 2  ;;  %v830_v40 = vrot.slane %v6906_v21, 2  ;;  %v721_v41 = vmax.f32 %v576_v0, %v715_v39  ;;  %v782_v44 = vsel %vm769_vm5, %v745_v35, %v751_v13  ;;  %v7075_v18 = vld [vmem:[#allocation3 + $0x28] sm:$0xff] }
  0x2e   :  { %v776_v42 = vsel %vm769_vm5, %v751_v13, %v757_v25  ;;  %v322_v45 = vrot.slane %v6886_v16, 7  ;;  %v794_v49 = vadd.f32 %v782_v44, %v649_v9  ;;  %v473_v39 = vrot.slane %v6888_v17, 1 }
  0x2f   :  { %v795_v51 = vadd.f32 %v776_v42, %v650_v10  ;;  %v848_v52 = vsel %vm769_vm5, %v824_v27, %v830_v40  ;;  %v854_v57 = vsel %vm769_vm5, %v818_v26, %v824_v27  ;;  %v546_v27 = vrot.slane %v6908_v22, 1 }
  0x30   :  { %v866_v58 = vmax.f32 %v721_v41, %v854_v57  ;;  %v867_v59 = vmax.f32 %v722_v33, %v848_v52  ;;  %v335_v0 = vsel %vm334_vm2, %v322_v45, %v328_v23  ;;  %v341_v1 = vsel %vm334_vm2, %v316_v15, %v322_v45 }
  0x31   :  { %v890_v2 = vmul.f32 0.033333335, %v794_v49  ;;  %v891_v3 = vmul.f32 0.033333335, %v795_v51  ;;  %v361_v9 = vadd.f32 %v341_v1, %v6886_v16  ;;  %v362_v10 = vadd.f32 %v335_v0, %v6888_v17 }
  0x32   :  { %v914_v19 = vmul.f32 0.5, %v866_v58  ;;  %v915_v13 = vmul.f32 0.5, %v867_v59  ;;  %v395_v33 = vrot.slane %v6906_v21, 7  ;;  %v612_v23 = vrot.slane %v6886_v16, 6 }
  0x33   :  { %v685_v41 = vrot.slane %v6906_v21, 6  ;;  %v763_v15 = vrot.slane %v6888_v17, 2  ;;  %v480_v17 = vsel %vm479_vm3, %v467_v37, %v473_v39  ;;  %v498_v57 = vsel %vm479_vm3, %v473_v39, %v455_v32 }
  0x34   :  { %v938_v42 = vadd.f32 %v914_v19, %v890_v2  ;;  %v939_v44 = vadd.f32 %v915_v13, %v891_v3  ;;  %v407_v45 = vsel %vm334_vm2, %v395_v33, %v401_v36  ;;  %v413_v49 = vsel %vm334_vm2, %v389_v24, %v395_v33  ;;  %v7058_v2 = vld [vmem:[#allocation2 + $0x20] sm:$0xff]  ;;  %v7071_v13 = vld [vmem:[#allocation2 + $0x38] sm:$0xff] }
  0x35   :  { %v433_v51 = vmax.f32 %v6906_v21, %v413_v49  ;;  %v434_v52 = vmax.f32 %v6908_v22, %v407_v45  ;;  %v506_v58 = vadd.f32 %v480_v17, %v361_v9  ;;  %v507_v59 = vadd.f32 %v498_v57, %v362_v10  ;;  %v7073_v33 = vld [vmem:[#allocation3 + $0x20] sm:$0xff] }
  0x36   :  { %v994_v36 = vpack.c.bf16 %v939_v44, %v938_v42  ;;  %v552_v24 = vsel %vm479_vm3, %v540_v50, %v546_v27  ;;  %v570_v16 = vsel %vm479_vm3, %v546_v27, %v528_v38  ;;  %v625_v7 = vsel %vm624_vm4, %v612_v23, %v618_v54  ;;  %v7060_v38 = vld [vmem:[#allocation2 + $0x28] sm:$0xff] }
  0x37   :  { %v578_v21 = vmax.f32 %v433_v51, %v552_v24  ;;  %v631_v32 = vsel %vm624_vm4, %v606_v53, %v612_v23  ;;  %v579_v37 = vmax.f32 %v434_v52, %v570_v16  ;;  %v652_v0 = vadd.f32 %v625_v7, %v507_v59  ;;  %v7106_v24 = vld [vmem:[#allocation2 + $0x30] sm:$0xff] }
  0x38   :  { %6268 = vmatprep.mubr.msk.bf16.mxu0 %vm15_vm0, %v994_v36  ;;  %v651_v50 = vadd.f32 %v631_v32, %v506_v58  ;;  %v697_v1 = vsel %vm624_vm4, %v685_v41, %v691_v14  ;;  %v703_v5 = vsel %vm624_vm4, %v679_v60, %v685_v41  ;;  %v770_v53 = vsel %vm769_vm5, %v757_v25, %v763_v15  ;;  %v7083_v25 = vld [vmem:[#allocation3 + $0x38] sm:$0xff] }
  0x39   :  { %v788_v54 = vsel %vm769_vm5, %v763_v15, %v745_v35  ;;  %v836_v3 = vrot.slane %v6908_v22, 2  ;;  %v723_v9 = vmax.f32 %v578_v21, %v703_v5  ;;  %v724_v10 = vmax.f32 %v579_v37, %v697_v1  ;;  %v7122_v1 = vld [vmem:[#allocation3 + $0x30] sm:$0xff] }
  0x3a   :  { %v796_v14 = vadd.f32 %v770_v53, %v651_v50  ;;  %v797_v19 = vadd.f32 %v788_v54, %v652_v0  ;;  %v311_v22 = vrot.slane %v7058_v2, 7  ;;  %v317_v39 = vrot.slane %v7060_v38, 7 }
  0x3b   :  { %v842_v60 = vsel %vm769_vm5, %v830_v40, %v836_v3  ;;  %v860_v35 = vsel %vm769_vm5, %v836_v3, %v818_v26  ;;  %v329_v42 = vrot.slane %v7071_v13, 7  ;;  %v384_v40 = vrot.slane %v7073_v33, 7 }
  0x3c   :  { %v868_v27 = vmax.f32 %v723_v9, %v842_v60  ;;  %v869_v23 = vmax.f32 %v724_v10, %v860_v35  ;;  %v892_v41 = vmul.f32 0.033333335, %v796_v14  ;;  %v893_v15 = vmul.f32 0.033333335, %v797_v19 }
  0x3d   :  { %v348_v8 = vsel %vm334_vm2, %v311_v22, %v317_v39  ;;  %v390_v26 = vrot.slane %v7075_v18, 7  ;;  %v402_v51 = vrot.slane %v7083_v25, 7  ;;  %v354_v52 = vsel %vm334_vm2, %v329_v42, %v311_v22 }
  0x3e   :  { %v916_v44 = vmul.f32 0.5, %v868_v27  ;;  %v917_v45 = vmul.f32 0.5, %v869_v23  ;;  %v364_v49 = vadd.f32 %v348_v8, %v7060_v38  ;;  %v456_v57 = vrot.slane %v7058_v2, 1 }
  0x3f   :  { %v420_v17 = vsel %vm334_vm2, %v384_v40, %v390_v26  ;;  %v462_v36 = vrot.slane %v7060_v38, 1  ;;  %v363_v16 = vadd.f32 %v354_v52, %v7058_v2  ;;  %v426_v21 = vsel %vm334_vm2, %v402_v51, %v384_v40 }
  0x40   :  { %v940_v58 = vadd.f32 %v916_v44, %v892_v41  ;;  %v941_v59 = vadd.f32 %v917_v45, %v893_v15  ;;  %v435_v7 = vmax.f32 %v7073_v33, %v426_v21  ;;  %v436_v32 = vmax.f32 %v7075_v18, %v420_v17 }
  0x41   :  { %v468_v37 = vrot.slane %v7106_v24, 1  ;;  %v493_v50 = vsel %vm479_vm3, %v456_v57, %v462_v36  ;;  %v529_v53 = vrot.slane %v7073_v33, 1  ;;  %v535_v54 = vrot.slane %v7075_v18, 1 }
  0x42   :  { %v973_v0 = vsel %vm72_vm6, %v941_v59, 0.0  ;;  %v508_v5 = vadd.f32 %v493_v50, %v363_v16  ;;  %v541_v10 = vrot.slane %v7122_v1, 1  ;;  %v601_v14 = vrot.slane %v7058_v2, 6  ;;  %v7165_v59 = vld [vmem:[%s14556_s0 + $0x1f8] sm:$0x1] }
  0x43   :  { %v995_v3 = vpack.c.bf16 %v973_v0, %v940_v58  ;;  %v487_v9 = vsel %vm479_vm3, %v462_v36, %v468_v37  ;;  %v565_v60 = vsel %vm479_vm3, %v529_v53, %v535_v54  ;;  %v607_v35 = vrot.slane %v7060_v38, 6  ;;  %v6023_v58 = vld [vmem:[%s14556_s0 + $0x1d8] sm:$0x1] }
  0x44   :  { %v509_v19 = vadd.f32 %v487_v9, %v364_v49  ;;  %v619_v22 = vrot.slane %v7071_v13, 6  ;;  %v559_v27 = vsel %vm479_vm3, %v535_v54, %v541_v10  ;;  %v580_v23 = vmax.f32 %v435_v7, %v565_v60 }
  0x45   :  { %6269 = vmatmul.mubr.msk.bf16.vlgmr.msra.gmra.mrb[0].mxu0 %vm15_vm0, %v995_v3  ;;  %v674_v41 = vrot.slane %v7073_v33, 6  ;;  %v680_v15 = vrot.slane %v7075_v18, 6  ;;  %v581_v8 = vmax.f32 %v436_v32, %v559_v27  ;;  %v638_v40 = vsel %vm624_vm4, %v601_v14, %v607_v35 }
  0x46   :  { %v644_v44 = vsel %vm624_vm4, %v619_v22, %v601_v14  ;;  %v692_v45 = vrot.slane %v7083_v25, 6  ;;  %v654_v52 = vadd.f32 %v638_v40, %v509_v19  ;;  %v746_v36 = vrot.slane %v7058_v2, 2  ;;  %v7331_v2 = vld [vmem:[%s14556_s0 + $0x200] sm:$0xff] }
  0x47   :  { %v653_v49 = vadd.f32 %v644_v44, %v508_v5  ;;  %v710_v17 = vsel %vm624_vm4, %v674_v41, %v680_v15  ;;  %v752_v7 = vrot.slane %v7060_v38, 2  ;;  %v758_v32 = vrot.slane %v7106_v24, 2  ;;  %v92_v38 = vld [vmem:[%s14556_s0 + $0x98] sm:$0x1] }
  0x48   :  { %v716_v16 = vsel %vm624_vm4, %v692_v45, %v674_v41  ;;  %v726_v21 = vmax.f32 %v581_v8, %v710_v17  ;;  %v819_v0 = vrot.slane %v7073_v33, 2  ;;  %v825_v5 = vrot.slane %v7075_v18, 2 }
  0x49   :  { %v725_v50 = vmax.f32 %v580_v23, %v716_v16  ;;  %v831_v54 = vrot.slane %v7122_v1, 2  ;;  %v777_v3 = vsel %vm769_vm5, %v752_v7, %v758_v32  ;;  %v783_v9 = vsel %vm769_vm5, %v746_v36, %v752_v7 }
  0x4a   :  { %v1062_v14 = vadd.f32 %v7165_v59, %v6023_v58  ;;  %v1083_v19 = vadd.f32 %v6740_v28, %v6880_v11  ;;  %v798_v60 = vadd.f32 %v783_v9, %v653_v49  ;;  %v799_v27 = vadd.f32 %v777_v3, %v654_v52 }
  0x4b   :  { %v849_v23 = vsel %vm769_vm5, %v825_v5, %v831_v54  ;;  %v855_v41 = vsel %vm769_vm5, %v819_v0, %v825_v5  ;;  %v1084_v44 = vadd.f32 %v6745_v29, %v6884_v12  ;;  %v1085_v11 = vadd.f32 %v6750_v30, %v6904_v20 }
  0x4c   :  { %v870_v8 = vmax.f32 %v725_v50, %v855_v41  ;;  %v871_v40 = vmax.f32 %v726_v21, %v849_v23  ;;  %1151 = vst.msk [vmem:[#allocation2 + $0x20] sm:$0xff] %vm15_vm0, %v1083_v19  ;;  %v894_v49 = vmul.f32 0.033333335, %v798_v60  ;;  %v895_v52 = vmul.f32 0.033333335, %v799_v27 }
  0x4d   :  { %v1086_v17 = vadd.f32 %v6760_v31, %v1062_v14  ;;  %v1107_v16 = vmax.f32 %v6829_v55, %v6849_v62  ;;  %v1108_v21 = vmax.f32 %v6834_v56, %v6854_v63  ;;  %v1109_v12 = vmax.f32 %v6844_v61, %v6864_v4  ;;  %1152 = vst.msk [vmem:[#allocation2 + $0x28] sm:$0xff] %vm15_vm0, %v1084_v44 }
  0x4e   :  { %v918_v7 = vmul.f32 0.5, %v870_v8  ;;  %v919_v3 = vmul.f32 0.5, %v871_v40  ;;  %1153 = vst.msk [vmem:[#allocation2 + $0x30] sm:$0xff] %vm15_vm0, %v1085_v11  ;;  %v1110_v20 = vmax.f32 %v6023_v58, %v7165_v59  ;;  %v323_v55 = vrot.slane %v7106_v24, 7 }
  0x4f   :  { %v1127_v50 = vmax.f32 %v1107_v16, %v6740_v28  ;;  %1154 = vst.msk [vmem:[#allocation2 + $0x38] sm:$0x1] %vm216_vm1, %v1086_v17  ;;  %v396_v5 = vrot.slane %v7122_v1, 7  ;;  %v1128_v56 = vmax.f32 %v1108_v21, %v6745_v29  ;;  %v1129_v61 = vmax.f32 %v1109_v12, %v6750_v30 }
  0x50   :  { %v942_v9 = vadd.f32 %v918_v7, %v894_v49  ;;  %v943_v14 = vadd.f32 %v919_v3, %v895_v52  ;;  %v1130_v19 = vmax.f32 %v1110_v20, %v6760_v31  ;;  %v336_v28 = vsel %vm334_vm2, %v323_v55, %v329_v42  ;;  %v7305_v20 = vld [vmem:[%s14556_s0 + $0xb0] sm:$0xff] }
  0x51   :  { %1175 = vst.msk [vmem:[#allocation3 + $0x20] sm:$0xff] %vm15_vm0, %v1127_v50  ;;  %v342_v58 = vsel %vm334_vm2, %v317_v39, %v323_v55  ;;  %v408_v29 = vsel %vm334_vm2, %v396_v5, %v402_v51  ;;  %1176 = vst.msk [vmem:[#allocation3 + $0x28] sm:$0xff] %vm15_vm0, %v1128_v56  ;;  %v366_v60 = vadd.f32 %v336_v28, %v7071_v13  ;;  %v474_v27 = vrot.slane %v7071_v13, 1  ;;  %v7310_v50 = vld [vmem:[%s14556_s0 + $0xb8] sm:$0x1]  ;;  %v7350_v28 = vld [vmem:[%s14556_s0 + $0x228] sm:$0xff] }
  0x52   :  { %v996_v30 = vpack.c.bf16 %v943_v14, %v942_v9  ;;  %1177 = vst.msk [vmem:[#allocation3 + $0x30] sm:$0xff] %vm15_vm0, %v1129_v61  ;;  %v365_v31 = vadd.f32 %v342_v58, %v7106_v24  ;;  %v414_v42 = vsel %vm334_vm2, %v390_v26, %v396_v5  ;;  %v438_v51 = vmax.f32 %v7083_v25, %v408_v29 }
  0x53   :  { %1178 = vst.msk [vmem:[#allocation3 + $0x38] sm:$0x1] %vm216_vm1, %v1130_v19  ;;  %v437_v39 = vmax.f32 %v7122_v1, %v414_v42  ;;  %v547_v23 = vrot.slane %v7083_v25, 1  ;;  %v613_v41 = vrot.slane %v7106_v24, 6  ;;  %v686_v8 = vrot.slane %v7122_v1, 6 }
  0x54   :  { %6272 = vmatprep.mubr.msk.bf16.mxu0 %vm15_vm0, %v996_v30  ;;  %v764_v40 = vrot.slane %v7071_v13, 2  ;;  %v837_v26 = vrot.slane %v7083_v25, 2  ;;  %v481_v44 = vsel %vm479_vm3, %v468_v37, %v474_v27  ;;  %v499_v11 = vsel %vm479_vm3, %v474_v27, %v456_v57  ;;  %v89_v37 = vld [vmem:[%s14556_s0 + $0x80] sm:$0xff]  ;;  %v90_v57 = vld [vmem:[%s14556_s0 + $0x88] sm:$0xff]  ;;  %v91_v13 = vld [vmem:[%s14556_s0 + $0x90] sm:$0xff] }
  0x55   :  { %v553_v49 = vsel %vm479_vm3, %v541_v10, %v547_v23  ;;  %v571_v52 = vsel %vm479_vm3, %v547_v23, %v529_v53  ;;  %v510_v17 = vadd.f32 %v481_v44, %v365_v31  ;;  %v511_v16 = vadd.f32 %v499_v11, %v366_v60  ;;  %v7295_v25 = vld [vmem:[%s14556_s0 + $0xa0] sm:$0xff]  ;;  %v6030_v27 = vld [vmem:[%s14556_s0 + $0x210] sm:$0xff]  ;;  %v6031_v44 = vld [vmem:[%s14556_s0 + $0x218] sm:$0x1] }
  0x56   :  { %v582_v7 = vmax.f32 %v437_v39, %v553_v49  ;;  %v583_v3 = vmax.f32 %v438_v51, %v571_v52  ;;  %v626_v10 = vsel %vm624_vm4, %v613_v41, %v619_v22  ;;  %v632_v53 = vsel %vm624_vm4, %v607_v35, %v613_v41  ;;  %v7362_v23 = vld [vmem:[%s14556_s0 + $0x230] sm:$0xff]  ;;  %v7372_v11 = vld [vmem:[%s14556_s0 + $0x238] sm:$0x1] }
  0x57   :  { %v698_v21 = vsel %vm624_vm4, %v686_v8, %v692_v45  ;;  %v704_v12 = vsel %vm624_vm4, %v680_v15, %v686_v8  ;;  %v655_v35 = vadd.f32 %v632_v53, %v510_v17  ;;  %v656_v22 = vadd.f32 %v626_v10, %v511_v16  ;;  %v7300_v15 = vld [vmem:[%s14556_s0 + $0xa8] sm:$0xff]  ;;  %v7392_v10 = vld [vmem:[%s14556_s0 + $0x300] sm:$0xff] }
  0x58   :  { %v727_v45 = vmax.f32 %v582_v7, %v704_v12  ;;  %v728_v18 = vmax.f32 %v583_v3, %v698_v21  ;;  %v771_v55 = vsel %vm769_vm5, %v758_v32, %v764_v40  ;;  %v789_v5 = vsel %vm769_vm5, %v764_v40, %v746_v36  ;;  %v7397_v53 = vld [vmem:[%s14556_s0 + $0x308] sm:$0xff]  ;;  %v7402_v21 = vld [vmem:[%s14556_s0 + $0x310] sm:$0xff] }
  0x59   :  { %v843_v9 = vsel %vm769_vm5, %v831_v54, %v837_v26  ;;  %v861_v14 = vsel %vm769_vm5, %v837_v26, %v819_v0  ;;  %v800_v56 = vadd.f32 %v771_v55, %v655_v35  ;;  %v801_v24 = vadd.f32 %v789_v5, %v656_v22  ;;  %v7340_v0 = vld [vmem:[%s14556_s0 + $0x208] sm:$0xff]  ;;  %v7345_v54 = vld [vmem:[%s14556_s0 + $0x220] sm:$0xff]  ;;  %v7420_v22 = vld [vmem:[%s14556_s0 + $0x330] sm:$0xff] }
  0x5a   :  { %v872_v61 = vmax.f32 %v727_v45, %v843_v9  ;;  %v873_v19 = vmax.f32 %v728_v18, %v861_v14  ;;  %v129_v36 = vadd.f32 %v7295_v25, %v89_v37  ;;  %v130_v1 = vadd.f32 %v7300_v15, %v90_v57  ;;  %v7415_v35 = vld [vmem:[%s14556_s0 + $0x328] sm:$0xff]  ;;  %v6063_v55 = vld [vmem:[%s14556_s0 + $0x318] sm:$0x1] }
  0x5b   :  { %v131_v32 = vadd.f32 %v7305_v20, %v91_v13  ;;  %v132_v33 = vadd.f32 %v7310_v50, %v92_v38  ;;  %v896_v58 = vmul.f32 0.033333335, %v800_v56  ;;  %v897_v29 = vmul.f32 0.033333335, %v801_v24  ;;  %v7435_v5 = vld [vmem:[%s14556_s0 + $0x338] sm:$0x1] }
  0x5c   :  { %v920_v30 = vmul.f32 0.5, %v872_v61  ;;  %v921_v31 = vmul.f32 0.5, %v873_v19  ;;  %v153_v60 = vadd.f32 %v129_v36, %v6797_v43  ;;  %v154_v42 = vadd.f32 %v130_v1, %v6807_v46  ;;  %v7445_v61 = vld [vmem:[#allocation2] sm:$0xff]  ;;  %v7447_v19 = vld [vmem:[#allocation2 + $0x8] sm:$0xff]  ;;  %v7452_v1 = vld [vmem:[#allocation2 + $0x18] sm:$0xff] }
  0x5d   :  { %v155_v39 = vadd.f32 %v131_v32, %v6812_v47  ;;  %v156_v51 = vadd.f32 %v132_v33, %v6817_v48  ;;  %v177_v40 = vmax.f32 %v89_v37, %v7295_v25  ;;  %v178_v26 = vmax.f32 %v90_v57, %v7300_v15  ;;  %14826 = vst [vmem:[#allocation5_spill] sm:$0xff] %v7452_v1  ;;  %v7454_v32 = vld [vmem:[#allocation3] sm:$0xff] }
  0x5e   :  { %v944_v41 = vadd.f32 %v920_v30, %v896_v58  ;;  %v945_v8 = vadd.f32 %v921_v31, %v897_v29  ;;  %v179_v49 = vmax.f32 %v91_v13, %v7305_v20  ;;  %v180_v52 = vmax.f32 %v92_v38, %v7310_v50  ;;  %222 = vst.msk [vmem:[#allocation2 + $0x40] sm:$0xff] %vm15_vm0, %v153_v60  ;;  %v7410_v38 = vld [vmem:[%s14556_s0 + $0x320] sm:$0xff]  ;;  %v7467_v60 = vld [vmem:[#allocation3 + $0x10] sm:$0xff] }
  0x5f   :  { %223 = vst.msk [vmem:[#allocation2 + $0x48] sm:$0xff] %vm15_vm0, %v154_v42  ;;  %224 = vst.msk [vmem:[#allocation2 + $0x50] sm:$0xff] %vm15_vm0, %v155_v39  ;;  %v1063_v17 = vadd.f32 %v7345_v54, %v7331_v2  ;;  %v1064_v16 = vadd.f32 %v7350_v28, %v7340_v0  ;;  %v197_v3 = vmax.f32 %v177_v40, %v6797_v43  ;;  %v7469_v42 = vld [vmem:[#allocation3 + $0x18] sm:$0xff] }
  0x60   :  { %225 = vst.msk [vmem:[#allocation2 + $0x58] sm:$0x1] %vm216_vm1, %v156_v51  ;;  %v977_v7 = vsel %vm72_vm6, %v945_v8, 0.0  ;;  %v198_v37 = vmax.f32 %v178_v26, %v6807_v46  ;;  %v1065_v57 = vadd.f32 %v7362_v23, %v6030_v27  ;;  %v199_v46 = vmax.f32 %v179_v49, %v6812_v47  ;;  %14827 = vst [vmem:[#allocation6_spill] sm:$0xff] %v7454_v32 }
  0x61   :  { %v997_v43 = vpack.c.bf16 %v977_v7, %v944_v41  ;;  %v200_v12 = vmax.f32 %v180_v52, %v6817_v48  ;;  %v1066_v13 = vadd.f32 %v7372_v11, %v6031_v44  ;;  %246 = vst.msk [vmem:[#allocation3 + $0x40] sm:$0xff] %vm15_vm0, %v197_v3  ;;  %v1087_v47 = vadd.f32 %v6849_v62, %v1063_v17 }
  0x62   :  { %247 = vst.msk [vmem:[#allocation3 + $0x48] sm:$0xff] %vm15_vm0, %v198_v37  ;;  %v1088_v48 = vadd.f32 %v6854_v63, %v1064_v16  ;;  %v1089_v45 = vadd.f32 %v6864_v4, %v1065_v57  ;;  %v1111_v18 = vmax.f32 %v7331_v2, %v7345_v54  ;;  %248 = vst.msk [vmem:[#allocation3 + $0x50] sm:$0xff] %vm15_vm0, %v199_v46  ;;  %v7449_v2 = vld [vmem:[#allocation2 + $0x10] sm:$0xff] }
  0x63   :  { %6273 = vmatmul.mubr.msk.bf16.gmra.mrb[4].mxu0 %vm15_vm0, %v997_v43  ;;  %249 = vst.msk [vmem:[#allocation3 + $0x58] sm:$0x1] %vm216_vm1, %v200_v12  ;;  %v1090_v9 = vadd.f32 %v7165_v59, %v1066_v13  ;;  %v1112_v14 = vmax.f32 %v7340_v0, %v7350_v28  ;;  %v1113_v56 = vmax.f32 %v6030_v27, %v7362_v23  ;;  %14825 = vst [vmem:[#allocation4_spill] sm:$0xff] %v7449_v2 }
  0x64   :  { %v1114_v24 = vmax.f32 %v6031_v44, %v7372_v11  ;;  %v1131_v36 = vmax.f32 %v1111_v18, %v6849_v62  ;;  %v1976_v33 = vadd.f32 %v7410_v38, %v7392_v10  ;;  %v1977_v0 = vadd.f32 %v7415_v35, %v7397_v53  ;;  %v7465_v62 = vld [vmem:[#allocation3 + $0x8] sm:$0xff]  ;;  %14829 = vst [vmem:[#allocation8_spill] sm:$0xff] %v7467_v60 }
  0x65   :  { %v1978_v58 = vadd.f32 %v7420_v22, %v7402_v21  ;;  %v1132_v29 = vmax.f32 %v1112_v14, %v6854_v63  ;;  %v1133_v30 = vmax.f32 %v1113_v56, %v6864_v4  ;;  %14828 = vst [vmem:[#allocation7_spill] sm:$0xff] %v7465_v62  ;;  %14830 = vst [vmem:[#allocation9_spill] sm:$0xff] %v7469_v42  ;;  %v7472_v51 = vld [vmem:[#allocation2 + $0x40] sm:$0xff] }
  0x66   :  { %v1134_v31 = vmax.f32 %v1114_v24, %v7165_v59  ;;  %v1979_v39 = vadd.f32 %v7435_v5, %v6063_v55  ;;  %v7474_v27 = vld [vmem:[#allocation2 + $0x48] sm:$0xff]  ;;  %v7476_v41 = vld [vmem:[#allocation2 + $0x50] sm:$0xff]  ;;  %v2024_v63 = vmax.f32 %v7392_v10, %v7410_v38  ;;  %v2025_v4 = vmax.f32 %v7397_v53, %v7415_v35  ;;  %2068 = vst.msk [vmem:[#allocation2] sm:$0xff] %vm15_vm0, %v1976_v33 }
  0x67   :  { %v2026_v59 = vmax.f32 %v7402_v21, %v7420_v22  ;;  %v2027_v8 = vmax.f32 %v6063_v55, %v7435_v5  ;;  %2069 = vst.msk [vmem:[#allocation2 + $0x8] sm:$0xff] %vm15_vm0, %v1977_v0  ;;  %2070 = vst.msk [vmem:[#allocation2 + $0x10] sm:$0xff] %vm15_vm0, %v1978_v58  ;;  %v7488_v40 = vld [vmem:[#allocation2 + $0x58] sm:$0xff]  ;;  %v312_v26 = vrot.slane %v7472_v51, 7  ;;  %v318_v44 = vrot.slane %v7474_v27, 7 }
  0x68   :  { %v457_v49 = vrot.slane %v7472_v51, 1  ;;  %v463_v52 = vrot.slane %v7474_v27, 1  ;;  %1155 = vst.msk [vmem:[#allocation2 + $0x40] sm:$0xff] %vm15_vm0, %v1087_v47  ;;  %1156 = vst.msk [vmem:[#allocation2 + $0x48] sm:$0xff] %vm15_vm0, %v1088_v48  ;;  %v330_v17 = vrot.slane %v7488_v40, 7  ;;  %v469_v16 = vrot.slane %v7476_v41, 1 }
  0x69   :  { %1157 = vst.msk [vmem:[#allocation2 + $0x50] sm:$0xff] %vm15_vm0, %v1089_v45  ;;  %v602_v7 = vrot.slane %v7472_v51, 6  ;;  %v608_v3 = vrot.slane %v7474_v27, 6  ;;  %2092 = vst.msk [vmem:[#allocation3] sm:$0xff] %vm15_vm0, %v2024_v63  ;;  %v7507_v37 = vld [vmem:[#allocation3 + $0x40] sm:$0xff]  ;;  %v7509_v57 = vld [vmem:[#allocation3 + $0x48] sm:$0xff]  ;;  %v349_v10 = vsel %vm334_vm2, %v312_v26, %v318_v44 }
  0x6a   :  { %2071 = vst.msk [vmem:[#allocation2 + $0x18] sm:$0x1] %vm216_vm1, %v1979_v39  ;;  %1158 = vst.msk [vmem:[#allocation2 + $0x58] sm:$0x1] %vm216_vm1, %v1090_v9  ;;  %v494_v53 = vsel %vm479_vm3, %v457_v49, %v463_v52  ;;  %v620_v21 = vrot.slane %v7488_v40, 6  ;;  %v747_v43 = vrot.slane %v7472_v51, 2  ;;  %v355_v13 = vsel %vm334_vm2, %v330_v17, %v312_v26 }
  0x6b   :  { %2093 = vst.msk [vmem:[#allocation3 + $0x8] sm:$0xff] %vm15_vm0, %v2025_v4  ;;  %2094 = vst.msk [vmem:[#allocation3 + $0x10] sm:$0xff] %vm15_vm0, %v2026_v59  ;;  %v7521_v46 = vld [vmem:[#allocation3 + $0x50] sm:$0xff]  ;;  %v7523_v12 = vld [vmem:[#allocation3 + $0x58] sm:$0xff]  ;;  %v368_v47 = vadd.f32 %v349_v10, %v7474_v27  ;;  %v385_v48 = vrot.slane %v7507_v37, 7  ;;  %v391_v45 = vrot.slane %v7509_v57, 7  ;;  %v367_v18 = vadd.f32 %v355_v13, %v7472_v51 }
  0x6c   :  { %2095 = vst.msk [vmem:[#allocation3 + $0x18] sm:$0x1] %vm216_vm1, %v2027_v8  ;;  %v403_v55 = vrot.slane %v7523_v12, 7  ;;  %v488_v9 = vsel %vm479_vm3, %v463_v52, %v469_v16  ;;  %v530_v14 = vrot.slane %v7507_v37, 1  ;;  %1182 = vst.msk [vmem:[#allocation3 + $0x58] sm:$0x1] %vm216_vm1, %v1134_v31  ;;  %v645_v4 = vsel %vm624_vm4, %v620_v21, %v602_v7 }
  0x6d   :  { %1179 = vst.msk [vmem:[#allocation3 + $0x40] sm:$0xff] %vm15_vm0, %v1131_v36  ;;  %1180 = vst.msk [vmem:[#allocation3 + $0x48] sm:$0xff] %vm15_vm0, %v1132_v29  ;;  %v421_v56 = vsel %vm334_vm2, %v385_v48, %v391_v45  ;;  %v513_v24 = vadd.f32 %v488_v9, %v368_v47  ;;  %v536_v36 = vrot.slane %v7509_v57, 1  ;;  %v542_v33 = vrot.slane %v7521_v46, 1 }
  0x6e   :  { %1181 = vst.msk [vmem:[#allocation3 + $0x50] sm:$0xff] %vm15_vm0, %v1133_v30  ;;  %v427_v0 = vsel %vm334_vm2, %v403_v55, %v385_v48  ;;  %v440_v58 = vmax.f32 %v7509_v57, %v421_v56  ;;  %v512_v29 = vadd.f32 %v494_v53, %v367_v18  ;;  %v639_v30 = vsel %vm624_vm4, %v602_v7, %v608_v3 }
  0x6f   :  { %v439_v31 = vmax.f32 %v7507_v37, %v427_v0  ;;  %v560_v39 = vsel %vm479_vm3, %v536_v36, %v542_v33  ;;  %v566_v63 = vsel %vm479_vm3, %v530_v14, %v536_v36  ;;  %v658_v26 = vadd.f32 %v639_v30, %v513_v24 }
  0x70   :  { %v585_v59 = vmax.f32 %v440_v58, %v560_v39  ;;  %v657_v8 = vadd.f32 %v645_v4, %v512_v29  ;;  %v675_v52 = vrot.slane %v7507_v37, 6  ;;  %v681_v53 = vrot.slane %v7509_v57, 6  ;;  %v7665_v51 = vld [vmem:[#allocation3] sm:$0xff] }
  0x71   :  { %v584_v10 = vmax.f32 %v439_v31, %v566_v63  ;;  %v693_v13 = vrot.slane %v7523_v12, 6  ;;  %v753_v47 = vrot.slane %v7474_v27, 2  ;;  %v759_v48 = vrot.slane %v7476_v41, 2 }
  0x72   :  { %v820_v18 = vrot.slane %v7507_v37, 2  ;;  %v826_v9 = vrot.slane %v7509_v57, 2  ;;  %v832_v7 = vrot.slane %v7521_v46, 2  ;;  %v711_v56 = vsel %vm624_vm4, %v675_v52, %v681_v53 }
  0x73   :  { %v717_v24 = vsel %vm624_vm4, %v693_v13, %v675_v52  ;;  %v784_v36 = vsel %vm769_vm5, %v747_v43, %v753_v47  ;;  %v324_v0 = vrot.slane %v7476_v41, 7  ;;  %v730_v29 = vmax.f32 %v585_v59, %v711_v56 }
  0x74   :  { %v729_v58 = vmax.f32 %v584_v10, %v717_v24  ;;  %v778_v57 = vsel %vm769_vm5, %v753_v47, %v759_v48  ;;  %v802_v30 = vadd.f32 %v784_v36, %v657_v8  ;;  %v850_v39 = vsel %vm769_vm5, %v826_v9, %v832_v7 }
  0x75   :  { %v803_v31 = vadd.f32 %v778_v57, %v658_v26  ;;  %v856_v63 = vsel %vm769_vm5, %v820_v18, %v826_v9  ;;  %v337_v4 = vsel %vm334_vm2, %v324_v0, %v330_v17  ;;  %v875_v52 = vmax.f32 %v730_v29, %v850_v39 }
  0x76   :  { %v874_v59 = vmax.f32 %v729_v58, %v856_v63  ;;  %v898_v10 = vmul.f32 0.033333335, %v802_v30  ;;  %v343_v8 = vsel %vm334_vm2, %v318_v44, %v324_v0  ;;  %v370_v56 = vadd.f32 %v337_v4, %v7488_v40 }
  0x77   :  { %v899_v26 = vmul.f32 0.033333335, %v803_v31  ;;  %v369_v47 = vadd.f32 %v343_v8, %v7476_v41  ;;  %v397_v9 = vrot.slane %v7521_v46, 7  ;;  %v923_v36 = vmul.f32 0.5, %v875_v52 }
  0x78   :  { %v922_v24 = vmul.f32 0.5, %v874_v59  ;;  %v475_v57 = vrot.slane %v7488_v40, 1  ;;  %v548_v17 = vrot.slane %v7523_v12, 1  ;;  %v614_v44 = vrot.slane %v7476_v41, 6 }
  0x79   :  { %v409_v58 = vsel %vm334_vm2, %v397_v9, %v403_v55  ;;  %v415_v29 = vsel %vm334_vm2, %v391_v45, %v397_v9  ;;  %v687_v0 = vrot.slane %v7521_v46, 6  ;;  %v947_v31 = vadd.f32 %v923_v36, %v899_v26  ;;  %v7627_v26 = vld [vmem:[#allocation2] sm:$0xff]  ;;  %v7639_v9 = vld [vmem:[#allocation2 + $0x8] sm:$0xff] }
  0x7a   :  { %v946_v30 = vadd.f32 %v922_v24, %v898_v10  ;;  %v441_v39 = vmax.f32 %v7521_v46, %v415_v29  ;;  %v442_v63 = vmax.f32 %v7523_v12, %v409_v58  ;;  %v482_v4 = vsel %vm479_vm3, %v469_v16, %v475_v57 }
  0x7b   :  { %v500_v45 = vsel %vm479_vm3, %v475_v57, %v457_v49  ;;  %v554_v55 = vsel %vm479_vm3, %v542_v33, %v548_v17  ;;  %v572_v59 = vsel %vm479_vm3, %v548_v17, %v530_v14  ;;  %v514_v10 = vadd.f32 %v482_v4, %v369_v47  ;;  %v7641_v47 = vld [vmem:[#allocation2 + $0x18] sm:$0xff] }
  0x7c   :  { %v998_v52 = vpack.c.bf16 %v947_v31, %v946_v30  ;;  %v515_v8 = vadd.f32 %v500_v45, %v370_v56  ;;  %v586_v41 = vmax.f32 %v441_v39, %v554_v55  ;;  %v587_v16 = vmax.f32 %v442_v63, %v572_v59  ;;  %v7669_v31 = vld [vmem:[#allocation3 + $0x18] sm:$0xff]  ;;  %v7681_v55 = vld [vmem:[#allocation2 + $0x10] sm:$0xff] }
  0x7d   :  { %v627_v49 = vsel %vm624_vm4, %v614_v44, %v620_v21  ;;  %v633_v33 = vsel %vm624_vm4, %v608_v3, %v614_v44  ;;  %v699_v14 = vsel %vm624_vm4, %v687_v0, %v693_v13  ;;  %v705_v36 = vsel %vm624_vm4, %v681_v53, %v687_v0  ;;  %v7667_v0 = vld [vmem:[#allocation3 + $0x8] sm:$0xff] }
  0x7e   :  { %6276 = vmatprep.mubr.msk.bf16.mxu0 %vm15_vm0, %v998_v52  ;;  %v659_v56 = vadd.f32 %v633_v33, %v514_v10  ;;  %v660_v24 = vadd.f32 %v627_v49, %v515_v8  ;;  %v765_v21 = vrot.slane %v7488_v40, 2  ;;  %v731_v27 = vmax.f32 %v586_v41, %v705_v36 }
  0x7f   :  { %v732_v57 = vmax.f32 %v587_v16, %v699_v14  ;;  %v838_v3 = vrot.slane %v7523_v12, 2  ;;  %v2164_v17 = vrot.slane %v7627_v26, 7  ;;  %v2170_v29 = vrot.slane %v7639_v9, 7 }
  0x80   :  { %v772_v13 = vsel %vm769_vm5, %v759_v48, %v765_v21  ;;  %v790_v58 = vsel %vm769_vm5, %v765_v21, %v747_v43  ;;  %v2182_v53 = vrot.slane %v7641_v47, 7  ;;  %v2236_v59 = vrot.slane %v7665_v51, 7 }
  0x81   :  { %v804_v44 = vadd.f32 %v772_v13, %v659_v56  ;;  %v805_v40 = vadd.f32 %v790_v58, %v660_v24  ;;  %v844_v12 = vsel %vm769_vm5, %v832_v7, %v838_v3  ;;  %v862_v48 = vsel %vm769_vm5, %v838_v3, %v820_v18  ;;  %v7709_v3 = vld [vmem:[#allocation3 + $0x10] sm:$0xff] }
  0x82   :  { %v876_v43 = vmax.f32 %v731_v27, %v844_v12  ;;  %v877_v30 = vmax.f32 %v732_v57, %v862_v48  ;;  %v2200_v46 = vsel %vm334_vm2, %v2164_v17, %v2170_v29  ;;  %v2206_v37 = vsel %vm334_vm2, %v2182_v53, %v2164_v17 }
  0x83   :  { %v900_v7 = vmul.f32 0.033333335, %v804_v44  ;;  %v901_v18 = vmul.f32 0.033333335, %v805_v40  ;;  %v2212_v39 = vadd.f32 %v2206_v37, %v7627_v26  ;;  %v2213_v63 = vadd.f32 %v2200_v46, %v7639_v9 }
  0x84   :  { %v924_v4 = vmul.f32 0.5, %v876_v43  ;;  %v925_v45 = vmul.f32 0.5, %v877_v30  ;;  %v2242_v52 = vrot.slane %v7667_v0, 7  ;;  %v2254_v10 = vrot.slane %v7669_v31, 7 }
  0x85   :  { %v2308_v8 = vrot.slane %v7627_v26, 1  ;;  %v2314_v41 = vrot.slane %v7639_v9, 1  ;;  %v2320_v16 = vrot.slane %v7681_v55, 1  ;;  %v14564_v56 = vrot.slane %v7665_v51, 1 }
  0x86   :  { %v948_v49 = vadd.f32 %v924_v4, %v900_v7  ;;  %v949_v33 = vadd.f32 %v925_v45, %v901_v18  ;;  %v2272_v14 = vsel %vm334_vm2, %v2236_v59, %v2242_v52  ;;  %v2278_v24 = vsel %vm334_vm2, %v2254_v10, %v2236_v59 }
  0x87   :  { %v2285_v36 = vmax.f32 %v7667_v0, %v2272_v14  ;;  %v2338_v21 = vsel %vm479_vm3, %v2314_v41, %v2320_v16  ;;  %v2344_v27 = vsel %vm479_vm3, %v2308_v8, %v2314_v41  ;;  %v2284_v17 = vmax.f32 %v7665_v51, %v2278_v24  ;;  %v7747_v14 = vld [vmem:[%s14556_s0 + $0x4a0] sm:$0xff] }
  0x88   :  { %v981_v57 = vsel %vm72_vm6, %v949_v33, 0.0  ;;  %v2356_v13 = vadd.f32 %v2344_v27, %v2212_v39  ;;  %v2357_v58 = vadd.f32 %v2338_v21, %v2213_v63  ;;  %v2386_v40 = vrot.slane %v7667_v0, 1  ;;  %v6109_v33 = vld [vmem:[%s14556_s0 + $0x488] sm:$0xff] }
  0x89   :  { %v999_v44 = vpack.c.bf16 %v981_v57, %v948_v49  ;;  %v14566_v12 = vrot.slane %v7709_v3, 1  ;;  %v2452_v48 = vrot.slane %v7627_v26, 6  ;;  %v14561_v43 = vrot.slane %v7639_v9, 6  ;;  %v6108_v49 = vld [vmem:[%s14556_s0 + $0x480] sm:$0xff]  ;;  %v6110_v57 = vld [vmem:[%s14556_s0 + $0x490] sm:$0xff] }
  0x8a   :  { %v14562_v30 = vrot.slane %v7641_v47, 6  ;;  %v2524_v46 = vrot.slane %v7665_v51, 6  ;;  %v14559_v37 = vrot.slane %v7667_v0, 6  ;;  %v2416_v18 = vsel %vm479_vm3, %v14564_v56, %v2386_v40 }
  0x8b   :  { %6277 = vmatmul.mubr.msk.bf16.gmra.mrb[8].mxu0 %vm15_vm0, %v999_v44  ;;  %v2410_v7 = vsel %vm479_vm3, %v2386_v40, %v14566_v12  ;;  %v14560_v39 = vrot.slane %v7669_v31, 6  ;;  %v14565_v63 = vrot.slane %v7627_v26, 2  ;;  %v2428_v4 = vmax.f32 %v2284_v17, %v2416_v18  ;;  %v7763_v17 = vld [vmem:[%s14556_s0 + $0x4a8] sm:$0xff] }
  0x8c   :  { %v2429_v45 = vmax.f32 %v2285_v36, %v2410_v7  ;;  %v2488_v59 = vsel %vm624_vm4, %v2452_v48, %v14561_v43  ;;  %v2494_v41 = vsel %vm624_vm4, %v14562_v30, %v2452_v48  ;;  %v2560_v21 = vsel %vm624_vm4, %v2524_v46, %v14559_v37 }
  0x8d   :  { %v2500_v24 = vadd.f32 %v2494_v41, %v2356_v13  ;;  %v2501_v36 = vadd.f32 %v2488_v59, %v2357_v58  ;;  %v2566_v27 = vsel %vm624_vm4, %v14560_v39, %v2524_v46  ;;  %v7768_v13 = vld [vmem:[%s14556_s0 + $0x4b0] sm:$0xff]  ;;  %v2602_v40 = vrot.slane %v7639_v9, 2  ;;  %v6111_v46 = vld [vmem:[%s14556_s0 + $0x498] sm:$0x1] }
  0x8e   :  { %v2572_v58 = vmax.f32 %v2428_v4, %v2566_v27  ;;  %v2573_v44 = vmax.f32 %v2429_v45, %v2560_v21  ;;  %v14563_v48 = vrot.slane %v7681_v55, 2  ;;  %v2668_v7 = vrot.slane %v7665_v51, 2  ;;  %v7781_v41 = vld [vmem:[%s14556_s0 + $0x4b8] sm:$0x1] }
  0x8f   :  { %v2674_v18 = vrot.slane %v7667_v0, 2  ;;  %v14567_v59 = vrot.slane %v7709_v3, 2  ;;  %v2897_v4 = vadd.f32 %v7747_v14, %v6108_v49  ;;  %v2632_v21 = vsel %vm769_vm5, %v14565_v63, %v2602_v40 }
  0x90   :  { %v2626_v45 = vsel %vm769_vm5, %v2602_v40, %v14563_v48  ;;  %v2898_v27 = vadd.f32 %v7763_v17, %v6109_v33  ;;  %v2899_v37 = vadd.f32 %v7768_v13, %v6110_v57  ;;  %v2644_v39 = vadd.f32 %v2632_v21, %v2500_v24 }
  0x91   :  { %v2645_v43 = vadd.f32 %v2626_v45, %v2501_v36  ;;  %v2698_v30 = vsel %vm769_vm5, %v2674_v18, %v14567_v59  ;;  %v2704_v48 = vsel %vm769_vm5, %v2668_v7, %v2674_v18  ;;  %2989 = vst.msk [vmem:[#allocation2] sm:$0xff] %vm15_vm0, %v2897_v4  ;;  %v2900_v63 = vadd.f32 %v7781_v41, %v6111_v46 }
  0x92   :  { %v2716_v56 = vmax.f32 %v2572_v58, %v2704_v48  ;;  %v2717_v40 = vmax.f32 %v2573_v44, %v2698_v30  ;;  %v2945_v12 = vmax.f32 %v6108_v49, %v7747_v14  ;;  %2990 = vst.msk [vmem:[#allocation2 + $0x8] sm:$0xff] %vm15_vm0, %v2898_v27  ;;  %2991 = vst.msk [vmem:[#allocation2 + $0x10] sm:$0xff] %vm15_vm0, %v2899_v37  ;;  %v2740_v24 = vmul.f32 0.033333335, %v2644_v39  ;;  %v7847_v27 = vld [vmem:[%s14556_s0 + $0xc0] sm:$0xff] }
  0x93   :  { %v2741_v36 = vmul.f32 0.033333335, %v2645_v43  ;;  %v2946_v45 = vmax.f32 %v6109_v33, %v7763_v17  ;;  %v2947_v21 = vmax.f32 %v6110_v57, %v7768_v13  ;;  %v2948_v4 = vmax.f32 %v6111_v46, %v7781_v41  ;;  %2992 = vst.msk [vmem:[#allocation2 + $0x18] sm:$0x1] %vm216_vm1, %v2900_v63 }
  0x94   :  { %v2764_v59 = vmul.f32 0.5, %v2716_v56  ;;  %v2765_v18 = vmul.f32 0.5, %v2717_v40  ;;  %3013 = vst.msk [vmem:[#allocation3] sm:$0xff] %vm15_vm0, %v2945_v12  ;;  %v2176_v30 = vrot.slane %v7681_v55, 7  ;;  %v2248_v43 = vrot.slane %v7709_v3, 7 }
  0x95   :  { %3014 = vst.msk [vmem:[#allocation3 + $0x8] sm:$0xff] %vm15_vm0, %v2946_v45  ;;  %3015 = vst.msk [vmem:[#allocation3 + $0x10] sm:$0xff] %vm15_vm0, %v2947_v21  ;;  %v2326_v37 = vrot.slane %v7641_v47, 1  ;;  %v2398_v39 = vrot.slane %v7669_v31, 1  ;;  %v2464_v56 = vrot.slane %v7681_v55, 6  ;;  %v14831_v40 = vrot.slane %v7709_v3, 1 }
  0x96   :  { %v2788_v49 = vadd.f32 %v2764_v59, %v2740_v24  ;;  %v2789_v33 = vadd.f32 %v2765_v18, %v2741_v36  ;;  %3016 = vst.msk [vmem:[#allocation3 + $0x18] sm:$0x1] %vm216_vm1, %v2948_v4  ;;  %v2188_v12 = vsel %vm334_vm2, %v2176_v30, %v2182_v53  ;;  %v2194_v63 = vsel %vm334_vm2, %v2170_v29, %v2176_v30  ;;  %v7864_v45 = vld [vmem:[%s14556_s0 + $0xc8] sm:$0xff] }
  0x97   :  { %v2214_v57 = vadd.f32 %v2194_v63, %v7681_v55  ;;  %v2215_v58 = vadd.f32 %v2188_v12, %v7641_v47  ;;  %v2260_v44 = vsel %vm334_vm2, %v2248_v43, %v2254_v10  ;;  %v2266_v48 = vsel %vm334_vm2, %v2242_v52, %v2248_v43  ;;  %v7874_v21 = vld [vmem:[%s14556_s0 + $0xe8] sm:$0xff] }
  0x98   :  { %v2836_v53 = vpack.c.bf16 %v2789_v33, %v2788_v49  ;;  %v2286_v46 = vmax.f32 %v7709_v3, %v2266_v48  ;;  %v2287_v59 = vmax.f32 %v7669_v31, %v2260_v44  ;;  %v2332_v29 = vsel %vm479_vm3, %v2320_v16, %v2326_v37  ;;  %v100_v48 = vld [vmem:[%s14556_s0 + $0xd8] sm:$0x1] }
  0x99   :  { %v2350_v52 = vsel %vm479_vm3, %v2326_v37, %v2308_v8  ;;  %v2358_v10 = vadd.f32 %v2332_v29, %v2214_v57  ;;  %v2404_v24 = vsel %vm479_vm3, %v14831_v40, %v2398_v39  ;;  %v14832_v36 = vrot.slane %v7665_v51, 1  ;;  %v7869_v8 = vld [vmem:[%s14556_s0 + $0xe0] sm:$0xff]  ;;  %v99_v57 = vld [vmem:[%s14556_s0 + $0xd0] sm:$0xff] }
  0x9a   :  { %6316 = vmatprep.mubr.msk.bf16.mxu1 %vm15_vm0, %v2836_v53  ;;  %v2359_v18 = vadd.f32 %v2350_v52, %v2215_v58  ;;  %v2430_v4 = vmax.f32 %v2286_v46, %v2404_v24  ;;  %v14833_v43 = vrot.slane %v7641_v47, 6  ;;  %v2536_v33 = vrot.slane %v7709_v3, 6  ;;  %v7943_v51 = vld [vmem:[%s14556_s0 + $0x260] sm:$0xff] }
  0x9b   :  { %v2422_v16 = vsel %vm479_vm3, %v2398_v39, %v14832_v36  ;;  %v14834_v39 = vrot.slane %v7639_v9, 6  ;;  %v2614_v12 = vrot.slane %v7641_v47, 2  ;;  %v2686_v63 = vrot.slane %v7669_v31, 2  ;;  %v7897_v9 = vld [vmem:[%s14556_s0 + $0xf0] sm:$0xff]  ;;  %v7902_v47 = vld [vmem:[%s14556_s0 + $0xf8] sm:$0x1] }
  0x9c   :  { %v2431_v30 = vmax.f32 %v2287_v59, %v2422_v16  ;;  %v2476_v37 = vsel %vm624_vm4, %v2464_v56, %v14833_v43  ;;  %v134_v53 = vadd.f32 %v7874_v21, %v7864_v45  ;;  %v14835_v46 = vrot.slane %v7669_v31, 6 }
  0x9d   :  { %v2482_v49 = vsel %vm624_vm4, %v14834_v39, %v2464_v56  ;;  %v2503_v44 = vadd.f32 %v2476_v37, %v2359_v18  ;;  %v133_v56 = vadd.f32 %v7869_v8, %v7847_v27  ;;  %v14836_v29 = vrot.slane %v7667_v0, 6 }
  0x9e   :  { %v2502_v58 = vadd.f32 %v2482_v49, %v2358_v10  ;;  %v2548_v59 = vsel %vm624_vm4, %v2536_v33, %v14835_v46  ;;  %v14837_v10 = vrot.slane %v7681_v55, 2  ;;  %v14838_v24 = vrot.slane %v7627_v26, 2 }
  0x9f   :  { %v2554_v52 = vsel %vm624_vm4, %v14836_v29, %v2536_v33  ;;  %v2575_v31 = vmax.f32 %v2431_v30, %v2548_v59  ;;  %v14839_v37 = vrot.slane %v7709_v3, 2  ;;  %v2710_v55 = vsel %vm769_vm5, %v2686_v63, %v2668_v7  ;;  %v6037_v3 = vld [vmem:[%s14556_s0 + $0x248] sm:$0xff]  ;;  %v6039_v59 = vld [vmem:[%s14556_s0 + $0x258] sm:$0x1] }
  0xa0   :  { %v2620_v40 = vsel %vm769_vm5, %v14837_v10, %v2614_v12  ;;  %v2638_v36 = vsel %vm769_vm5, %v2614_v12, %v14838_v24  ;;  %v2574_v16 = vmax.f32 %v2430_v4, %v2554_v52  ;;  %v135_v39 = vadd.f32 %v7897_v9, %v99_v57  ;;  %v6036_v4 = vld [vmem:[%s14556_s0 + $0x240] sm:$0xff]  ;;  %v7948_v7 = vld [vmem:[%s14556_s0 + $0x268] sm:$0xff]  ;;  %v7972_v24 = vld [vmem:[%s14556_s0 + $0x278] sm:$0x1] }
  0xa1   :  { %v2646_v18 = vadd.f32 %v2620_v40, %v2502_v58  ;;  %v2647_v43 = vadd.f32 %v2638_v36, %v2503_v44  ;;  %v2692_v0 = vsel %vm769_vm5, %v14839_v37, %v2686_v63  ;;  %v136_v26 = vadd.f32 %v7902_v47, %v100_v48  ;;  %v7992_v37 = vld [vmem:[%s14556_s0 + $0x348] sm:$0xff] }
  0xa2   :  { %v2718_v30 = vmax.f32 %v2574_v16, %v2692_v0  ;;  %v2719_v49 = vmax.f32 %v2575_v31, %v2710_v55  ;;  %v157_v63 = vadd.f32 %v133_v56, %v7295_v25  ;;  %v158_v58 = vadd.f32 %v134_v53, %v7300_v15  ;;  %v6038_v56 = vld [vmem:[%s14556_s0 + $0x250] sm:$0xff] }
  0xa3   :  { %v2742_v33 = vmul.f32 0.033333335, %v2646_v18  ;;  %v2743_v12 = vmul.f32 0.033333335, %v2647_v43  ;;  %v159_v44 = vadd.f32 %v135_v39, %v7305_v20  ;;  %v160_v46 = vadd.f32 %v136_v26, %v7310_v50  ;;  %v7967_v53 = vld [vmem:[%s14556_s0 + $0x270] sm:$0xff] }
  0xa4   :  { %v2766_v29 = vmul.f32 0.5, %v2718_v30  ;;  %v2767_v52 = vmul.f32 0.5, %v2719_v49  ;;  %v181_v10 = vmax.f32 %v7847_v27, %v7869_v8  ;;  %v182_v40 = vmax.f32 %v7864_v45, %v7874_v21  ;;  %226 = vst.msk [vmem:[#allocation2 + $0x60] sm:$0xff] %vm15_vm0, %v157_v63  ;;  %227 = vst.msk [vmem:[#allocation2 + $0x68] sm:$0xff] %vm15_vm0, %v158_v58  ;;  %v8006_v26 = vld [vmem:[%s14556_s0 + $0x358] sm:$0x1] }
  0xa5   :  { %v183_v36 = vmax.f32 %v99_v57, %v7897_v9  ;;  %v184_v27 = vmax.f32 %v100_v48, %v7902_v47  ;;  %228 = vst.msk [vmem:[#allocation2 + $0x70] sm:$0xff] %vm15_vm0, %v159_v44  ;;  %v1067_v45 = vadd.f32 %v7943_v51, %v6036_v4  ;;  %v1068_v16 = vadd.f32 %v7948_v7, %v6037_v3  ;;  %v7987_v48 = vld [vmem:[%s14556_s0 + $0x340] sm:$0xff]  ;;  %v8028_v63 = vld [vmem:[%s14556_s0 + $0x370] sm:$0xff]  ;;  %v8033_v58 = vld [vmem:[%s14556_s0 + $0x378] sm:$0x1] }
  0xa6   :  { %229 = vst.msk [vmem:[#allocation2 + $0x78] sm:$0x1] %vm216_vm1, %v160_v46  ;;  %v2790_v31 = vadd.f32 %v2766_v29, %v2742_v33  ;;  %v2791_v18 = vadd.f32 %v2767_v52, %v2743_v12  ;;  %v201_v43 = vmax.f32 %v181_v10, %v7295_v25  ;;  %v202_v57 = vmax.f32 %v182_v40, %v7300_v15  ;;  %v8001_v15 = vld [vmem:[%s14556_s0 + $0x350] sm:$0xff]  ;;  %v8023_v12 = vld [vmem:[%s14556_s0 + $0x368] sm:$0xff] }
  0xa7   :  { %v203_v0 = vmax.f32 %v183_v36, %v7305_v20  ;;  %v204_v55 = vmax.f32 %v184_v27, %v7310_v50  ;;  %v1069_v39 = vadd.f32 %v7967_v53, %v6038_v56  ;;  %v1070_v25 = vadd.f32 %v7972_v24, %v6039_v59  ;;  %v8011_v20 = vld [vmem:[%s14556_s0 + $0x360] sm:$0xff] }
  0xa8   :  { %v2815_v50 = vsel %vm72_vm6, %v2791_v18, 0.0  ;;  %250 = vst.msk [vmem:[#allocation3 + $0x60] sm:$0xff] %vm15_vm0, %v201_v43  ;;  %251 = vst.msk [vmem:[#allocation3 + $0x68] sm:$0xff] %vm15_vm0, %v202_v57  ;;  %v1091_v30 = vadd.f32 %v7345_v54, %v1067_v45  ;;  %v1092_v49 = vadd.f32 %v7350_v28, %v1068_v16  ;;  %v1115_v33 = vmax.f32 %v6036_v4, %v7943_v51  ;;  %v8047_v45 = vld [vmem:[#allocation2 + $0x20] sm:$0xff] }
  0xa9   :  { %v2837_v44 = vpack.c.bf16 %v2815_v50, %v2790_v31  ;;  %252 = vst.msk [vmem:[#allocation3 + $0x70] sm:$0xff] %vm15_vm0, %v203_v0  ;;  %v1093_v4 = vadd.f32 %v7362_v23, %v1069_v39  ;;  %v1094_v46 = vadd.f32 %v7372_v11, %v1070_v25  ;;  %v1116_v29 = vmax.f32 %v6037_v3, %v7948_v7 }
  0xaa   :  { %253 = vst.msk [vmem:[#allocation3 + $0x78] sm:$0x1] %vm216_vm1, %v204_v55  ;;  %v1117_v52 = vmax.f32 %v6038_v56, %v7967_v53  ;;  %v1118_v10 = vmax.f32 %v6039_v59, %v7972_v24  ;;  %v1135_v40 = vmax.f32 %v1115_v33, %v7345_v54  ;;  %v1980_v36 = vadd.f32 %v8011_v20, %v7987_v48 }
  0xab   :  { %6317 = vmatmul.mubr.msk.bf16.vlgmr.msra.gmra.mrb[0].mxu1 %vm15_vm0, %v2837_v44  ;;  %v1136_v27 = vmax.f32 %v1116_v29, %v7350_v28  ;;  %14840 = vst [vmem:[#allocation10_spill] sm:$0xff] %v8047_v45  ;;  %v8051_v16 = vadd.f32 %v8023_v12, %v7992_v37  ;;  %v8055_v3 = vadd.f32 %v8028_v63, %v8001_v15  ;;  %v8061_v59 = vld [vmem:[#allocation2 + $0x60] sm:$0xff]  ;;  %v8063_v56 = vld [vmem:[#allocation2 + $0x68] sm:$0xff] }
  0xac   :  { %v8059_v54 = vadd.f32 %v8033_v58, %v8006_v26  ;;  %v8065_v31 = vld [vmem:[#allocation2 + $0x70] sm:$0xff]  ;;  %v1137_v28 = vmax.f32 %v1117_v52, %v7362_v23  ;;  %v1138_v18 = vmax.f32 %v1118_v10, %v7372_v11  ;;  %v2004_v43 = vadd.f32 %v7410_v38, %v1980_v36  ;;  %1159 = vst.msk [vmem:[#allocation2 + $0x60] sm:$0xff] %vm15_vm0, %v1091_v30 }
  0xad   :  { %v8072_v0 = vld [vmem:[#allocation2 + $0x78] sm:$0xff]  ;;  %v313_v55 = vrot.slane %v8061_v59, 7  ;;  %v14568_v39 = vrot.slane %v8063_v56, 7  ;;  %v14569_v25 = vrot.slane %v8061_v59, 1  ;;  %v464_v50 = vrot.slane %v8063_v56, 1  ;;  %1160 = vst.msk [vmem:[#allocation2 + $0x68] sm:$0xff] %vm15_vm0, %v1092_v49 }
  0xae   :  { %1161 = vst.msk [vmem:[#allocation2 + $0x70] sm:$0xff] %vm15_vm0, %v1093_v4  ;;  %v331_v23 = vrot.slane %v8072_v0, 7  ;;  %v14571_v11 = vrot.slane %v8065_v31, 1  ;;  %v603_v38 = vrot.slane %v8061_v59, 6  ;;  %2072 = vst.msk [vmem:[#allocation2 + $0x20] sm:$0xff] %vm15_vm0, %v2004_v43  ;;  %v754_v62 = vrot.slane %v8063_v56, 2 }
  0xaf   :  { %1162 = vst.msk [vmem:[#allocation2 + $0x78] sm:$0x1] %vm216_vm1, %v1094_v46  ;;  %v8087_v44 = vld [vmem:[#allocation3 + $0x60] sm:$0xff]  ;;  %v8089_v29 = vld [vmem:[#allocation3 + $0x68] sm:$0xff]  ;;  %v350_v30 = vsel %vm334_vm2, %v313_v55, %v14568_v39  ;;  %v495_v49 = vsel %vm479_vm3, %v14569_v25, %v464_v50  ;;  %v760_v32 = vrot.slane %v8065_v31, 2 }
  0xb0   :  { %v8101_v52 = vld [vmem:[#allocation3 + $0x70] sm:$0xff]  ;;  %v356_v36 = vsel %vm334_vm2, %v331_v23, %v313_v55  ;;  %v372_v43 = vadd.f32 %v350_v30, %v8063_v56  ;;  %v386_v57 = vrot.slane %v8087_v44, 7  ;;  %v392_v39 = vrot.slane %v8089_v29, 7  ;;  %1183 = vst.msk [vmem:[#allocation3 + $0x60] sm:$0xff] %vm15_vm0, %v1135_v40  ;;  %1184 = vst.msk [vmem:[#allocation3 + $0x68] sm:$0xff] %vm15_vm0, %v1136_v27 }
  0xb1   :  { %v8103_v10 = vld [vmem:[#allocation3 + $0x78] sm:$0xff]  ;;  %v371_v25 = vadd.f32 %v356_v36, %v8061_v59  ;;  %v489_v4 = vsel %vm479_vm3, %v464_v50, %v14571_v11  ;;  %v14577_v55 = vrot.slane %v8087_v44, 1  ;;  %1185 = vst.msk [vmem:[#allocation3 + $0x70] sm:$0xff] %vm15_vm0, %v1137_v28  ;;  %v537_v27 = vrot.slane %v8089_v29, 1 }
  0xb2   :  { %v404_v46 = vrot.slane %v8103_v10, 7  ;;  %1186 = vst.msk [vmem:[#allocation3 + $0x78] sm:$0x1] %vm216_vm1, %v1138_v18  ;;  %v422_v40 = vsel %vm334_vm2, %v386_v57, %v392_v39  ;;  %v517_v30 = vadd.f32 %v489_v4, %v372_v43  ;;  %v543_v36 = vrot.slane %v8101_v52, 1 }
  0xb3   :  { %v444_v45 = vmax.f32 %v8089_v29, %v422_v40  ;;  %v516_v50 = vadd.f32 %v495_v49, %v371_v25  ;;  %v14841_v11 = vrot.slane %v8063_v56, 6  ;;  %v567_v43 = vsel %vm479_vm3, %v14577_v55, %v537_v27 }
  0xb4   :  { %v428_v33 = vsel %vm334_vm2, %v404_v46, %v386_v57  ;;  %v561_v4 = vsel %vm479_vm3, %v537_v27, %v543_v36  ;;  %v14842_v57 = vrot.slane %v8072_v0, 6  ;;  %v694_v42 = vrot.slane %v8103_v10, 6 }
  0xb5   :  { %v640_v28 = vsel %vm624_vm4, %v603_v38, %v14841_v11  ;;  %v443_v18 = vmax.f32 %v8087_v44, %v428_v33  ;;  %v589_v49 = vmax.f32 %v444_v45, %v561_v4  ;;  %v676_v11 = vrot.slane %v8087_v44, 6 }
  0xb6   :  { %v646_v25 = vsel %vm624_vm4, %v14842_v57, %v603_v38  ;;  %v662_v60 = vadd.f32 %v640_v28, %v517_v30  ;;  %v682_v33 = vrot.slane %v8089_v29, 6  ;;  %v827_v55 = vrot.slane %v8089_v29, 2 }
  0xb7   :  { %v661_v40 = vadd.f32 %v646_v25, %v516_v50  ;;  %v588_v2 = vmax.f32 %v443_v18, %v567_v43  ;;  %v14579_v38 = vrot.slane %v8101_v52, 2  ;;  %v718_v30 = vsel %vm624_vm4, %v694_v42, %v676_v11 }
  0xb8   :  { %v712_v45 = vsel %vm624_vm4, %v676_v11, %v682_v33  ;;  %v14843_v50 = vrot.slane %v8061_v59, 2  ;;  %v325_v18 = vrot.slane %v8065_v31, 7  ;;  %v779_v29 = vsel %vm769_vm5, %v754_v62, %v760_v32 }
  0xb9   :  { %v733_v4 = vmax.f32 %v588_v2, %v718_v30  ;;  %v734_v43 = vmax.f32 %v589_v49, %v712_v45  ;;  %v807_v25 = vadd.f32 %v779_v29, %v662_v60  ;;  %v851_v27 = vsel %vm769_vm5, %v827_v55, %v14579_v38 }
  0xba   :  { %v785_v28 = vsel %vm769_vm5, %v14843_v50, %v754_v62  ;;  %v14844_v11 = vrot.slane %v8087_v44, 2  ;;  %v338_v50 = vsel %vm334_vm2, %v325_v18, %v331_v23  ;;  %v14845_v62 = vrot.slane %v8063_v56, 7 }
  0xbb   :  { %v806_v57 = vadd.f32 %v785_v28, %v661_v40  ;;  %v879_v49 = vmax.f32 %v734_v43, %v851_v27  ;;  %v903_v40 = vmul.f32 0.033333335, %v807_v25  ;;  %v374_v28 = vadd.f32 %v338_v50, %v8072_v0 }
  0xbc   :  { %v857_v1 = vsel %vm769_vm5, %v14844_v11, %v827_v55  ;;  %v344_v60 = vsel %vm334_vm2, %v14845_v62, %v325_v18  ;;  %v398_v29 = vrot.slane %v8101_v52, 7  ;;  %v476_v11 = vrot.slane %v8072_v0, 1 }
  0xbd   :  { %v878_v2 = vmax.f32 %v733_v4, %v857_v1  ;;  %v902_v45 = vmul.f32 0.033333335, %v806_v57  ;;  %v373_v30 = vadd.f32 %v344_v60, %v8065_v31  ;;  %v927_v55 = vmul.f32 0.5, %v879_v49 }
  0xbe   :  { %v549_v1 = vrot.slane %v8103_v10, 1  ;;  %v410_v23 = vsel %vm334_vm2, %v398_v29, %v404_v46  ;;  %v416_v27 = vsel %vm334_vm2, %v392_v39, %v398_v29  ;;  %v615_v18 = vrot.slane %v8065_v31, 6 }
  0xbf   :  { %v926_v38 = vmul.f32 0.5, %v878_v2  ;;  %v688_v4 = vrot.slane %v8101_v52, 6  ;;  %v951_v57 = vadd.f32 %v927_v55, %v903_v40  ;;  %v445_v25 = vmax.f32 %v8101_v52, %v416_v27 }
  0xc0   :  { %v446_v50 = vmax.f32 %v8103_v10, %v410_v23  ;;  %v14846_v2 = vrot.slane %v8065_v31, 1  ;;  %v14847_v46 = vrot.slane %v8061_v59, 1  ;;  %v555_v62 = vsel %vm479_vm3, %v543_v36, %v549_v1 }
  0xc1   :  { %v950_v43 = vadd.f32 %v926_v38, %v902_v45  ;;  %v14848_v38 = vrot.slane %v8087_v44, 1  ;;  %v590_v31 = vmax.f32 %v445_v25, %v555_v62  ;;  %v14849_v23 = vrot.slane %v8072_v0, 6 }
  0xc2   :  { %v483_v49 = vsel %vm479_vm3, %v14846_v2, %v476_v11  ;;  %v501_v39 = vsel %vm479_vm3, %v476_v11, %v14847_v46  ;;  %v14850_v11 = vrot.slane %v8063_v56, 6  ;;  %v700_v2 = vsel %vm624_vm4, %v688_v4, %v694_v42 }
  0xc3   :  { %v573_v45 = vsel %vm479_vm3, %v549_v1, %v14848_v38  ;;  %v1000_v60 = vpack.c.bf16 %v951_v57, %v950_v43  ;;  %v518_v40 = vadd.f32 %v483_v49, %v373_v30  ;;  %v519_v29 = vadd.f32 %v501_v39, %v374_v28  ;;  %v8217_v57 = vld [vmem:[#allocation2 + $0x28] sm:$0xff]  ;;  %v8220_v49 = vld [vmem:[#allocation2 + $0x30] sm:$0xff] }
  0xc4   :  { %v591_v55 = vmax.f32 %v446_v50, %v573_v45  ;;  %v628_v27 = vsel %vm624_vm4, %v615_v18, %v14849_v23  ;;  %v634_v36 = vsel %vm624_vm4, %v14850_v11, %v615_v18  ;;  %v706_v28 = vsel %vm624_vm4, %v682_v33, %v688_v4  ;;  %14851 = vst [vmem:[#allocation11_spill] sm:$0xff] %v8220_v49  ;;  %v8222_v18 = vld [vmem:[#allocation2 + $0x38] sm:$0xff]  ;;  %v8232_v4 = vld [vmem:[#allocation3 + $0x20] sm:$0xff]  ;;  %v8246_v45 = vld [vmem:[#allocation3 + $0x28] sm:$0xff] }
  0xc5   :  { %6280 = vmatprep.mubr.msk.bf16.mxu0 %vm15_vm0, %v1000_v60  ;;  %v663_v1 = vadd.f32 %v634_v36, %v518_v40  ;;  %v664_v30 = vadd.f32 %v628_v27, %v519_v29  ;;  %v766_v43 = vrot.slane %v8072_v0, 2  ;;  %v735_v25 = vmax.f32 %v590_v31, %v706_v28  ;;  %14852 = vst [vmem:[#allocation12_spill] sm:$0xff] %v8222_v18  ;;  %v8248_v60 = vld [vmem:[#allocation3 + $0x30] sm:$0xff]  ;;  %v8264_v40 = vld [vmem:[#allocation2 + $0x20] sm:$0xff]  ;;  %v8269_v29 = vld [vmem:[%s14556_s0 + $0x4c8] sm:$0xff] }
  0xc6   :  { %v736_v50 = vmax.f32 %v591_v55, %v700_v2  ;;  %v839_v56 = vrot.slane %v8103_v10, 2  ;;  %v2005_v42 = vadd.f32 %v7415_v35, %v8051_v16  ;;  %v14853_v33 = vrot.slane %v8061_v59, 2  ;;  %14854 = vst [vmem:[#allocation13_spill] sm:$0xff] %v8232_v4  ;;  %14857 = vst [vmem:[#allocation14_spill] sm:$0xff] %v8246_v45  ;;  %v8274_v31 = vld [vmem:[%s14556_s0 + $0x4d8] sm:$0x1] }
  0xc7   :  { %v773_v46 = vsel %vm769_vm5, %v760_v32, %v766_v43  ;;  %v2006_v10 = vadd.f32 %v7420_v22, %v8055_v3  ;;  %v2007_v39 = vadd.f32 %v7435_v5, %v8059_v54  ;;  %v14855_v35 = vrot.slane %v8101_v52, 2  ;;  %14858 = vst [vmem:[#allocation15_spill] sm:$0xff] %v8248_v60  ;;  %v8254_v22 = vld [vmem:[%s14556_s0 + $0x4c0] sm:$0xff]  ;;  %v8256_v54 = vld [vmem:[#allocation3 + $0x38] sm:$0xff]  ;;  %v8287_v27 = vld [vmem:[%s14556_s0 + $0x4d0] sm:$0xff] }
  0xc8   :  { %v791_v0 = vsel %vm769_vm5, %v766_v43, %v14853_v33  ;;  %v808_v62 = vadd.f32 %v773_v46, %v663_v1  ;;  %v14856_v16 = vrot.slane %v8087_v44, 2  ;;  %2073 = vst.msk [vmem:[#allocation2 + $0x28] sm:$0xff] %vm15_vm0, %v2005_v42  ;;  %14859 = vst [vmem:[#allocation16_spill] sm:$0xff] %v8256_v54  ;;  %v2029_v44 = vmax.f32 %v7992_v37, %v8023_v12  ;;  %v8292_v11 = vld [vmem:[%s14556_s0 + $0x4e0] sm:$0xff]  ;;  %v8303_v1 = vld [vmem:[%s14556_s0 + $0x4e8] sm:$0xff] }
  0xc9   :  { %v809_v38 = vadd.f32 %v791_v0, %v664_v30  ;;  %v845_v32 = vsel %vm769_vm5, %v14855_v35, %v839_v56  ;;  %v2030_v52 = vmax.f32 %v8001_v15, %v8028_v63  ;;  %2074 = vst.msk [vmem:[#allocation2 + $0x30] sm:$0xff] %vm15_vm0, %v2006_v10  ;;  %v2031_v15 = vmax.f32 %v8006_v26, %v8033_v58  ;;  %v6570_v63 = vld [vmem:[%s14556_s0 + $0x320] sm:$0xff]  ;;  %v6571_v58 = vld [vmem:[%s14556_s0 + $0x328] sm:$0xff]  ;;  %v8308_v30 = vld [vmem:[%s14556_s0 + $0x4f0] sm:$0xff] }
  0xca   :  { %v863_v59 = vsel %vm769_vm5, %v839_v56, %v14856_v16  ;;  %v880_v5 = vmax.f32 %v735_v25, %v845_v32  ;;  %2075 = vst.msk [vmem:[#allocation2 + $0x38] sm:$0x1] %vm216_vm1, %v2007_v39  ;;  %v904_v37 = vmul.f32 0.033333335, %v808_v62  ;;  %v14860_v55 = vmax.f32 %v7987_v48, %v8011_v20  ;;  %v6572_v48 = vld [vmem:[%s14556_s0 + $0x330] sm:$0xff] }
  0xcb   :  { %v881_v3 = vmax.f32 %v736_v50, %v863_v59  ;;  %v905_v12 = vmul.f32 0.033333335, %v809_v38  ;;  %v2049_v2 = vmax.f32 %v2029_v44, %v6571_v58  ;;  %v2050_v20 = vmax.f32 %v2030_v52, %v6572_v48  ;;  %v8313_v28 = vld [vmem:[%s14556_s0 + $0x4f8] sm:$0x1] }
  0xcc   :  { %v2048_v23 = vmax.f32 %v14860_v55, %v6570_v63  ;;  %v928_v36 = vmul.f32 0.5, %v880_v5  ;;  %v6573_v43 = vld [vmem:[%s14556_s0 + $0x338] sm:$0x1]  ;;  %v2165_v50 = vrot.slane %v8264_v40, 7  ;;  %v14581_v56 = vrot.slane %v8264_v40, 1 }
  0xcd   :  { %v929_v26 = vmul.f32 0.5, %v881_v3  ;;  %v2051_v25 = vmax.f32 %v2031_v15, %v6573_v43  ;;  %v2453_v42 = vrot.slane %v8264_v40, 6  ;;  %2097 = vst.msk [vmem:[#allocation3 + $0x28] sm:$0xff] %vm15_vm0, %v2049_v2  ;;  %2098 = vst.msk [vmem:[#allocation3 + $0x30] sm:$0xff] %vm15_vm0, %v2050_v20  ;;  %v2901_v10 = vadd.f32 %v8292_v11, %v8254_v22 }
  0xce   :  { %2096 = vst.msk [vmem:[#allocation3 + $0x20] sm:$0xff] %vm15_vm0, %v2048_v23  ;;  %v952_v46 = vadd.f32 %v928_v36, %v904_v37  ;;  %v8330_v39 = vadd.f32 %v8303_v1, %v8269_v29  ;;  %v8334_v62 = vadd.f32 %v8308_v30, %v8287_v27  ;;  %v8338_v38 = vadd.f32 %v8313_v28, %v8274_v31 }
  0xcf   :  { %v953_v33 = vadd.f32 %v929_v26, %v905_v12  ;;  %2099 = vst.msk [vmem:[#allocation3 + $0x38] sm:$0x1] %vm216_vm1, %v2051_v25  ;;  %v8344_v16 = vld [vmem:[#allocation2 + $0x28] sm:$0xff]  ;;  %v2925_v59 = vadd.f32 %v7747_v14, %v2901_v10 }
  0xd0   :  { %v8351_v52 = vld [vmem:[#allocation2 + $0x30] sm:$0xff]  ;;  %v14583_v12 = vrot.slane %v8344_v16, 7  ;;  %v2315_v15 = vrot.slane %v8344_v16, 1  ;;  %v14580_v63 = vrot.slane %v8344_v16, 6  ;;  %v2603_v26 = vrot.slane %v8344_v16, 2 }
  0xd1   :  { %v985_v32 = vsel %vm72_vm6, %v953_v33, 0.0  ;;  %v8353_v37 = vld [vmem:[#allocation2 + $0x38] sm:$0xff]  ;;  %v14582_v23 = vrot.slane %v8351_v52, 1  ;;  %2993 = vst.msk [vmem:[#allocation2 + $0x20] sm:$0xff] %vm15_vm0, %v2925_v59  ;;  %v2927_v54 = vadd.f32 %v7768_v13, %v8334_v62  ;;  %v2952_v62 = vmax.f32 %v8274_v31, %v8313_v28 }
  0xd2   :  { %v1001_v44 = vpack.c.bf16 %v985_v32, %v952_v46  ;;  %v14585_v55 = vrot.slane %v8353_v37, 7  ;;  %v14584_v36 = vrot.slane %v8353_v37, 6  ;;  %v2201_v58 = vsel %vm334_vm2, %v2165_v50, %v14583_v12 }
  0xd3   :  { %v2345_v2 = vsel %vm479_vm3, %v14581_v56, %v2315_v15  ;;  %v2489_v48 = vsel %vm624_vm4, %v2453_v42, %v14580_v63  ;;  %v2217_v46 = vadd.f32 %v2201_v58, %v8344_v16  ;;  %v2339_v33 = vsel %vm479_vm3, %v2315_v15, %v14582_v23  ;;  %2995 = vst.msk [vmem:[#allocation2 + $0x30] sm:$0xff] %vm15_vm0, %v2927_v54 }
  0xd4   :  { %6281 = vmatmul.mubr.msk.bf16.gmra.mrb[12].mxu0 %vm15_vm0, %v1001_v44  ;;  %v2207_v25 = vsel %vm334_vm2, %v14585_v55, %v2165_v50  ;;  %v2495_v10 = vsel %vm624_vm4, %v14584_v36, %v2453_v42  ;;  %v8392_v32 = vld [vmem:[#allocation3 + $0x28] sm:$0xff]  ;;  %v8394_v59 = vld [vmem:[#allocation3 + $0x30] sm:$0xff]  ;;  %v2177_v31 = vrot.slane %v8351_v52, 7 }
  0xd5   :  { %v8377_v43 = vld [vmem:[#allocation3 + $0x20] sm:$0xff]  ;;  %v2216_v44 = vadd.f32 %v2207_v25, %v8264_v40  ;;  %v14586_v15 = vrot.slane %v8392_v32, 7  ;;  %v2361_v23 = vadd.f32 %v2339_v33, %v2217_v46  ;;  %v2387_v12 = vrot.slane %v8392_v32, 1 }
  0xd6   :  { %v2237_v50 = vrot.slane %v8377_v43, 7  ;;  %v14589_v58 = vrot.slane %v8377_v43, 1  ;;  %v2525_v63 = vrot.slane %v8377_v43, 6  ;;  %v8400_v56 = vld [vmem:[#allocation3 + $0x38] sm:$0xff]  ;;  %v14587_v42 = vrot.slane %v8394_v59, 1 }
  0xd7   :  { %v2255_v36 = vrot.slane %v8400_v56, 7  ;;  %v2360_v55 = vadd.f32 %v2345_v2, %v2216_v44  ;;  %v14588_v25 = vrot.slane %v8392_v32, 6  ;;  %v14590_v3 = vrot.slane %v8400_v56, 6 }
  0xd8   :  { %v2273_v5 = vsel %vm334_vm2, %v2237_v50, %v14586_v15  ;;  %v2411_v46 = vsel %vm479_vm3, %v2387_v12, %v14587_v42  ;;  %v2417_v33 = vsel %vm479_vm3, %v14589_v58, %v2387_v12  ;;  %v2505_v2 = vadd.f32 %v2489_v48, %v2361_v23 }
  0xd9   :  { %v2279_v44 = vsel %vm334_vm2, %v2255_v36, %v2237_v50  ;;  %v2289_v35 = vmax.f32 %v8392_v32, %v2273_v5  ;;  %v2504_v0 = vadd.f32 %v2495_v10, %v2360_v55  ;;  %v2561_v15 = vsel %vm624_vm4, %v2525_v63, %v14588_v25 }
  0xda   :  { %v2288_v20 = vmax.f32 %v8377_v43, %v2279_v44  ;;  %v2567_v42 = vsel %vm624_vm4, %v14590_v3, %v2525_v63  ;;  %v14861_v12 = vrot.slane %v8351_v52, 2  ;;  %v14862_v5 = vrot.slane %v8264_v40, 2 }
  0xdb   :  { %v2433_v48 = vmax.f32 %v2289_v35, %v2411_v46  ;;  %v2669_v44 = vrot.slane %v8377_v43, 2  ;;  %v2675_v58 = vrot.slane %v8392_v32, 2  ;;  %v2681_v63 = vrot.slane %v8394_v59, 2 }
  0xdc   :  { %v2627_v23 = vsel %vm769_vm5, %v2603_v26, %v14861_v12  ;;  %v2633_v55 = vsel %vm769_vm5, %v14862_v5, %v2603_v26  ;;  %v2432_v25 = vmax.f32 %v2288_v20, %v2417_v33  ;;  %v2926_v3 = vadd.f32 %v7763_v17, %v8330_v39 }
  0xdd   :  { %v2648_v10 = vadd.f32 %v2633_v55, %v2504_v0  ;;  %v2649_v50 = vadd.f32 %v2627_v23, %v2505_v2  ;;  %v2577_v60 = vmax.f32 %v2433_v48, %v2561_v15  ;;  %v2699_v0 = vsel %vm769_vm5, %v2675_v58, %v2681_v63 }
  0xde   :  { %v2576_v26 = vmax.f32 %v2432_v25, %v2567_v42  ;;  %v2705_v35 = vsel %vm769_vm5, %v2669_v44, %v2675_v58  ;;  %v2928_v39 = vadd.f32 %v7781_v41, %v8338_v38  ;;  %2994 = vst.msk [vmem:[#allocation2 + $0x28] sm:$0xff] %vm15_vm0, %v2926_v3  ;;  %v14863_v15 = vmax.f32 %v8254_v22, %v8292_v11 }
  0xdf   :  { %v2744_v12 = vmul.f32 0.033333335, %v2648_v10  ;;  %v2745_v49 = vmul.f32 0.033333335, %v2649_v50  ;;  %v2721_v20 = vmax.f32 %v2577_v60, %v2699_v0  ;;  %v14864_v25 = vmax.f32 %v8269_v29, %v8303_v1  ;;  %v8502_v50 = vld [vmem:[%s14556_s0 + $0x100] sm:$0xff] }
  0xe0   :  { %v2969_v42 = vmax.f32 %v14863_v15, %v7747_v14  ;;  %v2720_v58 = vmax.f32 %v2576_v26, %v2705_v35  ;;  %v14865_v60 = vmax.f32 %v8287_v27, %v8308_v30  ;;  %2996 = vst.msk [vmem:[#allocation2 + $0x38] sm:$0x1] %vm216_vm1, %v2928_v39  ;;  %v2249_v22 = vrot.slane %v8394_v59, 7 }
  0xe1   :  { %v2970_v46 = vmax.f32 %v14864_v25, %v7763_v17  ;;  %v2769_v14 = vmul.f32 0.5, %v2721_v20  ;;  %v2972_v3 = vmax.f32 %v2952_v62, %v7781_v41  ;;  %v2327_v17 = vrot.slane %v8353_v37, 1  ;;  %v8518_v20 = vld [vmem:[%s14556_s0 + $0x110] sm:$0xff]  ;;  %v8523_v62 = vld [vmem:[%s14556_s0 + $0x118] sm:$0x1] }
  0xe2   :  { %v2971_v38 = vmax.f32 %v14865_v60, %v7768_v13  ;;  %3017 = vst.msk [vmem:[#allocation3 + $0x20] sm:$0xff] %vm15_vm0, %v2969_v42  ;;  %v2399_v54 = vrot.slane %v8400_v56, 1  ;;  %v2768_v29 = vmul.f32 0.5, %v2720_v58  ;;  %v14866_v13 = vrot.slane %v8353_v37, 7 }
  0xe3   :  { %3018 = vst.msk [vmem:[#allocation3 + $0x28] sm:$0xff] %vm15_vm0, %v2970_v46  ;;  %v14867_v33 = vrot.slane %v8344_v16, 7  ;;  %v2261_v2 = vsel %vm334_vm2, %v2249_v22, %v2255_v36  ;;  %v2793_v23 = vadd.f32 %v2769_v14, %v2745_v49  ;;  %v14868_v48 = vrot.slane %v8392_v32, 7  ;;  %v8507_v49 = vld [vmem:[%s14556_s0 + $0x108] sm:$0xff]  ;;  %v8555_v14 = vld [vmem:[%s14556_s0 + $0x138] sm:$0x1] }
  0xe4   :  { %3019 = vst.msk [vmem:[#allocation3 + $0x30] sm:$0xff] %vm15_vm0, %v2971_v38  ;;  %v2189_v27 = vsel %vm334_vm2, %v2177_v31, %v14866_v13  ;;  %v2792_v36 = vadd.f32 %v2768_v29, %v2744_v12  ;;  %v2291_v0 = vmax.f32 %v8400_v56, %v2261_v2  ;;  %v14869_v35 = vrot.slane %v8351_v52, 1  ;;  %v8528_v12 = vld [vmem:[%s14556_s0 + $0x120] sm:$0xff] }
  0xe5   :  { %v2195_v41 = vsel %vm334_vm2, %v14867_v33, %v2177_v31  ;;  %3020 = vst.msk [vmem:[#allocation3 + $0x38] sm:$0x1] %vm216_vm1, %v2972_v3  ;;  %v2219_v55 = vadd.f32 %v2189_v27, %v8353_v37  ;;  %v2267_v10 = vsel %vm334_vm2, %v14868_v48, %v2249_v22  ;;  %v14870_v15 = vrot.slane %v8264_v40, 1  ;;  %v8545_v31 = vld [vmem:[%s14556_s0 + $0x128] sm:$0xff]  ;;  %v8550_v22 = vld [vmem:[%s14556_s0 + $0x130] sm:$0xff] }
  0xe6   :  { %v2218_v5 = vadd.f32 %v2195_v41, %v8351_v52  ;;  %v2290_v26 = vmax.f32 %v8394_v59, %v2267_v10  ;;  %v2333_v39 = vsel %vm479_vm3, %v14869_v35, %v2327_v17  ;;  %v14871_v46 = vrot.slane %v8394_v59, 1 }
  0xe7   :  { %v2351_v42 = vsel %vm479_vm3, %v2327_v17, %v14870_v15  ;;  %v14872_v60 = vrot.slane %v8377_v43, 1  ;;  %v2838_v3 = vpack.c.bf16 %v2793_v23, %v2792_v36  ;;  %v2537_v27 = vrot.slane %v8394_v59, 6  ;;  %v6045_v59 = vld [vmem:[%s14556_s0 + $0x288] sm:$0xff] }
  0xe8   :  { %v2362_v25 = vadd.f32 %v2333_v39, %v2218_v5  ;;  %v2405_v58 = vsel %vm479_vm3, %v14871_v46, %v2399_v54  ;;  %v2363_v17 = vadd.f32 %v2351_v42, %v2219_v55  ;;  %v2615_v33 = vrot.slane %v8353_v37, 2 }
  0xe9   :  { %v2423_v38 = vsel %vm479_vm3, %v2399_v54, %v14872_v60  ;;  %v2434_v29 = vmax.f32 %v2290_v26, %v2405_v58  ;;  %v2465_v54 = vrot.slane %v8351_v52, 6  ;;  %v2687_v41 = vrot.slane %v8400_v56, 2  ;;  %6320 = vmatprep.mubr.msk.bf16.mxu1 %vm15_vm0, %v2838_v3 }
  0xea   :  { %v2435_v13 = vmax.f32 %v2291_v0, %v2423_v38  ;;  %v137_v2 = vadd.f32 %v8528_v12, %v8502_v50  ;;  %v138_v5 = vadd.f32 %v8545_v31, %v8507_v49  ;;  %v139_v23 = vadd.f32 %v8550_v22, %v8518_v20 }
  0xeb   :  { %v140_v55 = vadd.f32 %v8555_v14, %v8523_v62  ;;  %v14873_v48 = vrot.slane %v8353_v37, 6  ;;  %v14874_v36 = vrot.slane %v8344_v16, 6  ;;  %v14875_v0 = vrot.slane %v8400_v56, 6 }
  0xec   :  { %v14876_v39 = vrot.slane %v8392_v32, 6  ;;  %v14877_v60 = vrot.slane %v8351_v52, 2  ;;  %v14878_v38 = vrot.slane %v8264_v40, 2  ;;  %v2693_v32 = vsel %vm769_vm5, %v2681_v63, %v2687_v41  ;;  %v6044_v40 = vld [vmem:[%s14556_s0 + $0x280] sm:$0xff] }
  0xed   :  { %v2477_v10 = vsel %vm624_vm4, %v2465_v54, %v14873_v48  ;;  %v2483_v26 = vsel %vm624_vm4, %v14874_v36, %v2465_v54  ;;  %v2549_v35 = vsel %vm624_vm4, %v2537_v27, %v14875_v0  ;;  %v162_v63 = vadd.f32 %v138_v5, %v7874_v21  ;;  %v6046_v54 = vld [vmem:[%s14556_s0 + $0x290] sm:$0xff] }
  0xee   :  { %v2555_v15 = vsel %vm624_vm4, %v14876_v39, %v2537_v27  ;;  %v2506_v42 = vadd.f32 %v2483_v26, %v2362_v25  ;;  %v2507_v37 = vadd.f32 %v2477_v10, %v2363_v17  ;;  %v2579_v58 = vmax.f32 %v2435_v13, %v2549_v35  ;;  %v8618_v27 = vld [vmem:[%s14556_s0 + $0x2a0] sm:$0xff] }
  0xef   :  { %v2578_v46 = vmax.f32 %v2434_v29, %v2555_v15  ;;  %v2621_v16 = vsel %vm769_vm5, %v14877_v60, %v2615_v33  ;;  %v2639_v56 = vsel %vm769_vm5, %v2615_v33, %v14878_v38  ;;  %v2711_v25 = vsel %vm769_vm5, %v2687_v41, %v2669_v44  ;;  %v8623_v33 = vld [vmem:[%s14556_s0 + $0x2a8] sm:$0xff]  ;;  %231 = vst.msk [vmem:[#allocation2 + $0x88] sm:$0xff] %vm15_vm0, %v162_v63 }
  0xf0   :  { %v2650_v3 = vadd.f32 %v2621_v16, %v2506_v42  ;;  %v2651_v52 = vadd.f32 %v2639_v56, %v2507_v37  ;;  %v2723_v29 = vmax.f32 %v2579_v58, %v2711_v25  ;;  %v161_v13 = vadd.f32 %v137_v2, %v7869_v8  ;;  %v8664_v58 = vld [vmem:[%s14556_s0 + $0x388] sm:$0xff]  ;;  %v8679_v16 = vld [vmem:[%s14556_s0 + $0x3a0] sm:$0xff] }
  0xf1   :  { %v2722_v17 = vmax.f32 %v2578_v46, %v2693_v32  ;;  %v163_v43 = vadd.f32 %v139_v23, %v7897_v9  ;;  %v164_v44 = vadd.f32 %v140_v55, %v7902_v47  ;;  %v185_v55 = vmax.f32 %v8502_v50, %v8528_v12  ;;  %v6047_v50 = vld [vmem:[%s14556_s0 + $0x298] sm:$0x1]  ;;  %v8659_v46 = vld [vmem:[%s14556_s0 + $0x380] sm:$0xff]  ;;  %v8684_v38 = vld [vmem:[%s14556_s0 + $0x3a8] sm:$0xff] }
  0xf2   :  { %v2746_v41 = vmul.f32 0.033333335, %v2650_v3  ;;  %v2747_v2 = vmul.f32 0.033333335, %v2651_v52  ;;  %v2771_v23 = vmul.f32 0.5, %v2723_v29  ;;  %v186_v48 = vmax.f32 %v8507_v49, %v8545_v31  ;;  %230 = vst.msk [vmem:[#allocation2 + $0x80] sm:$0xff] %vm15_vm0, %v161_v13 }
  0xf3   :  { %v2770_v5 = vmul.f32 0.5, %v2722_v17  ;;  %v187_v10 = vmax.f32 %v8518_v20, %v8550_v22  ;;  %v188_v36 = vmax.f32 %v8523_v62, %v8555_v14  ;;  %232 = vst.msk [vmem:[#allocation2 + $0x90] sm:$0xff] %vm15_vm0, %v163_v43  ;;  %v8643_v49 = vld [vmem:[%s14556_s0 + $0x2b0] sm:$0xff]  ;;  %v8648_v20 = vld [vmem:[%s14556_s0 + $0x2b8] sm:$0x1]  ;;  %v1071_v0 = vadd.f32 %v8618_v27, %v6044_v40 }
  0xf4   :  { %233 = vst.msk [vmem:[#allocation2 + $0x98] sm:$0x1] %vm216_vm1, %v164_v44  ;;  %v2795_v26 = vadd.f32 %v2771_v23, %v2747_v2  ;;  %v1072_v35 = vadd.f32 %v8623_v33, %v6045_v59  ;;  %v205_v39 = vmax.f32 %v185_v55, %v7869_v8  ;;  %v206_v15 = vmax.f32 %v186_v48, %v7874_v21  ;;  %v8696_v52 = vld [vmem:[%s14556_s0 + $0x398] sm:$0x1]  ;;  %v8701_v17 = vld [vmem:[%s14556_s0 + $0x3b0] sm:$0xff] }
  0xf5   :  { %v2794_v62 = vadd.f32 %v2770_v5, %v2746_v41  ;;  %v207_v42 = vmax.f32 %v187_v10, %v7897_v9  ;;  %v208_v37 = vmax.f32 %v188_v36, %v7902_v47  ;;  %v1073_v8 = vadd.f32 %v8643_v49, %v6046_v54  ;;  %v8674_v47 = vld [vmem:[%s14556_s0 + $0x390] sm:$0xff]  ;;  %v8706_v29 = vld [vmem:[%s14556_s0 + $0x3b8] sm:$0x1] }
  0xf6   :  { %v2819_v60 = vsel %vm72_vm6, %v2795_v26, 0.0  ;;  %v1074_v21 = vadd.f32 %v8648_v20, %v6047_v50  ;;  %v1095_v9 = vadd.f32 %v7943_v51, %v1071_v0  ;;  %254 = vst.msk [vmem:[#allocation3 + $0x80] sm:$0xff] %vm15_vm0, %v205_v39  ;;  %255 = vst.msk [vmem:[#allocation3 + $0x88] sm:$0xff] %vm15_vm0, %v206_v15  ;;  %v1096_v32 = vadd.f32 %v7948_v7, %v1072_v35  ;;  %v8725_v23 = vld [vmem:[#allocation2 + $0x88] sm:$0xff] }
  0xf7   :  { %v2839_v56 = vpack.c.bf16 %v2819_v60, %v2794_v62  ;;  %256 = vst.msk [vmem:[#allocation3 + $0x90] sm:$0xff] %vm15_vm0, %v207_v42  ;;  %v1119_v25 = vmax.f32 %v6044_v40, %v8618_v27  ;;  %v1120_v3 = vmax.f32 %v6045_v59, %v8623_v33  ;;  %v1097_v13 = vadd.f32 %v7967_v53, %v1073_v8 }
  0xf8   :  { %257 = vst.msk [vmem:[#allocation3 + $0x98] sm:$0x1] %vm216_vm1, %v208_v37  ;;  %v1098_v40 = vadd.f32 %v7972_v24, %v1074_v21  ;;  %v1121_v59 = vmax.f32 %v6046_v54, %v8643_v49  ;;  %v1122_v63 = vmax.f32 %v6047_v50, %v8648_v20  ;;  %v8717_v41 = vadd.f32 %v8679_v16, %v8659_v46 }
  0xf9   :  { %6321 = vmatmul.mubr.msk.bf16.gmra.mrb[4].mxu1 %vm15_vm0, %v2839_v56  ;;  %v1139_v43 = vmax.f32 %v1119_v25, %v7943_v51  ;;  %v1140_v44 = vmax.f32 %v1120_v3, %v7948_v7  ;;  %v8721_v2 = vadd.f32 %v8684_v38, %v8664_v58  ;;  %v8723_v5 = vld [vmem:[#allocation2 + $0x80] sm:$0xff]  ;;  %v8733_v7 = vadd.f32 %v8701_v17, %v8674_v47 }
  0xfa   :  { %v8727_v54 = vld [vmem:[#allocation2 + $0x90] sm:$0xff]  ;;  %v1141_v55 = vmax.f32 %v1121_v59, %v7967_v53  ;;  %v1142_v51 = vmax.f32 %v1122_v63, %v7972_v24  ;;  %v8737_v48 = vadd.f32 %v8706_v29, %v8696_v52  ;;  %v314_v36 = vrot.slane %v8723_v5, 7  ;;  %1163 = vst.msk [vmem:[#allocation2 + $0x80] sm:$0xff] %vm15_vm0, %v1095_v9  ;;  %1164 = vst.msk [vmem:[#allocation2 + $0x88] sm:$0xff] %vm15_vm0, %v1096_v32 }
  0xfb   :  { %v8739_v10 = vld [vmem:[#allocation2 + $0x98] sm:$0xff]  ;;  %v14598_v50 = vrot.slane %v8725_v23, 7  ;;  %v14595_v62 = vrot.slane %v8723_v5, 1  ;;  %v465_v53 = vrot.slane %v8725_v23, 1  ;;  %1165 = vst.msk [vmem:[#allocation2 + $0x90] sm:$0xff] %vm15_vm0, %v1097_v13  ;;  %v14596_v26 = vrot.slane %v8727_v54, 1 }
  0xfc   :  { %v14599_v24 = vrot.slane %v8739_v10, 7  ;;  %v604_v0 = vrot.slane %v8723_v5, 6  ;;  %v14594_v35 = vrot.slane %v8725_v23, 6  ;;  %1166 = vst.msk [vmem:[#allocation2 + $0x98] sm:$0x1] %vm216_vm1, %v1098_v40  ;;  %v14597_v42 = vrot.slane %v8739_v10, 6 }
  0xfd   :  { %v351_v39 = vsel %vm334_vm2, %v314_v36, %v14598_v50  ;;  %v496_v15 = vsel %vm479_vm3, %v14595_v62, %v465_v53  ;;  %v8763_v60 = vld [vmem:[#allocation3 + $0x80] sm:$0xff]  ;;  %v8765_v8 = vld [vmem:[#allocation3 + $0x88] sm:$0xff]  ;;  %v490_v32 = vsel %vm479_vm3, %v465_v53, %v14596_v26 }
  0xfe   :  { %v8767_v21 = vld [vmem:[#allocation3 + $0x90] sm:$0xff]  ;;  %v357_v9 = vsel %vm334_vm2, %v14599_v24, %v314_v36  ;;  %v376_v56 = vadd.f32 %v351_v39, %v8725_v23  ;;  %v641_v25 = vsel %vm624_vm4, %v604_v0, %v14594_v35  ;;  %v387_v40 = vrot.slane %v8763_v60, 7  ;;  %1187 = vst.msk [vmem:[#allocation3 + $0x80] sm:$0xff] %vm15_vm0, %v1139_v43  ;;  %1188 = vst.msk [vmem:[#allocation3 + $0x88] sm:$0xff] %vm15_vm0, %v1140_v44 }
  0xff   :  { %v8782_v3 = vld [vmem:[#allocation3 + $0x98] sm:$0xff]  ;;  %v375_v13 = vadd.f32 %v357_v9, %v8723_v5  ;;  %v393_v59 = vrot.slane %v8765_v8, 7  ;;  %v14601_v63 = vrot.slane %v8763_v60, 1  ;;  %1189 = vst.msk [vmem:[#allocation3 + $0x90] sm:$0xff] %vm15_vm0, %v1141_v55  ;;  %v538_v39 = vrot.slane %v8765_v8, 1 }
 0x100   :  { %v405_v36 = vrot.slane %v8782_v3, 7  ;;  %v521_v53 = vadd.f32 %v490_v32, %v376_v56  ;;  %v544_v35 = vrot.slane %v8767_v21, 1  ;;  %1190 = vst.msk [vmem:[#allocation3 + $0x98] sm:$0x1] %vm216_vm1, %v1142_v51  ;;  %v647_v43 = vsel %vm624_vm4, %v14597_v42, %v604_v0 }
 0x101   :  { %v423_v9 = vsel %vm334_vm2, %v387_v40, %v393_v59  ;;  %v520_v62 = vadd.f32 %v496_v15, %v375_v13  ;;  %v677_v44 = vrot.slane %v8763_v60, 6  ;;  %v568_v51 = vsel %vm479_vm3, %v14601_v63, %v538_v39 }
 0x102   :  { %v429_v55 = vsel %vm334_vm2, %v405_v36, %v387_v40  ;;  %v448_v56 = vmax.f32 %v8765_v8, %v423_v9  ;;  %v562_v32 = vsel %vm479_vm3, %v538_v39, %v544_v35  ;;  %v666_v26 = vadd.f32 %v641_v25, %v521_v53 }
 0x103   :  { %v447_v15 = vmax.f32 %v8763_v60, %v429_v55  ;;  %v665_v13 = vadd.f32 %v647_v43, %v520_v62  ;;  %v683_v0 = vrot.slane %v8765_v8, 6  ;;  %v695_v50 = vrot.slane %v8782_v3, 6 }
 0x104   :  { %v593_v42 = vmax.f32 %v448_v56, %v562_v32  ;;  %v755_v40 = vrot.slane %v8725_v23, 2  ;;  %v761_v9 = vrot.slane %v8727_v54, 2  ;;  %v822_v45 = vrot.slane %v8763_v60, 2 }
 0x105   :  { %v592_v24 = vmax.f32 %v447_v15, %v568_v51  ;;  %v713_v37 = vsel %vm624_vm4, %v677_v44, %v683_v0  ;;  %v828_v39 = vrot.slane %v8765_v8, 2  ;;  %v719_v62 = vsel %vm624_vm4, %v695_v50, %v677_v44 }
 0x106   :  { %v738_v25 = vmax.f32 %v593_v42, %v713_v37  ;;  %v780_v53 = vsel %vm769_vm5, %v755_v40, %v761_v9  ;;  %v14879_v43 = vrot.slane %v8723_v5, 2  ;;  %v834_v15 = vrot.slane %v8767_v21, 2 }
 0x107   :  { %v737_v56 = vmax.f32 %v592_v24, %v719_v62  ;;  %v811_v51 = vadd.f32 %v780_v53, %v666_v26  ;;  %v858_v8 = vsel %vm769_vm5, %v822_v45, %v828_v39  ;;  %v326_v63 = vrot.slane %v8727_v54, 7 }
 0x108   :  { %v786_v55 = vsel %vm769_vm5, %v14879_v43, %v755_v40  ;;  %v399_v42 = vrot.slane %v8767_v21, 7  ;;  %v477_v37 = vrot.slane %v8739_v10, 1  ;;  %v852_v44 = vsel %vm769_vm5, %v828_v39, %v834_v15 }
 0x109   :  { %v810_v32 = vadd.f32 %v786_v55, %v665_v13  ;;  %v882_v4 = vmax.f32 %v737_v56, %v858_v8  ;;  %v907_v40 = vmul.f32 0.033333335, %v811_v51  ;;  %v883_v24 = vmax.f32 %v738_v25, %v852_v44 }
 0x10a   :  { %v14880_v26 = vrot.slane %v8739_v10, 7  ;;  %v14881_v62 = vrot.slane %v8725_v23, 7  ;;  %v411_v43 = vsel %vm334_vm2, %v399_v42, %v405_v36  ;;  %v417_v25 = vsel %vm334_vm2, %v393_v59, %v399_v42 }
 0x10b   :  { %v906_v18 = vmul.f32 0.033333335, %v810_v32  ;;  %v930_v55 = vmul.f32 0.5, %v882_v4  ;;  %v931_v32 = vmul.f32 0.5, %v883_v24  ;;  %v449_v51 = vmax.f32 %v8767_v21, %v417_v25 }
 0x10c   :  { %v339_v13 = vsel %vm334_vm2, %v326_v63, %v14880_v26  ;;  %v345_v53 = vsel %vm334_vm2, %v14881_v62, %v326_v63  ;;  %v450_v8 = vmax.f32 %v8782_v3, %v411_v43  ;;  %v14882_v44 = vrot.slane %v8727_v54, 1 }
 0x10d   :  { %v377_v39 = vadd.f32 %v345_v53, %v8727_v54  ;;  %v378_v56 = vadd.f32 %v339_v13, %v8739_v10  ;;  %v954_v26 = vadd.f32 %v930_v55, %v906_v18  ;;  %v14883_v4 = vrot.slane %v8723_v5, 1 }
 0x10e   :  { %v484_v63 = vsel %vm479_vm3, %v14882_v44, %v477_v37  ;;  %v550_v62 = vrot.slane %v8782_v3, 1  ;;  %v955_v59 = vadd.f32 %v931_v32, %v907_v40  ;;  %v616_v24 = vrot.slane %v8727_v54, 6 }
 0x10f   :  { %v502_v36 = vsel %vm479_vm3, %v477_v37, %v14883_v4  ;;  %v522_v13 = vadd.f32 %v484_v63, %v377_v39  ;;  %v689_v53 = vrot.slane %v8767_v21, 6  ;;  %v14884_v25 = vrot.slane %v8763_v60, 1 }
 0x110   :  { %v523_v42 = vadd.f32 %v502_v36, %v378_v56  ;;  %v556_v43 = vsel %vm479_vm3, %v544_v35, %v550_v62  ;;  %v767_v55 = vrot.slane %v8739_v10, 2  ;;  %v840_v37 = vrot.slane %v8782_v3, 2  ;;  %v8896_v36 = vld [vmem:[#allocation2 + $0x48] sm:$0xff] }
 0x111   :  { %v574_v18 = vsel %vm479_vm3, %v550_v62, %v14884_v25  ;;  %v1002_v39 = vpack.c.bf16 %v955_v59, %v954_v26  ;;  %v594_v44 = vmax.f32 %v449_v51, %v556_v43  ;;  %v14885_v56 = vrot.slane %v8739_v10, 6  ;;  %v8886_v26 = vld [vmem:[#allocation2 + $0x40] sm:$0xff]  ;;  %v8900_v62 = vld [vmem:[#allocation2 + $0x58] sm:$0xff]  ;;  %v8916_v43 = vld [vmem:[%s14556_s0 + $0x508] sm:$0xff] }
 0x112   :  { %v595_v40 = vmax.f32 %v450_v8, %v574_v18  ;;  %v14886_v21 = vrot.slane %v8725_v23, 6  ;;  %v701_v32 = vsel %vm624_vm4, %v689_v53, %v695_v50  ;;  %v707_v3 = vsel %vm624_vm4, %v683_v0, %v689_v53  ;;  %v6575_v25 = vld [vmem:[%s14556_s0 + $0x368] sm:$0xff] }
 0x113   :  { %v629_v54 = vsel %vm624_vm4, %v616_v24, %v14885_v56  ;;  %6284 = vmatprep.mubr.msk.bf16.mxu0 %vm15_vm0, %v1002_v39  ;;  %v739_v8 = vmax.f32 %v594_v44, %v707_v3  ;;  %v774_v63 = vsel %vm769_vm5, %v761_v9, %v767_v55  ;;  %v14887_v23 = vrot.slane %v8723_v5, 2  ;;  %v6574_v9 = vld [vmem:[%s14556_s0 + $0x360] sm:$0xff]  ;;  %v6577_v39 = vld [vmem:[%s14556_s0 + $0x378] sm:$0x1]  ;;  %v8951_v56 = vld [vmem:[%s14556_s0 + $0x530] sm:$0xff] }
 0x114   :  { %v635_v35 = vsel %vm624_vm4, %v14886_v21, %v616_v24  ;;  %v668_v60 = vadd.f32 %v629_v54, %v523_v42  ;;  %v740_v10 = vmax.f32 %v595_v40, %v701_v32  ;;  %v846_v50 = vsel %vm769_vm5, %v834_v15, %v840_v37  ;;  %v8906_v15 = vld [vmem:[#allocation3 + $0x40] sm:$0xff]  ;;  %v6127_v3 = vld [vmem:[%s14556_s0 + $0x518] sm:$0x1] }
 0x115   :  { %v667_v51 = vadd.f32 %v635_v35, %v522_v13  ;;  %v792_v4 = vsel %vm769_vm5, %v767_v55, %v14887_v23  ;;  %v864_v0 = vsel %vm769_vm5, %v840_v37, %v822_v45  ;;  %v8898_v13 = vld [vmem:[#allocation2 + $0x50] sm:$0xff]  ;;  %v2008_v5 = vadd.f32 %v6574_v9, %v8717_v41  ;;  %v8911_v45 = vld [vmem:[%s14556_s0 + $0x500] sm:$0xff] }
 0x116   :  { %14888 = vst [vmem:[#allocation17_spill] sm:$0xff] %v8898_v13  ;;  %v813_v42 = vadd.f32 %v792_v4, %v668_v60  ;;  %v884_v24 = vmax.f32 %v739_v8, %v846_v50  ;;  %v885_v53 = vmax.f32 %v740_v10, %v864_v0  ;;  %v8921_v41 = vld [vmem:[%s14556_s0 + $0x510] sm:$0xff]  ;;  %v2009_v18 = vadd.f32 %v6575_v25, %v8721_v2  ;;  %v8941_v2 = vld [vmem:[%s14556_s0 + $0x520] sm:$0xff] }
 0x117   :  { %v812_v59 = vadd.f32 %v774_v63, %v667_v51  ;;  %v6576_v55 = vld [vmem:[%s14556_s0 + $0x370] sm:$0xff]  ;;  %v2011_v44 = vadd.f32 %v6577_v39, %v8737_v48  ;;  %v2032_v40 = vmax.f32 %v8659_v46, %v8679_v16  ;;  %2076 = vst.msk [vmem:[#allocation2 + $0x40] sm:$0xff] %vm15_vm0, %v2008_v5  ;;  %v2033_v21 = vmax.f32 %v8664_v58, %v8684_v38  ;;  %v8968_v58 = vld [vmem:[%s14556_s0 + $0x538] sm:$0x1]  ;;  %v8970_v51 = vld [vmem:[#allocation3 + $0x48] sm:$0xff] }
 0x118   :  { %v2010_v37 = vadd.f32 %v6576_v55, %v8733_v7  ;;  %v8946_v7 = vld [vmem:[%s14556_s0 + $0x528] sm:$0xff]  ;;  %v909_v54 = vmul.f32 0.033333335, %v813_v42  ;;  %v932_v46 = vmul.f32 0.5, %v884_v24  ;;  %v933_v16 = vmul.f32 0.5, %v885_v53  ;;  %2077 = vst.msk [vmem:[#allocation2 + $0x48] sm:$0xff] %vm15_vm0, %v2009_v18 }
 0x119   :  { %v908_v48 = vmul.f32 0.033333335, %v812_v59  ;;  %v2034_v35 = vmax.f32 %v8674_v47, %v8701_v17  ;;  %v2035_v60 = vmax.f32 %v8696_v52, %v8706_v29  ;;  %v2052_v32 = vmax.f32 %v2032_v40, %v6574_v9  ;;  %2079 = vst.msk [vmem:[#allocation2 + $0x58] sm:$0x1] %vm216_vm1, %v2011_v44  ;;  %v8972_v52 = vld [vmem:[#allocation3 + $0x50] sm:$0xff]  ;;  %v8974_v29 = vld [vmem:[#allocation3 + $0x58] sm:$0xff] }
 0x11a   :  { %2078 = vst.msk [vmem:[#allocation2 + $0x50] sm:$0xff] %vm15_vm0, %v2010_v37  ;;  %v957_v38 = vadd.f32 %v933_v16, %v909_v54  ;;  %14889 = vst [vmem:[#allocation18_spill] sm:$0xff] %v8972_v52  ;;  %v2905_v8 = vadd.f32 %v8941_v2, %v8911_v45  ;;  %v2906_v10 = vadd.f32 %v8946_v7, %v8916_v43  ;;  %v8986_v0 = vld [vmem:[%s14556_s0 + $0x140] sm:$0xff] }
 0x11b   :  { %v956_v47 = vadd.f32 %v932_v46, %v908_v48  ;;  %v2053_v63 = vmax.f32 %v2033_v21, %v6575_v25  ;;  %v2054_v23 = vmax.f32 %v2034_v35, %v6576_v55  ;;  %v2055_v4 = vmax.f32 %v2035_v60, %v6577_v39  ;;  %2100 = vst.msk [vmem:[#allocation3 + $0x40] sm:$0xff] %vm15_vm0, %v2052_v32  ;;  %v8991_v9 = vld [vmem:[%s14556_s0 + $0x160] sm:$0xff] }
 0x11c   :  { %v2907_v50 = vadd.f32 %v8951_v56, %v8921_v41  ;;  %v989_v5 = vsel %vm72_vm6, %v957_v38, 0.0  ;;  %v2908_v59 = vadd.f32 %v8968_v58, %v6127_v3  ;;  %v2929_v42 = vadd.f32 %v8292_v11, %v2905_v8 }
 0x11d   :  { %v2930_v24 = vadd.f32 %v8303_v1, %v2906_v10  ;;  %v1003_v53 = vpack.c.bf16 %v989_v5, %v956_v47  ;;  %2101 = vst.msk [vmem:[#allocation3 + $0x48] sm:$0xff] %vm15_vm0, %v2053_v63  ;;  %2102 = vst.msk [vmem:[#allocation3 + $0x50] sm:$0xff] %vm15_vm0, %v2054_v23  ;;  %v2953_v18 = vmax.f32 %v8911_v45, %v8941_v2 }
 0x11e   :  { %2103 = vst.msk [vmem:[#allocation3 + $0x58] sm:$0x1] %vm216_vm1, %v2055_v4  ;;  %v2931_v25 = vadd.f32 %v8308_v30, %v2907_v50  ;;  %v2954_v55 = vmax.f32 %v8916_v43, %v8946_v7  ;;  %v9006_v37 = vld [vmem:[#allocation2 + $0x40] sm:$0xff]  ;;  %v2932_v39 = vadd.f32 %v8313_v28, %v2908_v59  ;;  %v2955_v44 = vmax.f32 %v8921_v41, %v8951_v56 }
 0x11f   :  { %v2956_v40 = vmax.f32 %v6127_v3, %v8968_v58  ;;  %v9014_v48 = vadd.f32 %v8991_v9, %v8986_v0  ;;  %6285 = vmatmul.mubr.msk.bf16.gmra.mrb[16].mxu0 %vm15_vm0, %v1003_v53  ;;  %v2166_v45 = vrot.slane %v9006_v37, 7  ;;  %v14604_v54 = vrot.slane %v9006_v37, 1  ;;  %2997 = vst.msk [vmem:[#allocation2 + $0x40] sm:$0xff] %vm15_vm0, %v2929_v42  ;;  %v9022_v16 = vld [vmem:[#allocation2 + $0x48] sm:$0xff] }
 0x120   :  { %v2454_v43 = vrot.slane %v9006_v37, 6  ;;  %v14610_v46 = vrot.slane %v9006_v37, 2  ;;  %v9026_v21 = vld [vmem:[#allocation2 + $0x58] sm:$0xff]  ;;  %v2973_v35 = vmax.f32 %v2953_v18, %v8292_v11  ;;  %v2974_v60 = vmax.f32 %v2954_v55, %v8303_v1  ;;  %2998 = vst.msk [vmem:[#allocation2 + $0x48] sm:$0xff] %vm15_vm0, %v2930_v24 }
 0x121   :  { %v9024_v41 = vld [vmem:[#allocation2 + $0x50] sm:$0xff]  ;;  %v2975_v32 = vmax.f32 %v2955_v44, %v8308_v30  ;;  %v2976_v3 = vmax.f32 %v2956_v40, %v8313_v28  ;;  %v14608_v47 = vrot.slane %v9022_v16, 7  ;;  %v14609_v38 = vrot.slane %v9026_v21, 7  ;;  %3000 = vst.msk [vmem:[#allocation2 + $0x58] sm:$0x1] %vm216_vm1, %v2932_v39 }
 0x122   :  { %v2316_v8 = vrot.slane %v9022_v16, 1  ;;  %v14607_v10 = vrot.slane %v9024_v41, 1  ;;  %2999 = vst.msk [vmem:[#allocation2 + $0x50] sm:$0xff] %vm15_vm0, %v2931_v25  ;;  %v9039_v11 = vld [vmem:[#allocation3 + $0x40] sm:$0xff]  ;;  %v14605_v1 = vrot.slane %v9022_v16, 6  ;;  %v14606_v30 = vrot.slane %v9026_v21, 6 }
 0x123   :  { %v2604_v28 = vrot.slane %v9022_v16, 2  ;;  %v14611_v63 = vrot.slane %v9024_v41, 2  ;;  %v2202_v23 = vsel %vm334_vm2, %v2166_v45, %v14608_v47  ;;  %v2208_v4 = vsel %vm334_vm2, %v14609_v38, %v2166_v45  ;;  %3021 = vst.msk [vmem:[#allocation3 + $0x40] sm:$0xff] %vm15_vm0, %v2973_v35 }
 0x124   :  { %v2238_v50 = vrot.slane %v9039_v11, 7  ;;  %v2340_v5 = vsel %vm479_vm3, %v2316_v8, %v14607_v10  ;;  %v9059_v59 = vld [vmem:[#allocation3 + $0x48] sm:$0xff]  ;;  %v9061_v42 = vld [vmem:[#allocation3 + $0x50] sm:$0xff]  ;;  %v2220_v53 = vadd.f32 %v2208_v4, %v9006_v37  ;;  %v2221_v25 = vadd.f32 %v2202_v23, %v9022_v16 }
 0x125   :  { %v9063_v24 = vld [vmem:[#allocation3 + $0x58] sm:$0xff]  ;;  %v2346_v18 = vsel %vm479_vm3, %v14604_v54, %v2316_v8  ;;  %v2382_v55 = vrot.slane %v9039_v11, 1  ;;  %v2244_v39 = vrot.slane %v9059_v59, 7  ;;  %v2388_v40 = vrot.slane %v9059_v59, 1  ;;  %3022 = vst.msk [vmem:[#allocation3 + $0x48] sm:$0xff] %vm15_vm0, %v2974_v60  ;;  %3023 = vst.msk [vmem:[#allocation3 + $0x50] sm:$0xff] %vm15_vm0, %v2975_v32 }
 0x126   :  { %v2256_v44 = vrot.slane %v9063_v24, 7  ;;  %v2394_v45 = vrot.slane %v9061_v42, 1  ;;  %3024 = vst.msk [vmem:[#allocation3 + $0x58] sm:$0x1] %vm216_vm1, %v2976_v3  ;;  %v2364_v35 = vadd.f32 %v2346_v18, %v2220_v53  ;;  %v2365_v23 = vadd.f32 %v2340_v5, %v2221_v25 }
 0x127   :  { %v2490_v8 = vsel %vm624_vm4, %v2454_v43, %v14605_v1  ;;  %v2496_v4 = vsel %vm624_vm4, %v14606_v30, %v2454_v43  ;;  %v2274_v54 = vsel %vm334_vm2, %v2238_v50, %v2244_v39  ;;  %v2418_v3 = vsel %vm479_vm3, %v2382_v55, %v2388_v40 }
 0x128   :  { %v2280_v60 = vsel %vm334_vm2, %v2256_v44, %v2238_v50  ;;  %v2412_v32 = vsel %vm479_vm3, %v2388_v40, %v2394_v45  ;;  %v2293_v53 = vmax.f32 %v9059_v59, %v2274_v54  ;;  %v2508_v25 = vadd.f32 %v2496_v4, %v2364_v35 }
 0x129   :  { %v2292_v5 = vmax.f32 %v9039_v11, %v2280_v60  ;;  %v2509_v18 = vadd.f32 %v2490_v8, %v2365_v23  ;;  %v2526_v43 = vrot.slane %v9039_v11, 6  ;;  %v2532_v1 = vrot.slane %v9059_v59, 6 }
 0x12a   :  { %v2544_v30 = vrot.slane %v9063_v24, 6  ;;  %v2628_v50 = vsel %vm769_vm5, %v2604_v28, %v14611_v63  ;;  %v2437_v47 = vmax.f32 %v2293_v53, %v2412_v32  ;;  %v2634_v54 = vsel %vm769_vm5, %v14610_v46, %v2604_v28 }
 0x12b   :  { %v2436_v10 = vmax.f32 %v2292_v5, %v2418_v3  ;;  %v2653_v40 = vadd.f32 %v2628_v50, %v2509_v18  ;;  %v2562_v35 = vsel %vm624_vm4, %v2526_v43, %v2532_v1  ;;  %v2652_v8 = vadd.f32 %v2634_v54, %v2508_v25 }
 0x12c   :  { %v2568_v23 = vsel %vm624_vm4, %v2544_v30, %v2526_v43  ;;  %v2670_v4 = vrot.slane %v9039_v11, 2  ;;  %v2581_v38 = vmax.f32 %v2437_v47, %v2562_v35  ;;  %v2676_v3 = vrot.slane %v9059_v59, 2 }
 0x12d   :  { %v2580_v60 = vmax.f32 %v2436_v10, %v2568_v23  ;;  %v2682_v32 = vrot.slane %v9061_v42, 2  ;;  %v2748_v5 = vmul.f32 0.033333335, %v2652_v8  ;;  %v2749_v53 = vmul.f32 0.033333335, %v2653_v40 }
 0x12e   :  { %v2178_v28 = vrot.slane %v9024_v41, 7  ;;  %v2250_v18 = vrot.slane %v9061_v42, 7  ;;  %v2706_v25 = vsel %vm769_vm5, %v2670_v4, %v2676_v3  ;;  %v2328_v11 = vrot.slane %v9026_v21, 1 }
 0x12f   :  { %v2700_v50 = vsel %vm769_vm5, %v2676_v3, %v2682_v32  ;;  %v2400_v47 = vrot.slane %v9063_v24, 1  ;;  %v2724_v10 = vmax.f32 %v2580_v60, %v2706_v25  ;;  %v14890_v43 = vrot.slane %v9026_v21, 7 }
 0x130   :  { %v2725_v59 = vmax.f32 %v2581_v38, %v2700_v50  ;;  %v14891_v40 = vrot.slane %v9022_v16, 7  ;;  %v2262_v3 = vsel %vm334_vm2, %v2250_v18, %v2256_v44  ;;  %v2268_v38 = vsel %vm334_vm2, %v2244_v39, %v2250_v18  ;;  %v9154_v18 = vld [vmem:[%s14556_s0 + $0x148] sm:$0xff] }
 0x131   :  { %v2190_v54 = vsel %vm334_vm2, %v2178_v28, %v14890_v43  ;;  %v2772_v60 = vmul.f32 0.5, %v2724_v10  ;;  %v2294_v25 = vmax.f32 %v9061_v42, %v2268_v38  ;;  %v2295_v43 = vmax.f32 %v9063_v24, %v2262_v3 }
 0x132   :  { %v2196_v35 = vsel %vm334_vm2, %v14891_v40, %v2178_v28  ;;  %v2223_v8 = vadd.f32 %v2190_v54, %v9026_v21  ;;  %v2773_v50 = vmul.f32 0.5, %v2725_v59  ;;  %v14892_v46 = vrot.slane %v9024_v41, 1 }
 0x133   :  { %v2222_v23 = vadd.f32 %v2196_v35, %v9024_v41  ;;  %v14893_v40 = vrot.slane %v9006_v37, 1  ;;  %v2406_v44 = vsel %vm479_vm3, %v2394_v45, %v2400_v47  ;;  %v2424_v39 = vsel %vm479_vm3, %v2400_v47, %v2382_v55 }
 0x134   :  { %v2334_v28 = vsel %vm479_vm3, %v14892_v46, %v2328_v11  ;;  %v118_v46 = vld [vmem:[%s14556_s0 + $0x168] sm:$0xff]  ;;  %v2796_v10 = vadd.f32 %v2772_v60, %v2748_v5  ;;  %v2797_v59 = vadd.f32 %v2773_v50, %v2749_v53  ;;  %v2439_v38 = vmax.f32 %v2295_v43, %v2424_v39 }
 0x135   :  { %v2352_v54 = vsel %vm479_vm3, %v2328_v11, %v14893_v40  ;;  %v2366_v35 = vadd.f32 %v2334_v28, %v2222_v23  ;;  %v2438_v11 = vmax.f32 %v2294_v25, %v2406_v44  ;;  %v2466_v45 = vrot.slane %v9024_v41, 6 }
 0x136   :  { %v2367_v3 = vadd.f32 %v2352_v54, %v2223_v8  ;;  %v2538_v40 = vrot.slane %v9061_v42, 6  ;;  %v2840_v55 = vpack.c.bf16 %v2797_v59, %v2796_v10  ;;  %v2616_v47 = vrot.slane %v9026_v21, 2 }
 0x137   :  { %v2688_v63 = vrot.slane %v9063_v24, 2  ;;  %v142_v52 = vadd.f32 %v118_v46, %v9154_v18  ;;  %v14894_v13 = vrot.slane %v9026_v21, 6  ;;  %v14895_v53 = vrot.slane %v9022_v16, 6  ;;  %v115_v24 = vld [vmem:[%s14556_s0 + $0x150] sm:$0xff]  ;;  %v116_v16 = vld [vmem:[%s14556_s0 + $0x158] sm:$0x1] }
 0x138   :  { %v2550_v42 = vsel %vm624_vm4, %v2538_v40, %v2544_v30  ;;  %v2556_v8 = vsel %vm624_vm4, %v2532_v1, %v2538_v40  ;;  %6324 = vmatprep.mubr.msk.bf16.mxu1 %vm15_vm0, %v2840_v55  ;;  %v119_v30 = vld [vmem:[%s14556_s0 + $0x170] sm:$0xff]  ;;  %v120_v1 = vld [vmem:[%s14556_s0 + $0x178] sm:$0x1]  ;;  %v14896_v25 = vrot.slane %v9024_v41, 2  ;;  %v14897_v28 = vrot.slane %v9006_v37, 2  ;;  %v6052_v41 = vld [vmem:[%s14556_s0 + $0x2c0] sm:$0xff] }
 0x139   :  { %v2478_v5 = vsel %vm624_vm4, %v2466_v45, %v14894_v13  ;;  %v2484_v23 = vsel %vm624_vm4, %v14895_v53, %v2466_v45  ;;  %v2582_v13 = vmax.f32 %v2438_v11, %v2556_v8  ;;  %v2583_v50 = vmax.f32 %v2439_v38, %v2550_v42  ;;  %v6054_v42 = vld [vmem:[%s14556_s0 + $0x2d0] sm:$0xff] }
 0x13a   :  { %v2510_v21 = vadd.f32 %v2484_v23, %v2366_v35  ;;  %v2511_v60 = vadd.f32 %v2478_v5, %v2367_v3  ;;  %v2622_v43 = vsel %vm769_vm5, %v14896_v25, %v2616_v47  ;;  %v2640_v54 = vsel %vm769_vm5, %v2616_v47, %v14897_v28  ;;  %v6058_v8 = vld [vmem:[%s14556_s0 + $0x2f0] sm:$0xff]  ;;  %v9260_v28 = vld [vmem:[%s14556_s0 + $0x3e0] sm:$0xff] }
 0x13b   :  { %v2694_v44 = vsel %vm769_vm5, %v2682_v32, %v2688_v63  ;;  %v2712_v39 = vsel %vm769_vm5, %v2688_v63, %v2670_v4  ;;  %v143_v11 = vadd.f32 %v119_v30, %v115_v24  ;;  %v144_v38 = vadd.f32 %v120_v1, %v116_v16  ;;  %v6053_v32 = vld [vmem:[%s14556_s0 + $0x2c8] sm:$0xff]  ;;  %v6056_v63 = vld [vmem:[%s14556_s0 + $0x2e0] sm:$0xff] }
 0x13c   :  { %v2654_v10 = vadd.f32 %v2622_v43, %v2510_v21  ;;  %v2655_v59 = vadd.f32 %v2640_v54, %v2511_v60  ;;  %v2726_v35 = vmax.f32 %v2582_v13, %v2694_v44  ;;  %v2727_v3 = vmax.f32 %v2583_v50, %v2712_v39  ;;  %v6057_v4 = vld [vmem:[%s14556_s0 + $0x2e8] sm:$0xff] }
 0x13d   :  { %v165_v37 = vadd.f32 %v9014_v48, %v8528_v12  ;;  %v166_v45 = vadd.f32 %v142_v52, %v8545_v31  ;;  %v167_v48 = vadd.f32 %v143_v11, %v8550_v22  ;;  %v168_v52 = vadd.f32 %v144_v38, %v8555_v14  ;;  %v9265_v54 = vld [vmem:[%s14556_s0 + $0x3e8] sm:$0xff] }
 0x13e   :  { %v2750_v40 = vmul.f32 0.033333335, %v2654_v10  ;;  %v2751_v55 = vmul.f32 0.033333335, %v2655_v59  ;;  %v2774_v47 = vmul.f32 0.5, %v2726_v35  ;;  %v2775_v5 = vmul.f32 0.5, %v2727_v3 }
 0x13f   :  { %v189_v53 = vmax.f32 %v8986_v0, %v8991_v9  ;;  %v190_v23 = vmax.f32 %v9154_v18, %v118_v46  ;;  %234 = vst.msk [vmem:[#allocation2 + $0xa0] sm:$0xff] %vm15_vm0, %v165_v37  ;;  %235 = vst.msk [vmem:[#allocation2 + $0xa8] sm:$0xff] %vm15_vm0, %v166_v45  ;;  %v191_v13 = vmax.f32 %v115_v24, %v119_v30  ;;  %v9232_v0 = vld [vmem:[%s14556_s0 + $0x2d8] sm:$0x1]  ;;  %v9246_v30 = vld [vmem:[%s14556_s0 + $0x3c0] sm:$0xff] }
 0x140   :  { %v2798_v21 = vadd.f32 %v2774_v47, %v2750_v40  ;;  %v2799_v60 = vadd.f32 %v2775_v5, %v2751_v55  ;;  %v192_v50 = vmax.f32 %v116_v16, %v120_v1  ;;  %v9237_v9 = vld [vmem:[%s14556_s0 + $0x2f8] sm:$0x1]  ;;  %236 = vst.msk [vmem:[#allocation2 + $0xb0] sm:$0xff] %vm15_vm0, %v167_v48  ;;  %v1075_v24 = vadd.f32 %v6056_v63, %v6052_v41  ;;  %v9276_v10 = vld [vmem:[%s14556_s0 + $0x3d0] sm:$0xff] }
 0x141   :  { %v209_v18 = vmax.f32 %v189_v53, %v8528_v12  ;;  %v210_v46 = vmax.f32 %v190_v23, %v8545_v31  ;;  %237 = vst.msk [vmem:[#allocation2 + $0xb8] sm:$0x1] %vm216_vm1, %v168_v52  ;;  %v1076_v16 = vadd.f32 %v6057_v4, %v6053_v32  ;;  %v211_v25 = vmax.f32 %v191_v13, %v8550_v22  ;;  %v9255_v31 = vld [vmem:[%s14556_s0 + $0x3c8] sm:$0xff]  ;;  %v9281_v59 = vld [vmem:[%s14556_s0 + $0x3f0] sm:$0xff] }
 0x142   :  { %v2823_v1 = vsel %vm72_vm6, %v2799_v60, 0.0  ;;  %v212_v12 = vmax.f32 %v192_v50, %v8555_v14  ;;  %v1077_v43 = vadd.f32 %v6058_v8, %v6054_v42  ;;  %v1078_v22 = vadd.f32 %v9237_v9, %v9232_v0 }
 0x143   :  { %v2841_v44 = vpack.c.bf16 %v2823_v1, %v2798_v21  ;;  %258 = vst.msk [vmem:[#allocation3 + $0xa0] sm:$0xff] %vm15_vm0, %v209_v18  ;;  %259 = vst.msk [vmem:[#allocation3 + $0xa8] sm:$0xff] %vm15_vm0, %v210_v46  ;;  %v1099_v14 = vadd.f32 %v8618_v27, %v1075_v24  ;;  %v1100_v39 = vadd.f32 %v8623_v33, %v1076_v16 }
 0x144   :  { %260 = vst.msk [vmem:[#allocation3 + $0xb0] sm:$0xff] %vm15_vm0, %v211_v25  ;;  %v1101_v35 = vadd.f32 %v8643_v49, %v1077_v43  ;;  %v1123_v3 = vmax.f32 %v6052_v41, %v6056_v63  ;;  %v1124_v11 = vmax.f32 %v6053_v32, %v6057_v4  ;;  %v1125_v38 = vmax.f32 %v6054_v42, %v6058_v8 }
 0x145   :  { %261 = vst.msk [vmem:[#allocation3 + $0xb8] sm:$0x1] %vm216_vm1, %v212_v12  ;;  %6325 = vmatmul.mubr.msk.bf16.gmra.mrb[8].mxu1 %vm15_vm0, %v2841_v44  ;;  %v1102_v37 = vadd.f32 %v8648_v20, %v1078_v22  ;;  %v1126_v45 = vmax.f32 %v9232_v0, %v9237_v9  ;;  %v9292_v40 = vadd.f32 %v9260_v28, %v9246_v30 }
 0x146   :  { %v9296_v55 = vadd.f32 %v9265_v54, %v9255_v31  ;;  %v9298_v47 = vld [vmem:[#allocation2 + $0xa0] sm:$0xff]  ;;  %v9300_v41 = vld [vmem:[#allocation2 + $0xa8] sm:$0xff]  ;;  %v1143_v32 = vmax.f32 %v1123_v3, %v8618_v27  ;;  %v1144_v63 = vmax.f32 %v1124_v11, %v8623_v33  ;;  %v1145_v4 = vmax.f32 %v1125_v38, %v8643_v49 }
 0x147   :  { %v9307_v5 = vadd.f32 %v9281_v59, %v9276_v10  ;;  %v315_v48 = vrot.slane %v9298_v47, 7  ;;  %v14617_v52 = vrot.slane %v9300_v41, 7  ;;  %v14615_v53 = vrot.slane %v9298_v47, 1  ;;  %1167 = vst.msk [vmem:[#allocation2 + $0xa0] sm:$0xff] %vm15_vm0, %v1099_v14  ;;  %1168 = vst.msk [vmem:[#allocation2 + $0xa8] sm:$0xff] %vm15_vm0, %v1100_v39  ;;  %v9315_v27 = vld [vmem:[#allocation2 + $0xb0] sm:$0xff] }
 0x148   :  { %v466_v23 = vrot.slane %v9300_v41, 1  ;;  %v9317_v33 = vld [vmem:[#allocation2 + $0xb8] sm:$0xff]  ;;  %v605_v49 = vrot.slane %v9298_v47, 6  ;;  %v14614_v42 = vrot.slane %v9300_v41, 6  ;;  %v14620_v8 = vrot.slane %v9298_v47, 2  ;;  %1169 = vst.msk [vmem:[#allocation2 + $0xb0] sm:$0xff] %vm15_vm0, %v1101_v35 }
 0x149   :  { %v756_v21 = vrot.slane %v9300_v41, 2  ;;  %v14618_v60 = vrot.slane %v9317_v33, 7  ;;  %v352_v13 = vsel %vm334_vm2, %v315_v48, %v14617_v52  ;;  %v14616_v50 = vrot.slane %v9315_v27, 1  ;;  %1170 = vst.msk [vmem:[#allocation2 + $0xb8] sm:$0x1] %vm216_vm1, %v1102_v37 }
 0x14a   :  { %v497_v18 = vsel %vm479_vm3, %v14615_v53, %v466_v23  ;;  %v9335_v46 = vld [vmem:[#allocation3 + $0xa0] sm:$0xff]  ;;  %v9337_v24 = vld [vmem:[#allocation3 + $0xa8] sm:$0xff]  ;;  %v380_v16 = vadd.f32 %v352_v13, %v9300_v41  ;;  %v14619_v1 = vrot.slane %v9317_v33, 6  ;;  %v642_v25 = vsel %vm624_vm4, %v605_v49, %v14614_v42 }
 0x14b   :  { %v762_v12 = vrot.slane %v9315_v27, 2  ;;  %v9346_v43 = vld [vmem:[#allocation3 + $0xb0] sm:$0xff]  ;;  %v358_v22 = vsel %vm334_vm2, %v14618_v60, %v315_v48  ;;  %v388_v14 = vrot.slane %v9335_v46, 7  ;;  %v394_v39 = vrot.slane %v9337_v24, 7  ;;  %1191 = vst.msk [vmem:[#allocation3 + $0xa0] sm:$0xff] %vm15_vm0, %v1143_v32  ;;  %1192 = vst.msk [vmem:[#allocation3 + $0xa8] sm:$0xff] %vm15_vm0, %v1144_v63 }
 0x14c   :  { %v9348_v44 = vld [vmem:[#allocation3 + $0xb8] sm:$0xff]  ;;  %v491_v35 = vsel %vm479_vm3, %v466_v23, %v14616_v50  ;;  %v379_v3 = vadd.f32 %v358_v22, %v9298_v47  ;;  %v533_v37 = vrot.slane %v9335_v46, 1  ;;  %1193 = vst.msk [vmem:[#allocation3 + $0xb0] sm:$0xff] %vm15_vm0, %v1145_v4  ;;  %v539_v13 = vrot.slane %v9337_v24, 1 }
 0x14d   :  { %v406_v11 = vrot.slane %v9348_v44, 7  ;;  %v525_v38 = vadd.f32 %v491_v35, %v380_v16  ;;  %v424_v48 = vsel %vm334_vm2, %v388_v14, %v394_v39  ;;  %v545_v23 = vrot.slane %v9346_v43, 1 }
 0x14e   :  { %v648_v32 = vsel %vm624_vm4, %v14619_v1, %v605_v49  ;;  %v452_v16 = vmax.f32 %v9337_v24, %v424_v48  ;;  %v524_v22 = vadd.f32 %v497_v18, %v379_v3  ;;  %v569_v53 = vsel %vm479_vm3, %v533_v37, %v539_v13 }
 0x14f   :  { %v430_v63 = vsel %vm334_vm2, %v406_v11, %v388_v14  ;;  %v670_v35 = vadd.f32 %v642_v25, %v525_v38  ;;  %v563_v42 = vsel %vm479_vm3, %v539_v13, %v545_v23  ;;  %v678_v50 = vrot.slane %v9335_v46, 6 }
 0x150   :  { %v451_v4 = vmax.f32 %v9335_v46, %v430_v63  ;;  %v597_v52 = vmax.f32 %v452_v16, %v563_v42  ;;  %v669_v60 = vadd.f32 %v648_v32, %v524_v22  ;;  %v684_v49 = vrot.slane %v9337_v24, 6 }
 0x151   :  { %v696_v14 = vrot.slane %v9348_v44, 6  ;;  %v781_v18 = vsel %vm769_vm5, %v756_v21, %v762_v12  ;;  %v787_v25 = vsel %vm769_vm5, %v14620_v8, %v756_v21  ;;  %v823_v3 = vrot.slane %v9335_v46, 2  ;;  %v9539_v46 = vld [vmem:[%s14556_s0 + $0x560] sm:$0xff] }
 0x152   :  { %v596_v1 = vmax.f32 %v451_v4, %v569_v53  ;;  %v714_v42 = vsel %vm624_vm4, %v678_v50, %v684_v49  ;;  %v814_v38 = vadd.f32 %v787_v25, %v669_v60  ;;  %v815_v48 = vadd.f32 %v781_v18, %v670_v35 }
 0x153   :  { %v720_v53 = vsel %vm624_vm4, %v696_v14, %v678_v50  ;;  %v742_v32 = vmax.f32 %v597_v52, %v714_v42  ;;  %v829_v63 = vrot.slane %v9337_v24, 2  ;;  %v835_v21 = vrot.slane %v9346_v43, 2  ;;  %v9508_v24 = vld [vmem:[#allocation3 + $0x60] sm:$0xff] }
 0x154   :  { %v741_v13 = vmax.f32 %v596_v1, %v720_v53  ;;  %v910_v16 = vmul.f32 0.033333335, %v814_v38  ;;  %v911_v22 = vmul.f32 0.033333335, %v815_v48  ;;  %v1146_v4 = vmax.f32 %v1126_v45, %v8648_v20  ;;  %14908 = vst [vmem:[#allocation22_spill] sm:$0xff] %v9508_v24 }
 0x155   :  { %v327_v8 = vrot.slane %v9315_v27, 7  ;;  %v853_v60 = vsel %vm769_vm5, %v829_v63, %v835_v21  ;;  %v859_v52 = vsel %vm769_vm5, %v823_v3, %v829_v63  ;;  %v400_v50 = vrot.slane %v9346_v43, 7 }
 0x156   :  { %v478_v1 = vrot.slane %v9317_v33, 1  ;;  %v886_v35 = vmax.f32 %v741_v13, %v859_v52  ;;  %v887_v18 = vmax.f32 %v742_v32, %v853_v60  ;;  %1194 = vst.msk [vmem:[#allocation3 + $0xb8] sm:$0x1] %vm216_vm1, %v1146_v4  ;;  %v14898_v20 = vrot.slane %v9317_v33, 7 }
 0x157   :  { %v14899_v9 = vrot.slane %v9300_v41, 7  ;;  %v412_v53 = vsel %vm334_vm2, %v400_v50, %v406_v11  ;;  %v418_v38 = vsel %vm334_vm2, %v394_v39, %v400_v50  ;;  %v14900_v4 = vrot.slane %v9315_v27, 1 }
 0x158   :  { %v340_v0 = vsel %vm334_vm2, %v327_v8, %v14898_v20  ;;  %v934_v48 = vmul.f32 0.5, %v886_v35  ;;  %v935_v13 = vmul.f32 0.5, %v887_v18  ;;  %v453_v32 = vmax.f32 %v9346_v43, %v418_v38 }
 0x159   :  { %v346_v45 = vsel %vm334_vm2, %v14899_v9, %v327_v8  ;;  %v382_v42 = vadd.f32 %v340_v0, %v9317_v33  ;;  %v454_v63 = vmax.f32 %v9348_v44, %v412_v53  ;;  %v485_v8 = vsel %vm479_vm3, %v14900_v4, %v478_v1 }
 0x15a   :  { %v381_v25 = vadd.f32 %v346_v45, %v9315_v27  ;;  %v14901_v60 = vrot.slane %v9298_v47, 1  ;;  %v551_v11 = vrot.slane %v9348_v44, 1  ;;  %v617_v39 = vrot.slane %v9315_v27, 6 }
 0x15b   :  { %v958_v50 = vadd.f32 %v934_v48, %v910_v16  ;;  %v959_v35 = vadd.f32 %v935_v13, %v911_v22  ;;  %v14902_v45 = vrot.slane %v9317_v33, 6  ;;  %v9461_v16 = vld [vmem:[%s14556_s0 + $0x3d8] sm:$0x1]  ;;  %v768_v13 = vrot.slane %v9317_v33, 2  ;;  %v6579_v33 = vld [vmem:[%s14556_s0 + $0x3a8] sm:$0xff] }
 0x15c   :  { %v503_v52 = vsel %vm479_vm3, %v478_v1, %v14901_v60  ;;  %v526_v18 = vadd.f32 %v485_v8, %v381_v25  ;;  %v557_v0 = vsel %vm479_vm3, %v545_v23, %v551_v11  ;;  %v575_v9 = vsel %vm479_vm3, %v551_v11, %v533_v37  ;;  %v9466_v23 = vld [vmem:[%s14556_s0 + $0x3f8] sm:$0x1]  ;;  %v9471_v8 = vld [vmem:[#allocation2 + $0x60] sm:$0xff]  ;;  %v9473_v60 = vld [vmem:[#allocation2 + $0x68] sm:$0xff] }
 0x15d   :  { %v527_v20 = vadd.f32 %v503_v52, %v382_v42  ;;  %v630_v53 = vsel %vm624_vm4, %v617_v39, %v14902_v45  ;;  %v14903_v1 = vrot.slane %v9300_v41, 6  ;;  %v1004_v37 = vpack.c.bf16 %v959_v35, %v958_v50  ;;  %14904 = vst [vmem:[#allocation19_spill] sm:$0xff] %v9473_v60  ;;  %v9475_v52 = vld [vmem:[#allocation2 + $0x70] sm:$0xff] }
 0x15e   :  { %v598_v22 = vmax.f32 %v453_v32, %v557_v0  ;;  %v599_v25 = vmax.f32 %v454_v63, %v575_v9  ;;  %v690_v41 = vrot.slane %v9346_v43, 6  ;;  %v841_v4 = vrot.slane %v9348_v44, 2  ;;  %14905 = vst [vmem:[#allocation20_spill] sm:$0xff] %v9475_v52  ;;  %v6578_v63 = vld [vmem:[%s14556_s0 + $0x3a0] sm:$0xff]  ;;  %v9534_v43 = vld [vmem:[%s14556_s0 + $0x548] sm:$0xff] }
 0x15f   :  { %v636_v38 = vsel %vm624_vm4, %v14903_v1, %v617_v39  ;;  %v672_v48 = vadd.f32 %v630_v53, %v527_v20  ;;  %6288 = vmatprep.mubr.msk.bf16.mxu0 %vm15_vm0, %v1004_v37  ;;  %v1991_v32 = vadd.f32 %v9466_v23, %v9461_v16  ;;  %v2012_v11 = vadd.f32 %v6578_v63, %v9292_v40  ;;  %v9554_v37 = vld [vmem:[%s14556_s0 + $0x570] sm:$0xff] }
 0x160   :  { %v671_v42 = vadd.f32 %v636_v38, %v526_v18  ;;  %v2013_v39 = vadd.f32 %v6579_v33, %v9296_v55  ;;  %v2014_v50 = vadd.f32 %v8701_v17, %v9307_v5  ;;  %v702_v35 = vsel %vm624_vm4, %v690_v41, %v696_v14  ;;  %v9506_v14 = vld [vmem:[#allocation2 + $0x78] sm:$0xff] }
 0x161   :  { %v708_v18 = vsel %vm624_vm4, %v684_v49, %v690_v41  ;;  %v775_v40 = vsel %vm769_vm5, %v762_v12, %v768_v13  ;;  %v14906_v55 = vrot.slane %v9298_v47, 2  ;;  %v744_v44 = vmax.f32 %v599_v25, %v702_v35  ;;  %14907 = vst [vmem:[#allocation21_spill] sm:$0xff] %v9506_v14  ;;  %2080 = vst.msk [vmem:[#allocation2 + $0x60] sm:$0xff] %vm15_vm0, %v2012_v11  ;;  %v9516_v47 = vld [vmem:[%s14556_s0 + $0x540] sm:$0xff]  ;;  %v6580_v49 = vld [vmem:[%s14556_s0 + $0x3b8] sm:$0x1] }
 0x162   :  { %v743_v5 = vmax.f32 %v598_v22, %v708_v18  ;;  %v816_v20 = vadd.f32 %v775_v40, %v671_v42  ;;  %2081 = vst.msk [vmem:[#allocation2 + $0x68] sm:$0xff] %vm15_vm0, %v2013_v39  ;;  %2082 = vst.msk [vmem:[#allocation2 + $0x70] sm:$0xff] %vm15_vm0, %v2014_v50  ;;  %v847_v27 = vsel %vm769_vm5, %v835_v21, %v841_v4  ;;  %v9566_v41 = vld [vmem:[%s14556_s0 + $0x558] sm:$0x1]  ;;  %v6581_v50 = vld [vmem:[%s14556_s0 + $0x3b0] sm:$0xff]  ;;  %v14951_v60 = vrot.slane %v8217_v57, 7 }
 0x163   :  { %v793_v17 = vsel %vm769_vm5, %v768_v13, %v14906_v55  ;;  %v865_v12 = vsel %vm769_vm5, %v841_v4, %v823_v3  ;;  %v2015_v9 = vadd.f32 %v6580_v49, %v1991_v32  ;;  %v2036_v45 = vmax.f32 %v9246_v30, %v9260_v28  ;;  %v9544_v3 = vld [vmem:[%s14556_s0 + $0x568] sm:$0xff]  ;;  %v9549_v30 = vld [vmem:[%s14556_s0 + $0x550] sm:$0xff]  ;;  %v9571_v13 = vld [vmem:[%s14556_s0 + $0x578] sm:$0x1] }
 0x164   :  { %v817_v0 = vadd.f32 %v793_v17, %v672_v48  ;;  %v888_v21 = vmax.f32 %v743_v5, %v847_v27  ;;  %v889_v53 = vmax.f32 %v744_v44, %v865_v12  ;;  %v912_v1 = vmul.f32 0.033333335, %v816_v20  ;;  %v9573_v32 = vld [vmem:[#allocation3 + $0x68] sm:$0xff] }
 0x165   :  { %v2037_v22 = vmax.f32 %v9255_v31, %v9265_v54  ;;  %v2038_v25 = vmax.f32 %v9276_v10, %v9281_v59  ;;  %v2039_v42 = vmax.f32 %v9461_v16, %v9466_v23  ;;  %v2056_v48 = vmax.f32 %v2036_v45, %v6578_v63  ;;  %2083 = vst.msk [vmem:[#allocation2 + $0x78] sm:$0x1] %vm216_vm1, %v2015_v9  ;;  %v9575_v10 = vld [vmem:[#allocation3 + $0x70] sm:$0xff]  ;;  %v9577_v16 = vld [vmem:[#allocation3 + $0x78] sm:$0xff] }
 0x166   :  { %v913_v38 = vmul.f32 0.033333335, %v817_v0  ;;  %v936_v31 = vmul.f32 0.5, %v888_v21  ;;  %v937_v4 = vmul.f32 0.5, %v889_v53  ;;  %14909 = vst [vmem:[#allocation23_spill] sm:$0xff] %v9573_v32  ;;  %14910 = vst [vmem:[#allocation24_spill] sm:$0xff] %v9575_v10  ;;  %v2909_v63 = vadd.f32 %v9539_v46, %v9516_v47 }
 0x167   :  { %14911 = vst [vmem:[#allocation25_spill] sm:$0xff] %v9577_v16  ;;  %v2910_v11 = vadd.f32 %v9544_v3, %v9534_v43  ;;  %v2057_v39 = vmax.f32 %v2037_v22, %v6579_v33  ;;  %v2058_v35 = vmax.f32 %v2038_v25, %v6581_v50  ;;  %v2059_v18 = vmax.f32 %v2039_v42, %v6580_v49 }
 0x168   :  { %2104 = vst.msk [vmem:[#allocation3 + $0x60] sm:$0xff] %vm15_vm0, %v2056_v48  ;;  %v2911_v40 = vadd.f32 %v9554_v37, %v9549_v30  ;;  %v960_v55 = vadd.f32 %v936_v31, %v912_v1  ;;  %v961_v17 = vadd.f32 %v937_v4, %v913_v38  ;;  %v9591_v5 = vadd.f32 %v9571_v13, %v9566_v41  ;;  %v9597_v33 = vld [vmem:[#allocation2 + $0x60] sm:$0xff] }
 0x169   :  { %v2933_v44 = vadd.f32 %v8941_v2, %v2909_v63  ;;  %2105 = vst.msk [vmem:[#allocation3 + $0x68] sm:$0xff] %vm15_vm0, %v2057_v39  ;;  %2106 = vst.msk [vmem:[#allocation3 + $0x70] sm:$0xff] %vm15_vm0, %v2058_v35  ;;  %v9599_v20 = vld [vmem:[#allocation2 + $0x68] sm:$0xff]  ;;  %v2934_v0 = vadd.f32 %v8946_v7, %v2910_v11  ;;  %v9609_v45 = vld [vmem:[#allocation2 + $0x70] sm:$0xff]  ;;  %v2167_v21 = vrot.slane %v9597_v33, 7  ;;  %v14622_v1 = vrot.slane %v9597_v33, 1 }
 0x16a   :  { %2107 = vst.msk [vmem:[#allocation3 + $0x78] sm:$0x1] %vm216_vm1, %v2059_v18  ;;  %v2935_v27 = vadd.f32 %v8951_v56, %v2911_v40  ;;  %v993_v9 = vsel %vm72_vm6, %v961_v17, 0.0  ;;  %v14625_v53 = vrot.slane %v9599_v20, 7  ;;  %v2317_v22 = vrot.slane %v9599_v20, 1 }
 0x16b   :  { %3001 = vst.msk [vmem:[#allocation2 + $0x60] sm:$0xff] %vm15_vm0, %v2933_v44  ;;  %v1005_v38 = vpack.c.bf16 %v993_v9, %v960_v55  ;;  %v14623_v25 = vrot.slane %v9609_v45, 1  ;;  %v2455_v42 = vrot.slane %v9597_v33, 6  ;;  %3002 = vst.msk [vmem:[#allocation2 + $0x68] sm:$0xff] %vm15_vm0, %v2934_v0  ;;  %v14621_v4 = vrot.slane %v9599_v20, 6 }
 0x16c   :  { %3003 = vst.msk [vmem:[#allocation2 + $0x70] sm:$0xff] %vm15_vm0, %v2935_v27  ;;  %v9620_v48 = vld [vmem:[#allocation2 + $0x78] sm:$0xff]  ;;  %v2203_v31 = vsel %vm334_vm2, %v2167_v21, %v14625_v53  ;;  %v14624_v63 = vrot.slane %v9597_v33, 2  ;;  %v2605_v11 = vrot.slane %v9599_v20, 2  ;;  %v2347_v18 = vsel %vm479_vm3, %v14622_v1, %v2317_v22 }
 0x16d   :  { %6289 = vmatmul.mubr.msk.bf16.gmra.mrb[20].mxu0 %vm15_vm0, %v1005_v38  ;;  %v14626_v39 = vrot.slane %v9620_v48, 7  ;;  %v2225_v50 = vadd.f32 %v2203_v31, %v9599_v20  ;;  %v2341_v35 = vsel %vm479_vm3, %v2317_v22, %v14623_v25  ;;  %v14627_v55 = vrot.slane %v9620_v48, 6 }
 0x16e   :  { %v2491_v17 = vsel %vm624_vm4, %v2455_v42, %v14621_v4  ;;  %v14628_v44 = vrot.slane %v9609_v45, 2  ;;  %v2635_v0 = vsel %vm769_vm5, %v14624_v63, %v2605_v11 }
 0x16f   :  { %v9640_v40 = vld [vmem:[#allocation3 + $0x60] sm:$0xff]  ;;  %v2209_v27 = vsel %vm334_vm2, %v14626_v39, %v2167_v21  ;;  %v2369_v38 = vadd.f32 %v2341_v35, %v2225_v50  ;;  %v2497_v63 = vsel %vm624_vm4, %v14627_v55, %v2455_v42 }
 0x170   :  { %v2239_v9 = vrot.slane %v9640_v40, 7  ;;  %v9658_v31 = vld [vmem:[#allocation3 + $0x68] sm:$0xff]  ;;  %v9660_v4 = vld [vmem:[#allocation3 + $0x70] sm:$0xff]  ;;  %v2224_v25 = vadd.f32 %v2209_v27, %v9597_v33  ;;  %v2527_v21 = vrot.slane %v9640_v40, 6  ;;  %v2629_v50 = vsel %vm769_vm5, %v2605_v11, %v14628_v44 }
 0x171   :  { %v9662_v1 = vld [vmem:[#allocation3 + $0x78] sm:$0xff]  ;;  %v2245_v35 = vrot.slane %v9658_v31, 7  ;;  %v2389_v39 = vrot.slane %v9658_v31, 1  ;;  %v2395_v27 = vrot.slane %v9660_v4, 1  ;;  %v2513_v12 = vadd.f32 %v2491_v17, %v2369_v38 }
 0x172   :  { %v2257_v53 = vrot.slane %v9662_v1, 7  ;;  %v2368_v49 = vadd.f32 %v2347_v18, %v2224_v25  ;;  %v14634_v22 = vrot.slane %v9658_v31, 6  ;;  %v2545_v42 = vrot.slane %v9662_v1, 6 }
 0x173   :  { %v2275_v55 = vsel %vm334_vm2, %v2239_v9, %v2245_v35  ;;  %v2413_v44 = vsel %vm479_vm3, %v2389_v39, %v2395_v27  ;;  %v14912_v10 = vrot.slane %v9640_v40, 1  ;;  %v2657_v16 = vadd.f32 %v2629_v50, %v2513_v12 }
 0x174   :  { %v2281_v11 = vsel %vm334_vm2, %v2257_v53, %v2239_v9  ;;  %v2297_v18 = vmax.f32 %v9658_v31, %v2275_v55  ;;  %v2512_v17 = vadd.f32 %v2497_v63, %v2368_v49  ;;  %v2563_v38 = vsel %vm624_vm4, %v2527_v21, %v14634_v22 }
 0x175   :  { %v2419_v52 = vsel %vm479_vm3, %v14912_v10, %v2389_v39  ;;  %v2296_v25 = vmax.f32 %v9640_v40, %v2281_v11  ;;  %v2569_v9 = vsel %vm624_vm4, %v2545_v42, %v2527_v21  ;;  %v2671_v32 = vrot.slane %v9640_v40, 2 }
 0x176   :  { %v2677_v10 = vrot.slane %v9658_v31, 2  ;;  %v2441_v11 = vmax.f32 %v2297_v18, %v2413_v44  ;;  %v2656_v24 = vadd.f32 %v2635_v0, %v2512_v17  ;;  %v2683_v49 = vrot.slane %v9660_v4, 2 }
 0x177   :  { %v2440_v39 = vmax.f32 %v2296_v25, %v2419_v52  ;;  %v2753_v55 = vmul.f32 0.033333335, %v2657_v16  ;;  %v2936_v22 = vadd.f32 %v8968_v58, %v9591_v5  ;;  %v2959_v12 = vmax.f32 %v9549_v30, %v9554_v37 }
 0x178   :  { %v2707_v63 = vsel %vm769_vm5, %v2671_v32, %v2677_v10  ;;  %v2585_v50 = vmax.f32 %v2441_v11, %v2563_v38  ;;  %v2701_v52 = vsel %vm769_vm5, %v2677_v10, %v2683_v49  ;;  %v2752_v44 = vmul.f32 0.033333335, %v2656_v24 }
 0x179   :  { %v2584_v21 = vmax.f32 %v2440_v39, %v2569_v9  ;;  %v2960_v0 = vmax.f32 %v9566_v41, %v9571_v13  ;;  %v14913_v16 = vmax.f32 %v9516_v47, %v9539_v46  ;;  %v14914_v30 = vmax.f32 %v9534_v43, %v9544_v3  ;;  %3004 = vst.msk [vmem:[#allocation2 + $0x78] sm:$0x1] %vm216_vm1, %v2936_v22 }
 0x17a   :  { %v2979_v18 = vmax.f32 %v2959_v12, %v8951_v56  ;;  %v2729_v38 = vmax.f32 %v2585_v50, %v2701_v52  ;;  %v2179_v24 = vrot.slane %v9609_v45, 7  ;;  %v2251_v41 = vrot.slane %v9660_v4, 7 }
 0x17b   :  { %v2977_v25 = vmax.f32 %v14913_v16, %v8941_v2  ;;  %v2978_v5 = vmax.f32 %v14914_v30, %v8946_v7  ;;  %v2728_v17 = vmax.f32 %v2584_v21, %v2707_v63  ;;  %v2980_v9 = vmax.f32 %v2960_v0, %v8968_v58 }
 0x17c   :  { %3027 = vst.msk [vmem:[#allocation3 + $0x70] sm:$0xff] %vm15_vm0, %v2979_v18  ;;  %v2329_v2 = vrot.slane %v9620_v48, 1  ;;  %v2401_v7 = vrot.slane %v9662_v1, 1  ;;  %v2467_v56 = vrot.slane %v9609_v45, 6  ;;  %v2777_v43 = vmul.f32 0.5, %v2729_v38 }
 0x17d   :  { %3025 = vst.msk [vmem:[#allocation3 + $0x60] sm:$0xff] %vm15_vm0, %v2977_v25  ;;  %3026 = vst.msk [vmem:[#allocation3 + $0x68] sm:$0xff] %vm15_vm0, %v2978_v5  ;;  %v2776_v47 = vmul.f32 0.5, %v2728_v17  ;;  %v14915_v22 = vrot.slane %v9620_v48, 7  ;;  %v14916_v58 = vrot.slane %v9599_v20, 7  ;;  %v2263_v12 = vsel %vm334_vm2, %v2251_v41, %v2257_v53 }
 0x17e   :  { %3028 = vst.msk [vmem:[#allocation3 + $0x78] sm:$0x1] %vm216_vm1, %v2980_v9  ;;  %v2269_v21 = vsel %vm334_vm2, %v2245_v35, %v2251_v41  ;;  %v2801_v52 = vadd.f32 %v2777_v43, %v2753_v55  ;;  %v2299_v16 = vmax.f32 %v9662_v1, %v2263_v12  ;;  %v14917_v25 = vrot.slane %v9609_v45, 1 }
 0x17f   :  { %v2191_v10 = vsel %vm334_vm2, %v2179_v24, %v14915_v22  ;;  %v2197_v39 = vsel %vm334_vm2, %v14916_v58, %v2179_v24  ;;  %v2800_v50 = vadd.f32 %v2776_v47, %v2752_v44  ;;  %v2298_v0 = vmax.f32 %v9660_v4, %v2269_v21 }
 0x180   :  { %v2226_v11 = vadd.f32 %v2197_v39, %v9609_v45  ;;  %v2227_v63 = vadd.f32 %v2191_v10, %v9620_v48  ;;  %v2335_v30 = vsel %vm479_vm3, %v14917_v25, %v2329_v2  ;;  %v14918_v5 = vrot.slane %v9597_v33, 1 }
 0x181   :  { %v2407_v53 = vsel %vm479_vm3, %v2395_v27, %v2401_v7  ;;  %v14919_v35 = vrot.slane %v9640_v40, 1  ;;  %v2842_v44 = vpack.c.bf16 %v2801_v52, %v2800_v50  ;;  %v14920_v9 = vrot.slane %v9620_v48, 6 }
 0x182   :  { %v2353_v18 = vsel %vm479_vm3, %v2329_v2, %v14918_v5  ;;  %v2370_v17 = vadd.f32 %v2335_v30, %v2226_v11  ;;  %v2442_v24 = vmax.f32 %v2298_v0, %v2407_v53  ;;  %v14921_v2 = vrot.slane %v9599_v20, 6  ;;  %v14925_v30 = vld [vmem:[#allocation5_spill] sm:$0xff] }
 0x183   :  { %v2425_v55 = vsel %vm479_vm3, %v2401_v7, %v14919_v35  ;;  %v2371_v38 = vadd.f32 %v2353_v18, %v2227_v63  ;;  %v2479_v47 = vsel %vm624_vm4, %v2467_v56, %v14920_v9  ;;  %v2539_v43 = vrot.slane %v9660_v4, 6  ;;  %6328 = vmatprep.mubr.msk.bf16.mxu1 %vm15_vm0, %v2842_v44  ;;  %v14926_v35 = vld [vmem:[#allocation6_spill] sm:$0xff]  ;;  %v14927_v44 = vld [vmem:[#allocation7_spill] sm:$0xff] }
 0x184   :  { %v2443_v41 = vmax.f32 %v2299_v16, %v2425_v55  ;;  %v2485_v27 = vsel %vm624_vm4, %v14921_v2, %v2467_v56  ;;  %v2617_v10 = vrot.slane %v9620_v48, 2  ;;  %v2689_v58 = vrot.slane %v9662_v1, 2 }
 0x185   :  { %v2514_v7 = vadd.f32 %v2485_v27, %v2370_v17  ;;  %v2515_v22 = vadd.f32 %v2479_v47, %v2371_v38  ;;  %v2551_v39 = vsel %vm624_vm4, %v2539_v43, %v2545_v42  ;;  %v14922_v20 = vrot.slane %v9658_v31, 6 }
 0x186   :  { %v1243_v11 = vrot.slane %v7445_v61, 7  ;;  %v1249_v63 = vrot.slane %v7447_v19, 7  ;;  %v2587_v21 = vmax.f32 %v2443_v41, %v2551_v39  ;;  %v14923_v48 = vrot.slane %v9609_v45, 2 }
 0x187   :  { %v2557_v56 = vsel %vm624_vm4, %v14922_v20, %v2539_v43  ;;  %v14924_v1 = vrot.slane %v9597_v33, 2  ;;  %v2695_v0 = vsel %vm769_vm5, %v2683_v49, %v2689_v58  ;;  %v2713_v45 = vsel %vm769_vm5, %v2689_v58, %v2671_v32 }
 0x188   :  { %v2586_v12 = vmax.f32 %v2442_v24, %v2557_v56  ;;  %v2623_v50 = vsel %vm769_vm5, %v14923_v48, %v2617_v10  ;;  %v2731_v25 = vmax.f32 %v2587_v21, %v2713_v45  ;;  %v1261_v5 = vrot.slane %v14925_v30, 7  ;;  %v14928_v24 = vld [vmem:[#allocation9_spill] sm:$0xff] }
 0x189   :  { %v2641_v42 = vsel %vm769_vm5, %v2617_v10, %v14924_v1  ;;  %v2658_v31 = vadd.f32 %v2623_v50, %v2514_v7  ;;  %v1279_v33 = vsel %vm334_vm2, %v1243_v11, %v1249_v63  ;;  %v1315_v49 = vrot.slane %v14926_v35, 7  ;;  %v14929_v7 = vld [vmem:[#allocation4_spill] sm:$0xff] }
 0x18a   :  { %v2659_v52 = vadd.f32 %v2641_v42, %v2515_v22  ;;  %v2730_v16 = vmax.f32 %v2586_v12, %v2695_v0  ;;  %v1292_v4 = vadd.f32 %v1279_v33, %v7447_v19  ;;  %v2779_v40 = vmul.f32 0.5, %v2731_v25  ;;  %v14930_v42 = vld [vmem:[#allocation8_spill] sm:$0xff]  ;;  %v9849_v25 = vpop.f32.mrb[0].mxu0 }
 0x18b   :  { %v2754_v18 = vmul.f32 0.033333335, %v2658_v31  ;;  %v1285_v32 = vsel %vm334_vm2, %v1261_v5, %v1243_v11  ;;  %v1321_v17 = vrot.slane %v14927_v44, 7  ;;  %v1333_v41 = vrot.slane %v14928_v24, 7 }
 0x18c   :  { %v2755_v53 = vmul.f32 0.033333335, %v2659_v52  ;;  %v2778_v55 = vmul.f32 0.5, %v2730_v16  ;;  %v1291_v38 = vadd.f32 %v1285_v32, %v7445_v61  ;;  %v1387_v9 = vrot.slane %v7445_v61, 1 }
 0x18d   :  { %v1393_v47 = vrot.slane %v7447_v19, 1  ;;  %v1351_v43 = vsel %vm334_vm2, %v1315_v49, %v1321_v17  ;;  %v1399_v22 = vrot.slane %v14929_v7, 1  ;;  %v1357_v10 = vsel %vm334_vm2, %v1333_v41, %v1315_v49  ;;  %v9862_v49 = vpop.f32.mrb[1].mxu0 }
 0x18e   :  { %v2802_v2 = vadd.f32 %v2778_v55, %v2754_v18  ;;  %v2803_v27 = vadd.f32 %v2779_v40, %v2755_v53  ;;  %v1364_v58 = vmax.f32 %v14927_v44, %v1351_v43  ;;  %v1459_v20 = vrot.slane %v14926_v35, 1 }
 0x18f   :  { %v1423_v39 = vsel %vm479_vm3, %v1387_v9, %v1393_v47  ;;  %v1363_v11 = vmax.f32 %v14926_v35, %v1357_v10  ;;  %v1417_v12 = vsel %vm479_vm3, %v1393_v47, %v1399_v22  ;;  %v1465_v1 = vrot.slane %v14927_v44, 1  ;;  %v9872_v47 = vpop.f32.mrb[2].mxu0 }
 0x190   :  { %v2827_v56 = vsel %vm72_vm6, %v2803_v27, 0.0  ;;  %v1435_v21 = vadd.f32 %v1423_v39, %v1291_v38  ;;  %v1436_v50 = vadd.f32 %v1417_v12, %v1292_v4  ;;  %v1471_v31 = vrot.slane %v14930_v42, 1 }
 0x191   :  { %v2843_v48 = vpack.c.bf16 %v2827_v56, %v2802_v2  ;;  %v1531_v52 = vrot.slane %v7445_v61, 6  ;;  %v1537_v0 = vrot.slane %v7447_v19, 6  ;;  %v1549_v45 = vrot.slane %v14925_v30, 6 }
 0x192   :  { %v1603_v16 = vrot.slane %v14926_v35, 6  ;;  %v1489_v33 = vsel %vm479_vm3, %v1465_v1, %v1471_v31  ;;  %v1495_v18 = vsel %vm479_vm3, %v1459_v20, %v1465_v1  ;;  %v14635_v53 = vrot.slane %v14927_v44, 6 }
 0x193   :  { %6329 = vmatmul.mubr.msk.bf16.gmra.mrb[12].mxu1 %vm15_vm0, %v2843_v48  ;;  %v14636_v4 = vrot.slane %v14928_v24, 6  ;;  %v1507_v55 = vmax.f32 %v1363_v11, %v1495_v18  ;;  %v1508_v40 = vmax.f32 %v1364_v58, %v1489_v33  ;;  %v1567_v32 = vsel %vm624_vm4, %v1531_v52, %v1537_v0  ;;  %v9882_v58 = vpop.f32.mrb[3].mxu0 }
 0x194   :  { %v1573_v38 = vsel %vm624_vm4, %v1549_v45, %v1531_v52  ;;  %v1580_v27 = vadd.f32 %v1567_v32, %v1436_v50  ;;  %v1639_v43 = vsel %vm624_vm4, %v1603_v16, %v14635_v53  ;;  %v1675_v11 = vrot.slane %v7445_v61, 2 }
 0x195   :  { %v1579_v2 = vadd.f32 %v1573_v38, %v1435_v21  ;;  %v1645_v10 = vsel %vm624_vm4, %v14636_v4, %v1603_v16  ;;  %v1652_v56 = vmax.f32 %v1508_v40, %v1639_v43  ;;  %v1681_v12 = vrot.slane %v7447_v19, 2  ;;  %v9976_v19 = vld [vmem:[%s14556_s0 + $0x428] sm:$0xff] }
 0x196   :  { %v1651_v39 = vmax.f32 %v1507_v55, %v1645_v10  ;;  %v1687_v21 = vrot.slane %v14929_v7, 2  ;;  %v1747_v48 = vrot.slane %v14926_v35, 2  ;;  %v1753_v50 = vrot.slane %v14927_v44, 2  ;;  %v6140_v35 = vld [vmem:[%s14556_s0 + $0x580] sm:$0xff] }
 0x197   :  { %v1759_v1 = vrot.slane %v14930_v42, 2  ;;  %v1711_v52 = vsel %vm769_vm5, %v1675_v11, %v1681_v12  ;;  %v1255_v16 = vrot.slane %v14929_v7, 7  ;;  %v1327_v33 = vrot.slane %v14930_v42, 7 }
 0x198   :  { %v1405_v18 = vrot.slane %v14925_v30, 1  ;;  %v1705_v55 = vsel %vm769_vm5, %v1681_v12, %v1687_v21  ;;  %v1723_v40 = vadd.f32 %v1711_v52, %v1579_v2  ;;  %v1783_v38 = vsel %vm769_vm5, %v1747_v48, %v1753_v50 }
 0x199   :  { %v1777_v32 = vsel %vm769_vm5, %v1753_v50, %v1759_v1  ;;  %v1724_v43 = vadd.f32 %v1705_v55, %v1580_v27  ;;  %v1795_v10 = vmax.f32 %v1651_v39, %v1783_v38  ;;  %v1267_v4 = vsel %vm334_vm2, %v1255_v16, %v1261_v5 }
 0x19a   :  { %v1796_v53 = vmax.f32 %v1652_v56, %v1777_v32  ;;  %v1819_v12 = vmul.f32 0.033333335, %v1723_v40  ;;  %v1273_v2 = vsel %vm334_vm2, %v1249_v63, %v1255_v16  ;;  %v1294_v52 = vadd.f32 %v1267_v4, %v14925_v30 }
 0x19b   :  { %v1339_v27 = vsel %vm334_vm2, %v1327_v33, %v1333_v41  ;;  %v1820_v39 = vmul.f32 0.033333335, %v1724_v43  ;;  %v1843_v56 = vmul.f32 0.5, %v1795_v10  ;;  %v1293_v55 = vadd.f32 %v1273_v2, %v14929_v7 }
 0x19c   :  { %v1844_v50 = vmul.f32 0.5, %v1796_v53  ;;  %v1345_v5 = vsel %vm334_vm2, %v1321_v17, %v1327_v33  ;;  %v1366_v40 = vmax.f32 %v14928_v24, %v1339_v27  ;;  %v1411_v63 = vsel %vm479_vm3, %v1399_v22, %v1405_v18  ;;  %v9935_v53 = vld [vmem:[%s14556_s0 + $0x400] sm:$0xff] }
 0x19d   :  { %v1429_v41 = vsel %vm479_vm3, %v1405_v18, %v1387_v9  ;;  %v9940_v17 = vld [vmem:[%s14556_s0 + $0x420] sm:$0xff]  ;;  %v1867_v4 = vadd.f32 %v1843_v56, %v1819_v12  ;;  %v1365_v33 = vmax.f32 %v14930_v42, %v1345_v5  ;;  %v1437_v22 = vadd.f32 %v1411_v63, %v1293_v55 }
 0x19e   :  { %v1868_v16 = vadd.f32 %v1844_v50, %v1820_v39  ;;  %v1438_v32 = vadd.f32 %v1429_v41, %v1294_v52  ;;  %v1477_v61 = vrot.slane %v14928_v24, 1  ;;  %v1543_v9 = vrot.slane %v14929_v7, 6  ;;  %v6093_v39 = vld [vmem:[%s14556_s0 + $0x408] sm:$0xff] }
 0x19f   :  { %v1615_v18 = vrot.slane %v14930_v42, 6  ;;  %v1693_v43 = vrot.slane %v14925_v30, 2  ;;  %v1765_v10 = vrot.slane %v14928_v24, 2  ;;  %v1992_v2 = vadd.f32 %v9940_v17, %v9935_v53  ;;  %v6094_v30 = vld [vmem:[%s14556_s0 + $0x410] sm:$0xff] }
 0x1a0   :  { %v1915_v38 = vpack.c.bf16 %v1868_v16, %v1867_v4  ;;  %v1483_v12 = vsel %vm479_vm3, %v1471_v31, %v1477_v61  ;;  %v1501_v7 = vsel %vm479_vm3, %v1477_v61, %v1459_v20  ;;  %v1555_v52 = vsel %vm624_vm4, %v1543_v9, %v1549_v45  ;;  %v10013_v61 = vld [vmem:[#allocation2 + $0x88] sm:$0xff] }
 0x1a1   :  { %v1561_v27 = vsel %vm624_vm4, %v1537_v0, %v1543_v9  ;;  %v1509_v31 = vmax.f32 %v1365_v33, %v1483_v12  ;;  %v1510_v56 = vmax.f32 %v1366_v40, %v1501_v7  ;;  %v1582_v20 = vadd.f32 %v1555_v52, %v1438_v32  ;;  %v9981_v0 = vld [vmem:[%s14556_s0 + $0x430] sm:$0xff]  ;;  %v10011_v32 = vld [vmem:[#allocation2 + $0x80] sm:$0xff]  ;;  %14934 = vst [vmem:[#allocation6_spill] sm:$0xff] %v10013_v61 }
 0x1a2   :  { %6292 = vmatprep.mubr.msk.bf16.mxu0 %vm15_vm0, %v1915_v38  ;;  %v1581_v50 = vadd.f32 %v1561_v27, %v1437_v22  ;;  %v14931_v45 = vrot.slane %v14928_v24, 6  ;;  %v14932_v5 = vrot.slane %v14927_v44, 6  ;;  %v1699_v63 = vsel %vm769_vm5, %v1687_v21, %v1693_v43  ;;  %v6095_v24 = vld [vmem:[%s14556_s0 + $0x418] sm:$0x1]  ;;  %14933 = vst [vmem:[#allocation5_spill] sm:$0xff] %v10011_v32  ;;  %v10015_v9 = vld [vmem:[#allocation2 + $0x90] sm:$0xff] }
 0x1a3   :  { %v1717_v41 = vsel %vm769_vm5, %v1693_v43, %v1675_v11  ;;  %v10001_v44 = vld [vmem:[%s14556_s0 + $0x438] sm:$0x1]  ;;  %v1771_v21 = vsel %vm769_vm5, %v1759_v1, %v1765_v10  ;;  %v1789_v11 = vsel %vm769_vm5, %v1765_v10, %v1747_v48  ;;  %14935 = vst [vmem:[#allocation7_spill] sm:$0xff] %v10015_v9  ;;  %v1994_v38 = vadd.f32 %v9981_v0, %v6094_v30  ;;  %v10025_v48 = vld [vmem:[%s14556_s0 + $0x5a0] sm:$0xff] }
 0x1a4   :  { %v1627_v55 = vsel %vm624_vm4, %v1615_v18, %v14931_v45  ;;  %v1633_v40 = vsel %vm624_vm4, %v14932_v5, %v1615_v18  ;;  %v1725_v33 = vadd.f32 %v1699_v63, %v1581_v50  ;;  %v1726_v22 = vadd.f32 %v1717_v41, %v1582_v20  ;;  %v10027_v1 = vld [vmem:[#allocation2 + $0x98] sm:$0xff]  ;;  %v10029_v10 = vld [vmem:[#allocation3 + $0x80] sm:$0xff]  ;;  %v6141_v50 = vld [vmem:[%s14556_s0 + $0x588] sm:$0xff] }
 0x1a5   :  { %v1653_v4 = vmax.f32 %v1509_v31, %v1633_v40  ;;  %v1654_v16 = vmax.f32 %v1510_v56, %v1627_v55  ;;  %v1993_v18 = vadd.f32 %v9976_v19, %v6093_v39  ;;  %14936 = vst [vmem:[#allocation9_spill] sm:$0xff] %v10027_v1  ;;  %14937 = vst [vmem:[#allocation4_spill] sm:$0xff] %v10029_v10  ;;  %v6142_v40 = vld [vmem:[%s14556_s0 + $0x590] sm:$0xff]  ;;  %v10054_v41 = vld [vmem:[#allocation3 + $0x88] sm:$0xff] }
 0x1a6   :  { %v1821_v12 = vmul.f32 0.033333335, %v1725_v33  ;;  %v1822_v7 = vmul.f32 0.033333335, %v1726_v22  ;;  %v1995_v52 = vadd.f32 %v10001_v44, %v6095_v24  ;;  %v2016_v27 = vadd.f32 %v9260_v28, %v1992_v2  ;;  %v10047_v2 = vld [vmem:[%s14556_s0 + $0x5a8] sm:$0xff]  ;;  %v10052_v63 = vld [vmem:[%s14556_s0 + $0x5b0] sm:$0xff] }
 0x1a7   :  { %v1797_v43 = vmax.f32 %v1653_v4, %v1771_v21  ;;  %v1798_v42 = vmax.f32 %v1654_v16, %v1789_v11  ;;  %v2017_v31 = vadd.f32 %v9265_v54, %v1993_v18  ;;  %v2018_v56 = vadd.f32 %v9281_v59, %v1994_v38  ;;  %14938 = vst [vmem:[#allocation8_spill] sm:$0xff] %v10054_v41  ;;  %v6143_v16 = vld [vmem:[%s14556_s0 + $0x598] sm:$0x1] }
 0x1a8   :  { %v2040_v55 = vmax.f32 %v9935_v53, %v9940_v17  ;;  %v2041_v5 = vmax.f32 %v6093_v39, %v9976_v19  ;;  %v2019_v53 = vadd.f32 %v9466_v23, %v1995_v52  ;;  %v2042_v39 = vmax.f32 %v6094_v30, %v9981_v0  ;;  %2084 = vst.msk [vmem:[#allocation2 + $0x80] sm:$0xff] %vm15_vm0, %v2016_v27  ;;  %v10068_v33 = vld [vmem:[%s14556_s0 + $0x5b8] sm:$0x1] }
 0x1a9   :  { %v1845_v20 = vmul.f32 0.5, %v1797_v43  ;;  %v1846_v45 = vmul.f32 0.5, %v1798_v42  ;;  %v2043_v4 = vmax.f32 %v6095_v24, %v10001_v44  ;;  %2085 = vst.msk [vmem:[#allocation2 + $0x88] sm:$0xff] %vm15_vm0, %v2017_v31  ;;  %2086 = vst.msk [vmem:[#allocation2 + $0x90] sm:$0xff] %vm15_vm0, %v2018_v56  ;;  %v2913_v22 = vadd.f32 %v10025_v48, %v6140_v35  ;;  %v10071_v24 = vld [vmem:[#allocation3 + $0x90] sm:$0xff]  ;;  %v10073_v11 = vld [vmem:[#allocation3 + $0x98] sm:$0xff] }
 0x1aa   :  { %14939 = vst [vmem:[#allocation26_spill] sm:$0xff] %v10071_v24  ;;  %14940 = vst [vmem:[#allocation27_spill] sm:$0xff] %v10073_v11  ;;  %v2060_v18 = vmax.f32 %v2040_v55, %v9260_v28  ;;  %v2061_v38 = vmax.f32 %v2041_v5, %v9265_v54  ;;  %v2062_v43 = vmax.f32 %v2042_v39, %v9281_v59 }
 0x1ab   :  { %v1869_v30 = vadd.f32 %v1845_v20, %v1821_v12  ;;  %v1870_v21 = vadd.f32 %v1846_v45, %v1822_v7  ;;  %v2063_v42 = vmax.f32 %v2043_v4, %v9466_v23  ;;  %2087 = vst.msk [vmem:[#allocation2 + $0x98] sm:$0x1] %vm216_vm1, %v2019_v53  ;;  %v2914_v52 = vadd.f32 %v10047_v2, %v6141_v50  ;;  %v14941_v53 = vld [vmem:[#allocation10_spill] sm:$0xff] }
 0x1ac   :  { %v2915_v27 = vadd.f32 %v10052_v63, %v6142_v40  ;;  %2108 = vst.msk [vmem:[#allocation3 + $0x80] sm:$0xff] %vm15_vm0, %v2060_v18  ;;  %2109 = vst.msk [vmem:[#allocation3 + $0x88] sm:$0xff] %vm15_vm0, %v2061_v38  ;;  %v2916_v28 = vadd.f32 %v10068_v33, %v6143_v16  ;;  %v2937_v54 = vadd.f32 %v9539_v46, %v2913_v22  ;;  %v14942_v22 = vld [vmem:[#allocation12_spill] sm:$0xff] }
 0x1ad   :  { %v1894_v12 = vsel %vm72_vm6, %v1870_v21, 0.0  ;;  %v2961_v59 = vmax.f32 %v6140_v35, %v10025_v48  ;;  %2110 = vst.msk [vmem:[#allocation3 + $0x90] sm:$0xff] %vm15_vm0, %v2062_v43  ;;  %v2938_v7 = vadd.f32 %v9544_v3, %v2914_v52  ;;  %v2962_v56 = vmax.f32 %v6141_v50, %v10047_v2  ;;  %v14944_v43 = vld [vmem:[#allocation14_spill] sm:$0xff] }
 0x1ae   :  { %v1916_v23 = vpack.c.bf16 %v1894_v12, %v1869_v30  ;;  %2111 = vst.msk [vmem:[#allocation3 + $0x98] sm:$0x1] %vm216_vm1, %v2063_v42  ;;  %v2939_v31 = vadd.f32 %v9554_v37, %v2915_v27  ;;  %v2940_v20 = vadd.f32 %v9571_v13, %v2916_v28  ;;  %v2963_v45 = vmax.f32 %v6142_v40, %v10052_v63  ;;  %v10113_v42 = vpop.f32.mrb[4].mxu0 }
 0x1af   :  { %v2964_v55 = vmax.f32 %v6143_v16, %v10068_v33  ;;  %v2981_v5 = vmax.f32 %v2961_v59, %v9539_v46  ;;  %v2982_v35 = vmax.f32 %v2962_v56, %v9544_v3  ;;  %v10103_v21 = vld [vmem:[#allocation2 + $0x80] sm:$0xff]  ;;  %v14943_v16 = vld [vmem:[#allocation13_spill] sm:$0xff] }
 0x1b0   :  { %6293 = vmatmul.mubr.msk.bf16.gmra.mrb[24].mxu0 %vm15_vm0, %v1916_v23  ;;  %v10105_v50 = vld [vmem:[#allocation2 + $0x88] sm:$0xff]  ;;  %v10107_v18 = vld [vmem:[#allocation2 + $0x90] sm:$0xff]  ;;  %v2983_v40 = vmax.f32 %v2963_v45, %v9554_v37  ;;  %v2168_v52 = vrot.slane %v10103_v21, 7  ;;  %v14638_v12 = vrot.slane %v10103_v21, 1  ;;  %3005 = vst.msk [vmem:[#allocation2 + $0x80] sm:$0xff] %vm15_vm0, %v2937_v54  ;;  %v2456_v59 = vrot.slane %v10103_v21, 6 }
 0x1b1   :  { %v2984_v46 = vmax.f32 %v2964_v55, %v9571_v13  ;;  %v14637_v27 = vrot.slane %v10105_v50, 7  ;;  %v2318_v28 = vrot.slane %v10105_v50, 1  ;;  %3006 = vst.msk [vmem:[#allocation2 + $0x88] sm:$0xff] %vm15_vm0, %v2938_v7  ;;  %3007 = vst.msk [vmem:[#allocation2 + $0x90] sm:$0xff] %vm15_vm0, %v2939_v31  ;;  %v14639_v13 = vrot.slane %v10107_v18, 1 }
 0x1b2   :  { %v10122_v37 = vld [vmem:[#allocation2 + $0x98] sm:$0xff] }
 0x1b3   :  { %v10128_v45 = vld [vmem:[#allocation3 + $0x80] sm:$0xff]  ;;  %v10130_v55 = vld [vmem:[#allocation3 + $0x88] sm:$0xff]  ;;  %v2186_v54 = vrot.slane %v10122_v37, 7  ;;  %v2204_v7 = vsel %vm334_vm2, %v2168_v52, %v14637_v27  ;;  %v2348_v31 = vsel %vm479_vm3, %v14638_v12, %v2318_v28  ;;  %3008 = vst.msk [vmem:[#allocation2 + $0x98] sm:$0x1] %vm216_vm1, %v2940_v20  ;;  %v2342_v27 = vsel %vm479_vm3, %v2318_v28, %v14639_v13 }
 0x1b4   :  { %v10143_v3 = vld [vmem:[#allocation3 + $0x90] sm:$0xff]  ;;  %v2229_v39 = vadd.f32 %v2204_v7, %v10105_v50  ;;  %v2240_v4 = vrot.slane %v10128_v45, 7  ;;  %v2246_v56 = vrot.slane %v10130_v55, 7  ;;  %3029 = vst.msk [vmem:[#allocation3 + $0x80] sm:$0xff] %vm15_vm0, %v2981_v5  ;;  %3030 = vst.msk [vmem:[#allocation3 + $0x88] sm:$0xff] %vm15_vm0, %v2982_v35  ;;  %v14642_v7 = vrot.slane %v10128_v45, 1 }
 0x1b5   :  { %v10145_v30 = vld [vmem:[#allocation3 + $0x98] sm:$0xff]  ;;  %v2210_v20 = vsel %vm334_vm2, %v2186_v54, %v2168_v52  ;;  %v2390_v38 = vrot.slane %v10130_v55, 1  ;;  %3031 = vst.msk [vmem:[#allocation3 + $0x90] sm:$0xff] %vm15_vm0, %v2983_v40  ;;  %v14646_v35 = vrot.slane %v10143_v3, 1  ;;  %v2528_v11 = vrot.slane %v10128_v45, 6 }
 0x1b6   :  { %v2258_v12 = vrot.slane %v10145_v30, 7  ;;  %3032 = vst.msk [vmem:[#allocation3 + $0x98] sm:$0x1] %vm216_vm1, %v2984_v46  ;;  %v2228_v23 = vadd.f32 %v2210_v20, %v10103_v21  ;;  %v2276_v5 = vsel %vm334_vm2, %v2240_v4, %v2246_v56  ;;  %v2373_v28 = vadd.f32 %v2342_v27, %v2229_v39 }
 0x1b7   :  { %v2301_v13 = vmax.f32 %v10130_v55, %v2276_v5  ;;  %v2420_v40 = vsel %vm479_vm3, %v14642_v7, %v2390_v38  ;;  %v14945_v46 = vrot.slane %v10105_v50, 6  ;;  %v14946_v27 = vrot.slane %v10122_v37, 6 }
 0x1b8   :  { %v2282_v52 = vsel %vm334_vm2, %v2258_v12, %v2240_v4  ;;  %v2372_v39 = vadd.f32 %v2348_v31, %v2228_v23  ;;  %v2414_v4 = vsel %vm479_vm3, %v2390_v38, %v14646_v35  ;;  %v2534_v41 = vrot.slane %v10130_v55, 6 }
 0x1b9   :  { %v2492_v20 = vsel %vm624_vm4, %v2456_v59, %v14945_v46  ;;  %v2300_v24 = vmax.f32 %v10128_v45, %v2282_v52  ;;  %v2498_v5 = vsel %vm624_vm4, %v14946_v27, %v2456_v59  ;;  %v2445_v9 = vmax.f32 %v2301_v13, %v2414_v4 }
 0x1ba   :  { %v2517_v7 = vadd.f32 %v2492_v20, %v2373_v28  ;;  %v2516_v10 = vadd.f32 %v2498_v5, %v2372_v39  ;;  %v2546_v23 = vrot.slane %v10145_v30, 6  ;;  %v2606_v31 = vrot.slane %v10105_v50, 2 }
 0x1bb   :  { %v2444_v46 = vmax.f32 %v2300_v24, %v2420_v40  ;;  %v2564_v38 = vsel %vm624_vm4, %v2528_v11, %v2534_v41  ;;  %v2612_v52 = vrot.slane %v10107_v18, 2  ;;  %v2672_v35 = vrot.slane %v10128_v45, 2 }
 0x1bc   :  { %v2678_v13 = vrot.slane %v10130_v55, 2  ;;  %v2570_v59 = vsel %vm624_vm4, %v2546_v23, %v2528_v11  ;;  %v2589_v28 = vmax.f32 %v2445_v9, %v2564_v38  ;;  %v14947_v24 = vrot.slane %v10103_v21, 2 }
 0x1bd   :  { %v2684_v20 = vrot.slane %v10143_v3, 2  ;;  %v2588_v39 = vmax.f32 %v2444_v46, %v2570_v59  ;;  %v2630_v4 = vsel %vm769_vm5, %v2606_v31, %v2612_v52  ;;  %v2180_v9 = vrot.slane %v10107_v18, 7 }
 0x1be   :  { %v2636_v40 = vsel %vm769_vm5, %v14947_v24, %v2606_v31  ;;  %v2708_v5 = vsel %vm769_vm5, %v2672_v35, %v2678_v13  ;;  %v2661_v55 = vadd.f32 %v2630_v4, %v2517_v7  ;;  %v2252_v38 = vrot.slane %v10143_v3, 7 }
 0x1bf   :  { %v2660_v27 = vadd.f32 %v2636_v40, %v2516_v10  ;;  %v2702_v11 = vsel %vm769_vm5, %v2678_v13, %v2684_v20  ;;  %v2732_v1 = vmax.f32 %v2588_v39, %v2708_v5  ;;  %v2330_v46 = vrot.slane %v10122_v37, 1  ;;  %v10220_v40 = vpop.f32.mrb[5].mxu0 }
 0x1c0   :  { %v2733_v24 = vmax.f32 %v2589_v28, %v2702_v11  ;;  %v2757_v59 = vmul.f32 0.033333335, %v2661_v55  ;;  %v2192_v10 = vsel %vm334_vm2, %v2180_v9, %v2186_v54  ;;  %v14948_v31 = vrot.slane %v10105_v50, 7 }
 0x1c1   :  { %v2756_v61 = vmul.f32 0.033333335, %v2660_v27  ;;  %v2264_v13 = vsel %vm334_vm2, %v2252_v38, %v2258_v12  ;;  %v2780_v4 = vmul.f32 0.5, %v2732_v1  ;;  %v2231_v27 = vadd.f32 %v2192_v10, %v10122_v37 }
 0x1c2   :  { %v2198_v7 = vsel %vm334_vm2, %v14948_v31, %v2180_v9  ;;  %v2781_v39 = vmul.f32 0.5, %v2733_v24  ;;  %v2270_v5 = vsel %vm334_vm2, %v2246_v56, %v2252_v38  ;;  %v2303_v54 = vmax.f32 %v10145_v30, %v2264_v13 }
 0x1c3   :  { %v2230_v28 = vadd.f32 %v2198_v7, %v10107_v18  ;;  %v14949_v55 = vrot.slane %v10107_v18, 1  ;;  %v14950_v12 = vrot.slane %v10103_v21, 1  ;;  %v2804_v9 = vadd.f32 %v2780_v4, %v2756_v61 }
 0x1c4   :  { %v2805_v24 = vadd.f32 %v2781_v39, %v2757_v59  ;;  %v2302_v31 = vmax.f32 %v10143_v3, %v2270_v5  ;;  %v2402_v56 = vrot.slane %v10145_v30, 1  ;;  %v2468_v38 = vrot.slane %v10107_v18, 6 }
 0x1c5   :  { %v2336_v11 = vsel %vm479_vm3, %v14949_v55, %v2330_v46  ;;  %v2354_v1 = vsel %vm479_vm3, %v2330_v46, %v14950_v12  ;;  %v2540_v13 = vrot.slane %v10143_v3, 6  ;;  %v2618_v55 = vrot.slane %v10122_v37, 2 }
 0x1c6   :  { %v2374_v10 = vadd.f32 %v2336_v11, %v2230_v28  ;;  %v2375_v7 = vadd.f32 %v2354_v1, %v2231_v27  ;;  %v2844_v32 = vpack.c.bf16 %v2805_v24, %v2804_v9  ;;  %v2690_v14 = vrot.slane %v10145_v30, 2 }
 0x1c7   :  { %v14952_v61 = vrot.slane %v14941_v53, 7  ;;  %v14953_v59 = vrot.slane %v10143_v3, 1  ;;  %v14954_v18 = vrot.slane %v10128_v45, 1  ;;  %v14955_v28 = vrot.slane %v10122_v37, 6 }
 0x1c8   :  { %v14956_v27 = vrot.slane %v10105_v50, 6  ;;  %6332 = vmatprep.mubr.msk.bf16.mxu1 %vm15_vm0, %v2844_v32  ;;  %v2552_v45 = vsel %vm624_vm4, %v2540_v13, %v2546_v23  ;;  %v2558_v37 = vsel %vm624_vm4, %v2534_v41, %v2540_v13  ;;  %v2624_v1 = vsel %vm769_vm5, %v2612_v52, %v2618_v55 }
 0x1c9   :  { %v1280_v46 = vsel %vm334_vm2, %v14952_v61, %v14951_v60  ;;  %v2408_v4 = vsel %vm479_vm3, %v14953_v59, %v2402_v56  ;;  %v2426_v39 = vsel %vm479_vm3, %v2402_v56, %v14954_v18  ;;  %v2480_v30 = vsel %vm624_vm4, %v2468_v38, %v14955_v28  ;;  %v14960_v59 = vld [vmem:[#allocation16_spill] sm:$0xff] }
 0x1ca   :  { %v2486_v60 = vsel %vm624_vm4, %v14956_v27, %v2468_v38  ;;  %v2446_v3 = vmax.f32 %v2302_v31, %v2408_v4  ;;  %v2447_v5 = vmax.f32 %v2303_v54, %v2426_v39  ;;  %v2519_v12 = vadd.f32 %v2480_v30, %v2375_v7  ;;  %v10296_v27 = vpop.f32.mrb[6].mxu0 }
 0x1cb   :  { %v2518_v11 = vadd.f32 %v2486_v60, %v2374_v10  ;;  %v14957_v50 = vrot.slane %v10103_v21, 2  ;;  %v2696_v10 = vsel %vm769_vm5, %v2684_v20, %v2690_v14  ;;  %v2714_v23 = vsel %vm769_vm5, %v2690_v14, %v2672_v35 }
 0x1cc   :  { %v2590_v24 = vmax.f32 %v2446_v3, %v2558_v37  ;;  %v2591_v32 = vmax.f32 %v2447_v5, %v2552_v45  ;;  %v14958_v41 = vmov %v14952_v61  ;;  %v14959_v7 = vrot.slane %v14942_v22, 7  ;;  %v14964_v5 = vld [vmem:[#allocation11_spill] sm:$0xff]  ;;  %v10307_v37 = vpop.f32.mrb[7].mxu0 }
 0x1cd   :  { %v2642_v9 = vsel %vm769_vm5, %v2618_v55, %v14957_v50  ;;  %v2662_v31 = vadd.f32 %v2624_v1, %v2518_v11  ;;  %v1296_v52 = vadd.f32 %v1280_v46, %v8217_v57  ;;  %v1334_v20 = vrot.slane %v14960_v59, 7 }
 0x1ce   :  { %v2663_v54 = vadd.f32 %v2642_v9, %v2519_v12  ;;  %v1286_v21 = vsel %vm334_vm2, %v14959_v7, %v14958_v41  ;;  %v2734_v56 = vmax.f32 %v2590_v24, %v2696_v10  ;;  %v2735_v38 = vmax.f32 %v2591_v32, %v2714_v23 }
 0x1cf   :  { %v2758_v13 = vmul.f32 0.033333335, %v2662_v31  ;;  %v1295_v61 = vadd.f32 %v1286_v21, %v14941_v53  ;;  %v14961_v4 = vrot.slane %v14944_v43, 7  ;;  %v14962_v14 = vrot.slane %v14943_v16, 7 }
 0x1d0   :  { %v2759_v55 = vmul.f32 0.033333335, %v2663_v54  ;;  %v1388_v18 = vrot.slane %v14941_v53, 1  ;;  %v2782_v39 = vmul.f32 0.5, %v2734_v56  ;;  %v2783_v28 = vmul.f32 0.5, %v2735_v38  ;;  %v14965_v54 = vld [vmem:[#allocation15_spill] sm:$0xff] }
 0x1d1   :  { %v1352_v35 = vsel %vm334_vm2, %v14962_v14, %v14961_v4  ;;  %v1394_v30 = vrot.slane %v8217_v57, 1  ;;  %v14963_v60 = vmov %v14962_v14  ;;  %v1400_v11 = vrot.slane %v14964_v5, 1 }
 0x1d2   :  { %v1368_v46 = vmax.f32 %v14944_v43, %v1352_v35  ;;  %v1358_v3 = vsel %vm334_vm2, %v1334_v20, %v14963_v60  ;;  %v14659_v12 = vrot.slane %v14943_v16, 1  ;;  %v1466_v45 = vrot.slane %v14944_v43, 1 }
 0x1d3   :  { %v2806_v1 = vadd.f32 %v2782_v39, %v2758_v13  ;;  %v2807_v50 = vadd.f32 %v2783_v28, %v2759_v55  ;;  %v1367_v9 = vmax.f32 %v14943_v16, %v1358_v3  ;;  %v1424_v24 = vsel %vm479_vm3, %v1388_v18, %v1394_v30  ;;  %v10335_v39 = vpop.f32.mrb[8].mxu0 }
 0x1d4   :  { %v1418_v32 = vsel %vm479_vm3, %v1394_v30, %v1400_v11  ;;  %v1439_v31 = vadd.f32 %v1424_v24, %v1295_v61  ;;  %v1472_v10 = vrot.slane %v14965_v54, 1  ;;  %v1496_v23 = vsel %vm479_vm3, %v14659_v12, %v1466_v45  ;;  %v10348_v3 = vpop.f32.mrb[9].mxu0 }
 0x1d5   :  { %v2831_v41 = vsel %vm72_vm6, %v2807_v50, 0.0  ;;  %v1440_v7 = vadd.f32 %v1418_v32, %v1296_v52  ;;  %v1511_v21 = vmax.f32 %v1367_v9, %v1496_v23  ;;  %v1532_v56 = vrot.slane %v14941_v53, 6  ;;  %v10358_v24 = vpop.f32.mrb[10].mxu0 }
 0x1d6   :  { %v2845_v38 = vpack.c.bf16 %v2831_v41, %v2806_v1  ;;  %v1490_v13 = vsel %vm479_vm3, %v1466_v45, %v1472_v10  ;;  %v14656_v55 = vrot.slane %v8217_v57, 6  ;;  %v14658_v61 = vrot.slane %v14942_v22, 6 }
 0x1d7   :  { %v1512_v4 = vmax.f32 %v1368_v46, %v1490_v13  ;;  %v1604_v14 = vrot.slane %v14943_v16, 6  ;;  %v14654_v35 = vrot.slane %v14944_v43, 6  ;;  %v14655_v52 = vrot.slane %v14960_v59, 6 }
 0x1d8   :  { %6333 = vmatmul.mubr.msk.bf16.gmra.mrb[16].mxu1 %vm15_vm0, %v2845_v38  ;;  %v1568_v28 = vsel %vm624_vm4, %v1532_v56, %v14656_v55  ;;  %v1574_v46 = vsel %vm624_vm4, %v14658_v61, %v1532_v56  ;;  %v14652_v30 = vrot.slane %v14941_v53, 2  ;;  %v1682_v60 = vrot.slane %v8217_v57, 2 }
 0x1d9   :  { %v1583_v45 = vadd.f32 %v1574_v46, %v1439_v31  ;;  %v1584_v1 = vadd.f32 %v1568_v28, %v1440_v7  ;;  %v1640_v50 = vsel %vm624_vm4, %v1604_v14, %v14654_v35  ;;  %v1646_v9 = vsel %vm624_vm4, %v14655_v52, %v1604_v14  ;;  %v10365_v7 = vpop.f32.mrb[11].mxu0  ;;  %v10370_v28 = vpop.f32.mrb[0].mxu1 }
 0x1da   :  { %v1655_v32 = vmax.f32 %v1511_v21, %v1646_v9  ;;  %v1656_v23 = vmax.f32 %v1512_v4, %v1640_v50  ;;  %v14653_v41 = vrot.slane %v14964_v5, 2  ;;  %v1712_v31 = vsel %vm769_vm5, %v14652_v30, %v1682_v60 }
 0x1db   :  { %v1727_v56 = vadd.f32 %v1712_v31, %v1583_v45  ;;  %v14660_v38 = vrot.slane %v14943_v16, 2  ;;  %v1754_v13 = vrot.slane %v14944_v43, 2  ;;  %v14657_v14 = vrot.slane %v14965_v54, 2  ;;  %v10379_v45 = vpop.f32.mrb[1].mxu1 }
 0x1dc   :  { %v1706_v21 = vsel %vm769_vm5, %v1682_v60, %v14653_v41  ;;  %v1256_v4 = vrot.slane %v14964_v5, 7  ;;  %v1328_v46 = vrot.slane %v14965_v54, 7  ;;  %v1406_v50 = vrot.slane %v14942_v22, 1  ;;  %v10389_v41 = vpop.f32.mrb[2].mxu1 }
 0x1dd   :  { %v1728_v9 = vadd.f32 %v1706_v21, %v1584_v1  ;;  %v1778_v31 = vsel %vm769_vm5, %v1754_v13, %v14657_v14  ;;  %v1784_v30 = vsel %vm769_vm5, %v14660_v38, %v1754_v13  ;;  %v1823_v60 = vmul.f32 0.033333335, %v1727_v56  ;;  %v10399_v61 = vpop.f32.mrb[3].mxu1 }
 0x1de   :  { %v1799_v35 = vmax.f32 %v1655_v32, %v1784_v30  ;;  %v1800_v52 = vmax.f32 %v1656_v23, %v1778_v31  ;;  %v14966_v55 = vrot.slane %v14942_v22, 7  ;;  %v14967_v21 = vrot.slane %v8217_v57, 7 }
 0x1df   :  { %v1824_v12 = vmul.f32 0.033333335, %v1728_v9  ;;  %v1340_v30 = vsel %vm334_vm2, %v1328_v46, %v1334_v20  ;;  %v1430_v20 = vsel %vm479_vm3, %v1406_v50, %v1388_v18  ;;  %v1616_v18 = vrot.slane %v14965_v54, 6 }
 0x1e0   :  { %v1268_v1 = vsel %vm334_vm2, %v1256_v4, %v14966_v55  ;;  %v1274_v14 = vsel %vm334_vm2, %v14967_v21, %v1256_v4  ;;  %v1847_v32 = vmul.f32 0.5, %v1799_v35  ;;  %v1848_v23 = vmul.f32 0.5, %v1800_v52 }
 0x1e1   :  { %v1297_v13 = vadd.f32 %v1274_v14, %v14964_v5  ;;  %v1298_v56 = vadd.f32 %v1268_v1, %v14942_v22  ;;  %v14968_v55 = vrot.slane %v14944_v43, 7  ;;  %v1370_v4 = vmax.f32 %v14960_v59, %v1340_v30 }
 0x1e2   :  { %v1412_v14 = vsel %vm479_vm3, %v1400_v11, %v1406_v50  ;;  %v1478_v35 = vrot.slane %v14960_v59, 1  ;;  %v1871_v52 = vadd.f32 %v1847_v32, %v1823_v60  ;;  %v1872_v1 = vadd.f32 %v1848_v23, %v1824_v12 }
 0x1e3   :  { %v1346_v31 = vsel %vm334_vm2, %v14968_v55, %v1328_v46  ;;  %v1441_v21 = vadd.f32 %v1412_v14, %v1297_v13  ;;  %v1442_v46 = vadd.f32 %v1430_v20, %v1298_v56  ;;  %v14969_v55 = vrot.slane %v14943_v16, 1  ;;  %v6100_v13 = vld [vmem:[%s14556_s0 + $0x440] sm:$0xff] }
 0x1e4   :  { %v1369_v9 = vmax.f32 %v14965_v54, %v1346_v31  ;;  %v1484_v30 = vsel %vm479_vm3, %v1472_v10, %v1478_v35  ;;  %v1544_v31 = vrot.slane %v14964_v5, 6  ;;  %v1917_v50 = vpack.c.bf16 %v1872_v1, %v1871_v52  ;;  %v10439_v10 = vld [vmem:[%s14556_s0 + $0x448] sm:$0xff]  ;;  %v6104_v56 = vld [vmem:[%s14556_s0 + $0x460] sm:$0xff]  ;;  %v6106_v1 = vld [vmem:[%s14556_s0 + $0x470] sm:$0xff] }
 0x1e5   :  { %v1502_v11 = vsel %vm479_vm3, %v1478_v35, %v14969_v55  ;;  %v1694_v12 = vrot.slane %v14942_v22, 2  ;;  %v14970_v32 = vrot.slane %v14942_v22, 6  ;;  %v14972_v14 = vrot.slane %v14960_v59, 6  ;;  %v6102_v22 = vld [vmem:[%s14556_s0 + $0x450] sm:$0xff] }
 0x1e6   :  { %v1513_v38 = vmax.f32 %v1369_v9, %v1484_v30  ;;  %v1514_v60 = vmax.f32 %v1370_v4, %v1502_v11  ;;  %v14971_v4 = vrot.slane %v8217_v57, 6  ;;  %v14973_v35 = vrot.slane %v14944_v43, 6  ;;  %v6105_v57 = vld [vmem:[%s14556_s0 + $0x468] sm:$0xff]  ;;  %6296 = vmatprep.mubr.msk.bf16.mxu0 %vm15_vm0, %v1917_v50 }
 0x1e7   :  { %v1556_v23 = vsel %vm624_vm4, %v1544_v31, %v14970_v32  ;;  %v1628_v20 = vsel %vm624_vm4, %v1616_v18, %v14972_v14  ;;  %v14974_v32 = vrot.slane %v14964_v5, 2  ;;  %v14975_v14 = vrot.slane %v14941_v53, 2 }
 0x1e8   :  { %v1562_v9 = vsel %vm624_vm4, %v14971_v4, %v1544_v31  ;;  %v1634_v52 = vsel %vm624_vm4, %v14973_v35, %v1616_v18  ;;  %v1586_v55 = vadd.f32 %v1556_v23, %v1442_v46  ;;  %v1658_v11 = vmax.f32 %v1514_v60, %v1628_v20  ;;  %v6103_v31 = vld [vmem:[%s14556_s0 + $0x458] sm:$0x1]  ;;  %v10485_v23 = vld [vmem:[#allocation2 + $0xa0] sm:$0xff]  ;;  %v10489_v20 = vld [vmem:[#allocation2 + $0xb0] sm:$0xff] }
 0x1e9   :  { %v1585_v30 = vadd.f32 %v1562_v9, %v1441_v21  ;;  %v1657_v43 = vmax.f32 %v1513_v38, %v1634_v52  ;;  %v6107_v18 = vld [vmem:[%s14556_s0 + $0x478] sm:$0x1]  ;;  %v1700_v4 = vsel %vm769_vm5, %v14974_v32, %v1694_v12  ;;  %v1718_v21 = vsel %vm769_vm5, %v1694_v12, %v14975_v14  ;;  %v10487_v9 = vld [vmem:[#allocation2 + $0xa8] sm:$0xff]  ;;  %14977 = vst [vmem:[#allocation12_spill] sm:$0xff] %v10489_v20 }
 0x1ea   :  { %v1766_v38 = vrot.slane %v14960_v59, 2  ;;  %v1996_v46 = vadd.f32 %v6104_v56, %v6100_v13  ;;  %v1730_v60 = vadd.f32 %v1718_v21, %v1586_v55  ;;  %14976 = vst [vmem:[#allocation10_spill] sm:$0xff] %v10487_v9  ;;  %v1997_v5 = vadd.f32 %v6105_v57, %v10439_v10 }
 0x1eb   :  { %v1729_v50 = vadd.f32 %v1700_v4, %v1585_v30  ;;  %v1998_v35 = vadd.f32 %v6106_v1, %v6102_v22  ;;  %v14978_v52 = vrot.slane %v14965_v54, 2  ;;  %v14979_v12 = vrot.slane %v14943_v16, 2  ;;  %v10500_v30 = vld [vmem:[#allocation2 + $0xb8] sm:$0xff]  ;;  %v6148_v4 = vld [vmem:[%s14556_s0 + $0x5c0] sm:$0xff]  ;;  %v6149_v54 = vld [vmem:[%s14556_s0 + $0x5c8] sm:$0xff] }
 0x1ec   :  { %14980 = vst [vmem:[#allocation13_spill] sm:$0xff] %v10500_v30  ;;  %v1999_v55 = vadd.f32 %v6107_v18, %v6103_v31  ;;  %v2020_v32 = vadd.f32 %v9940_v17, %v1996_v46  ;;  %v1826_v16 = vmul.f32 0.033333335, %v1730_v60  ;;  %v6153_v46 = vld [vmem:[%s14556_s0 + $0x5e8] sm:$0xff]  ;;  %v2021_v20 = vadd.f32 %v9976_v19, %v1997_v5  ;;  %v6150_v5 = vld [vmem:[%s14556_s0 + $0x5d0] sm:$0xff] }
 0x1ed   :  { %v1772_v53 = vsel %vm769_vm5, %v14978_v52, %v1766_v38  ;;  %v1790_v59 = vsel %vm769_vm5, %v1766_v38, %v14979_v12  ;;  %v1825_v52 = vmul.f32 0.033333335, %v1729_v50  ;;  %v6152_v38 = vld [vmem:[%s14556_s0 + $0x5e0] sm:$0xff]  ;;  %v2022_v30 = vadd.f32 %v9981_v0, %v1998_v35  ;;  %v6154_v35 = vld [vmem:[%s14556_s0 + $0x5f0] sm:$0xff] }
 0x1ee   :  { %v1801_v14 = vmax.f32 %v1657_v43, %v1772_v53  ;;  %v1802_v21 = vmax.f32 %v1658_v11, %v1790_v59  ;;  %v10515_v12 = vld [vmem:[#allocation3 + $0xa0] sm:$0xff]  ;;  %v2023_v9 = vadd.f32 %v10001_v44, %v1999_v55  ;;  %v2044_v43 = vmax.f32 %v6100_v13, %v6104_v56  ;;  %2088 = vst.msk [vmem:[#allocation2 + $0xa0] sm:$0xff] %vm15_vm0, %v2020_v32  ;;  %v6151_v11 = vld [vmem:[%s14556_s0 + $0x5d8] sm:$0x1]  ;;  %v10534_v56 = vld [vmem:[#allocation3 + $0xa8] sm:$0xff] }
 0x1ef   :  { %14981 = vst [vmem:[#allocation14_spill] sm:$0xff] %v10515_v12  ;;  %v2045_v53 = vmax.f32 %v10439_v10, %v6105_v57  ;;  %v2046_v59 = vmax.f32 %v6102_v22, %v6106_v1  ;;  %v6155_v13 = vld [vmem:[%s14556_s0 + $0x5f8] sm:$0x1]  ;;  %14982 = vst [vmem:[#allocation16_spill] sm:$0xff] %v10534_v56  ;;  %v10536_v55 = vld [vmem:[#allocation3 + $0xb0] sm:$0xff]  ;;  %v2047_v32 = vmax.f32 %v6103_v31, %v6107_v18 }
 0x1f0   :  { %v1849_v50 = vmul.f32 0.5, %v1801_v14  ;;  %v1850_v60 = vmul.f32 0.5, %v1802_v21  ;;  %14983 = vst [vmem:[#allocation11_spill] sm:$0xff] %v10536_v55  ;;  %v2064_v10 = vmax.f32 %v2044_v43, %v9940_v17  ;;  %2089 = vst.msk [vmem:[#allocation2 + $0xa8] sm:$0xff] %vm15_vm0, %v2021_v20  ;;  %v2917_v22 = vadd.f32 %v6152_v38, %v6148_v4  ;;  %v10542_v21 = vld [vmem:[#allocation3 + $0xb8] sm:$0xff] }
 0x1f1   :  { %2090 = vst.msk [vmem:[#allocation2 + $0xb0] sm:$0xff] %vm15_vm0, %v2022_v30  ;;  %v2918_v57 = vadd.f32 %v6153_v46, %v6149_v54  ;;  %14984 = vst [vmem:[#allocation15_spill] sm:$0xff] %v10542_v21  ;;  %v2065_v12 = vmax.f32 %v2045_v53, %v9976_v19  ;;  %v2066_v56 = vmax.f32 %v2046_v59, %v9981_v0 }
 0x1f2   :  { %2091 = vst.msk [vmem:[#allocation2 + $0xb8] sm:$0x1] %vm216_vm1, %v2023_v9  ;;  %v1873_v1 = vadd.f32 %v1849_v50, %v1825_v52  ;;  %v1874_v14 = vadd.f32 %v1850_v60, %v1826_v16  ;;  %v2067_v31 = vmax.f32 %v2047_v32, %v10001_v44  ;;  %v2919_v17 = vadd.f32 %v6154_v35, %v6150_v5  ;;  %v3769_v50 = vld [vmem:[%s14557_s2] sm:$0x7] }
 0x1f3   :  { %2112 = vst.msk [vmem:[#allocation3 + $0xa0] sm:$0xff] %vm15_vm0, %v2064_v10  ;;  %v2920_v18 = vadd.f32 %v6155_v13, %v6151_v11  ;;  %v2941_v20 = vadd.f32 %v10025_v48, %v2917_v22  ;;  %2113 = vst.msk [vmem:[#allocation3 + $0xa8] sm:$0xff] %vm15_vm0, %v2065_v12  ;;  %v2942_v30 = vadd.f32 %v10047_v2, %v2918_v57 }
 0x1f4   :  { %v1898_v9 = vsel %vm72_vm6, %v1874_v14, 0.0  ;;  %2114 = vst.msk [vmem:[#allocation3 + $0xb0] sm:$0xff] %vm15_vm0, %v2066_v56  ;;  %v2965_v19 = vmax.f32 %v6148_v4, %v6152_v38  ;;  %v2966_v52 = vmax.f32 %v6149_v54, %v6153_v46  ;;  %v2943_v44 = vadd.f32 %v10052_v63, %v2919_v17 }
 0x1f5   :  { %v1918_v0 = vpack.c.bf16 %v1898_v9, %v1873_v1  ;;  %2115 = vst.msk [vmem:[#allocation3 + $0xb8] sm:$0x1] %vm216_vm1, %v2067_v31  ;;  %v2944_v16 = vadd.f32 %v10068_v33, %v2920_v18  ;;  %v2967_v43 = vmax.f32 %v6150_v5, %v6154_v35  ;;  %v10560_v60 = vld [vmem:[#allocation2 + $0xa0] sm:$0xff]  ;;  %v2968_v12 = vmax.f32 %v6151_v11, %v6155_v13 }
 0x1f6   :  { %v2985_v53 = vmax.f32 %v2965_v19, %v10025_v48  ;;  %v3780_v4 = vsub.s32 0, %v6664_v6  ;;  %v2169_v54 = vrot.slane %v10560_v60, 7  ;;  %v14666_v38 = vrot.slane %v10560_v60, 1  ;;  %3009 = vst.msk [vmem:[#allocation2 + $0xa0] sm:$0xff] %vm15_vm0, %v2941_v20 }
 0x1f7   :  { %6297 = vmatmul.mubr.msk.bf16.gmra.mrb[28].mxu0 %vm15_vm0, %v1918_v0  ;;  %v2457_v46 = vrot.slane %v10560_v60, 6  ;;  %v2986_v59 = vmax.f32 %v2966_v52, %v10047_v2  ;;  %v10570_v5 = vld [vmem:[#allocation2 + $0xa8] sm:$0xff]  ;;  %v14672_v48 = vrot.slane %v10560_v60, 2  ;;  %v2987_v13 = vmax.f32 %v2967_v43, %v10052_v63 }
 0x1f8   :  { %v10572_v35 = vld [vmem:[#allocation2 + $0xb0] sm:$0xff]  ;;  %v2988_v56 = vmax.f32 %v2968_v12, %v10068_v33  ;;  %v10579_v32 = vrot.slane %v3769_v50, %v3780_v4  ;;  %v14669_v10 = vrot.slane %v10570_v5, 7  ;;  %v2319_v22 = vrot.slane %v10570_v5, 1  ;;  %3010 = vst.msk [vmem:[#allocation2 + $0xa8] sm:$0xff] %vm15_vm0, %v2942_v30 }
 0x1f9   :  { %v10574_v11 = vld [vmem:[#allocation2 + $0xb8] sm:$0xff]  ;;  %v14667_v57 = vrot.slane %v10572_v35, 1  ;;  %3011 = vst.msk [vmem:[#allocation2 + $0xb0] sm:$0xff] %vm15_vm0, %v2943_v44  ;;  %v14668_v63 = vrot.slane %v10570_v5, 6  ;;  %v2607_v14 = vrot.slane %v10570_v5, 2  ;;  %v14670_v31 = vrot.slane %v10572_v35, 2 }
 0x1fa   :  { %v2187_v2 = vrot.slane %v10574_v11, 7  ;;  %3012 = vst.msk [vmem:[#allocation2 + $0xb8] sm:$0x1] %vm216_vm1, %v2944_v16  ;;  %v10588_v1 = vld [vmem:[#allocation3 + $0xa0] sm:$0xff]  ;;  %v14671_v33 = vrot.slane %v10574_v11, 6  ;;  %v10594_v17 = vld [vmem:[#allocation3 + $0xa8] sm:$0xff]  ;;  %v2205_v20 = vsel %vm334_vm2, %v2169_v54, %v14669_v10  ;;  %v2349_v43 = vsel %vm479_vm3, %v14666_v38, %v2319_v22 }
 0x1fb   :  { %v10596_v18 = vld [vmem:[#allocation3 + $0xb0] sm:$0xff]  ;;  %v2241_v30 = vrot.slane %v10588_v1, 7  ;;  %v2343_v19 = vsel %vm479_vm3, %v2319_v22, %v14667_v57  ;;  %3033 = vst.msk [vmem:[#allocation3 + $0xa0] sm:$0xff] %vm15_vm0, %v2985_v53  ;;  %v2233_v44 = vadd.f32 %v2205_v20, %v10570_v5  ;;  %v2247_v16 = vrot.slane %v10594_v17, 7  ;;  %3034 = vst.msk [vmem:[#allocation3 + $0xa8] sm:$0xff] %vm15_vm0, %v2986_v59 }
 0x1fc   :  { %v2211_v9 = vsel %vm334_vm2, %v2187_v2, %v2169_v54  ;;  %v10612_v52 = vld [vmem:[#allocation3 + $0xb8] sm:$0xff]  ;;  %3035 = vst.msk [vmem:[#allocation3 + $0xb0] sm:$0xff] %vm15_vm0, %v2987_v13  ;;  %v2385_v12 = vrot.slane %v10588_v1, 1  ;;  %v2391_v53 = vrot.slane %v10594_v17, 1  ;;  %v2397_v4 = vrot.slane %v10596_v18, 1 }
 0x1fd   :  { %v2232_v0 = vadd.f32 %v2211_v9, %v10560_v60  ;;  %v2259_v50 = vrot.slane %v10612_v52, 7  ;;  %3036 = vst.msk [vmem:[#allocation3 + $0xb8] sm:$0x1] %vm216_vm1, %v2988_v56  ;;  %v2277_v54 = vsel %vm334_vm2, %v2241_v30, %v2247_v16  ;;  %v2377_v9 = vadd.f32 %v2343_v19, %v2233_v44 }
 0x1fe   :  { %v2493_v59 = vsel %vm624_vm4, %v2457_v46, %v14668_v63  ;;  %v2305_v22 = vmax.f32 %v10594_v17, %v2277_v54  ;;  %v2415_v38 = vsel %vm479_vm3, %v2391_v53, %v2397_v4  ;;  %v2421_v56 = vsel %vm479_vm3, %v2385_v12, %v2391_v53 }
 0x1ff   :  { %v2376_v20 = vadd.f32 %v2349_v43, %v2232_v0  ;;  %v2283_v13 = vsel %vm334_vm2, %v2259_v50, %v2241_v30  ;;  %v2499_v19 = vsel %vm624_vm4, %v14671_v33, %v2457_v46  ;;  %v2521_v0 = vadd.f32 %v2493_v59, %v2377_v9 }
 0x200   :  { %v2304_v57 = vmax.f32 %v10588_v1, %v2283_v13  ;;  %v2529_v44 = vrot.slane %v10588_v1, 6  ;;  %v2449_v43 = vmax.f32 %v2305_v22, %v2415_v38  ;;  %v2535_v54 = vrot.slane %v10594_v17, 6 }
 0x201   :  { %v2520_v30 = vadd.f32 %v2499_v19, %v2376_v20  ;;  %v2547_v63 = vrot.slane %v10612_v52, 6  ;;  %v2631_v53 = vsel %vm769_vm5, %v2607_v14, %v14670_v31  ;;  %v2637_v46 = vsel %vm769_vm5, %v14672_v48, %v2607_v14 }
 0x202   :  { %v2448_v10 = vmax.f32 %v2304_v57, %v2421_v56  ;;  %v2673_v9 = vrot.slane %v10588_v1, 2  ;;  %v2565_v38 = vsel %vm624_vm4, %v2529_v44, %v2535_v54  ;;  %v2665_v57 = vadd.f32 %v2631_v53, %v2521_v0 }
 0x203   :  { %v2571_v20 = vsel %vm624_vm4, %v2547_v63, %v2529_v44  ;;  %v2664_v59 = vadd.f32 %v2637_v46, %v2520_v30  ;;  %v2593_v22 = vmax.f32 %v2449_v43, %v2565_v38  ;;  %v2679_v56 = vrot.slane %v10594_v17, 2 }
 0x204   :  { %v2592_v13 = vmax.f32 %v2448_v10, %v2571_v20  ;;  %v2685_v19 = vrot.slane %v10596_v18, 2  ;;  %v2761_v33 = vmul.f32 0.033333335, %v2665_v57  ;;  %v2181_v14 = vrot.slane %v10572_v35, 7 }
 0x205   :  { %v2760_v31 = vmul.f32 0.033333335, %v2664_v59  ;;  %v2253_v1 = vrot.slane %v10596_v18, 7  ;;  %v2709_v44 = vsel %vm769_vm5, %v2673_v9, %v2679_v56  ;;  %v2331_v0 = vrot.slane %v10574_v11, 1 }
 0x206   :  { %v2703_v48 = vsel %vm769_vm5, %v2679_v56, %v2685_v19  ;;  %v2403_v10 = vrot.slane %v10612_v52, 1  ;;  %v2736_v43 = vmax.f32 %v2592_v13, %v2709_v44  ;;  %v2193_v30 = vsel %vm334_vm2, %v2181_v14, %v2187_v2 }
 0x207   :  { %v2737_v17 = vmax.f32 %v2593_v22, %v2703_v48  ;;  %v14985_v53 = vrot.slane %v10570_v5, 7  ;;  %v2235_v20 = vadd.f32 %v2193_v30, %v10574_v11  ;;  %v2265_v59 = vsel %vm334_vm2, %v2253_v1, %v2259_v50 }
 0x208   :  { %v2271_v48 = vsel %vm334_vm2, %v2247_v16, %v2253_v1  ;;  %v2784_v57 = vmul.f32 0.5, %v2736_v43  ;;  %v2307_v2 = vmax.f32 %v10612_v52, %v2265_v59  ;;  %v14986_v56 = vrot.slane %v10572_v35, 1 }
 0x209   :  { %v2199_v46 = vsel %vm334_vm2, %v14985_v53, %v2181_v14  ;;  %v2785_v13 = vmul.f32 0.5, %v2737_v17  ;;  %v2306_v22 = vmax.f32 %v10596_v18, %v2271_v48  ;;  %v14987_v44 = vrot.slane %v10560_v60, 1 }
 0x20a   :  { %v2234_v38 = vadd.f32 %v2199_v46, %v10572_v35  ;;  %v2337_v14 = vsel %vm479_vm3, %v14986_v56, %v2331_v0  ;;  %v2409_v50 = vsel %vm479_vm3, %v2397_v4, %v2403_v10  ;;  %v2427_v16 = vsel %vm479_vm3, %v2403_v10, %v2385_v12 }
 0x20b   :  { %v2355_v30 = vsel %vm479_vm3, %v2331_v0, %v14987_v44  ;;  %v2808_v1 = vadd.f32 %v2784_v57, %v2760_v31  ;;  %v2809_v43 = vadd.f32 %v2785_v13, %v2761_v33  ;;  %v2450_v46 = vmax.f32 %v2306_v22, %v2409_v50 }
 0x20c   :  { %v2378_v17 = vadd.f32 %v2337_v14, %v2234_v38  ;;  %v2379_v53 = vadd.f32 %v2355_v30, %v2235_v20  ;;  %v2451_v59 = vmax.f32 %v2307_v2, %v2427_v16  ;;  %v2469_v48 = vrot.slane %v10572_v35, 6 }
 0x20d   :  { %v2541_v56 = vrot.slane %v10596_v18, 6  ;;  %v2846_v55 = vpack.c.bf16 %v2809_v43, %v2808_v1  ;;  %v2619_v21 = vrot.slane %v10574_v11, 2  ;;  %v2691_v0 = vrot.slane %v10612_v52, 2 }
 0x20e   :  { %v10706_v4 = vadd.f32 %v9849_v25, %v10579_v32  ;;  %v14989_v31 = vrot.slane %v10574_v11, 6  ;;  %v14990_v12 = vrot.slane %v10570_v5, 6  ;;  %v14991_v57 = vrot.slane %v10572_v35, 2 }
 0x20f   :  { %v2553_v18 = vsel %vm624_vm4, %v2541_v56, %v2547_v63  ;;  %v2559_v52 = vsel %vm624_vm4, %v2535_v54, %v2541_v56  ;;  %6336 = vmatprep.mubr.msk.bf16.mxu1 %vm15_vm0, %v2846_v55  ;;  %v14992_v13 = vrot.slane %v10560_v60, 2  ;;  %v2697_v63 = vsel %vm769_vm5, %v2685_v19, %v2691_v0  ;;  %v10734_v54 = vpop.f32.mrb[12].mxu0 }
 0x210   :  { %14988 = vst [vmem:[#allocation28_spill] sm:$0xff] %v10706_v4  ;;  %v2481_v33 = vsel %vm624_vm4, %v2469_v48, %v14989_v31  ;;  %v2487_v10 = vsel %vm624_vm4, %v14990_v12, %v2469_v48  ;;  %v2594_v20 = vmax.f32 %v2450_v46, %v2559_v52  ;;  %v2595_v11 = vmax.f32 %v2451_v59, %v2553_v18  ;;  %v10736_v30 = vpop.f32.mrb[13].mxu0 }
 0x211   :  { %v2522_v25 = vadd.f32 %v2487_v10, %v2378_v17  ;;  %v2523_v38 = vadd.f32 %v2481_v33, %v2379_v53  ;;  %v2625_v5 = vsel %vm769_vm5, %v14991_v57, %v2619_v21  ;;  %v2643_v22 = vsel %vm769_vm5, %v2619_v21, %v14992_v13  ;;  %4371 = vadd.xlane.f32.xlu1 %v10706_v4  ;;  %v10746_v19 = vpop.f32.mrb[14].mxu0 }
 0x212   :  { %v2715_v55 = vsel %vm769_vm5, %v2691_v0, %v2673_v9  ;;  %v2738_v14 = vmax.f32 %v2594_v20, %v2697_v63  ;;  %v10740_v60 = vadd.f32 %v9862_v49, %v10579_v32  ;;  %v10744_v21 = vadd.f32 %v9872_v47, %v10579_v32  ;;  %v10748_v9 = vpop.f32.mrb[4].mxu1  ;;  %v10758_v53 = vpop.f32.mrb[15].mxu0 }
 0x213   :  { %v2666_v2 = vadd.f32 %v2625_v5, %v2522_v25  ;;  %v2667_v35 = vadd.f32 %v2643_v22, %v2523_v38  ;;  %v2739_v44 = vmax.f32 %v2595_v11, %v2715_v55  ;;  %v10752_v17 = vadd.f32 %v9882_v58, %v10579_v32  ;;  %v10760_v46 = vpop.f32.mrb[5].mxu1  ;;  %v14996_v55 = vld [vmem:[#allocation17_spill] sm:$0xff] }
 0x214   :  { %14993 = vst [vmem:[#allocation29_spill] sm:$0xff] %v10740_v60  ;;  %14994 = vst [vmem:[#allocation30_spill] sm:$0xff] %v10744_v21  ;;  %v2786_v1 = vmul.f32 0.5, %v2738_v14  ;;  %4367 = vadd.xlane.f32.xlu0 %v10740_v60  ;;  %v1245_v49 = vrot.slane %v8886_v26, 7  ;;  %v1251_v47 = vrot.slane %v8896_v36, 7  ;;  %v1263_v56 = vrot.slane %v8900_v62, 7 }
 0x215   :  { %v2762_v50 = vmul.f32 0.033333335, %v2666_v2  ;;  %v2763_v16 = vmul.f32 0.033333335, %v2667_v35  ;;  %v2787_v43 = vmul.f32 0.5, %v2739_v44  ;;  %14995 = vst [vmem:[#allocation31_spill] sm:$0xff] %v10752_v17  ;;  %4373 = vadd.xlane.f32.xlu1 %v10744_v21 }
 0x216   :  { %v1317_v0 = vrot.slane %v8906_v15, 7  ;;  %v10764_v58 = vpop.f32.mrb[6].mxu1  ;;  %v1281_v31 = vsel %vm334_vm2, %v1245_v49, %v1251_v47  ;;  %v1323_v33 = vrot.slane %v8970_v51, 7  ;;  %v1335_v12 = vrot.slane %v8974_v29, 7 }
 0x217   :  { %v2810_v59 = vadd.f32 %v2786_v1, %v2762_v50  ;;  %v2811_v48 = vadd.f32 %v2787_v43, %v2763_v16  ;;  %v14678_v10 = vrot.slane %v8886_v26, 1  ;;  %v10773_v18 = vpop.f32.mrb[7].mxu1  ;;  %v1287_v25 = vsel %vm334_vm2, %v1263_v56, %v1245_v49  ;;  %v14997_v16 = vld [vmem:[#allocation18_spill] sm:$0xff] }
 0x218   :  { %v1300_v38 = vadd.f32 %v1281_v31, %v8896_v36  ;;  %v1395_v20 = vrot.slane %v8896_v36, 1  ;;  %v1299_v57 = vadd.f32 %v1287_v25, %v8886_v26  ;;  %v1353_v5 = vsel %vm334_vm2, %v1317_v0, %v1323_v33 }
 0x219   :  { %v2835_v52 = vsel %vm72_vm6, %v2811_v48, 0.0  ;;  %v1359_v13 = vsel %vm334_vm2, %v1335_v12, %v1317_v0  ;;  %v1372_v63 = vmax.f32 %v8970_v51, %v1353_v5  ;;  %v1401_v2 = vrot.slane %v14996_v55, 1 }
 0x21a   :  { %v2847_v11 = vpack.c.bf16 %v2835_v52, %v2810_v59  ;;  %v1371_v22 = vmax.f32 %v8906_v15, %v1359_v13  ;;  %v1425_v35 = vsel %vm479_vm3, %v14678_v10, %v1395_v20  ;;  %v14675_v44 = vrot.slane %v8906_v15, 1 }
 0x21b   :  { %v1443_v14 = vadd.f32 %v1425_v35, %v1299_v57  ;;  %v1467_v50 = vrot.slane %v8970_v51, 1  ;;  %v14677_v1 = vrot.slane %v14997_v16, 1  ;;  %v1419_v43 = vsel %vm479_vm3, %v1395_v20, %v1401_v2 }
 0x21c   :  { %6337 = vmatmul.mubr.msk.bf16.gmra.mrb[20].mxu1 %vm15_vm0, %v2847_v11  ;;  %v1533_v49 = vrot.slane %v8886_v26, 6  ;;  %v14676_v59 = vrot.slane %v8896_v36, 6  ;;  %v1551_v48 = vrot.slane %v8900_v62, 6  ;;  %v1444_v0 = vadd.f32 %v1419_v43, %v1300_v38 }
 0x21d   :  { %v1491_v31 = vsel %vm479_vm3, %v1467_v50, %v14677_v1  ;;  %v1497_v52 = vsel %vm479_vm3, %v14675_v44, %v1467_v50  ;;  %v1605_v25 = vrot.slane %v8906_v15, 6  ;;  %v1611_v35 = vrot.slane %v8970_v51, 6 }
 0x21e   :  { %v1515_v20 = vmax.f32 %v1371_v22, %v1497_v52  ;;  %v1516_v11 = vmax.f32 %v1372_v63, %v1491_v31  ;;  %v1569_v57 = vsel %vm624_vm4, %v1533_v49, %v14676_v59  ;;  %v1575_v38 = vsel %vm624_vm4, %v1551_v48, %v1533_v49 }
 0x21f   :  { %v1587_v5 = vadd.f32 %v1575_v38, %v1443_v14  ;;  %v1588_v13 = vadd.f32 %v1569_v57, %v1444_v0  ;;  %v1623_v43 = vrot.slane %v8974_v29, 6  ;;  %v1677_v50 = vrot.slane %v8886_v26, 2 }
 0x220   :  { %v1683_v44 = vrot.slane %v8896_v36, 2  ;;  %v14679_v22 = vrot.slane %v14996_v55, 2  ;;  %v1749_v63 = vrot.slane %v8906_v15, 2  ;;  %v1641_v31 = vsel %vm624_vm4, %v1605_v25, %v1611_v35 }
 0x221   :  { %v1647_v49 = vsel %vm624_vm4, %v1623_v43, %v1605_v25  ;;  %v1755_v14 = vrot.slane %v8970_v51, 2  ;;  %v14680_v0 = vrot.slane %v14997_v16, 2  ;;  %v1660_v57 = vmax.f32 %v1516_v11, %v1641_v31 }
 0x222   :  { %v1659_v52 = vmax.f32 %v1515_v20, %v1647_v49  ;;  %v1707_v38 = vsel %vm769_vm5, %v1683_v44, %v14679_v22  ;;  %v1713_v59 = vsel %vm769_vm5, %v1677_v50, %v1683_v44  ;;  %v4658_v49 = vmul.f32 %v10706_v4, %v10706_v4 }
 0x223   :  { %v1731_v1 = vadd.f32 %v1713_v59, %v1587_v5  ;;  %v1732_v10 = vadd.f32 %v1707_v38, %v1588_v13  ;;  %v1779_v25 = vsel %vm769_vm5, %v1755_v14, %v14680_v0  ;;  %v1785_v20 = vsel %vm769_vm5, %v1749_v63, %v1755_v14 }
 0x224   :  { %v1803_v11 = vmax.f32 %v1659_v52, %v1785_v20  ;;  %v1804_v31 = vmax.f32 %v1660_v57, %v1779_v25  ;;  %v1257_v22 = vrot.slane %v14996_v55, 7  ;;  %v1329_v5 = vrot.slane %v14997_v16, 7  ;;  %4756 = vadd.xlane.f32.xlu0 %v4658_v49 }
 0x225   :  { %v1827_v44 = vmul.f32 0.033333335, %v1731_v1  ;;  %v1828_v59 = vmul.f32 0.033333335, %v1732_v10  ;;  %v1407_v13 = vrot.slane %v8900_v62, 1  ;;  %v1545_v51 = vrot.slane %v14996_v55, 6 }
 0x226   :  { %v1851_v38 = vmul.f32 0.5, %v1803_v11  ;;  %v1852_v0 = vmul.f32 0.5, %v1804_v31  ;;  %v1269_v14 = vsel %vm334_vm2, %v1257_v22, %v1263_v56  ;;  %v1275_v52 = vsel %vm334_vm2, %v1251_v47, %v1257_v22 }
 0x227   :  { %v1301_v1 = vadd.f32 %v1275_v52, %v14996_v55  ;;  %v1302_v10 = vadd.f32 %v1269_v14, %v8900_v62  ;;  %v1341_v57 = vsel %vm334_vm2, %v1329_v5, %v1335_v12  ;;  %v1347_v25 = vsel %vm334_vm2, %v1323_v33, %v1329_v5 }
 0x228   :  { %v1875_v56 = vadd.f32 %v1851_v38, %v1827_v44  ;;  %v1876_v20 = vadd.f32 %v1852_v0, %v1828_v59  ;;  %v1373_v11 = vmax.f32 %v14997_v16, %v1347_v25  ;;  %v1374_v47 = vmax.f32 %v8974_v29, %v1341_v57  ;;  %4369 = vadd.xlane.f32.xlu0 %v10752_v17 }
 0x229   :  { %v1413_v22 = vsel %vm479_vm3, %v1401_v2, %v1407_v13  ;;  %v14998_v31 = vrot.slane %v8886_v26, 1  ;;  %v1479_v12 = vrot.slane %v8974_v29, 1  ;;  %v1617_v0 = vrot.slane %v14997_v16, 6  ;;  %v10939_v26 = vld [vmem:[#allocation3 + $0x18] sm:$0xff] }
 0x22a   :  { %v1919_v14 = vpack.c.bf16 %v1876_v20, %v1875_v56  ;;  %v1445_v33 = vadd.f32 %v1413_v22, %v1301_v1  ;;  %v14999_v59 = vrot.slane %v14997_v16, 1  ;;  %v15000_v5 = vrot.slane %v8906_v15, 1 }
 0x22b   :  { %v1431_v49 = vsel %vm479_vm3, %v1407_v13, %v14998_v31  ;;  %v1557_v38 = vsel %vm624_vm4, %v1545_v51, %v1551_v48  ;;  %v15001_v52 = vrot.slane %v8896_v36, 6  ;;  %v1629_v20 = vsel %vm624_vm4, %v1617_v0, %v1623_v43  ;;  %v10907_v36 = vld [vmem:[#allocation2] sm:$0xff]  ;;  %v10917_v43 = vld [vmem:[#allocation2 + $0x18] sm:$0xff] }
 0x22c   :  { %v1446_v44 = vadd.f32 %v1431_v49, %v1302_v10  ;;  %v1485_v2 = vsel %vm479_vm3, %v14999_v59, %v1479_v12  ;;  %v1503_v13 = vsel %vm479_vm3, %v1479_v12, %v15000_v5  ;;  %6300 = vmatprep.mubr.msk.bf16.mxu0 %vm15_vm0, %v1919_v14  ;;  %v1635_v22 = vsel %vm624_vm4, %v1611_v35, %v1617_v0  ;;  %v10919_v35 = vld [vmem:[#allocation3] sm:$0xff]  ;;  %v10937_v5 = vld [vmem:[#allocation3 + $0x8] sm:$0xff] }
 0x22d   :  { %v1563_v1 = vsel %vm624_vm4, %v15001_v52, %v1545_v51  ;;  %v1517_v10 = vmax.f32 %v1373_v11, %v1485_v2  ;;  %v1518_v57 = vmax.f32 %v1374_v47, %v1503_v13  ;;  %v1695_v31 = vrot.slane %v8900_v62, 2  ;;  %v10915_v51 = vld [vmem:[#allocation2 + $0x8] sm:$0xff] }
 0x22e   :  { %v1589_v25 = vadd.f32 %v1563_v1, %v1445_v33  ;;  %v1590_v56 = vadd.f32 %v1557_v38, %v1446_v44  ;;  %v1767_v48 = vrot.slane %v8974_v29, 2  ;;  %v4659_v11 = vmul.f32 %v10744_v21, %v10744_v21 }
 0x22f   :  { %v1661_v49 = vmax.f32 %v1517_v10, %v1635_v22  ;;  %v1662_v12 = vmax.f32 %v1518_v57, %v1629_v20  ;;  %v10913_v47 = vadd.f32 %v10113_v42, %v10579_v32  ;;  %v15003_v62 = vrot.slane %v14996_v55, 2 }
 0x230   :  { %v1719_v14 = vsel %vm769_vm5, %v1695_v31, %v1677_v50  ;;  %v15004_v33 = vrot.slane %v14997_v16, 2  ;;  %v1791_v44 = vsel %vm769_vm5, %v1767_v48, %v1749_v63  ;;  %4758 = vadd.xlane.f32.xlu1 %v4659_v11  ;;  %v3085_v50 = vrot.slane %v10907_v36, 7 }
 0x231   :  { %15002 = vst [vmem:[#allocation17_spill] sm:$0xff] %v10913_v47  ;;  %v1701_v29 = vsel %vm769_vm5, %v15003_v62, %v1695_v31  ;;  %v1734_v55 = vadd.f32 %v1719_v14, %v1590_v56  ;;  %v1806_v2 = vmax.f32 %v1662_v12, %v1791_v44  ;;  %v3091_v16 = vrot.slane %v10915_v51, 7 }
 0x232   :  { %v1773_v42 = vsel %vm769_vm5, %v15004_v33, %v1767_v48  ;;  %v1733_v0 = vadd.f32 %v1701_v29, %v1589_v25  ;;  %v3103_v13 = vrot.slane %v10917_v43, 7  ;;  %v3157_v15 = vrot.slane %v10919_v35, 7 }
 0x233   :  { %v1805_v59 = vmax.f32 %v1661_v49, %v1773_v42  ;;  %v1830_v52 = vmul.f32 0.033333335, %v1734_v55  ;;  %v1854_v1 = vmul.f32 0.5, %v1806_v2  ;;  %v3121_v10 = vsel %vm334_vm2, %v3085_v50, %v3091_v16  ;;  %v10957_v49 = vld [vmem:[#allocation2 + $0x10] sm:$0xff] }
 0x234   :  { %v1829_v38 = vmul.f32 0.033333335, %v1733_v0  ;;  %v3127_v57 = vsel %vm334_vm2, %v3103_v13, %v3085_v50  ;;  %v14686_v25 = vrot.slane %v10937_v5, 7  ;;  %v3175_v56 = vrot.slane %v10939_v26, 7  ;;  %v10974_v55 = vld [vmem:[#allocation3 + $0x10] sm:$0xff] }
 0x235   :  { %v1853_v63 = vmul.f32 0.5, %v1805_v59  ;;  %v1878_v22 = vadd.f32 %v1854_v1, %v1830_v52  ;;  %v3133_v31 = vadd.f32 %v3127_v57, %v10907_v36  ;;  %v3134_v48 = vadd.f32 %v3121_v10, %v10915_v51 }
 0x236   :  { %v3193_v12 = vsel %vm334_vm2, %v3157_v15, %v14686_v25  ;;  %v3199_v11 = vsel %vm334_vm2, %v3175_v56, %v3157_v15  ;;  %v14684_v62 = vrot.slane %v10907_v36, 1  ;;  %v3235_v29 = vrot.slane %v10915_v51, 1 }
 0x237   :  { %v1877_v20 = vadd.f32 %v1853_v63, %v1829_v38  ;;  %v1902_v14 = vsel %vm72_vm6, %v1878_v22, 0.0  ;;  %v3205_v33 = vmax.f32 %v10919_v35, %v3199_v11  ;;  %v3206_v42 = vmax.f32 %v10937_v5, %v3193_v12 }
 0x238   :  { %v14685_v44 = vrot.slane %v10957_v49, 1  ;;  %v3265_v59 = vsel %vm479_vm3, %v14684_v62, %v3235_v29  ;;  %v14681_v2 = vrot.slane %v10919_v35, 1  ;;  %v3307_v50 = vrot.slane %v10937_v5, 1 }
 0x239   :  { %v1920_v0 = vpack.c.bf16 %v1902_v14, %v1877_v20  ;;  %v3277_v38 = vadd.f32 %v3265_v59, %v3133_v31  ;;  %v14682_v52 = vrot.slane %v10974_v55, 1  ;;  %v3373_v63 = vrot.slane %v10907_v36, 6 }
 0x23a   :  { %v3259_v15 = vsel %vm479_vm3, %v3235_v29, %v14685_v44  ;;  %v3337_v10 = vsel %vm479_vm3, %v14681_v2, %v3307_v50  ;;  %v3379_v57 = vrot.slane %v10915_v51, 6  ;;  %v3391_v20 = vrot.slane %v10917_v43, 6 }
 0x23b   :  { %6301 = vmatmul.mubr.msk.bf16.gmra.mrb[32].mxu0 %vm15_vm0, %v1920_v0  ;;  %v3278_v1 = vadd.f32 %v3259_v15, %v3134_v48  ;;  %v3331_v22 = vsel %vm479_vm3, %v3307_v50, %v14682_v52  ;;  %v3349_v31 = vmax.f32 %v3205_v33, %v3337_v10  ;;  %v3445_v12 = vrot.slane %v10919_v35, 6 }
 0x23c   :  { %v14683_v11 = vrot.slane %v10937_v5, 6  ;;  %v3350_v48 = vmax.f32 %v3206_v42, %v3331_v22  ;;  %v3409_v29 = vsel %vm624_vm4, %v3373_v63, %v3379_v57  ;;  %v3415_v14 = vsel %vm624_vm4, %v3391_v20, %v3373_v63 }
 0x23d   :  { %v3463_v0 = vrot.slane %v10939_v26, 6  ;;  %v3421_v59 = vadd.f32 %v3415_v14, %v3277_v38  ;;  %v3422_v15 = vadd.f32 %v3409_v29, %v3278_v1  ;;  %v3517_v50 = vrot.slane %v10907_v36, 2 }
 0x23e   :  { %v3481_v33 = vsel %vm624_vm4, %v3445_v12, %v14683_v11  ;;  %v3523_v22 = vrot.slane %v10915_v51, 2  ;;  %v3529_v2 = vrot.slane %v10957_v49, 2  ;;  %v3589_v52 = vrot.slane %v10919_v35, 2 }
 0x23f   :  { %v3487_v42 = vsel %vm624_vm4, %v3463_v0, %v3445_v12  ;;  %v3494_v10 = vmax.f32 %v3350_v48, %v3481_v33  ;;  %v3595_v38 = vrot.slane %v10937_v5, 2  ;;  %v3601_v1 = vrot.slane %v10974_v55, 2 }
 0x240   :  { %v3493_v63 = vmax.f32 %v3349_v31, %v3487_v42  ;;  %v3547_v29 = vsel %vm769_vm5, %v3523_v22, %v3529_v2  ;;  %v3553_v14 = vsel %vm769_vm5, %v3517_v50, %v3523_v22  ;;  %v11024_v12 = vadd.f32 %v10220_v40, %v10579_v32 }
 0x241   :  { %v3097_v48 = vrot.slane %v10957_v49, 7  ;;  %v3565_v33 = vadd.f32 %v3553_v14, %v3421_v59  ;;  %v3566_v31 = vadd.f32 %v3547_v29, %v3422_v15  ;;  %v3619_v42 = vsel %vm769_vm5, %v3595_v38, %v3601_v1 }
 0x242   :  { %15005 = vst [vmem:[#allocation18_spill] sm:$0xff] %v11024_v12  ;;  %v3625_v11 = vsel %vm769_vm5, %v3589_v52, %v3595_v38  ;;  %v3638_v44 = vmax.f32 %v3494_v10, %v3619_v42  ;;  %v3247_v10 = vrot.slane %v10917_v43, 1  ;;  %v3457_v51 = vrot.slane %v10974_v55, 6 }
 0x243   :  { %v3637_v62 = vmax.f32 %v3493_v63, %v3625_v11  ;;  %v3109_v22 = vsel %vm334_vm2, %v3097_v48, %v3103_v13  ;;  %v3115_v40 = vsel %vm334_vm2, %v3091_v16, %v3097_v48  ;;  %v3661_v59 = vmul.f32 0.033333335, %v3565_v33 }
 0x244   :  { %v3662_v15 = vmul.f32 0.033333335, %v3566_v31  ;;  %v3135_v29 = vadd.f32 %v3115_v40, %v10957_v49  ;;  %v3136_v14 = vadd.f32 %v3109_v22, %v10917_v43  ;;  %v3686_v38 = vmul.f32 0.5, %v3638_v44 }
 0x245   :  { %v3685_v25 = vmul.f32 0.5, %v3637_v62  ;;  %v3169_v11 = vrot.slane %v10974_v55, 7  ;;  %v3319_v63 = vrot.slane %v10939_v26, 1  ;;  %v3385_v13 = vrot.slane %v10957_v49, 6 }
 0x246   :  { %v3535_v16 = vrot.slane %v10917_v43, 2  ;;  %v3710_v33 = vadd.f32 %v3686_v38, %v3662_v15  ;;  %v15006_v44 = vrot.slane %v10937_v5, 7  ;;  %v15007_v40 = vrot.slane %v10957_v49, 1 }
 0x247   :  { %v3709_v48 = vadd.f32 %v3685_v25, %v3661_v59  ;;  %v3181_v62 = vsel %vm334_vm2, %v3169_v11, %v3175_v56  ;;  %v15008_v25 = vrot.slane %v10907_v36, 1  ;;  %v15009_v21 = vrot.slane %v10974_v55, 1 }
 0x248   :  { %v3187_v31 = vsel %vm334_vm2, %v15006_v44, %v3169_v11  ;;  %v3208_v22 = vmax.f32 %v10939_v26, %v3181_v62  ;;  %v3253_v43 = vsel %vm479_vm3, %v15007_v40, %v3247_v10  ;;  %v15010_v62 = vrot.slane %v10919_v35, 1  ;;  %v11101_v40 = vpop.f32.mrb[16].mxu0 }
 0x249   :  { %v3207_v42 = vmax.f32 %v10974_v55, %v3187_v31  ;;  %v3271_v59 = vsel %vm479_vm3, %v3247_v10, %v15008_v25  ;;  %v3757_v56 = vpack.c.bf16 %v3710_v33, %v3709_v48  ;;  %v3279_v15 = vadd.f32 %v3253_v43, %v3135_v29  ;;  %v11115_v43 = vpop.f32.mrb[17].mxu0 }
 0x24a   :  { %v3280_v38 = vadd.f32 %v3271_v59, %v3136_v14  ;;  %v3325_v11 = vsel %vm479_vm3, %v15009_v21, %v3319_v63  ;;  %v3343_v49 = vsel %vm479_vm3, %v3319_v63, %v15010_v62  ;;  %v3397_v36 = vsel %vm624_vm4, %v3385_v13, %v3391_v20 }
 0x24b   :  { %v3351_v44 = vmax.f32 %v3207_v42, %v3325_v11  ;;  %v3403_v10 = vsel %vm624_vm4, %v3379_v57, %v3385_v13  ;;  %6340 = vmatprep.mubr.msk.bf16.mxu1 %vm15_vm0, %v3757_v56  ;;  %v3352_v29 = vmax.f32 %v3208_v22, %v3343_v49  ;;  %v3469_v21 = vsel %vm624_vm4, %v3457_v51, %v3463_v0 }
 0x24c   :  { %v3423_v14 = vadd.f32 %v3403_v10, %v3279_v15  ;;  %v3424_v55 = vadd.f32 %v3397_v36, %v3280_v38  ;;  %v15011_v35 = vrot.slane %v10937_v5, 6  ;;  %v3541_v48 = vsel %vm769_vm5, %v3529_v2, %v3535_v16  ;;  %v11123_v38 = vpop.f32.mrb[18].mxu0 }
 0x24d   :  { %v3559_v20 = vsel %vm769_vm5, %v3535_v16, %v3517_v50  ;;  %v3607_v57 = vrot.slane %v10939_v26, 2  ;;  %v3496_v33 = vmax.f32 %v3352_v29, %v3469_v21  ;;  %v11099_v2 = vadd.f32 %v10307_v37, %v10579_v32 }
 0x24e   :  { %v3475_v63 = vsel %vm624_vm4, %v15011_v35, %v3457_v51  ;;  %v3567_v31 = vadd.f32 %v3541_v48, %v3423_v14  ;;  %v3568_v42 = vadd.f32 %v3559_v20, %v3424_v55  ;;  %v11095_v51 = vadd.f32 %v10296_v27, %v10579_v32  ;;  %v15022_v55 = vld [vmem:[#allocation19_spill] sm:$0xff]  ;;  %v15023_v35 = vld [vmem:[#allocation21_spill] sm:$0xff]  ;;  %v15024_v48 = vld [vmem:[#allocation22_spill] sm:$0xff] }
 0x24f   :  { %v3495_v13 = vmax.f32 %v3351_v44, %v3475_v63  ;;  %v3613_v0 = vsel %vm769_vm5, %v3601_v1, %v3607_v57  ;;  %v3631_v5 = vsel %vm769_vm5, %v3607_v57, %v3589_v52  ;;  %15013 = vst [vmem:[#allocation33_spill] sm:$0xff] %v11099_v2  ;;  %v4657_v1 = vmul.f32 %v10752_v17, %v10752_v17  ;;  %v15025_v57 = vld [vmem:[#allocation23_spill] sm:$0xff] }
 0x250   :  { %15012 = vst [vmem:[#allocation32_spill] sm:$0xff] %v11095_v51  ;;  %v3640_v26 = vmax.f32 %v3496_v33, %v3631_v5  ;;  %v3663_v16 = vmul.f32 0.033333335, %v3567_v31  ;;  %v3664_v22 = vmul.f32 0.033333335, %v3568_v42  ;;  %v4656_v52 = vmul.f32 %v10740_v60, %v10740_v60 }
 0x251   :  { %v3639_v50 = vmax.f32 %v3495_v13, %v3613_v0  ;;  %v11109_v27 = vmul.f32 %v11095_v51, %v11095_v51  ;;  %v11113_v37 = vadd.f32 %v10335_v39, %v10579_v32  ;;  %v4662_v56 = vmul.f32 %v10913_v47, %v10913_v47  ;;  %4754 = vadd.xlane.f32.xlu1 %v4657_v1  ;;  %v15027_v1 = vld [vmem:[#allocation20_spill] sm:$0xff] }
 0x252   :  { %v3688_v59 = vmul.f32 0.5, %v3640_v26  ;;  %v11121_v15 = vadd.f32 %v10348_v3, %v10579_v32  ;;  %4752 = vadd.xlane.f32.xlu0 %v4656_v52  ;;  %v11127_v11 = vadd.f32 %v10358_v24, %v10579_v32  ;;  %v11131_v39 = vadd.f32 %v10365_v7, %v10579_v32  ;;  %v11138_v3 = vpop.f32.mrb[19].mxu0 }
 0x253   :  { %15014 = vst [vmem:[#allocation34_spill] sm:$0xff] %v11113_v37  ;;  %v3687_v25 = vmul.f32 0.5, %v3639_v50  ;;  %v11135_v62 = vmul.f32 %v11099_v2, %v11099_v2  ;;  %v1246_v49 = vrot.slane %v9471_v8, 7  ;;  %v11142_v10 = vadd.f32 %v10370_v28, %v10579_v32 }
 0x254   :  { %15015 = vst [vmem:[#allocation35_spill] sm:$0xff] %v11121_v15  ;;  %15016 = vst [vmem:[#allocation36_spill] sm:$0xff] %v11127_v11  ;;  %v3712_v36 = vadd.f32 %v3688_v59, %v3664_v22  ;;  %v11146_v24 = vmul.f32 %v11024_v12, %v11024_v12  ;;  %v11150_v7 = vadd.f32 %v10379_v45, %v10579_v32  ;;  %v1252_v21 = vrot.slane %v15022_v55, 7 }
 0x255   :  { %15017 = vst [vmem:[#allocation37_spill] sm:$0xff] %v11131_v39  ;;  %v3711_v44 = vadd.f32 %v3687_v25, %v3663_v16  ;;  %15018 = vst [vmem:[#allocation38_spill] sm:$0xff] %v11142_v10  ;;  %v11154_v29 = vadd.f32 %v10389_v41, %v10579_v32  ;;  %v11158_v14 = vadd.f32 %v10399_v61, %v10579_v32  ;;  %v1264_v63 = vrot.slane %v15023_v35, 7  ;;  %v15026_v41 = vld [vmem:[#allocation25_spill] sm:$0xff] }
 0x256   :  { %15019 = vst [vmem:[#allocation39_spill] sm:$0xff] %v11150_v7  ;;  %v3736_v28 = vsel %vm72_vm6, %v3712_v36, 0.0  ;;  %v1318_v20 = vrot.slane %v15024_v48, 7  ;;  %v14691_v45 = vrot.slane %v15025_v57, 7  ;;  %4381 = vadd.xlane.f32.xlu1 %v11095_v51  ;;  %4379 = vadd.xlane.f32.xlu0 %v10913_v47  ;;  %v1282_v61 = vsel %vm334_vm2, %v1246_v49, %v1252_v21 }
 0x257   :  { %15020 = vst [vmem:[#allocation40_spill] sm:$0xff] %v11154_v29  ;;  %15021 = vst [vmem:[#allocation41_spill] sm:$0xff] %v11158_v14  ;;  %v3758_v13 = vpack.c.bf16 %v3736_v28, %v3711_v44  ;;  %v1336_v33 = vrot.slane %v15026_v41, 7  ;;  %v14688_v31 = vrot.slane %v9471_v8, 1  ;;  %v1288_v42 = vsel %vm334_vm2, %v1264_v63, %v1246_v49 }
 0x258   :  { %v1304_v0 = vadd.f32 %v1282_v61, %v15022_v55  ;;  %v1354_v5 = vsel %vm334_vm2, %v1318_v20, %v14691_v45  ;;  %v1396_v50 = vrot.slane %v15022_v55, 1  ;;  %v1303_v26 = vadd.f32 %v1288_v42, %v9471_v8 }
 0x259   :  { %6341 = vmatmul.mubr.msk.bf16.gmra.mrb[24].mxu1 %vm15_vm0, %v3758_v13  ;;  %v1360_v16 = vsel %vm334_vm2, %v1336_v33, %v1318_v20  ;;  %v1376_v22 = vmax.f32 %v15025_v57, %v1354_v5  ;;  %v14689_v52 = vrot.slane %v15027_v1, 1  ;;  %v14690_v49 = vrot.slane %v15024_v48, 1  ;;  %v15028_v20 = vld [vmem:[#allocation24_spill] sm:$0xff] }
 0x25a   :  { %v1375_v25 = vmax.f32 %v15024_v48, %v1360_v16  ;;  %v1426_v59 = vsel %vm479_vm3, %v14688_v31, %v1396_v50  ;;  %v1468_v44 = vrot.slane %v15025_v57, 1  ;;  %4377 = vadd.xlane.f32.xlu1 %v11099_v2  ;;  %4375 = vadd.xlane.f32.xlu0 %v11024_v12  ;;  %v1474_v13 = vrot.slane %v15028_v20, 1 }
 0x25b   :  { %v1420_v36 = vsel %vm479_vm3, %v1396_v50, %v14689_v52  ;;  %v1447_v28 = vadd.f32 %v1426_v59, %v1303_v26  ;;  %v1534_v61 = vrot.slane %v9471_v8, 6  ;;  %v14692_v16 = vrot.slane %v15022_v55, 6 }
 0x25c   :  { %v1448_v42 = vadd.f32 %v1420_v36, %v1304_v0  ;;  %v1498_v5 = vsel %vm479_vm3, %v14690_v49, %v1468_v44  ;;  %v14698_v31 = vrot.slane %v15023_v35, 6  ;;  %v1492_v50 = vsel %vm479_vm3, %v1468_v44, %v1474_v13 }
 0x25d   :  { %v1519_v26 = vmax.f32 %v1375_v25, %v1498_v5  ;;  %v1606_v59 = vrot.slane %v15024_v48, 6  ;;  %v14693_v52 = vrot.slane %v15025_v57, 6  ;;  %v1520_v0 = vmax.f32 %v1376_v22, %v1492_v50 }
 0x25e   :  { %v1570_v36 = vsel %vm624_vm4, %v1534_v61, %v14692_v16  ;;  %v1576_v49 = vsel %vm624_vm4, %v14698_v31, %v1534_v61  ;;  %v14695_v45 = vrot.slane %v15026_v41, 6  ;;  %4766 = vadd.xlane.f32.xlu1 %v11109_v27  ;;  %4764 = vadd.xlane.f32.xlu0 %v4662_v56  ;;  %v14696_v5 = vrot.slane %v9471_v8, 2 }
 0x25f   :  { %v1591_v25 = vadd.f32 %v1576_v49, %v1447_v28  ;;  %v1592_v44 = vadd.f32 %v1570_v36, %v1448_v42  ;;  %v1642_v22 = vsel %vm624_vm4, %v1606_v59, %v14693_v52  ;;  %v1684_v16 = vrot.slane %v15022_v55, 2 }
 0x260   :  { %v1648_v50 = vsel %vm624_vm4, %v14695_v45, %v1606_v59  ;;  %v1664_v61 = vmax.f32 %v1520_v0, %v1642_v22  ;;  %v14694_v27 = vrot.slane %v15027_v1, 2  ;;  %v1750_v49 = vrot.slane %v15024_v48, 2  ;;  %v11253_v22 = vpop.f32.mrb[8].mxu1 }
 0x261   :  { %v1663_v56 = vmax.f32 %v1519_v26, %v1648_v50  ;;  %v1756_v28 = vrot.slane %v15025_v57, 2  ;;  %v14697_v42 = vrot.slane %v15028_v20, 2  ;;  %v1714_v59 = vsel %vm769_vm5, %v14696_v5, %v1684_v16 }
 0x262   :  { %v1708_v36 = vsel %vm769_vm5, %v1684_v16, %v14694_v27  ;;  %v1258_v0 = vrot.slane %v15027_v1, 7  ;;  %v1330_v26 = vrot.slane %v15028_v20, 7  ;;  %4762 = vadd.xlane.f32.xlu1 %v11135_v62  ;;  %4760 = vadd.xlane.f32.xlu0 %v11146_v24  ;;  %v1735_v50 = vadd.f32 %v1714_v59, %v1591_v25 }
 0x263   :  { %v1736_v52 = vadd.f32 %v1708_v36, %v1592_v44  ;;  %v1780_v27 = vsel %vm769_vm5, %v1756_v28, %v14697_v42  ;;  %v1408_v45 = vrot.slane %v15023_v35, 1  ;;  %v1786_v16 = vsel %vm769_vm5, %v1750_v49, %v1756_v28 }
 0x264   :  { %v1808_v5 = vmax.f32 %v1664_v61, %v1780_v27  ;;  %v1270_v62 = vsel %vm334_vm2, %v1258_v0, %v1264_v63  ;;  %v1276_v24 = vsel %vm334_vm2, %v1252_v21, %v1258_v0  ;;  %v1807_v25 = vmax.f32 %v1663_v56, %v1786_v16 }
 0x265   :  { %v1831_v44 = vmul.f32 0.033333335, %v1735_v50  ;;  %v1832_v36 = vmul.f32 0.033333335, %v1736_v52  ;;  %v1305_v59 = vadd.f32 %v1276_v24, %v15027_v1  ;;  %v1306_v31 = vadd.f32 %v1270_v62, %v15023_v35  ;;  %v11297_v62 = vld [vmem:[#allocation2 + $0x20] sm:$0xff] }
 0x266   :  { %v1856_v42 = vmul.f32 0.5, %v1808_v5  ;;  %v1342_v61 = vsel %vm334_vm2, %v1330_v26, %v1336_v33  ;;  %v15029_v63 = vrot.slane %v15025_v57, 7  ;;  %4389 = vadd.xlane.f32.xlu1 %v11127_v11  ;;  %4387 = vadd.xlane.f32.xlu0 %v11113_v37  ;;  %v1855_v21 = vmul.f32 0.5, %v1807_v25 }
 0x267   :  { %v1378_v5 = vmax.f32 %v15026_v41, %v1342_v61  ;;  %v15030_v56 = vrot.slane %v15027_v1, 1  ;;  %v15031_v0 = vrot.slane %v9471_v8, 1  ;;  %v1480_v16 = vrot.slane %v15026_v41, 1 }
 0x268   :  { %v1348_v27 = vsel %vm334_vm2, %v15029_v63, %v1330_v26  ;;  %v1880_v33 = vadd.f32 %v1856_v42, %v1832_v36  ;;  %v1879_v24 = vadd.f32 %v1855_v21, %v1831_v44  ;;  %v1546_v61 = vrot.slane %v15027_v1, 6 }
 0x269   :  { %v1377_v52 = vmax.f32 %v15028_v20, %v1348_v27  ;;  %v1414_v28 = vsel %vm479_vm3, %v15030_v56, %v1408_v45  ;;  %v1432_v26 = vsel %vm479_vm3, %v1408_v45, %v15031_v0  ;;  %v1618_v63 = vrot.slane %v15028_v20, 6 }
 0x26a   :  { %v1449_v50 = vadd.f32 %v1414_v28, %v1305_v59  ;;  %v1450_v25 = vadd.f32 %v1432_v26, %v1306_v31  ;;  %v1486_v42 = vsel %vm479_vm3, %v1474_v13, %v1480_v16  ;;  %v15032_v36 = vrot.slane %v15024_v48, 1  ;;  %4469 = vadd.xlane.f32.xlu1 %v11154_v29  ;;  %4467 = vadd.xlane.f32.xlu0 %v11142_v10 }
 0x26b   :  { %v1696_v59 = vrot.slane %v15023_v35, 2  ;;  %v1768_v27 = vrot.slane %v15026_v41, 2  ;;  %v1921_v31 = vpack.c.bf16 %v1880_v33, %v1879_v24  ;;  %v1521_v44 = vmax.f32 %v1377_v52, %v1486_v42  ;;  %v11330_v24 = vld [vmem:[#allocation2 + $0x28] sm:$0xff] }
 0x26c   :  { %v1504_v45 = vsel %vm479_vm3, %v1480_v16, %v15032_v36  ;;  %v3086_v56 = vrot.slane %v11297_v62, 7  ;;  %v15033_v13 = vrot.slane %v15023_v35, 6  ;;  %v15034_v0 = vrot.slane %v15022_v55, 6 }
 0x26d   :  { %v1522_v21 = vmax.f32 %v1378_v5, %v1504_v45  ;;  %v15035_v16 = vrot.slane %v15026_v41, 6  ;;  %v15036_v52 = vrot.slane %v15025_v57, 6  ;;  %6304 = vmatprep.mubr.msk.bf16.mxu0 %vm15_vm0, %v1921_v31  ;;  %v11333_v45 = vld [vmem:[#allocation2 + $0x38] sm:$0xff]  ;;  %v11337_v41 = vld [vmem:[#allocation3 + $0x28] sm:$0xff]  ;;  %v3518_v12 = vrot.slane %v11297_v62, 2 }
 0x26e   :  { %v1558_v28 = vsel %vm624_vm4, %v1546_v61, %v15033_v13  ;;  %v1564_v26 = vsel %vm624_vm4, %v15034_v0, %v1546_v61  ;;  %v11335_v61 = vld [vmem:[#allocation3 + $0x20] sm:$0xff]  ;;  %v15037_v13 = vrot.slane %v15027_v1, 2  ;;  %4385 = vadd.xlane.f32.xlu1 %v11131_v39  ;;  %v14699_v48 = vrot.slane %v11337_v41, 7  ;;  %4383 = vadd.xlane.f32.xlu0 %v11121_v15 }
 0x26f   :  { %v1630_v33 = vsel %vm624_vm4, %v1618_v63, %v15035_v16  ;;  %v1636_v5 = vsel %vm624_vm4, %v15036_v52, %v1618_v63  ;;  %v1593_v35 = vadd.f32 %v1564_v26, %v1449_v50  ;;  %v1594_v42 = vadd.f32 %v1558_v28, %v1450_v25  ;;  %v11358_v26 = vpop.f32.mrb[9].mxu1 }
 0x270   :  { %v1665_v55 = vmax.f32 %v1521_v44, %v1636_v5  ;;  %v1666_v36 = vmax.f32 %v1522_v21, %v1630_v33  ;;  %v1702_v57 = vsel %vm769_vm5, %v15037_v13, %v1696_v59  ;;  %v15038_v63 = vrot.slane %v9471_v8, 2  ;;  %v11356_v8 = vld [vmem:[#allocation3 + $0x38] sm:$0xff] }
 0x271   :  { %v15039_v50 = vrot.slane %v15028_v20, 2  ;;  %v1792_v44 = vsel %vm769_vm5, %v1768_v27, %v1750_v49  ;;  %v1737_v21 = vadd.f32 %v1702_v57, %v1593_v35  ;;  %v14702_v20 = vrot.slane %v11330_v24, 7  ;;  %v11365_v49 = vpop.f32.mrb[10].mxu1 }
 0x272   :  { %v1720_v31 = vsel %vm769_vm5, %v1696_v59, %v15038_v63  ;;  %v1810_v0 = vmax.f32 %v1666_v36, %v1792_v44  ;;  %v14703_v59 = vrot.slane %v11333_v45, 7  ;;  %v3158_v16 = vrot.slane %v11335_v61, 7  ;;  %v11380_v13 = vpop.f32.mrb[11].mxu1  ;;  %4465 = vadd.xlane.f32.xlu1 %v11158_v14  ;;  %4463 = vadd.xlane.f32.xlu0 %v11150_v7 }
 0x273   :  { %v1774_v25 = vsel %vm769_vm5, %v15039_v50, %v1768_v27  ;;  %v1738_v1 = vadd.f32 %v1720_v31, %v1594_v42  ;;  %v1833_v27 = vmul.f32 0.033333335, %v1737_v21  ;;  %v3122_v35 = vsel %vm334_vm2, %v3086_v56, %v14702_v20  ;;  %15040 = vst [vmem:[#allocation19_spill] sm:$0xff] %v11380_v13 }
 0x274   :  { %v1809_v28 = vmax.f32 %v1665_v55, %v1774_v25  ;;  %v1858_v5 = vmul.f32 0.5, %v1810_v0  ;;  %v3128_v42 = vsel %vm334_vm2, %v14703_v59, %v3086_v56  ;;  %v14701_v55 = vrot.slane %v11356_v8, 7  ;;  %v11385_v25 = vld [vmem:[#allocation2 + $0x30] sm:$0xff] }
 0x275   :  { %v1834_v33 = vmul.f32 0.033333335, %v1738_v1  ;;  %v3194_v36 = vsel %vm334_vm2, %v3158_v16, %v14699_v48  ;;  %v3137_v31 = vadd.f32 %v3128_v42, %v11297_v62  ;;  %v3138_v50 = vadd.f32 %v3122_v35, %v11330_v24  ;;  %v11397_v0 = vld [vmem:[#allocation3 + $0x30] sm:$0xff] }
 0x276   :  { %v1857_v52 = vmul.f32 0.5, %v1809_v28  ;;  %v3200_v56 = vsel %vm334_vm2, %v14701_v55, %v3158_v16  ;;  %v3210_v44 = vmax.f32 %v11337_v41, %v3194_v36  ;;  %v14700_v21 = vrot.slane %v11297_v62, 1 }
 0x277   :  { %v1882_v63 = vadd.f32 %v1858_v5, %v1834_v33  ;;  %v3236_v1 = vrot.slane %v11330_v24, 1  ;;  %v3242_v33 = vrot.slane %v11385_v25, 1  ;;  %v3308_v35 = vrot.slane %v11337_v41, 1 }
 0x278   :  { %v1881_v57 = vadd.f32 %v1857_v52, %v1833_v27  ;;  %v3209_v27 = vmax.f32 %v11335_v61, %v3200_v56  ;;  %v3302_v52 = vrot.slane %v11335_v61, 1  ;;  %v3314_v42 = vrot.slane %v11397_v0, 1 }
 0x279   :  { %v1906_v28 = vsel %vm72_vm6, %v1882_v63, 0.0  ;;  %v3266_v5 = vsel %vm479_vm3, %v14700_v21, %v3236_v1  ;;  %v3260_v36 = vsel %vm479_vm3, %v3236_v1, %v3242_v33  ;;  %v3374_v56 = vrot.slane %v11297_v62, 6 }
 0x27a   :  { %v1922_v16 = vpack.c.bf16 %v1906_v28, %v1881_v57  ;;  %v3281_v63 = vadd.f32 %v3266_v5, %v3137_v31  ;;  %v14705_v48 = vrot.slane %v11330_v24, 6  ;;  %v3282_v57 = vadd.f32 %v3260_v36, %v3138_v50 }
 0x27b   :  { %v3332_v28 = vsel %vm479_vm3, %v3308_v35, %v3314_v42  ;;  %v3338_v21 = vsel %vm479_vm3, %v3302_v52, %v3308_v35  ;;  %v3392_v55 = vrot.slane %v11333_v45, 6  ;;  %v3446_v1 = vrot.slane %v11335_v61, 6 }
 0x27c   :  { %6305 = vmatmul.mubr.msk.bf16.gmra.mrb[36].mxu0 %vm15_vm0, %v1922_v16  ;;  %v3353_v20 = vmax.f32 %v3209_v27, %v3338_v21  ;;  %v3354_v59 = vmax.f32 %v3210_v44, %v3332_v28  ;;  %v3410_v31 = vsel %vm624_vm4, %v3374_v56, %v14705_v48  ;;  %v3452_v5 = vrot.slane %v11337_v41, 6 }
 0x27d   :  { %v3416_v50 = vsel %vm624_vm4, %v3392_v55, %v3374_v56  ;;  %v3426_v16 = vadd.f32 %v3410_v31, %v3282_v57  ;;  %v3464_v36 = vrot.slane %v11356_v8, 6  ;;  %v3524_v44 = vrot.slane %v11330_v24, 2 }
 0x27e   :  { %v3425_v35 = vadd.f32 %v3416_v50, %v3281_v63  ;;  %v3530_v21 = vrot.slane %v11385_v25, 2  ;;  %v3482_v27 = vsel %vm624_vm4, %v3446_v1, %v3452_v5  ;;  %v3590_v56 = vrot.slane %v11335_v61, 2 }
 0x27f   :  { %v3488_v28 = vsel %vm624_vm4, %v3464_v36, %v3446_v1  ;;  %v3596_v57 = vrot.slane %v11337_v41, 2  ;;  %v3498_v48 = vmax.f32 %v3354_v59, %v3482_v27  ;;  %v3554_v50 = vsel %vm769_vm5, %v3518_v12, %v3524_v44 }
 0x280   :  { %v3497_v31 = vmax.f32 %v3353_v20, %v3488_v28  ;;  %v3548_v63 = vsel %vm769_vm5, %v3524_v44, %v3530_v21  ;;  %v3569_v2 = vadd.f32 %v3554_v50, %v3425_v35  ;;  %v3602_v51 = vrot.slane %v11397_v0, 2 }
 0x281   :  { %v3570_v47 = vadd.f32 %v3548_v63, %v3426_v16  ;;  %v3626_v17 = vsel %vm769_vm5, %v3590_v56, %v3596_v57  ;;  %v3098_v61 = vrot.slane %v11385_v25, 7  ;;  %v3170_v60 = vrot.slane %v11397_v0, 7 }
 0x282   :  { %v3641_v1 = vmax.f32 %v3497_v31, %v3626_v17  ;;  %v3248_v20 = vrot.slane %v11333_v45, 1  ;;  %v3620_v59 = vsel %vm769_vm5, %v3596_v57, %v3602_v51  ;;  %v3665_v27 = vmul.f32 0.033333335, %v3569_v2 }
 0x283   :  { %v3666_v28 = vmul.f32 0.033333335, %v3570_v47  ;;  %v3320_v35 = vrot.slane %v11356_v8, 1  ;;  %v3642_v16 = vmax.f32 %v3498_v48, %v3620_v59  ;;  %v15041_v63 = vrot.slane %v11333_v45, 7 }
 0x284   :  { %v3689_v44 = vmul.f32 0.5, %v3641_v1  ;;  %v15042_v31 = vrot.slane %v11330_v24, 7  ;;  %v15043_v47 = vrot.slane %v11356_v8, 7  ;;  %v15044_v48 = vrot.slane %v11337_v41, 7 }
 0x285   :  { %v3110_v17 = vsel %vm334_vm2, %v3098_v61, %v15041_v63  ;;  %v3690_v59 = vmul.f32 0.5, %v3642_v16  ;;  %v3326_v41 = vsel %vm479_vm3, %v3314_v42, %v3320_v35  ;;  %v4667_v42 = vmul.f32 %v11127_v11, %v11127_v11 }
 0x286   :  { %v3116_v50 = vsel %vm334_vm2, %v15042_v31, %v3098_v61  ;;  %v3140_v57 = vadd.f32 %v3110_v17, %v11333_v45  ;;  %v3182_v2 = vsel %vm334_vm2, %v3170_v60, %v15043_v47  ;;  %v3188_v1 = vsel %vm334_vm2, %v15044_v48, %v3170_v60 }
 0x287   :  { %v3139_v4 = vadd.f32 %v3116_v50, %v11385_v25  ;;  %v3713_v63 = vadd.f32 %v3689_v44, %v3665_v27  ;;  %v3211_v13 = vmax.f32 %v11397_v0, %v3188_v1  ;;  %v3212_v61 = vmax.f32 %v11356_v8, %v3182_v2  ;;  %4774 = vadd.xlane.f32.xlu1 %v4667_v42  ;;  %v15056_v42 = vld [vmem:[#allocation6_spill] sm:$0xff] }
 0x288   :  { %v3254_v31 = vsel %vm479_vm3, %v3242_v33, %v3248_v20  ;;  %v15045_v17 = vrot.slane %v11297_v62, 1  ;;  %v3344_v60 = vsel %vm479_vm3, %v3320_v35, %v3302_v52  ;;  %v3714_v16 = vadd.f32 %v3690_v59, %v3666_v28 }
 0x289   :  { %v3283_v27 = vadd.f32 %v3254_v31, %v3139_v4  ;;  %v3355_v47 = vmax.f32 %v3211_v13, %v3326_v41  ;;  %v3356_v48 = vmax.f32 %v3212_v61, %v3344_v60  ;;  %v3386_v2 = vrot.slane %v11385_v25, 6 }
 0x28a   :  { %v3272_v50 = vsel %vm479_vm3, %v3248_v20, %v15045_v17  ;;  %v3458_v33 = vrot.slane %v11397_v0, 6  ;;  %v3536_v62 = vrot.slane %v11333_v45, 2  ;;  %v3759_v1 = vpack.c.bf16 %v3714_v16, %v3713_v63 }
 0x28b   :  { %v3284_v44 = vadd.f32 %v3272_v50, %v3140_v57  ;;  %v3608_v20 = vrot.slane %v11356_v8, 2  ;;  %v4666_v52 = vmul.f32 %v11113_v37, %v11113_v37  ;;  %v3398_v4 = vsel %vm624_vm4, %v3386_v2, %v3392_v55 }
 0x28c   :  { %v15046_v13 = vrot.slane %v11330_v24, 6  ;;  %v3470_v45 = vsel %vm624_vm4, %v3458_v33, %v3464_v36  ;;  %v3476_v8 = vsel %vm624_vm4, %v3452_v5, %v3458_v33  ;;  %6344 = vmatprep.mubr.msk.bf16.mxu1 %vm15_vm0, %v3759_v1  ;;  %v3542_v55 = vsel %vm769_vm5, %v3530_v21, %v3536_v62 }
 0x28d   :  { %v3428_v28 = vadd.f32 %v3398_v4, %v3284_v44  ;;  %v3499_v35 = vmax.f32 %v3355_v47, %v3476_v8  ;;  %v3500_v57 = vmax.f32 %v3356_v48, %v3470_v45  ;;  %v3560_v24 = vsel %vm769_vm5, %v3536_v62, %v3518_v12  ;;  %4772 = vadd.xlane.f32.xlu0 %v4666_v52  ;;  %v15057_v4 = vld [vmem:[#allocation9_spill] sm:$0xff]  ;;  %v15059_v8 = vld [vmem:[#allocation8_spill] sm:$0xff] }
 0x28e   :  { %v3404_v25 = vsel %vm624_vm4, %v15046_v13, %v3386_v2  ;;  %v3614_v59 = vsel %vm769_vm5, %v3602_v51, %v3608_v20  ;;  %v3632_v36 = vsel %vm769_vm5, %v3608_v20, %v3590_v56  ;;  %v4707_v17 = vmul.f32 %v11154_v29, %v11154_v29 }
 0x28f   :  { %v3427_v0 = vadd.f32 %v3404_v25, %v3283_v27  ;;  %v3572_v63 = vadd.f32 %v3560_v24, %v3428_v28  ;;  %v3643_v61 = vmax.f32 %v3499_v35, %v3614_v59  ;;  %v3644_v31 = vmax.f32 %v3500_v57, %v3632_v36 }
 0x290   :  { %v4706_v21 = vmul.f32 %v11142_v10, %v11142_v10  ;;  %v4665_v12 = vmul.f32 %v11131_v39, %v11131_v39  ;;  %v11514_v51 = vadd.f32 %v10734_v54, %v10579_v32  ;;  %4854 = vadd.xlane.f32.xlu1 %v4707_v17  ;;  %v4664_v16 = vmul.f32 %v11121_v15, %v11121_v15 }
 0x291   :  { %v3571_v5 = vadd.f32 %v3542_v55, %v3427_v0  ;;  %v3668_v50 = vmul.f32 0.033333335, %v3572_v63  ;;  %v3691_v41 = vmul.f32 0.5, %v3643_v61  ;;  %v3692_v60 = vmul.f32 0.5, %v3644_v31  ;;  %v15060_v0 = vld [vmem:[#allocation27_spill] sm:$0xff] }
 0x292   :  { %15047 = vst [vmem:[#allocation21_spill] sm:$0xff] %v11514_v51  ;;  %v11520_v27 = vadd.f32 %v10736_v30, %v10579_v32  ;;  %v11524_v44 = vadd.f32 %v10746_v19, %v10579_v32  ;;  %v11528_v54 = vadd.f32 %v10758_v53, %v10579_v32  ;;  %4852 = vadd.xlane.f32.xlu0 %v4706_v21  ;;  %v1253_v52 = vrot.slane %v15056_v42, 7  ;;  %v15061_v31 = vld [vmem:[#allocation7_spill] sm:$0xff] }
 0x293   :  { %v3667_v56 = vmul.f32 0.033333335, %v3571_v5  ;;  %v3716_v48 = vadd.f32 %v3692_v60, %v3668_v50  ;;  %v4705_v2 = vmul.f32 %v11158_v14, %v11158_v14  ;;  %v11534_v33 = vadd.f32 %v10748_v9, %v10579_v32  ;;  %v15055_v9 = vld [vmem:[#allocation5_spill] sm:$0xff] }
 0x294   :  { %15048 = vst [vmem:[#allocation22_spill] sm:$0xff] %v11520_v27  ;;  %15049 = vst [vmem:[#allocation23_spill] sm:$0xff] %v11524_v44  ;;  %v4704_v30 = vmul.f32 %v11150_v7, %v11150_v7  ;;  %v11540_v19 = vadd.f32 %v10760_v46, %v10579_v32  ;;  %v11544_v53 = vadd.f32 %v10764_v58, %v10579_v32  ;;  %v1247_v20 = vrot.slane %v15055_v9, 7  ;;  %v15058_v46 = vld [vmem:[#allocation4_spill] sm:$0xff] }
 0x295   :  { %15050 = vst [vmem:[#allocation25_spill] sm:$0xff] %v11528_v54  ;;  %v3715_v47 = vadd.f32 %v3691_v41, %v3667_v56  ;;  %15051 = vst [vmem:[#allocation20_spill] sm:$0xff] %v11534_v33  ;;  %v11548_v62 = vadd.f32 %v10773_v18, %v10579_v32  ;;  %v3740_v1 = vsel %vm72_vm6, %v3716_v48, 0.0  ;;  %v1265_v13 = vrot.slane %v15057_v4, 7  ;;  %4770 = vadd.xlane.f32.xlu1 %v4665_v12  ;;  %v15062_v41 = vld [vmem:[#allocation26_spill] sm:$0xff] }
 0x296   :  { %15052 = vst [vmem:[#allocation24_spill] sm:$0xff] %v11540_v19  ;;  %15053 = vst [vmem:[#allocation42_spill] sm:$0xff] %v11544_v53  ;;  %v1319_v45 = vrot.slane %v15058_v46, 7  ;;  %v1325_v58 = vrot.slane %v15059_v8, 7  ;;  %v1337_v28 = vrot.slane %v15060_v0, 7  ;;  %4768 = vadd.xlane.f32.xlu0 %v4664_v16  ;;  %v1283_v18 = vsel %vm334_vm2, %v1247_v20, %v1253_v52 }
 0x297   :  { %15054 = vst [vmem:[#allocation43_spill] sm:$0xff] %v11548_v62  ;;  %v3760_v25 = vpack.c.bf16 %v3740_v1, %v3715_v47  ;;  %v1289_v35 = vsel %vm334_vm2, %v1265_v13, %v1247_v20  ;;  %v1391_v57 = vrot.slane %v15055_v9, 1  ;;  %v1397_v55 = vrot.slane %v15056_v42, 1 }
 0x298   :  { %v1307_v24 = vadd.f32 %v1289_v35, %v15055_v9  ;;  %v1308_v59 = vadd.f32 %v1283_v18, %v15056_v42  ;;  %v1355_v36 = vsel %vm334_vm2, %v1319_v45, %v1325_v58  ;;  %v1361_v5 = vsel %vm334_vm2, %v1337_v28, %v1319_v45 }
 0x299   :  { %6345 = vmatmul.mubr.msk.bf16.gmra.mrb[28].mxu1 %vm15_vm0, %v3760_v25  ;;  %v1379_v63 = vmax.f32 %v15058_v46, %v1361_v5  ;;  %v1380_v61 = vmax.f32 %v15059_v8, %v1355_v36  ;;  %v1403_v17 = vrot.slane %v15061_v31, 1  ;;  %v1427_v21 = vsel %vm479_vm3, %v1391_v57, %v1397_v55  ;;  %4850 = vadd.xlane.f32.xlu1 %v4705_v2 }
 0x29a   :  { %v1451_v12 = vadd.f32 %v1427_v21, %v1307_v24  ;;  %v1463_v56 = vrot.slane %v15058_v46, 1  ;;  %v1469_v50 = vrot.slane %v15059_v8, 1  ;;  %v1475_v60 = vrot.slane %v15062_v41, 1  ;;  %4848 = vadd.xlane.f32.xlu0 %v4704_v30 }
 0x29b   :  { %v1421_v16 = vsel %vm479_vm3, %v1397_v55, %v1403_v17  ;;  %v1535_v47 = vrot.slane %v15055_v9, 6  ;;  %v1541_v48 = vrot.slane %v15056_v42, 6  ;;  %v1553_v1 = vrot.slane %v15057_v4, 6 }
 0x29c   :  { %v1452_v2 = vadd.f32 %v1421_v16, %v1308_v59  ;;  %v1493_v20 = vsel %vm479_vm3, %v1469_v50, %v1475_v60  ;;  %v1499_v30 = vsel %vm479_vm3, %v1463_v56, %v1469_v50  ;;  %v1607_v25 = vrot.slane %v15058_v46, 6 }
 0x29d   :  { %v1523_v45 = vmax.f32 %v1379_v63, %v1499_v30  ;;  %v1524_v18 = vmax.f32 %v1380_v61, %v1493_v20  ;;  %v1571_v35 = vsel %vm624_vm4, %v1535_v47, %v1541_v48  ;;  %v1577_v55 = vsel %vm624_vm4, %v1553_v1, %v1535_v47  ;;  %4397 = vadd.xlane.f32.xlu1 %v11524_v44 }
 0x29e   :  { %v1595_v24 = vadd.f32 %v1577_v55, %v1451_v12  ;;  %v1596_v59 = vadd.f32 %v1571_v35, %v1452_v2  ;;  %v14712_v36 = vrot.slane %v15059_v8, 6  ;;  %v1625_v5 = vrot.slane %v15060_v0, 6  ;;  %4395 = vadd.xlane.f32.xlu0 %v11514_v51 }
 0x29f   :  { %v14713_v63 = vrot.slane %v15055_v9, 2  ;;  %v1685_v61 = vrot.slane %v15056_v42, 2  ;;  %v14715_v21 = vrot.slane %v15061_v31, 2  ;;  %v1751_v50 = vrot.slane %v15058_v46, 2 }
 0x2a0   :  { %v1643_v12 = vsel %vm624_vm4, %v1607_v25, %v14712_v36  ;;  %v1649_v16 = vsel %vm624_vm4, %v1625_v5, %v1607_v25  ;;  %v1757_v47 = vrot.slane %v15059_v8, 2  ;;  %v14714_v2 = vrot.slane %v15062_v41, 2 }
 0x2a1   :  { %v1667_v20 = vmax.f32 %v1523_v45, %v1649_v16  ;;  %v1668_v30 = vmax.f32 %v1524_v18, %v1643_v12  ;;  %v1709_v35 = vsel %vm769_vm5, %v1685_v61, %v14715_v21  ;;  %v1715_v55 = vsel %vm769_vm5, %v14713_v63, %v1685_v61  ;;  %4477 = vadd.xlane.f32.xlu1 %v11544_v53 }
 0x2a2   :  { %v1739_v36 = vadd.f32 %v1715_v55, %v1595_v24  ;;  %v1740_v25 = vadd.f32 %v1709_v35, %v1596_v59  ;;  %v1781_v45 = vsel %vm769_vm5, %v1757_v47, %v14714_v2  ;;  %v1787_v18 = vsel %vm769_vm5, %v1751_v50, %v1757_v47  ;;  %4475 = vadd.xlane.f32.xlu0 %v11534_v33 }
 0x2a3   :  { %v1811_v12 = vmax.f32 %v1667_v20, %v1787_v18  ;;  %v1812_v16 = vmax.f32 %v1668_v30, %v1781_v45  ;;  %v1259_v61 = vrot.slane %v15061_v31, 7  ;;  %v1331_v63 = vrot.slane %v15062_v41, 7 }
 0x2a4   :  { %v1835_v24 = vmul.f32 0.033333335, %v1739_v36  ;;  %v1836_v59 = vmul.f32 0.033333335, %v1740_v25  ;;  %v1409_v35 = vrot.slane %v15057_v4, 1  ;;  %v1481_v55 = vrot.slane %v15060_v0, 1 }
 0x2a5   :  { %v1859_v2 = vmul.f32 0.5, %v1811_v12  ;;  %v1860_v21 = vmul.f32 0.5, %v1812_v16  ;;  %v1271_v47 = vsel %vm334_vm2, %v1259_v61, %v1265_v13  ;;  %v1277_v20 = vsel %vm334_vm2, %v1253_v52, %v1259_v61  ;;  %4393 = vadd.xlane.f32.xlu1 %v11528_v54  ;;  %v11693_v16 = vld [vmem:[#allocation2 + $0x48] sm:$0xff] }
 0x2a6   :  { %v1309_v30 = vadd.f32 %v1277_v20, %v15061_v31  ;;  %v1310_v36 = vadd.f32 %v1271_v47, %v15057_v4  ;;  %v1343_v25 = vsel %vm334_vm2, %v1331_v63, %v1337_v28  ;;  %v1349_v45 = vsel %vm334_vm2, %v1325_v58, %v1331_v63  ;;  %4391 = vadd.xlane.f32.xlu0 %v11520_v27 }
 0x2a7   :  { %v1883_v13 = vadd.f32 %v1859_v2, %v1835_v24  ;;  %v1884_v18 = vadd.f32 %v1860_v21, %v1836_v59  ;;  %v1381_v52 = vmax.f32 %v15062_v41, %v1349_v45  ;;  %v1382_v12 = vmax.f32 %v15060_v0, %v1343_v25  ;;  %v11691_v2 = vld [vmem:[#allocation2 + $0x40] sm:$0xff] }
 0x2a8   :  { %v1415_v28 = vsel %vm479_vm3, %v1403_v17, %v1409_v35  ;;  %v1433_v58 = vsel %vm479_vm3, %v1409_v35, %v1391_v57  ;;  %v1487_v63 = vsel %vm479_vm3, %v1475_v60, %v1481_v55  ;;  %v1505_v21 = vsel %vm479_vm3, %v1481_v55, %v1463_v56  ;;  %v11695_v17 = vld [vmem:[#allocation2 + $0x58] sm:$0xff] }
 0x2a9   :  { %v1923_v61 = vpack.c.bf16 %v1884_v18, %v1883_v13  ;;  %v1453_v24 = vadd.f32 %v1415_v28, %v1309_v30  ;;  %v1454_v59 = vadd.f32 %v1433_v58, %v1310_v36  ;;  %v1525_v57 = vmax.f32 %v1381_v52, %v1487_v63  ;;  %4473 = vadd.xlane.f32.xlu1 %v11548_v62  ;;  %v11727_v63 = vld [vmem:[#allocation3 + $0x40] sm:$0xff] }
 0x2aa   :  { %v1526_v35 = vmax.f32 %v1382_v12, %v1505_v21  ;;  %v1547_v47 = vrot.slane %v15061_v31, 6  ;;  %v1619_v60 = vrot.slane %v15062_v41, 6  ;;  %v1697_v20 = vrot.slane %v15057_v4, 2  ;;  %4471 = vadd.xlane.f32.xlu0 %v11540_v19  ;;  %v11723_v12 = vpop.f32.mrb[20].mxu0  ;;  %v11725_v4 = vpop.f32.mrb[12].mxu1 }
 0x2ab   :  { %6308 = vmatprep.mubr.msk.bf16.mxu0 %vm15_vm0, %v1923_v61  ;;  %v1769_v56 = vrot.slane %v15060_v0, 2  ;;  %v3087_v55 = vrot.slane %v11691_v2, 7  ;;  %v14720_v25 = vrot.slane %v11693_v16, 7  ;;  %v14722_v30 = vrot.slane %v11695_v17, 7  ;;  %v11731_v0 = vpop.f32.mrb[21].mxu0 }
 0x2ac   :  { %v1559_v36 = vsel %vm624_vm4, %v1547_v47, %v1553_v1  ;;  %v1565_v45 = vsel %vm624_vm4, %v1541_v48, %v1547_v47  ;;  %v1631_v13 = vsel %vm624_vm4, %v1619_v60, %v1625_v5  ;;  %v15063_v18 = vrot.slane %v15059_v8, 6  ;;  %v11729_v48 = vld [vmem:[#allocation3 + $0x48] sm:$0xff] }
 0x2ad   :  { %v1597_v1 = vadd.f32 %v1565_v45, %v1453_v24  ;;  %v1598_v28 = vadd.f32 %v1559_v36, %v1454_v59  ;;  %v1670_v58 = vmax.f32 %v1526_v35, %v1631_v13  ;;  %v15064_v5 = vrot.slane %v15061_v31, 2  ;;  %v11749_v35 = vpop.f32.mrb[22].mxu0 }
 0x2ae   :  { %v1637_v52 = vsel %vm624_vm4, %v15063_v18, %v1619_v60  ;;  %v15065_v21 = vrot.slane %v15055_v9, 2  ;;  %v15066_v24 = vrot.slane %v15062_v41, 2  ;;  %v11751_v9 = vld [vmem:[#allocation3 + $0x58] sm:$0xff]  ;;  %v11753_v45 = vpop.f32.mrb[23].mxu0  ;;  %v3123_v41 = vsel %vm334_vm2, %v3087_v55, %v14720_v25 }
 0x2af   :  { %v1669_v42 = vmax.f32 %v1525_v57, %v1637_v52  ;;  %v1703_v8 = vsel %vm769_vm5, %v15064_v5, %v1697_v20  ;;  %v1793_v57 = vsel %vm769_vm5, %v1769_v56, %v1751_v50  ;;  %v3129_v46 = vsel %vm334_vm2, %v14722_v30, %v3087_v55  ;;  %v11832_v30 = vpop.f32.mrb[13].mxu1 }
 0x2b0   :  { %v1721_v61 = vsel %vm769_vm5, %v1697_v20, %v15065_v21  ;;  %v1775_v59 = vsel %vm769_vm5, %v15066_v24, %v1769_v56  ;;  %v1741_v31 = vadd.f32 %v1703_v8, %v1597_v1  ;;  %v1814_v36 = vmax.f32 %v1670_v58, %v1793_v57  ;;  %v11772_v8 = vld [vmem:[#allocation2 + $0x50] sm:$0xff] }
 0x2b1   :  { %v1742_v47 = vadd.f32 %v1721_v61, %v1598_v28  ;;  %v1813_v60 = vmax.f32 %v1669_v42, %v1775_v59  ;;  %v3159_v50 = vrot.slane %v11727_v63, 7  ;;  %v14716_v20 = vrot.slane %v11729_v48, 7  ;;  %v11776_v24 = vld [vmem:[#allocation3 + $0x50] sm:$0xff] }
 0x2b2   :  { %v1837_v56 = vmul.f32 0.033333335, %v1741_v31  ;;  %v1862_v52 = vmul.f32 0.5, %v1814_v36  ;;  %v3141_v1 = vadd.f32 %v3129_v46, %v11691_v2  ;;  %v3142_v28 = vadd.f32 %v3123_v41, %v11693_v16 }
 0x2b3   :  { %v1838_v13 = vmul.f32 0.033333335, %v1742_v47  ;;  %v1861_v18 = vmul.f32 0.5, %v1813_v60  ;;  %v14719_v42 = vrot.slane %v11751_v9, 7  ;;  %v3195_v58 = vsel %vm334_vm2, %v3159_v50, %v14716_v20 }
 0x2b4   :  { %v3214_v21 = vmax.f32 %v11729_v48, %v3195_v58  ;;  %v14717_v61 = vrot.slane %v11691_v2, 1  ;;  %v3237_v57 = vrot.slane %v11693_v16, 1  ;;  %v3243_v31 = vrot.slane %v11772_v8, 1 }
 0x2b5   :  { %v1885_v55 = vadd.f32 %v1861_v18, %v1837_v56  ;;  %v1886_v5 = vadd.f32 %v1862_v52, %v1838_v13  ;;  %v3201_v59 = vsel %vm334_vm2, %v14719_v42, %v3159_v50  ;;  %v14718_v47 = vrot.slane %v11727_v63, 1 }
 0x2b6   :  { %v3213_v36 = vmax.f32 %v11727_v63, %v3201_v59  ;;  %v3309_v41 = vrot.slane %v11729_v48, 1  ;;  %v3315_v46 = vrot.slane %v11776_v24, 1  ;;  %v3261_v13 = vsel %vm479_vm3, %v3237_v57, %v3243_v31 }
 0x2b7   :  { %v1910_v60 = vsel %vm72_vm6, %v1886_v5, 0.0  ;;  %v3267_v50 = vsel %vm479_vm3, %v14717_v61, %v3237_v57  ;;  %v3375_v18 = vrot.slane %v11691_v2, 6  ;;  %v3286_v58 = vadd.f32 %v3261_v13, %v3142_v28 }
 0x2b8   :  { %v1924_v56 = vpack.c.bf16 %v1910_v60, %v1885_v55  ;;  %v3285_v52 = vadd.f32 %v3267_v50, %v3141_v1  ;;  %v3333_v5 = vsel %vm479_vm3, %v3309_v41, %v3315_v46  ;;  %v3339_v55 = vsel %vm479_vm3, %v14718_v47, %v3309_v41 }
 0x2b9   :  { %v3357_v59 = vmax.f32 %v3213_v36, %v3339_v55  ;;  %v3358_v60 = vmax.f32 %v3214_v21, %v3333_v5  ;;  %v3381_v20 = vrot.slane %v11693_v16, 6  ;;  %v3393_v57 = vrot.slane %v11695_v17, 6 }
 0x2ba   :  { %6309 = vmatmul.mubr.msk.bf16.gmra.mrb[40].mxu0 %vm15_vm0, %v1924_v56  ;;  %v3447_v61 = vrot.slane %v11727_v63, 6  ;;  %v14721_v1 = vrot.slane %v11729_v48, 6  ;;  %v3465_v28 = vrot.slane %v11751_v9, 6  ;;  %v14723_v13 = vrot.slane %v11691_v2, 2 }
 0x2bb   :  { %v3411_v50 = vsel %vm624_vm4, %v3375_v18, %v3381_v20  ;;  %v3417_v41 = vsel %vm624_vm4, %v3393_v57, %v3375_v18  ;;  %v3525_v21 = vrot.slane %v11693_v16, 2  ;;  %v14724_v36 = vrot.slane %v11772_v8, 2 }
 0x2bc   :  { %v3429_v56 = vadd.f32 %v3417_v41, %v3285_v52  ;;  %v3430_v5 = vadd.f32 %v3411_v50, %v3286_v58  ;;  %v3483_v55 = vsel %vm624_vm4, %v3447_v61, %v14721_v1  ;;  %v3489_v47 = vsel %vm624_vm4, %v3465_v28, %v3447_v61 }
 0x2bd   :  { %v3501_v42 = vmax.f32 %v3357_v59, %v3489_v47  ;;  %v3502_v25 = vmax.f32 %v3358_v60, %v3483_v55  ;;  %v3549_v18 = vsel %vm769_vm5, %v3525_v21, %v14724_v36  ;;  %v3555_v52 = vsel %vm769_vm5, %v14723_v13, %v3525_v21 }
 0x2be   :  { %v3573_v58 = vadd.f32 %v3555_v52, %v3429_v56  ;;  %v3574_v50 = vadd.f32 %v3549_v18, %v3430_v5  ;;  %v3591_v41 = vrot.slane %v11727_v63, 2  ;;  %v3597_v1 = vrot.slane %v11729_v48, 2 }
 0x2bf   :  { %v3603_v61 = vrot.slane %v11776_v24, 2  ;;  %v3099_v47 = vrot.slane %v11772_v8, 7  ;;  %v3171_v59 = vrot.slane %v11776_v24, 7  ;;  %v3249_v60 = vrot.slane %v11695_v17, 1 }
 0x2c0   :  { %v3627_v55 = vsel %vm769_vm5, %v3591_v41, %v3597_v1  ;;  %v3669_v21 = vmul.f32 0.033333335, %v3573_v58  ;;  %v3670_v56 = vmul.f32 0.033333335, %v3574_v50  ;;  %v3321_v5 = vrot.slane %v11751_v9, 1 }
 0x2c1   :  { %v3621_v18 = vsel %vm769_vm5, %v3597_v1, %v3603_v61  ;;  %v3645_v52 = vmax.f32 %v3501_v42, %v3627_v55  ;;  %v15067_v13 = vrot.slane %v11695_v17, 7  ;;  %v15068_v7 = vrot.slane %v11693_v16, 7 }
 0x2c2   :  { %v3646_v15 = vmax.f32 %v3502_v25, %v3621_v18  ;;  %v15069_v39 = vrot.slane %v11751_v9, 7  ;;  %v15070_v55 = vrot.slane %v11729_v48, 7  ;;  %v3327_v10 = vsel %vm479_vm3, %v3315_v46, %v3321_v5 }
 0x2c3   :  { %v3111_v36 = vsel %vm334_vm2, %v3099_v47, %v15067_v13  ;;  %v3117_v14 = vsel %vm334_vm2, %v15068_v7, %v3099_v47  ;;  %v3693_v1 = vmul.f32 0.5, %v3645_v52  ;;  %v3255_v7 = vsel %vm479_vm3, %v3243_v31, %v3249_v60 }
 0x2c4   :  { %v3143_v58 = vadd.f32 %v3117_v14, %v11772_v8  ;;  %v3144_v50 = vadd.f32 %v3111_v36, %v11695_v17  ;;  %v3183_v42 = vsel %vm334_vm2, %v3171_v59, %v15069_v39  ;;  %v3189_v13 = vsel %vm334_vm2, %v15070_v55, %v3171_v59 }
 0x2c5   :  { %v3216_v16 = vmax.f32 %v11751_v9, %v3183_v42  ;;  %v3694_v25 = vmul.f32 0.5, %v3646_v15  ;;  %v3215_v14 = vmax.f32 %v11776_v24, %v3189_v13  ;;  %v15071_v36 = vrot.slane %v11691_v2, 1 }
 0x2c6   :  { %v3287_v39 = vadd.f32 %v3255_v7, %v3143_v58  ;;  %v3717_v18 = vadd.f32 %v3693_v1, %v3669_v21  ;;  %v15072_v59 = vrot.slane %v11727_v63, 1  ;;  %v3387_v13 = vrot.slane %v11772_v8, 6 }
 0x2c7   :  { %v3273_v47 = vsel %vm479_vm3, %v3249_v60, %v15071_v36  ;;  %v3718_v31 = vadd.f32 %v3694_v25, %v3670_v56  ;;  %v3359_v15 = vmax.f32 %v3215_v14, %v3327_v10  ;;  %v3459_v29 = vrot.slane %v11776_v24, 6  ;;  %v11906_v36 = vpop.f32.mrb[14].mxu1 }
 0x2c8   :  { %v3288_v52 = vadd.f32 %v3273_v47, %v3144_v50  ;;  %v3345_v42 = vsel %vm479_vm3, %v3321_v5, %v15072_v59  ;;  %v3537_v60 = vrot.slane %v11695_v17, 2  ;;  %v3609_v21 = vrot.slane %v11751_v9, 2 }
 0x2c9   :  { %v3360_v55 = vmax.f32 %v3216_v16, %v3345_v42  ;;  %v4671_v58 = vmul.f32 %v11524_v44, %v11524_v44  ;;  %v3761_v46 = vpack.c.bf16 %v3718_v31, %v3717_v18  ;;  %v3399_v63 = vsel %vm624_vm4, %v3387_v13, %v3393_v57  ;;  %v11912_v18 = vpop.f32.mrb[15].mxu1 }
 0x2ca   :  { %v3405_v56 = vsel %vm624_vm4, %v3381_v20, %v3387_v13  ;;  %v4670_v10 = vmul.f32 %v11514_v51, %v11514_v51  ;;  %v3432_v50 = vadd.f32 %v3399_v63, %v3288_v52  ;;  %v3471_v17 = vsel %vm624_vm4, %v3459_v29, %v3465_v28  ;;  %v15080_v63 = vld [vmem:[#allocation10_spill] sm:$0xff] }
 0x2cb   :  { %v3431_v5 = vadd.f32 %v3405_v56, %v3287_v39  ;;  %v15073_v9 = vrot.slane %v11729_v48, 6  ;;  %4782 = vadd.xlane.f32.xlu1 %v4671_v58  ;;  %6348 = vmatprep.mubr.msk.bf16.mxu1 %vm15_vm0, %v3761_v46  ;;  %v3504_v1 = vmax.f32 %v3360_v55, %v3471_v17  ;;  %v15074_v20 = vrot.slane %v11772_v8, 2  ;;  %v15083_v17 = vld [vmem:[#allocation16_spill] sm:$0xff] }
 0x2cc   :  { %v15075_v7 = vrot.slane %v11691_v2, 2  ;;  %v3633_v14 = vsel %vm769_vm5, %v3609_v21, %v3591_v41  ;;  %4780 = vadd.xlane.f32.xlu0 %v4670_v10  ;;  %v4711_v39 = vmul.f32 %v11544_v53, %v11544_v53  ;;  %v4710_v2 = vmul.f32 %v11534_v33, %v11534_v33 }
 0x2cd   :  { %v3477_v24 = vsel %vm624_vm4, %v15073_v9, %v3459_v29  ;;  %v3543_v16 = vsel %vm769_vm5, %v15074_v20, %v3537_v60  ;;  %v3615_v29 = vsel %vm769_vm5, %v3603_v61, %v3609_v21  ;;  %v3648_v47 = vmax.f32 %v3504_v1, %v3633_v14  ;;  %v15084_v9 = vld [vmem:[#allocation15_spill] sm:$0xff] }
 0x2ce   :  { %v3503_v57 = vmax.f32 %v3359_v15, %v3477_v24  ;;  %v3561_v28 = vsel %vm769_vm5, %v3537_v60, %v15075_v7  ;;  %v3575_v25 = vadd.f32 %v3543_v16, %v3431_v5  ;;  %v4669_v61 = vmul.f32 %v11528_v54, %v11528_v54  ;;  %v15082_v5 = vld [vmem:[#allocation14_spill] sm:$0xff] }
 0x2cf   :  { %v3576_v48 = vadd.f32 %v3561_v28, %v3432_v50  ;;  %v11918_v41 = vadd.f32 %v11101_v40, %v10579_v32  ;;  %v3696_v31 = vmul.f32 0.5, %v3648_v47  ;;  %4862 = vadd.xlane.f32.xlu1 %v4711_v39  ;;  %v4668_v15 = vmul.f32 %v11520_v27, %v11520_v27 }
 0x2d0   :  { %v3647_v8 = vmax.f32 %v3503_v57, %v3615_v29  ;;  %v3671_v52 = vmul.f32 0.033333335, %v3575_v25  ;;  %v11924_v55 = vadd.f32 %v11115_v43, %v10579_v32  ;;  %4860 = vadd.xlane.f32.xlu0 %v4710_v2  ;;  %v11928_v13 = vadd.f32 %v11123_v38, %v10579_v32  ;;  %v15081_v43 = vld [vmem:[#allocation13_spill] sm:$0xff] }
 0x2d1   :  { %v3672_v59 = vmul.f32 0.033333335, %v3576_v48  ;;  %15076 = vst [vmem:[#allocation5_spill] sm:$0xff] %v11918_v41  ;;  %v11932_v60 = vadd.f32 %v11138_v3, %v10579_v32  ;;  %v4709_v40 = vmul.f32 %v11548_v62, %v11548_v62  ;;  %v1248_v21 = vrot.slane %v10485_v23, 7 }
 0x2d2   :  { %v3695_v42 = vmul.f32 0.5, %v3647_v8  ;;  %15077 = vst [vmem:[#allocation6_spill] sm:$0xff] %v11924_v55  ;;  %15078 = vst [vmem:[#allocation9_spill] sm:$0xff] %v11928_v13  ;;  %v1254_v56 = vrot.slane %v15080_v63, 7  ;;  %v1266_v10 = vrot.slane %v15081_v43, 7  ;;  %v1320_v50 = vrot.slane %v15082_v5, 7 }
 0x2d3   :  { %15079 = vst [vmem:[#allocation4_spill] sm:$0xff] %v11932_v60  ;;  %v3720_v46 = vadd.f32 %v3696_v31, %v3672_v59  ;;  %v1326_v38 = vrot.slane %v15083_v17, 7  ;;  %v1338_v24 = vrot.slane %v15084_v9, 7  ;;  %v1392_v3 = vrot.slane %v10485_v23, 1  ;;  %4778 = vadd.xlane.f32.xlu1 %v4669_v61  ;;  %v15085_v8 = vld [vmem:[#allocation12_spill] sm:$0xff]  ;;  %v15086_v31 = vld [vmem:[#allocation11_spill] sm:$0xff] }
 0x2d4   :  { %v3719_v58 = vadd.f32 %v3695_v42, %v3671_v52  ;;  %v1284_v1 = vsel %vm334_vm2, %v1248_v21, %v1254_v56  ;;  %v1290_v20 = vsel %vm334_vm2, %v1266_v10, %v1248_v21  ;;  %v1398_v16 = vrot.slane %v15080_v63, 1  ;;  %4776 = vadd.xlane.f32.xlu0 %v4668_v15 }
 0x2d5   :  { %v3744_v57 = vsel %vm72_vm6, %v3720_v46, 0.0  ;;  %v1311_v28 = vadd.f32 %v1290_v20, %v10485_v23  ;;  %v1312_v25 = vadd.f32 %v1284_v1, %v15080_v63  ;;  %v1356_v48 = vsel %vm334_vm2, %v1320_v50, %v1326_v38 }
 0x2d6   :  { %v3762_v7 = vpack.c.bf16 %v3744_v57, %v3719_v58  ;;  %v1362_v29 = vsel %vm334_vm2, %v1338_v24, %v1320_v50  ;;  %v1384_v14 = vmax.f32 %v15083_v17, %v1356_v48  ;;  %v1404_v47 = vrot.slane %v15085_v8, 1 }
 0x2d7   :  { %v1428_v39 = vsel %vm479_vm3, %v1392_v3, %v1398_v16  ;;  %v1383_v2 = vmax.f32 %v15082_v5, %v1362_v29  ;;  %v1464_v59 = vrot.slane %v15082_v5, 1  ;;  %v1470_v61 = vrot.slane %v15083_v17, 1  ;;  %4858 = vadd.xlane.f32.xlu1 %v4709_v40 }
 0x2d8   :  { %6349 = vmatmul.mubr.msk.bf16.gmra.mrb[32].mxu1 %vm15_vm0, %v3762_v7  ;;  %v1455_v52 = vadd.f32 %v1428_v39, %v1311_v28  ;;  %v1422_v42 = vsel %vm479_vm3, %v1398_v16, %v1404_v47  ;;  %v1476_v15 = vrot.slane %v15086_v31, 1  ;;  %v1536_v21 = vrot.slane %v10485_v23, 6 }
 0x2d9   :  { %v1542_v58 = vrot.slane %v15080_v63, 6  ;;  %v1456_v46 = vadd.f32 %v1422_v42, %v1312_v25  ;;  %v1500_v50 = vsel %vm479_vm3, %v1464_v59, %v1470_v61  ;;  %v1554_v57 = vrot.slane %v15081_v43, 6 }
 0x2da   :  { %v1608_v1 = vrot.slane %v15082_v5, 6  ;;  %v1494_v40 = vsel %vm479_vm3, %v1470_v61, %v1476_v15  ;;  %v1527_v20 = vmax.f32 %v1383_v2, %v1500_v50  ;;  %v14734_v7 = vrot.slane %v15083_v17, 6 }
 0x2db   :  { %v1572_v16 = vsel %vm624_vm4, %v1536_v21, %v1542_v58  ;;  %v1528_v28 = vmax.f32 %v1384_v14, %v1494_v40  ;;  %v1578_v25 = vsel %vm624_vm4, %v1554_v57, %v1536_v21  ;;  %v14736_v29 = vrot.slane %v15084_v9, 6  ;;  %4405 = vadd.xlane.f32.xlu1 %v11928_v13 }
 0x2dc   :  { %v1600_v48 = vadd.f32 %v1572_v16, %v1456_v46  ;;  %v1599_v39 = vadd.f32 %v1578_v25, %v1455_v52  ;;  %v1644_v2 = vsel %vm624_vm4, %v1608_v1, %v14734_v7  ;;  %v14733_v61 = vrot.slane %v10485_v23, 2 }
 0x2dd   :  { %v1686_v42 = vrot.slane %v15080_v63, 2  ;;  %v1650_v14 = vsel %vm624_vm4, %v14736_v29, %v1608_v1  ;;  %v1672_v21 = vmax.f32 %v1528_v28, %v1644_v2  ;;  %v14735_v46 = vrot.slane %v15085_v8, 2 }
 0x2de   :  { %v14737_v52 = vrot.slane %v15082_v5, 2  ;;  %v1671_v50 = vmax.f32 %v1527_v20, %v1650_v14  ;;  %v1758_v16 = vrot.slane %v15083_v17, 2  ;;  %v14738_v25 = vrot.slane %v15086_v31, 2 }
 0x2df   :  { %v1716_v40 = vsel %vm769_vm5, %v14733_v61, %v1686_v42  ;;  %v1710_v1 = vsel %vm769_vm5, %v1686_v42, %v14735_v46  ;;  %v12024_v2 = vadd.f32 %v11253_v22, %v10579_v32  ;;  %v4708_v20 = vmul.f32 %v11540_v19, %v11540_v19 }
 0x2e0   :  { %v1743_v28 = vadd.f32 %v1716_v40, %v1599_v39  ;;  %v1744_v14 = vadd.f32 %v1710_v1, %v1600_v48  ;;  %v1782_v61 = vsel %vm769_vm5, %v1758_v16, %v14738_v25  ;;  %v1788_v7 = vsel %vm769_vm5, %v14737_v52, %v1758_v16  ;;  %v12074_v25 = vpop.f32.mrb[16].mxu1 }
 0x2e1   :  { %15087 = vst [vmem:[#allocation8_spill] sm:$0xff] %v12024_v2  ;;  %v1260_v39 = vrot.slane %v15085_v8, 7  ;;  %v1815_v42 = vmax.f32 %v1671_v50, %v1788_v7  ;;  %v1816_v40 = vmax.f32 %v1672_v21, %v1782_v61  ;;  %4856 = vadd.xlane.f32.xlu0 %v4708_v20  ;;  %v1332_v46 = vrot.slane %v15086_v31, 7  ;;  %v12049_v50 = vpop.f32.mrb[24].mxu0  ;;  %15088 = vst [vmem:[#allocation27_spill] sm:$0xff] %v12074_v25 }
 0x2e2   :  { %v1839_v22 = vmul.f32 0.033333335, %v1743_v28  ;;  %v1840_v29 = vmul.f32 0.033333335, %v1744_v14  ;;  %v1410_v16 = vrot.slane %v15081_v43, 1 }
 0x2e3   :  { %v1272_v48 = vsel %vm334_vm2, %v1260_v39, %v1266_v10  ;;  %v1278_v1 = vsel %vm334_vm2, %v1254_v56, %v1260_v39  ;;  %v1863_v52 = vmul.f32 0.5, %v1815_v42  ;;  %v1864_v7 = vmul.f32 0.5, %v1816_v40 }
 0x2e4   :  { %v1313_v61 = vadd.f32 %v1278_v1, %v15085_v8  ;;  %v1314_v21 = vadd.f32 %v1272_v48, %v15081_v43  ;;  %v1344_v10 = vsel %vm334_vm2, %v1332_v46, %v1338_v24  ;;  %v1350_v56 = vsel %vm334_vm2, %v1326_v38, %v1332_v46  ;;  %v12068_v24 = vpop.f32.mrb[25].mxu0 }
 0x2e5   :  { %v1416_v28 = vsel %vm479_vm3, %v1404_v47, %v1410_v16  ;;  %v1434_v20 = vsel %vm479_vm3, %v1410_v16, %v1392_v3  ;;  %v1887_v14 = vadd.f32 %v1863_v52, %v1839_v22  ;;  %v1888_v39 = vadd.f32 %v1864_v7, %v1840_v29  ;;  %4403 = vadd.xlane.f32.xlu0 %v11918_v41  ;;  %v12072_v1 = vpop.f32.mrb[26].mxu0 }
 0x2e6   :  { %v1385_v42 = vmax.f32 %v15086_v31, %v1350_v56  ;;  %v1386_v40 = vmax.f32 %v15084_v9, %v1344_v10  ;;  %v1457_v48 = vadd.f32 %v1416_v28, %v1313_v61  ;;  %v1458_v38 = vadd.f32 %v1434_v20, %v1314_v21  ;;  %v12095_v10 = vpop.f32.mrb[27].mxu0  ;;  %v12097_v56 = vpop.f32.mrb[17].mxu1 }
 0x2e7   :  { %v1482_v46 = vrot.slane %v15084_v9, 1  ;;  %v1548_v47 = vrot.slane %v15085_v8, 6  ;;  %v1925_v3 = vpack.c.bf16 %v1888_v39, %v1887_v14  ;;  %v1620_v29 = vrot.slane %v15086_v31, 6  ;;  %15089 = vst [vmem:[#allocation7_spill] sm:$0xff] %v12095_v10  ;;  %15090 = vst [vmem:[#allocation26_spill] sm:$0xff] %v12097_v56  ;;  %v12100_v14 = vpop.f32.mrb[18].mxu1 }
 0x2e8   :  { %v1698_v52 = vrot.slane %v15081_v43, 2  ;;  %v1770_v22 = vrot.slane %v15084_v9, 2  ;;  %15091 = vst [vmem:[#allocation10_spill] sm:$0xff] %v12100_v14  ;;  %v15092_v43 = vrot.slane %v15084_v9, 6  ;;  %v15094_v39 = vrot.slane %v15085_v8, 2  ;;  %v12119_v9 = vpop.f32.mrb[19].mxu1 }
 0x2e9   :  { %v1488_v16 = vsel %vm479_vm3, %v1476_v15, %v1482_v46  ;;  %v1506_v7 = vsel %vm479_vm3, %v1482_v46, %v1464_v59  ;;  %v1560_v61 = vsel %vm624_vm4, %v1548_v47, %v1554_v57  ;;  %v1566_v21 = vsel %vm624_vm4, %v1542_v58, %v1548_v47  ;;  %6312 = vmatprep.mubr.msk.bf16.mxu0 %vm15_vm0, %v1925_v3  ;;  %v12121_v3 = vld [vmem:[#allocation2 + $0x60] sm:$0xff]  ;;  %v12125_v8 = vld [vmem:[#allocation2 + $0x78] sm:$0xff] }
 0x2ea   :  { %v1529_v15 = vmax.f32 %v1385_v42, %v1488_v16  ;;  %v1530_v28 = vmax.f32 %v1386_v40, %v1506_v7  ;;  %v1601_v20 = vadd.f32 %v1566_v21, %v1457_v48  ;;  %v1602_v59 = vadd.f32 %v1560_v61, %v1458_v38  ;;  %4483 = vadd.xlane.f32.xlu0 %v12024_v2 }
 0x2eb   :  { %v1632_v63 = vsel %vm624_vm4, %v1620_v29, %v15092_v43  ;;  %v15093_v57 = vrot.slane %v15083_v17, 6  ;;  %v1704_v42 = vsel %vm769_vm5, %v15094_v39, %v1698_v52  ;;  %v15095_v40 = vrot.slane %v10485_v23, 2  ;;  %15096 = vst [vmem:[#allocation13_spill] sm:$0xff] %v12119_v9 }
 0x2ec   :  { %v1674_v46 = vmax.f32 %v1530_v28, %v1632_v63  ;;  %v1745_v17 = vadd.f32 %v1704_v42, %v1601_v20  ;;  %v15097_v16 = vrot.slane %v15086_v31, 2  ;;  %v12137_v61 = vadd.f32 %v11358_v26, %v10579_v32  ;;  %v12145_v28 = vld [vmem:[#allocation3 + $0x68] sm:$0xff] }
 0x2ed   :  { %v1638_v58 = vsel %vm624_vm4, %v15093_v57, %v1620_v29  ;;  %v1722_v48 = vsel %vm769_vm5, %v1698_v52, %v15095_v40  ;;  %v12123_v29 = vld [vmem:[#allocation2 + $0x68] sm:$0xff]  ;;  %v15098_v52 = vrot.slane %v15082_v5, 2  ;;  %v12141_v21 = vadd.f32 %v11365_v49, %v10579_v32  ;;  %v12147_v5 = vld [vmem:[#allocation3 + $0x78] sm:$0xff] }
 0x2ee   :  { %v1673_v38 = vmax.f32 %v1529_v15, %v1638_v58  ;;  %v1746_v47 = vadd.f32 %v1722_v48, %v1602_v59  ;;  %v1776_v23 = vsel %vm769_vm5, %v15097_v16, %v1770_v22  ;;  %15099 = vst [vmem:[#allocation14_spill] sm:$0xff] %v12137_v61  ;;  %v12143_v15 = vld [vmem:[#allocation3 + $0x60] sm:$0xff]  ;;  %v1841_v59 = vmul.f32 0.033333335, %v1745_v17  ;;  %4399 = vadd.xlane.f32.xlu0 %v11924_v55  ;;  %v12158_v58 = vpop.xlane.xlu1 %4371 }
 0x2ef   :  { %v1794_v7 = vsel %vm769_vm5, %v1770_v22, %v15098_v52  ;;  %15100 = vst [vmem:[#allocation16_spill] sm:$0xff] %v12141_v21  ;;  %v15101_v22 = vld [vmem:[#allocation19_spill] sm:$0xff]  ;;  %v3088_v26 = vrot.slane %v12121_v3, 7  ;;  %v14741_v57 = vrot.slane %v12123_v29, 7  ;;  %v14742_v49 = vrot.slane %v12125_v8, 7  ;;  %4485 = vadd.xlane.f32.xlu1 %v12141_v21  ;;  %v12172_v52 = vld [vmem:[#allocation2 + $0x70] sm:$0xff] }
 0x2f0   :  { %v1817_v31 = vmax.f32 %v1673_v38, %v1776_v23  ;;  %v1818_v20 = vmax.f32 %v1674_v46, %v1794_v7  ;;  %v1842_v43 = vmul.f32 0.033333335, %v1746_v47  ;;  %v12151_v63 = vadd.f32 %v15101_v22, %v10579_v32  ;;  %v12270_v33 = vpop.f32.mrb[20].mxu1 }
 0x2f1   :  { %v3160_v40 = vrot.slane %v12143_v15, 7  ;;  %v14739_v48 = vrot.slane %v12145_v28, 7  ;;  %v3124_v38 = vsel %vm334_vm2, %v3088_v26, %v14741_v57  ;;  %v3130_v46 = vsel %vm334_vm2, %v14742_v49, %v3088_v26  ;;  %15108 = vst [vmem:[#allocation45_spill] sm:$0xff] %v12270_v33 }
 0x2f2   :  { %15102 = vst [vmem:[#allocation15_spill] sm:$0xff] %v12151_v63  ;;  %v1865_v39 = vmul.f32 0.5, %v1817_v31  ;;  %v1866_v42 = vmul.f32 0.5, %v1818_v20  ;;  %v14740_v17 = vrot.slane %v12147_v5, 7  ;;  %v14745_v47 = vrot.slane %v12121_v3, 1  ;;  %4479 = vadd.xlane.f32.xlu0 %v12137_v61 }
 0x2f3   :  { %v3145_v7 = vadd.f32 %v3130_v46, %v12121_v3  ;;  %v3146_v31 = vadd.f32 %v3124_v38, %v12123_v29  ;;  %v3196_v20 = vsel %vm334_vm2, %v3160_v40, %v14739_v48  ;;  %v3238_v26 = vrot.slane %v12123_v29, 1  ;;  %4401 = vadd.xlane.f32.xlu1 %v11932_v60  ;;  %v12195_v48 = vld [vmem:[#allocation3 + $0x70] sm:$0xff] }
 0x2f4   :  { %v1889_v16 = vadd.f32 %v1865_v39, %v1841_v59  ;;  %v1890_v23 = vadd.f32 %v1866_v42, %v1842_v43  ;;  %v3202_v22 = vsel %vm334_vm2, %v14740_v17, %v3160_v40  ;;  %v14743_v59 = vrot.slane %v12172_v52, 1  ;;  %v12188_v43 = vpop.xlane.xlu0 %4367 }
 0x2f5   :  { %v3217_v42 = vmax.f32 %v12143_v15, %v3202_v22  ;;  %v3218_v38 = vmax.f32 %v12145_v28, %v3196_v20  ;;  %v14746_v46 = vrot.slane %v12143_v15, 1  ;;  %v3268_v57 = vsel %vm479_vm3, %v14745_v47, %v3238_v26  ;;  %v12206_v22 = vpop.xlane.xlu1 %4373 }
 0x2f6   :  { %v1914_v39 = vsel %vm72_vm6, %v1890_v23, 0.0  ;;  %v3262_v17 = vsel %vm479_vm3, %v3238_v26, %v14743_v59  ;;  %v3310_v23 = vrot.slane %v12145_v28, 1  ;;  %v3289_v20 = vadd.f32 %v3268_v57, %v3145_v7 }
 0x2f7   :  { %v1926_v40 = vpack.c.bf16 %v1914_v39, %v1889_v16  ;;  %v3290_v49 = vadd.f32 %v3262_v17, %v3146_v31  ;;  %v14752_v16 = vrot.slane %v12195_v48, 1  ;;  %v3376_v39 = vrot.slane %v12121_v3, 6  ;;  %4481 = vadd.xlane.f32.xlu1 %v12151_v63 }
 0x2f8   :  { %v3340_v59 = vsel %vm479_vm3, %v14746_v46, %v3310_v23  ;;  %v14750_v19 = vrot.slane %v12123_v29, 6  ;;  %v14751_v26 = vrot.slane %v12125_v8, 6  ;;  %v3448_v47 = vrot.slane %v12143_v15, 6  ;;  %v12234_v54 = vpop.xlane.xlu0 %4756 }
 0x2f9   :  { %6313 = vmatmul.mubr.msk.bf16.gmra.mrb[44].mxu0 %vm15_vm0, %v1926_v40  ;;  %v3334_v57 = vsel %vm479_vm3, %v3310_v23, %v14752_v16  ;;  %v3361_v17 = vmax.f32 %v3217_v42, %v3340_v59  ;;  %v14753_v7 = vrot.slane %v12145_v28, 6  ;;  %v14754_v31 = vrot.slane %v12147_v5, 6  ;;  %v12236_v59 = vpop.f32.mrb[28].mxu0 }
 0x2fa   :  { %v3362_v40 = vmax.f32 %v3218_v38, %v3334_v57  ;;  %v3412_v46 = vsel %vm624_vm4, %v3376_v39, %v14750_v19  ;;  %v3418_v62 = vsel %vm624_vm4, %v14751_v26, %v3376_v39  ;;  %15103 = vst [vmem:[#allocation12_spill] sm:$0xff] %v12236_v59  ;;  %v12246_v19 = vpop.f32.mrb[29].mxu0  ;;  %v3526_v16 = vrot.slane %v12123_v29, 2 }
 0x2fb   :  { %v3433_v42 = vadd.f32 %v3418_v62, %v3289_v20  ;;  %v3434_v23 = vadd.f32 %v3412_v46, %v3290_v49  ;;  %v3484_v38 = vsel %vm624_vm4, %v3448_v47, %v14753_v7  ;;  %v3490_v57 = vsel %vm624_vm4, %v14754_v31, %v3448_v47  ;;  %15104 = vst [vmem:[#allocation11_spill] sm:$0xff] %v12246_v19  ;;  %v12250_v62 = vpop.xlane.xlu1 %4758  ;;  %v12252_v49 = vpop.f32.mrb[30].mxu0 }
 0x2fc   :  { %v3505_v39 = vmax.f32 %v3361_v17, %v3490_v57  ;;  %v3506_v26 = vmax.f32 %v3362_v40, %v3484_v38  ;;  %v14758_v27 = vrot.slane %v12172_v52, 2  ;;  %15105 = vst [vmem:[#allocation19_spill] sm:$0xff] %v12252_v49  ;;  %v3598_v20 = vrot.slane %v12145_v28, 2  ;;  %v12268_v46 = vpop.f32.mrb[31].mxu0 }
 0x2fd   :  { %v3100_v47 = vrot.slane %v12172_v52, 7  ;;  %v15106_v40 = vrot.slane %v12121_v3, 2  ;;  %v3172_v57 = vrot.slane %v12195_v48, 7  ;;  %v3250_v31 = vrot.slane %v12125_v8, 1  ;;  %15107 = vst [vmem:[#allocation44_spill] sm:$0xff] %v12268_v46 }
 0x2fe   :  { %v3550_v17 = vsel %vm769_vm5, %v3526_v16, %v14758_v27  ;;  %v15109_v51 = vrot.slane %v12195_v48, 2  ;;  %v15110_v44 = vrot.slane %v12143_v15, 2  ;;  %v15111_v19 = vrot.slane %v12125_v8, 7 }
 0x2ff   :  { %v3556_v38 = vsel %vm769_vm5, %v15106_v40, %v3526_v16  ;;  %v3578_v53 = vadd.f32 %v3550_v17, %v3434_v23  ;;  %v12288_v17 = vpop.xlane.xlu0 %4369  ;;  %v3460_v11 = vrot.slane %v12195_v48, 6  ;;  %v3610_v14 = vrot.slane %v12147_v5, 2 }
 0x300   :  { %v3577_v7 = vadd.f32 %v3556_v38, %v3433_v42  ;;  %v3622_v27 = vsel %vm769_vm5, %v3598_v20, %v15109_v51  ;;  %v3628_v16 = vsel %vm769_vm5, %v15110_v44, %v3598_v20  ;;  %v3112_v46 = vsel %vm334_vm2, %v3100_v47, %v15111_v19 }
 0x301   :  { %v3649_v40 = vmax.f32 %v3505_v39, %v3628_v16  ;;  %v3650_v49 = vmax.f32 %v3506_v26, %v3622_v27  ;;  %v15112_v42 = vrot.slane %v12123_v29, 7  ;;  %v3674_v38 = vmul.f32 0.033333335, %v3578_v53  ;;  %v12300_v16 = vpop.xlane.xlu1 %4754 }
 0x302   :  { %v3673_v51 = vmul.f32 0.033333335, %v3577_v7  ;;  %v3148_v44 = vadd.f32 %v3112_v46, %v12125_v8  ;;  %v15113_v26 = vrot.slane %v12147_v5, 7  ;;  %v15114_v20 = vrot.slane %v12145_v28, 7  ;;  %v12302_v7 = vpop.f32.mrb[21].mxu1 }
 0x303   :  { %v3118_v23 = vsel %vm334_vm2, %v15112_v42, %v3100_v47  ;;  %v3697_v39 = vmul.f32 0.5, %v3649_v40  ;;  %v3698_v27 = vmul.f32 0.5, %v3650_v49  ;;  %15115 = vst [vmem:[#allocation46_spill] sm:$0xff] %v12302_v7  ;;  %v15116_v49 = vrot.slane %v12172_v52, 1 }
 0x304   :  { %v3147_v33 = vadd.f32 %v3118_v23, %v12172_v52  ;;  %v3184_v19 = vsel %vm334_vm2, %v3172_v57, %v15113_v26  ;;  %v3190_v47 = vsel %vm334_vm2, %v15114_v20, %v3172_v57  ;;  %v15117_v42 = vrot.slane %v12121_v3, 1  ;;  %v12314_v26 = vpop.f32.mrb[22].mxu1 }
 0x305   :  { %v3219_v53 = vmax.f32 %v12195_v48, %v3190_v47  ;;  %v3220_v46 = vmax.f32 %v12147_v5, %v3184_v19  ;;  %v3256_v40 = vsel %vm479_vm3, %v15116_v49, %v3250_v31  ;;  %15118 = vst [vmem:[#allocation47_spill] sm:$0xff] %v12314_v26  ;;  %v3721_v57 = vadd.f32 %v3697_v39, %v3673_v51  ;;  %v12316_v37 = vpop.f32.mrb[23].mxu1  ;;  %v12327_v51 = vpop.xlane.xlu0 %4752 }
 0x306   :  { %v3274_v23 = vsel %vm479_vm3, %v3250_v31, %v15117_v42  ;;  %v3722_v20 = vadd.f32 %v3698_v27, %v3674_v38  ;;  %v3291_v59 = vadd.f32 %v3256_v40, %v3147_v33  ;;  %15119 = vst [vmem:[#allocation48_spill] sm:$0xff] %v12316_v37  ;;  %v3322_v19 = vrot.slane %v12147_v5, 1  ;;  %v12346_v37 = vld [vmem:[#allocation2 + $0x80] sm:$0xff]  ;;  %v12348_v26 = vpop.xlane.xlu1 %4381 }
 0x307   :  { %v3292_v7 = vadd.f32 %v3274_v23, %v3148_v44  ;;  %v3388_v47 = vrot.slane %v12172_v52, 6  ;;  %v3538_v49 = vrot.slane %v12125_v8, 2  ;;  %v4675_v31 = vmul.f32 %v11928_v13, %v11928_v13 }
 0x308   :  { %v3763_v9 = vpack.c.bf16 %v3722_v20, %v3721_v57  ;;  %v4674_v33 = vmul.f32 %v11918_v41, %v11918_v41  ;;  %v15120_v38 = vrot.slane %v12195_v48, 1  ;;  %v15121_v39 = vrot.slane %v12143_v15, 1 }
 0x309   :  { %v15122_v40 = vrot.slane %v12125_v8, 6  ;;  %v15123_v23 = vrot.slane %v12123_v29, 6  ;;  %v15124_v8 = vrot.slane %v12147_v5, 6  ;;  %v15125_v29 = vrot.slane %v12145_v28, 6  ;;  %4790 = vadd.xlane.f32.xlu1 %v4675_v31  ;;  %v12366_v5 = vld [vmem:[#allocation2 + $0x88] sm:$0xff] }
 0x30a   :  { %v3328_v44 = vsel %vm479_vm3, %v15120_v38, %v3322_v19  ;;  %v3346_v27 = vsel %vm479_vm3, %v3322_v19, %v15121_v39  ;;  %6352 = vmatprep.mubr.msk.bf16.mxu1 %vm15_vm0, %v3763_v9  ;;  %v15126_v9 = vrot.slane %v12172_v52, 2  ;;  %4788 = vadd.xlane.f32.xlu0 %v4674_v33  ;;  %v12372_v52 = vld [vmem:[#allocation3 + $0x88] sm:$0xff]  ;;  %v3089_v33 = vrot.slane %v12346_v37, 7 }
 0x30b   :  { %v3400_v42 = vsel %vm624_vm4, %v3388_v47, %v15122_v40  ;;  %v3406_v57 = vsel %vm624_vm4, %v15123_v23, %v3388_v47  ;;  %v3363_v20 = vmax.f32 %v3219_v53, %v3328_v44  ;;  %v3364_v41 = vmax.f32 %v3220_v46, %v3346_v27  ;;  %v12368_v27 = vld [vmem:[#allocation2 + $0x98] sm:$0xff] }
 0x30c   :  { %v3435_v38 = vadd.f32 %v3406_v57, %v3291_v59  ;;  %v3436_v13 = vadd.f32 %v3400_v42, %v3292_v7  ;;  %v3472_v19 = vsel %vm624_vm4, %v3460_v11, %v15124_v8  ;;  %v3478_v47 = vsel %vm624_vm4, %v15125_v29, %v3460_v11  ;;  %v12370_v11 = vld [vmem:[#allocation3 + $0x80] sm:$0xff] }
 0x30d   :  { %v3544_v59 = vsel %vm769_vm5, %v15126_v9, %v3538_v49  ;;  %v15127_v7 = vrot.slane %v12121_v3, 2  ;;  %v3507_v46 = vmax.f32 %v3363_v20, %v3478_v47  ;;  %v3508_v44 = vmax.f32 %v3364_v41, %v3472_v19 }
 0x30e   :  { %v3579_v39 = vadd.f32 %v3544_v59, %v3435_v38  ;;  %v15128_v40 = vrot.slane %v12195_v48, 2  ;;  %v4715_v41 = vmul.f32 %v12141_v21, %v12141_v21  ;;  %v12387_v48 = vpop.xlane.xlu0 %4379  ;;  %v14769_v38 = vrot.slane %v12366_v5, 7  ;;  %v12395_v59 = vpop.xlane.xlu1 %4377 }
 0x30f   :  { %v3562_v53 = vsel %vm769_vm5, %v3538_v49, %v15127_v7  ;;  %v15129_v49 = vrot.slane %v12143_v15, 2  ;;  %v14775_v15 = vrot.slane %v12368_v27, 7  ;;  %v14765_v8 = vrot.slane %v12372_v52, 7 }
 0x310   :  { %v3580_v28 = vadd.f32 %v3562_v53, %v3436_v13  ;;  %v3616_v3 = vsel %vm769_vm5, %v15128_v40, %v3610_v14  ;;  %v12384_v13 = vld [vmem:[#allocation3 + $0x98] sm:$0xff]  ;;  %v3675_v57 = vmul.f32 0.033333335, %v3579_v39  ;;  %4870 = vadd.xlane.f32.xlu1 %v4715_v41  ;;  %v14764_v9 = vrot.slane %v12346_v37, 1  ;;  %v12410_v40 = vld [vmem:[#allocation2 + $0x90] sm:$0xff] }
 0x311   :  { %v3634_v31 = vsel %vm769_vm5, %v3610_v14, %v15129_v49  ;;  %v3651_v42 = vmax.f32 %v3507_v46, %v3616_v3  ;;  %v3161_v14 = vrot.slane %v12370_v11, 7  ;;  %v14768_v47 = vrot.slane %v12384_v13, 7 }
 0x312   :  { %v3652_v23 = vmax.f32 %v3508_v44, %v3634_v31  ;;  %v3676_v20 = vmul.f32 0.033333335, %v3580_v28  ;;  %v3125_v7 = vsel %vm334_vm2, %v3089_v33, %v14769_v38  ;;  %v3131_v53 = vsel %vm334_vm2, %v14775_v15, %v3089_v33 }
 0x313   :  { %v3699_v19 = vmul.f32 0.5, %v3651_v42  ;;  %v3197_v46 = vsel %vm334_vm2, %v3161_v14, %v14765_v8  ;;  %v3239_v44 = vrot.slane %v12366_v5, 1  ;;  %v3149_v3 = vadd.f32 %v3131_v53, %v12346_v37 }
 0x314   :  { %v3700_v29 = vmul.f32 0.5, %v3652_v23  ;;  %v3150_v49 = vadd.f32 %v3125_v7, %v12366_v5  ;;  %v3203_v31 = vsel %vm334_vm2, %v14768_v47, %v3161_v14  ;;  %v3222_v41 = vmax.f32 %v12372_v52, %v3197_v46  ;;  %v12430_v14 = vpop.xlane.xlu0 %4375 }
 0x315   :  { %v3723_v39 = vadd.f32 %v3699_v19, %v3675_v57  ;;  %v14766_v33 = vrot.slane %v12410_v40, 1  ;;  %v3269_v42 = vsel %vm479_vm3, %v14764_v9, %v3239_v44  ;;  %v12426_v57 = vld [vmem:[#allocation3 + $0x90] sm:$0xff]  ;;  %v3311_v46 = vrot.slane %v12372_v52, 1 }
 0x316   :  { %v3724_v28 = vadd.f32 %v3700_v29, %v3676_v20  ;;  %v3221_v20 = vmax.f32 %v12370_v11, %v3203_v31  ;;  %v3293_v19 = vadd.f32 %v3269_v42, %v3149_v3  ;;  %v14771_v29 = vrot.slane %v12370_v11, 1  ;;  %v12441_v42 = vpop.xlane.xlu1 %4766 }
 0x317   :  { %v3263_v53 = vsel %vm479_vm3, %v3239_v44, %v14766_v33  ;;  %v14767_v9 = vrot.slane %v12426_v57, 1  ;;  %v3377_v8 = vrot.slane %v12346_v37, 6  ;;  %v14770_v31 = vrot.slane %v12366_v5, 6 }
 0x318   :  { %v3748_v23 = vsel %vm72_vm6, %v3724_v28, 0.0  ;;  %v3294_v28 = vadd.f32 %v3263_v53, %v3150_v49  ;;  %v14774_v3 = vrot.slane %v12368_v27, 6  ;;  %v3449_v49 = vrot.slane %v12370_v11, 6 }
 0x319   :  { %v3764_v7 = vpack.c.bf16 %v3748_v23, %v3723_v39  ;;  %v3335_v44 = vsel %vm479_vm3, %v3311_v46, %v14767_v9  ;;  %v3341_v39 = vsel %vm479_vm3, %v14771_v29, %v3311_v46  ;;  %v14772_v23 = vrot.slane %v12372_v52, 6  ;;  %v12470_v29 = vpop.xlane.xlu0 %4764 }
 0x31a   :  { %v3365_v53 = vmax.f32 %v3221_v20, %v3341_v39  ;;  %v3366_v33 = vmax.f32 %v3222_v41, %v3335_v44  ;;  %v3419_v9 = vsel %vm624_vm4, %v14774_v3, %v3377_v8  ;;  %v14773_v46 = vrot.slane %v12384_v13, 6 }
 0x31b   :  { %6353 = vmatmul.mubr.msk.bf16.gmra.mrb[36].mxu1 %vm15_vm0, %v3764_v7  ;;  %v3413_v7 = vsel %vm624_vm4, %v3377_v8, %v14770_v31  ;;  %v3437_v47 = vadd.f32 %v3419_v9, %v3293_v19  ;;  %v3485_v20 = vsel %vm624_vm4, %v3449_v49, %v14772_v23  ;;  %v14776_v44 = vrot.slane %v12346_v37, 2  ;;  %v12489_v23 = vpop.xlane.xlu1 %4762 }
 0x31c   :  { %v3438_v38 = vadd.f32 %v3413_v7, %v3294_v28  ;;  %v3510_v41 = vmax.f32 %v3366_v33, %v3485_v20  ;;  %v3527_v39 = vrot.slane %v12366_v5, 2  ;;  %v14777_v31 = vrot.slane %v12410_v40, 2 }
 0x31d   :  { %v3491_v8 = vsel %vm624_vm4, %v14773_v46, %v3449_v49  ;;  %v14781_v9 = vrot.slane %v12370_v11, 2  ;;  %v3599_v19 = vrot.slane %v12372_v52, 2  ;;  %v14779_v28 = vrot.slane %v12426_v57, 2  ;;  %v12491_v46 = vpop.f32.mrb[32].mxu0 }
 0x31e   :  { %v3509_v33 = vmax.f32 %v3365_v53, %v3491_v8  ;;  %v3551_v7 = vsel %vm769_vm5, %v3527_v39, %v14777_v31  ;;  %v3557_v20 = vsel %vm769_vm5, %v14776_v44, %v3527_v39  ;;  %v4714_v49 = vmul.f32 %v12024_v2, %v12024_v2  ;;  %15130 = vst [vmem:[#allocation49_spill] sm:$0xff] %v12491_v46  ;;  %v12501_v39 = vpop.f32.mrb[33].mxu0 }
 0x31f   :  { %v3581_v3 = vadd.f32 %v3557_v20, %v3437_v47  ;;  %v3582_v15 = vadd.f32 %v3551_v7, %v3438_v38  ;;  %v3623_v53 = vsel %vm769_vm5, %v3599_v19, %v14779_v28  ;;  %v3629_v8 = vsel %vm769_vm5, %v14781_v9, %v3599_v19  ;;  %15131 = vst [vmem:[#allocation50_spill] sm:$0xff] %v12501_v39  ;;  %v12505_v38 = vpop.f32.mrb[34].mxu0 }
 0x320   :  { %v3653_v44 = vmax.f32 %v3509_v33, %v3629_v8  ;;  %v3654_v31 = vmax.f32 %v3510_v41, %v3623_v53  ;;  %4868 = vadd.xlane.f32.xlu0 %v4714_v49  ;;  %v3101_v2 = vrot.slane %v12410_v40, 7  ;;  %v3173_v47 = vrot.slane %v12426_v57, 7  ;;  %15132 = vst [vmem:[#allocation51_spill] sm:$0xff] %v12505_v38  ;;  %v12517_v53 = vpop.xlane.xlu0 %4760  ;;  %v12533_v38 = vpop.xlane.xlu1 %4389 }
 0x321   :  { %v3677_v7 = vmul.f32 0.033333335, %v3581_v3  ;;  %v3678_v20 = vmul.f32 0.033333335, %v3582_v15  ;;  %v3251_v28 = vrot.slane %v12368_v27, 1  ;;  %v3323_v21 = vrot.slane %v12384_v13, 1 }
 0x322   :  { %v3701_v46 = vmul.f32 0.5, %v3653_v44  ;;  %v3702_v56 = vmul.f32 0.5, %v3654_v31  ;;  %v15133_v19 = vrot.slane %v12368_v27, 7  ;;  %v15134_v33 = vrot.slane %v12366_v5, 7  ;;  %v12519_v3 = vpop.f32.mrb[35].mxu0  ;;  %15138 = vst [vmem:[#allocation53_spill] sm:$0xff] %v12533_v38 }
 0x323   :  { %15135 = vst [vmem:[#allocation52_spill] sm:$0xff] %v12519_v3  ;;  %v15136_v31 = vrot.slane %v12384_v13, 7  ;;  %v3389_v38 = vrot.slane %v12410_v40, 6  ;;  %v3461_v10 = vrot.slane %v12426_v57, 6  ;;  %v4945_v34 = vmul.f32 0.0078125, %v12300_v16 }
 0x324   :  { %v3113_v41 = vsel %vm334_vm2, %v3101_v2, %v15133_v19  ;;  %v3119_v49 = vsel %vm334_vm2, %v15134_v33, %v3101_v2  ;;  %v15137_v19 = vrot.slane %v12372_v52, 7  ;;  %v3725_v39 = vadd.f32 %v3701_v46, %v3677_v7 }
 0x325   :  { %v3151_v15 = vadd.f32 %v3119_v49, %v12410_v40  ;;  %v3152_v8 = vadd.f32 %v3113_v41, %v12368_v27  ;;  %v3185_v44 = vsel %vm334_vm2, %v3173_v47, %v15136_v31  ;;  %v3726_v2 = vadd.f32 %v3702_v56, %v3678_v20 }
 0x326   :  { %v3191_v9 = vsel %vm334_vm2, %v15137_v19, %v3173_v47  ;;  %v3224_v3 = vmax.f32 %v12384_v13, %v3185_v44  ;;  %v15139_v41 = vrot.slane %v12410_v40, 1  ;;  %v15140_v31 = vrot.slane %v12346_v37, 1 }
 0x327   :  { %v3223_v33 = vmax.f32 %v12426_v57, %v3191_v9  ;;  %v15141_v47 = vrot.slane %v12426_v57, 1  ;;  %v15142_v46 = vrot.slane %v12370_v11, 1  ;;  %v3765_v7 = vpack.c.bf16 %v3726_v2, %v3725_v39  ;;  %v12560_v39 = vpop.xlane.xlu0 %4387 }
 0x328   :  { %v3257_v49 = vsel %vm479_vm3, %v15139_v41, %v3251_v28  ;;  %v3275_v25 = vsel %vm479_vm3, %v3251_v28, %v15140_v31  ;;  %v3539_v28 = vrot.slane %v12368_v27, 2  ;;  %v3611_v31 = vrot.slane %v12384_v13, 2 }
 0x329   :  { %v3329_v56 = vsel %vm479_vm3, %v15141_v47, %v3323_v21  ;;  %v3347_v9 = vsel %vm479_vm3, %v3323_v21, %v15142_v46  ;;  %v3295_v20 = vadd.f32 %v3257_v49, %v3151_v15  ;;  %v3296_v44 = vadd.f32 %v3275_v25, %v3152_v8  ;;  %6356 = vmatprep.mubr.msk.bf16.mxu1 %vm15_vm0, %v3765_v7 }
 0x32a   :  { %v3367_v19 = vmax.f32 %v3223_v33, %v3329_v56  ;;  %v3368_v41 = vmax.f32 %v3224_v3, %v3347_v9  ;;  %v4673_v47 = vmul.f32 %v11932_v60, %v11932_v60  ;;  %v4672_v21 = vmul.f32 %v11924_v55, %v11924_v55 }
 0x32b   :  { %v15143_v25 = vrot.slane %v12368_v27, 6  ;;  %v15144_v15 = vrot.slane %v12366_v5, 6  ;;  %v15145_v2 = vrot.slane %v12384_v13, 6  ;;  %v15146_v49 = vrot.slane %v12372_v52, 6 }
 0x32c   :  { %4786 = vadd.xlane.f32.xlu1 %v4673_v47  ;;  %v15147_v5 = vrot.slane %v12410_v40, 2  ;;  %4784 = vadd.xlane.f32.xlu0 %v4672_v21  ;;  %v12612_v21 = vld [vmem:[#allocation3 + $0xb8] sm:$0xff] }
 0x32d   :  { %v3401_v3 = vsel %vm624_vm4, %v3389_v38, %v15143_v25  ;;  %v3407_v8 = vsel %vm624_vm4, %v15144_v15, %v3389_v38  ;;  %v3473_v33 = vsel %vm624_vm4, %v3461_v10, %v15145_v2  ;;  %v3479_v56 = vsel %vm624_vm4, %v15146_v49, %v3461_v10  ;;  %v12578_v25 = vpop.xlane.xlu1 %4469 }
 0x32e   :  { %v3439_v46 = vadd.f32 %v3407_v8, %v3295_v20  ;;  %v3440_v27 = vadd.f32 %v3401_v3, %v3296_v44  ;;  %v3511_v9 = vmax.f32 %v3367_v19, %v3479_v56  ;;  %v3512_v7 = vmax.f32 %v3368_v41, %v3473_v33  ;;  %v12596_v3 = vld [vmem:[#allocation2 + $0xa0] sm:$0xff] }
 0x32f   :  { %v3545_v13 = vsel %vm769_vm5, %v15147_v5, %v3539_v28  ;;  %v15148_v38 = vrot.slane %v12346_v37, 2  ;;  %v15149_v15 = vrot.slane %v12426_v57, 2  ;;  %v15150_v20 = vrot.slane %v12370_v11, 2  ;;  %v12598_v37 = vld [vmem:[#allocation2 + $0xa8] sm:$0xff]  ;;  %v12608_v8 = vld [vmem:[#allocation3 + $0xa0] sm:$0xff] }
 0x330   :  { %v3583_v40 = vadd.f32 %v3545_v13, %v3439_v46  ;;  %v12604_v57 = vadd.f32 %v11723_v12, %v10579_v32  ;;  %v4713_v11 = vmul.f32 %v12151_v63, %v12151_v63  ;;  %v12614_v46 = vpop.xlane.xlu0 %4467  ;;  %v3090_v12 = vrot.slane %v12596_v3, 7 }
 0x331   :  { %v3563_v52 = vsel %vm769_vm5, %v3539_v28, %v15148_v38  ;;  %v3617_v10 = vsel %vm769_vm5, %v15149_v15, %v3611_v31  ;;  %v3635_v44 = vsel %vm769_vm5, %v3611_v31, %v15150_v20  ;;  %v12600_v28 = vld [vmem:[#allocation2 + $0xb8] sm:$0xff]  ;;  %v12610_v31 = vld [vmem:[#allocation3 + $0xa8] sm:$0xff]  ;;  %v3162_v38 = vrot.slane %v12608_v8, 7  ;;  %v12625_v15 = vpop.xlane.xlu1 %4385 }
 0x332   :  { %v3584_v19 = vadd.f32 %v3563_v52, %v3440_v27  ;;  %v3655_v41 = vmax.f32 %v3511_v9, %v3617_v10  ;;  %v3656_v47 = vmax.f32 %v3512_v7, %v3635_v44  ;;  %15151 = vst [vmem:[#allocation54_spill] sm:$0xff] %v12604_v57  ;;  %v3679_v2 = vmul.f32 0.033333335, %v3583_v40  ;;  %4866 = vadd.xlane.f32.xlu1 %v4713_v11 }
 0x333   :  { %v12618_v27 = vadd.f32 %v11749_v35, %v10579_v32  ;;  %v14784_v9 = vrot.slane %v12598_v37, 7  ;;  %v14785_v7 = vrot.slane %v12600_v28, 7  ;;  %v14782_v52 = vrot.slane %v12610_v31, 7 }
 0x334   :  { %v3680_v33 = vmul.f32 0.033333335, %v3584_v19  ;;  %v3703_v49 = vmul.f32 0.5, %v3655_v41  ;;  %v3704_v56 = vmul.f32 0.5, %v3656_v47  ;;  %v14783_v20 = vrot.slane %v12612_v21, 7 }
 0x335   :  { %15152 = vst [vmem:[#allocation55_spill] sm:$0xff] %v12618_v27  ;;  %v3126_v35 = vsel %vm334_vm2, %v3090_v12, %v14784_v9  ;;  %v3132_v10 = vsel %vm334_vm2, %v14785_v7, %v3090_v12  ;;  %v14786_v44 = vrot.slane %v12596_v3, 1  ;;  %v3198_v47 = vsel %vm334_vm2, %v3162_v38, %v14782_v52  ;;  %v12654_v12 = vld [vmem:[#allocation3 + $0xb0] sm:$0xff] }
 0x336   :  { %v3727_v5 = vadd.f32 %v3703_v49, %v3679_v2  ;;  %v3728_v13 = vadd.f32 %v3704_v56, %v3680_v33  ;;  %v3153_v19 = vadd.f32 %v3132_v10, %v12596_v3  ;;  %v3154_v41 = vadd.f32 %v3126_v35, %v12598_v37  ;;  %v12645_v2 = vld [vmem:[#allocation2 + $0xb0] sm:$0xff]  ;;  %4413 = vadd.xlane.f32.xlu1 %v12618_v27 }
 0x337   :  { %v3204_v33 = vsel %vm334_vm2, %v14783_v20, %v3162_v38  ;;  %v3226_v49 = vmax.f32 %v12610_v31, %v3198_v47  ;;  %v3240_v56 = vrot.slane %v12598_v37, 1  ;;  %v14791_v35 = vrot.slane %v12645_v2, 1 }
 0x338   :  { %v3752_v40 = vsel %vm72_vm6, %v3728_v13, 0.0  ;;  %v3225_v13 = vmax.f32 %v12608_v8, %v3204_v33  ;;  %v3312_v10 = vrot.slane %v12610_v31, 1  ;;  %v3378_v52 = vrot.slane %v12596_v3, 6 }
 0x339   :  { %v3766_v11 = vpack.c.bf16 %v3752_v40, %v3727_v5  ;;  %v14790_v5 = vrot.slane %v12608_v8, 1  ;;  %v12660_v40 = vpop.xlane.xlu0 %4383  ;;  %v3270_v38 = vsel %vm479_vm3, %v14786_v44, %v3240_v56  ;;  %v3264_v20 = vsel %vm479_vm3, %v3240_v56, %v14791_v35  ;;  %v12679_v44 = vpop.xlane.xlu1 %4465 }
 0x33a   :  { %v3297_v9 = vadd.f32 %v3270_v38, %v3153_v19  ;;  %v14793_v7 = vrot.slane %v12600_v28, 6  ;;  %v3298_v47 = vadd.f32 %v3264_v20, %v3154_v41  ;;  %v15153_v63 = vrot.slane %v12654_v12, 1 }
 0x33b   :  { %6357 = vmatmul.mubr.msk.bf16.gmra.mrb[40].mxu1 %vm15_vm0, %v3766_v11  ;;  %v3342_v11 = vsel %vm479_vm3, %v14790_v5, %v3312_v10  ;;  %v15154_v60 = vrot.slane %v12598_v37, 6  ;;  %v3450_v5 = vrot.slane %v12608_v8, 6  ;;  %v14792_v20 = vrot.slane %v12610_v31, 6 }
 0x33c   :  { %v3336_v33 = vsel %vm479_vm3, %v3312_v10, %v15153_v63  ;;  %v3369_v55 = vmax.f32 %v3225_v13, %v3342_v11  ;;  %v3420_v38 = vsel %vm624_vm4, %v14793_v7, %v3378_v52  ;;  %v14794_v63 = vrot.slane %v12612_v21, 6  ;;  %v12697_v10 = vpop.f32.mrb[24].mxu1 }
 0x33d   :  { %v3414_v19 = vsel %vm624_vm4, %v3378_v52, %v15154_v60  ;;  %v3370_v56 = vmax.f32 %v3226_v49, %v3336_v33  ;;  %v3441_v41 = vadd.f32 %v3420_v38, %v3297_v9  ;;  %15155 = vst [vmem:[#allocation56_spill] sm:$0xff] %v12697_v10  ;;  %v3486_v60 = vsel %vm624_vm4, %v3450_v5, %v14792_v20  ;;  %v12706_v11 = vpop.xlane.xlu0 %4463  ;;  %v12708_v9 = vpop.f32.mrb[25].mxu1 }
 0x33e   :  { %v3442_v35 = vadd.f32 %v3414_v19, %v3298_v47  ;;  %v3528_v49 = vrot.slane %v12598_v37, 2  ;;  %v14795_v52 = vrot.slane %v12645_v2, 2  ;;  %15156 = vst [vmem:[#allocation57_spill] sm:$0xff] %v12706_v11  ;;  %15157 = vst [vmem:[#allocation58_spill] sm:$0xff] %v12708_v9  ;;  %v3492_v47 = vsel %vm624_vm4, %v14794_v63, %v3450_v5  ;;  %v12716_v7 = vpop.f32.mrb[26].mxu1 }
 0x33f   :  { %v3514_v19 = vmax.f32 %v3370_v56, %v3486_v60  ;;  %v3600_v38 = vrot.slane %v12610_v31, 2  ;;  %15158 = vst [vmem:[#allocation59_spill] sm:$0xff] %v12716_v7  ;;  %v3513_v13 = vmax.f32 %v3369_v55, %v3492_v47  ;;  %v15159_v9 = vrot.slane %v12596_v3, 2  ;;  %v12728_v56 = vpop.xlane.xlu1 %4774  ;;  %v12730_v60 = vpop.f32.mrb[27].mxu1 }
 0x340   :  { %v3552_v33 = vsel %vm769_vm5, %v3528_v49, %v14795_v52  ;;  %v4712_v5 = vmul.f32 %v12137_v61, %v12137_v61  ;;  %15160 = vst [vmem:[#allocation60_spill] sm:$0xff] %v12728_v56  ;;  %15161 = vst [vmem:[#allocation61_spill] sm:$0xff] %v12730_v60  ;;  %v15162_v55 = vrot.slane %v12654_v12, 2  ;;  %v15163_v52 = vrot.slane %v12608_v8, 2 }
 0x341   :  { %v3558_v10 = vsel %vm769_vm5, %v15159_v9, %v3528_v49  ;;  %v3586_v20 = vadd.f32 %v3552_v33, %v3442_v35  ;;  %v12742_v49 = vadd.f32 %v11725_v4, %v10579_v32  ;;  %v3174_v33 = vrot.slane %v12654_v12, 7 }
 0x342   :  { %v3585_v63 = vadd.f32 %v3558_v10, %v3441_v41  ;;  %v3624_v47 = vsel %vm769_vm5, %v3600_v38, %v15162_v55  ;;  %v3630_v7 = vsel %vm769_vm5, %v15163_v52, %v3600_v38  ;;  %4864 = vadd.xlane.f32.xlu0 %v4712_v5  ;;  %v3102_v41 = vrot.slane %v12645_v2, 7 }
 0x343   :  { %15164 = vst [vmem:[#allocation62_spill] sm:$0xff] %v12742_v49  ;;  %v3657_v9 = vmax.f32 %v3513_v13, %v3630_v7  ;;  %v3658_v61 = vmax.f32 %v3514_v19, %v3624_v47  ;;  %v3682_v10 = vmul.f32 0.033333335, %v3586_v20  ;;  %v3252_v55 = vrot.slane %v12600_v28, 1  ;;  %v12755_v13 = vpop.xlane.xlu0 %4772 }
 0x344   :  { %v3681_v35 = vmul.f32 0.033333335, %v3585_v63  ;;  %v15165_v11 = vrot.slane %v12600_v28, 7  ;;  %v15166_v4 = vrot.slane %v12598_v37, 7  ;;  %15167 = vst [vmem:[#allocation63_spill] sm:$0xff] %v12755_v13  ;;  %v15168_v19 = vrot.slane %v12612_v21, 7 }
 0x345   :  { %v3705_v60 = vmul.f32 0.5, %v3657_v9  ;;  %v3706_v56 = vmul.f32 0.5, %v3658_v61  ;;  %v15169_v38 = vrot.slane %v12610_v31, 7 }
 0x346   :  { %v3114_v52 = vsel %vm334_vm2, %v3102_v41, %v15165_v11  ;;  %v3120_v7 = vsel %vm334_vm2, %v15166_v4, %v3102_v41  ;;  %v3186_v61 = vsel %vm334_vm2, %v3174_v33, %v15168_v19  ;;  %4411 = vadd.xlane.f32.xlu0 %v12604_v57  ;;  %v12770_v4 = vpop.xlane.xlu1 %4854  ;;  %v15172_v19 = vrot.slane %v12596_v3, 1 }
 0x347   :  { %v3155_v20 = vadd.f32 %v3120_v7, %v12645_v2  ;;  %v3156_v63 = vadd.f32 %v3114_v52, %v12600_v28  ;;  %v3192_v11 = vsel %vm334_vm2, %v15169_v38, %v3174_v33  ;;  %v3729_v5 = vadd.f32 %v3705_v60, %v3681_v35  ;;  %15170 = vst [vmem:[#allocation64_spill] sm:$0xff] %v12770_v4 }
 0x348   :  { %v3730_v47 = vadd.f32 %v3706_v56, %v3682_v10  ;;  %v3227_v9 = vmax.f32 %v12654_v12, %v3192_v11  ;;  %v3228_v41 = vmax.f32 %v12612_v21, %v3186_v61  ;;  %v15171_v52 = vrot.slane %v12645_v2, 1 }
 0x349   :  { %v3276_v33 = vsel %vm479_vm3, %v3252_v55, %v15172_v19  ;;  %v3324_v56 = vrot.slane %v12612_v21, 1  ;;  %v3390_v60 = vrot.slane %v12645_v2, 6  ;;  %v3462_v38 = vrot.slane %v12654_v12, 6 }
 0x34a   :  { %v3258_v7 = vsel %vm479_vm3, %v15171_v52, %v3252_v55  ;;  %v3767_v35 = vpack.c.bf16 %v3730_v47, %v3729_v5  ;;  %v3300_v61 = vadd.f32 %v3276_v33, %v3156_v63  ;;  %v15173_v11 = vrot.slane %v12654_v12, 1  ;;  %4491 = vadd.xlane.f32.xlu0 %v12742_v49 }
 0x34b   :  { %v3299_v10 = vadd.f32 %v3258_v7, %v3155_v20  ;;  %v15174_v52 = vrot.slane %v12608_v8, 1  ;;  %v15175_v55 = vrot.slane %v12600_v28, 6  ;;  %v15176_v20 = vrot.slane %v12598_v37, 6 }
 0x34c   :  { %v3330_v4 = vsel %vm479_vm3, %v15173_v11, %v3324_v56  ;;  %6360 = vmatprep.mubr.msk.bf16.mxu1 %vm15_vm0, %v3767_v35  ;;  %v12800_v11 = vpop.xlane.xlu0 %4852  ;;  %v3612_v35 = vrot.slane %v12612_v21, 2 }
 0x34d   :  { %v3348_v13 = vsel %vm479_vm3, %v3324_v56, %v15174_v52  ;;  %v3402_v19 = vsel %vm624_vm4, %v3390_v60, %v15175_v55  ;;  %v3408_v63 = vsel %vm624_vm4, %v15176_v20, %v3390_v60  ;;  %v3371_v5 = vmax.f32 %v3227_v9, %v3330_v4 }
 0x34e   :  { %v3372_v47 = vmax.f32 %v3228_v41, %v3348_v13  ;;  %v3443_v7 = vadd.f32 %v3408_v63, %v3299_v10  ;;  %v3444_v33 = vadd.f32 %v3402_v19, %v3300_v61  ;;  %v15177_v56 = vrot.slane %v12612_v21, 6 }
 0x34f   :  { %v15178_v55 = vrot.slane %v12610_v31, 6  ;;  %v3540_v60 = vrot.slane %v12600_v28, 2  ;;  %v12815_v13 = vadd.f32 %v11731_v0, %v10579_v32  ;;  %v12819_v4 = vadd.f32 %v11906_v36, %v10579_v32  ;;  %v12821_v31 = vpop.xlane.xlu1 %4770 }
 0x350   :  { %v3474_v52 = vsel %vm624_vm4, %v3462_v38, %v15177_v56  ;;  %v15181_v10 = vrot.slane %v12645_v2, 2  ;;  %v15182_v21 = vrot.slane %v12596_v3, 2  ;;  %v15183_v0 = vrot.slane %v12654_v12, 2 }
 0x351   :  { %v3480_v37 = vsel %vm624_vm4, %v15178_v55, %v3462_v38  ;;  %15179 = vst [vmem:[#allocation65_spill] sm:$0xff] %v12815_v13  ;;  %v3516_v41 = vmax.f32 %v3372_v47, %v3474_v52  ;;  %15180 = vst [vmem:[#allocation66_spill] sm:$0xff] %v12819_v4  ;;  %v15184_v36 = vrot.slane %v12608_v8, 2  ;;  %4493 = vadd.xlane.f32.xlu1 %v12819_v4  ;;  %4407 = vadd.xlane.f32.xlu0 %v12815_v13  ;;  %v12851_v52 = vpop.xlane.xlu0 %4768 }
 0x352   :  { %v3515_v9 = vmax.f32 %v3371_v5, %v3480_v37  ;;  %v3546_v28 = vsel %vm769_vm5, %v15181_v10, %v3540_v60  ;;  %v3564_v61 = vsel %vm769_vm5, %v3540_v60, %v15182_v21  ;;  %v3618_v38 = vsel %vm769_vm5, %v15183_v0, %v3612_v35 }
 0x353   :  { %v3636_v19 = vsel %vm769_vm5, %v3612_v35, %v15184_v36  ;;  %v3587_v20 = vadd.f32 %v3546_v28, %v3443_v7  ;;  %v3588_v2 = vadd.f32 %v3564_v61, %v3444_v33  ;;  %v12842_v3 = vadd.f32 %v11753_v45, %v10579_v32  ;;  %v12861_v60 = vpop.xlane.xlu1 %4850 }
 0x354   :  { %v3659_v63 = vmax.f32 %v3515_v9, %v3618_v38  ;;  %v3660_v5 = vmax.f32 %v3516_v41, %v3636_v19  ;;  %v12846_v12 = vmul.f32 0.0078125, %v12158_v58  ;;  %v12849_v8 = vmul.f32 0.0078125, %v12206_v22 }
 0x355   :  { %15185 = vst [vmem:[#allocation67_spill] sm:$0xff] %v12842_v3  ;;  %v3683_v47 = vmul.f32 0.033333335, %v3587_v20  ;;  %v3684_v56 = vmul.f32 0.033333335, %v3588_v2  ;;  %v12855_v55 = vadd.f32 %v11832_v30, %v10579_v32  ;;  %4409 = vadd.xlane.f32.xlu1 %v12842_v3  ;;  %v12859_v58 = vmul.f32 0.0078125, %v12188_v43 }
 0x356   :  { %v3707_v7 = vmul.f32 0.5, %v3659_v63  ;;  %v3708_v33 = vmul.f32 0.5, %v3660_v5  ;;  %v5042_v22 = vmul.f32 %v12846_v12, %v12846_v12  ;;  %v5043_v35 = vmul.f32 %v12849_v8, %v12849_v8 }
 0x357   :  { %15186 = vst [vmem:[#allocation68_spill] sm:$0xff] %v12855_v55  ;;  %4487 = vadd.xlane.f32.xlu0 %v12855_v55  ;;  %v4946_v30 = vmul.f32 0.0078125, %v12234_v54  ;;  %v4947_v9 = vmul.f32 0.0078125, %v12250_v62  ;;  %v12874_v43 = vadd.f32 %v11912_v18, %v10579_v32  ;;  %v12877_v10 = vmul.f32 0.0078125, %v12288_v17  ;;  %v12885_v62 = vpop.xlane.xlu0 %4848  ;;  %v12893_v2 = vpop.xlane.xlu1 %4397 }
 0x358   :  { %v3731_v45 = vadd.f32 %v3707_v7, %v3683_v47  ;;  %v3732_v37 = vadd.f32 %v3708_v33, %v3684_v56  ;;  %v4678_v21 = vmul.f32 %v12604_v57, %v12604_v57  ;;  %v5040_v18 = vmul.f32 %v12859_v58, %v12859_v58 }
 0x359   :  { %15187 = vst [vmem:[#allocation69_spill] sm:$0xff] %v12874_v43  ;;  %v5138_v61 = vsub.f32 %v4946_v30, %v5042_v22  ;;  %v5139_v0 = vsub.f32 %v4947_v9, %v5043_v35  ;;  %4489 = vadd.xlane.f32.xlu1 %v12874_v43  ;;  %v5041_v54 = vmul.f32 %v12877_v10, %v12877_v10  ;;  %v4944_v36 = vmul.f32 0.0078125, %v12327_v51  ;;  %v12909_v9 = vpop.f32.mrb[36].mxu0 }
 0x35a   :  { %v3756_v41 = vsel %vm72_vm6, %v3732_v37, 0.0  ;;  %v4679_v19 = vmul.f32 %v12618_v27, %v12618_v27  ;;  %v4718_v5 = vmul.f32 %v12742_v49, %v12742_v49  ;;  %v12898_v7 = vmul.f32 0.0078125, %v12348_v26 }
 0x35b   :  { %v3768_v28 = vpack.c.bf16 %v3756_v41, %v3731_v45  ;;  %4796 = vadd.xlane.f32.xlu0 %v4678_v21  ;;  %v5234_v17 = vmax.f32 %v5138_v61, 0.0  ;;  %v5235_v38 = vmax.f32 %v5139_v0, 0.0  ;;  %v5137_v20 = vsub.f32 %v4945_v34, %v5041_v54  ;;  %v12907_v30 = vpop.xlane.xlu0 %4395  ;;  %v12926_v54 = vpop.xlane.xlu1 %4477 }
 0x35c   :  { %v5136_v47 = vsub.f32 %v4944_v36, %v5040_v18  ;;  %v5714_v33 = vsub.s32 1, %v6664_v6  ;;  %v12902_v45 = vmul.f32 0.0078125, %v12387_v48  ;;  %v5814_v37 = vsub.s32 2, %v6664_v6  ;;  %v12917_v6 = vpop.f32.mrb[37].mxu0 }
 0x35d   :  { %6361 = vmatmul.mubr.msk.bf16.gmra.mrb[44].mxu1 %vm15_vm0, %v3768_v28  ;;  %v5426_v63 = vadd.f32 1e-05, %v5234_v17  ;;  %v5427_v16 = vadd.f32 1e-05, %v5235_v38  ;;  %4798 = vadd.xlane.f32.xlu1 %v4679_v19  ;;  %v5233_v56 = vmax.f32 %v5137_v20, 0.0  ;;  %v4719_v22 = vmul.f32 %v12819_v4, %v12819_v4  ;;  %15188 = vst [vmem:[#allocation70_spill] sm:$0xff] %v12917_v6 }
 0x35e   :  { %v5232_v51 = vmax.f32 %v5136_v47, 0.0  ;;  %v4676_v26 = vmul.f32 %v12815_v13, %v12815_v13  ;;  %v5047_v28 = vmul.f32 %v12898_v7, %v12898_v7  ;;  %v5046_v48 = vmul.f32 %v12902_v45, %v12902_v45  ;;  %v12928_v34 = vpop.f32.mrb[38].mxu0 }
 0x35f   :  { %6378 = vrsqrt.f32 %v5426_v63  ;;  %4876 = vadd.xlane.f32.xlu0 %v4718_v5  ;;  %v5425_v35 = vadd.f32 1e-05, %v5233_v56  ;;  %v12920_v21 = vmul.f32 0.0078125, %v12395_v59  ;;  %v12923_v61 = vmul.f32 0.0078125, %v12430_v14  ;;  %15189 = vst [vmem:[#allocation71_spill] sm:$0xff] %v12928_v34  ;;  %v12933_v36 = vpop.f32.mrb[39].mxu0  ;;  %v12950_v47 = vpop.xlane.xlu0 %4475 }
 0x360   :  { %6380 = vrsqrt.f32 %v5427_v16  ;;  %v5424_v41 = vadd.f32 1e-05, %v5232_v51  ;;  %v4951_v0 = vmul.f32 0.0078125, %v12441_v42  ;;  %v4950_v18 = vmul.f32 0.0078125, %v12470_v29  ;;  %15190 = vst [vmem:[#allocation72_spill] sm:$0xff] %v12933_v36  ;;  %v15191_v56 = vld [vmem:[#allocation28_spill] sm:$0xff] }
 0x361   :  { %4878 = vadd.xlane.f32.xlu1 %v4719_v22  ;;  %6382 = vrsqrt.f32 %v5425_v35  ;;  %v4949_v17 = vmul.f32 0.0078125, %v12489_v23  ;;  %v4948_v38 = vmul.f32 0.0078125, %v12517_v53  ;;  %v4677_v59 = vmul.f32 %v12842_v3, %v12842_v3  ;;  %v6582_v23 = vld [vmem:[%s14557_s2] sm:$0x7]  ;;  %v15192_v22 = vld [vmem:[#allocation29_spill] sm:$0xff] }
 0x362   :  { %6384 = vrsqrt.f32 %v5424_v41  ;;  %v5045_v14 = vmul.f32 %v12920_v21, %v12920_v21  ;;  %v5044_v42 = vmul.f32 %v12923_v61, %v12923_v61  ;;  %v4716_v19 = vmul.f32 %v12855_v55, %v12855_v55 }
 0x363   :  { %4792 = vadd.xlane.f32.xlu0 %v4676_v26  ;;  %v5143_v20 = vsub.f32 %v4951_v0, %v5047_v28  ;;  %v5142_v29 = vsub.f32 %v4950_v18, %v5046_v48  ;;  %v12946_v53 = vrot.slane %v6582_v23, %v5714_v33  ;;  %v12948_v63 = vrot.slane %v6582_v23, %v5814_v37  ;;  %v15193_v28 = vld [vmem:[#allocation30_spill] sm:$0xff]  ;;  %v12960_v18 = vpop.xlane.xlu1 %4393 }
 0x364   :  { %v5141_v16 = vsub.f32 %v4949_v17, %v5045_v14  ;;  %v5140_v5 = vsub.f32 %v4948_v38, %v5044_v42  ;;  %v5330_v51 = vsub.f32 %v15191_v56, %v12846_v12  ;;  %v5328_v35 = vsub.f32 %v15192_v22, %v12859_v58  ;;  %v15194_v38 = vld [vmem:[#allocation31_spill] sm:$0xff]  ;;  %v15200_v22 = vld [vmem:[#allocation26_spill] sm:$0xff] }
 0x365   :  { %4794 = vadd.xlane.f32.xlu1 %v4677_v59  ;;  %v5239_v26 = vmax.f32 %v5143_v20, 0.0  ;;  %v5238_v41 = vmax.f32 %v5142_v29, 0.0  ;;  %v5331_v33 = vsub.f32 %v15193_v28, %v12849_v8  ;;  %v4717_v37 = vmul.f32 %v12874_v43, %v12874_v43  ;;  %v15211_v43 = vld [vmem:[#allocation64_spill] sm:$0xff] }
 0x366   :  { %v5237_v48 = vmax.f32 %v5141_v16, 0.0  ;;  %v5236_v0 = vmax.f32 %v5140_v5, 0.0  ;;  %v5329_v12 = vsub.f32 %v15194_v38, %v12877_v10  ;;  %v12966_v58 = vadd.f32 %v12049_v50, %v10579_v32  ;;  %v15197_v10 = vld [vmem:[#allocation7_spill] sm:$0xff]  ;;  %v15202_v38 = vld [vmem:[#allocation32_spill] sm:$0xff] }
 0x367   :  { %4872 = vadd.xlane.f32.xlu0 %v4716_v19  ;;  %v5431_v59 = vadd.f32 1e-05, %v5239_v26  ;;  %v5430_v14 = vadd.f32 1e-05, %v5238_v41  ;;  %v12970_v8 = vadd.f32 %v12072_v1, %v10579_v32  ;;  %v12974_v16 = vadd.f32 %v12068_v24, %v10579_v32  ;;  %v15198_v1 = vld [vmem:[#allocation27_spill] sm:$0xff]  ;;  %v12990_v24 = vpop.xlane.xlu0 %4391 }
 0x368   :  { %15195 = vst [vmem:[#allocation28_spill] sm:$0xff] %v12966_v58  ;;  %v5429_v20 = vadd.f32 1e-05, %v5237_v48  ;;  %v5428_v29 = vadd.f32 1e-05, %v5236_v0  ;;  %v12978_v50 = vadd.f32 %v15197_v10, %v10579_v32  ;;  %v12988_v26 = vadd.f32 %v15200_v22, %v10579_v32 }
 0x369   :  { %v6379_v17 = vpop.eup %6378  ;;  %15196 = vst [vmem:[#allocation29_spill] sm:$0xff] %v12970_v8  ;;  %4874 = vadd.xlane.f32.xlu1 %v4717_v37  ;;  %6386 = vrsqrt.f32 %v5431_v59  ;;  %v15201_v37 = vld [vmem:[#allocation10_spill] sm:$0xff]  ;;  %v5335_v59 = vsub.f32 %v15202_v38, %v12898_v7  ;;  %v13019_v10 = vmul.f32 0.0078125, %v12578_v25  ;;  %v13033_v22 = vmul.f32 0.0078125, %v12625_v15 }
 0x36a   :  { %v6381_v42 = vpop.eup %6380  ;;  %v5618_v19 = vmul.f32 %v6379_v17, %v5330_v51  ;;  %v12984_v51 = vadd.f32 %v15198_v1, %v10579_v32  ;;  %6388 = vrsqrt.f32 %v5430_v14  ;;  %v12995_v48 = vadd.f32 %v15201_v37, %v10579_v32  ;;  %v13001_v14 = vpop.xlane.xlu1 %4473  ;;  %v15208_v15 = vld [vmem:[#allocation18_spill] sm:$0xff] }
 0x36b   :  { %v5619_v23 = vmul.f32 %v6381_v42, %v5331_v33  ;;  %4419 = vadd.xlane.f32.xlu0 %v12966_v58  ;;  %v6383_v5 = vpop.eup %6382  ;;  %6390 = vrsqrt.f32 %v5429_v20  ;;  %v13010_v20 = vmul.f32 0.0078125, %v12560_v39  ;;  %v5091_v38 = vmul.f32 %v13019_v10, %v13019_v10 }
 0x36c   :  { %v5718_v56 = vmul.f32 %v12946_v53, %v5618_v19  ;;  %15199 = vst [vmem:[#allocation30_spill] sm:$0xff] %v12984_v51  ;;  %v6385_v41 = vpop.eup %6384  ;;  %v5617_v33 = vmul.f32 %v6383_v5, %v5329_v12  ;;  %6392 = vrsqrt.f32 %v5428_v29  ;;  %v15203_v19 = vld [vmem:[#allocation53_spill] sm:$0xff]  ;;  %v13022_v5 = vmul.f32 0.0078125, %v12614_v46 }
 0x36d   :  { %v5719_v28 = vmul.f32 %v12946_v53, %v5619_v23  ;;  %v5616_v17 = vmul.f32 %v6385_v41, %v5328_v35  ;;  %4421 = vadd.xlane.f32.xlu1 %v12970_v8  ;;  %v13007_v23 = vmul.f32 0.0078125, %v15203_v19  ;;  %v15204_v35 = vld [vmem:[#allocation17_spill] sm:$0xff]  ;;  %v4995_v55 = vmul.f32 0.0078125, %v15211_v43 }
 0x36e   :  { %v5818_v0 = vadd.f32 %v12948_v63, %v5718_v56  ;;  %v5717_v12 = vmul.f32 %v12946_v53, %v5617_v33  ;;  %v5334_v29 = vsub.f32 %v15204_v35, %v12902_v45  ;;  %v15205_v56 = vld [vmem:[#allocation13_spill] sm:$0xff]  ;;  %v13036_v45 = vmul.f32 0.0078125, %v12660_v40  ;;  %v13073_v19 = vpop.xlane.xlu1 %4782 }
 0x36f   :  { %v5819_v42 = vadd.f32 %v12948_v63, %v5719_v28  ;;  %4499 = vadd.xlane.f32.xlu0 %v12984_v51  ;;  %v5716_v7 = vmul.f32 %v12946_v53, %v5616_v17  ;;  %v13030_v1 = vadd.f32 %v15205_v56, %v10579_v32  ;;  %v15206_v46 = vld [vmem:[#allocation33_spill] sm:$0xff]  ;;  %v13043_v28 = vmul.f32 0.0078125, %v12679_v44  ;;  %v15209_v56 = vld [vmem:[#allocation60_spill] sm:$0xff] }
 0x370   :  { %5914 = vst [vmem:[%s14558_s3 + $0x10] sm:$0xff] %v5818_v0  ;;  %v5817_v39 = vadd.f32 %v12948_v63, %v5717_v12  ;;  %v5333_v41 = vsub.f32 %v15206_v46, %v12920_v21  ;;  %v15207_v33 = vld [vmem:[#allocation57_spill] sm:$0xff]  ;;  %v13048_v0 = vpop.xlane.xlu0 %4471  ;;  %v5332_v40 = vsub.f32 %v15208_v15, %v12923_v61  ;;  %v5051_v21 = vmul.f32 %v13007_v23, %v13007_v23  ;;  %v15210_v46 = vld [vmem:[#allocation63_spill] sm:$0xff] }
 0x371   :  { %5915 = vst [vmem:[%s14558_s3 + $0x18] sm:$0x1] %v5819_v42  ;;  %v5816_v25 = vadd.f32 %v12948_v63, %v5716_v7  ;;  %4501 = vadd.xlane.f32.xlu1 %v12995_v48  ;;  %v13046_v37 = vmul.f32 0.0078125, %v15207_v33  ;;  %v5050_v44 = vmul.f32 %v13010_v20, %v13010_v20  ;;  %v4683_v17 = vmul.f32 %v12970_v8, %v12970_v8 }
 0x372   :  { %5913 = vst [vmem:[%s14558_s3 + $0x8] sm:$0xff] %v5817_v39  ;;  %v4682_v61 = vmul.f32 %v12966_v58, %v12966_v58  ;;  %v5090_v42 = vmul.f32 %v13022_v5, %v13022_v5  ;;  %v4722_v12 = vmul.f32 %v12984_v51, %v12984_v51  ;;  %v5049_v35 = vmul.f32 %v13033_v22, %v13033_v22 }
 0x373   :  { %4415 = vadd.xlane.f32.xlu0 %v12974_v16  ;;  %5912 = vst [vmem:[%s14558_s3] sm:$0xff] %v5816_v25  ;;  %v6387_v7 = vpop.eup %6386  ;;  %v13079_v39 = vmul.f32 %v13036_v45, %v13036_v45  ;;  %v4955_v25 = vmul.f32 0.0078125, %v15209_v56  ;;  %v4954_v33 = vmul.f32 0.0078125, %v15210_v46  ;;  %v13086_v51 = vmul.f32 %v13043_v28, %v13043_v28 }
 0x374   :  { %v6389_v15 = vpop.eup %6388  ;;  %v5623_v8 = vmul.f32 %v6387_v7, %v5335_v59  ;;  %v13090_v58 = vmul.f32 %v13046_v37, %v13046_v37  ;;  %v4994_v59 = vmul.f32 0.0078125, %v12800_v11  ;;  %v5187_v27 = vsub.f32 %v4995_v55, %v5091_v38  ;;  %v13097_v36 = vpop.xlane.xlu0 %4780 }
 0x375   :  { %4417 = vadd.xlane.f32.xlu1 %v12978_v50  ;;  %v6391_v3 = vpop.eup %6390  ;;  %v5622_v13 = vmul.f32 %v6389_v15, %v5334_v29  ;;  %v5147_v56 = vsub.f32 %v4955_v25, %v5051_v21  ;;  %v5146_v46 = vsub.f32 %v4954_v33, %v5050_v44  ;;  %v4953_v57 = vmul.f32 0.0078125, %v12821_v31 }
 0x376   :  { %v6393_v7 = vpop.eup %6392  ;;  %v5723_v4 = vmul.f32 %v12946_v53, %v5623_v8  ;;  %v5621_v49 = vmul.f32 %v6391_v3, %v5333_v41  ;;  %v5283_v11 = vmax.f32 %v5187_v27, 0.0  ;;  %v5186_v44 = vsub.f32 %v4994_v59, %v5090_v42  ;;  %v13103_v8 = vpop.xlane.xlu1 %4862 }
 0x377   :  { %4495 = vadd.xlane.f32.xlu0 %v12988_v26  ;;  %v5722_v6 = vmul.f32 %v12946_v53, %v5622_v13  ;;  %v5620_v43 = vmul.f32 %v6393_v7, %v5332_v40  ;;  %v5243_v34 = vmax.f32 %v5147_v56, 0.0  ;;  %v5242_v29 = vmax.f32 %v5146_v46, 0.0  ;;  %v13111_v27 = vpop.f32.mrb[28].mxu1 }
 0x378   :  { %v5823_v15 = vadd.f32 %v12948_v63, %v5723_v4  ;;  %v5721_v21 = vmul.f32 %v12946_v53, %v5621_v49  ;;  %v5475_v49 = vadd.f32 1e-05, %v5283_v11  ;;  %v5282_v41 = vmax.f32 %v5186_v44, 0.0  ;;  %v13125_v25 = vpop.xlane.xlu0 %4860  ;;  %v15214_v11 = vld [vmem:[#allocation40_spill] sm:$0xff] }
 0x379   :  { %4497 = vadd.xlane.f32.xlu1 %v13030_v1  ;;  %v5822_v3 = vadd.f32 %v12948_v63, %v5722_v6  ;;  %v5720_v31 = vmul.f32 %v12946_v53, %v5620_v43  ;;  %v5435_v55 = vadd.f32 1e-05, %v5243_v34  ;;  %v5434_v13 = vadd.f32 1e-05, %v5242_v29 }
 0x37a   :  { %5919 = vst [vmem:[%s14558_s3 + $0x38] sm:$0x1] %v5823_v15  ;;  %v5821_v4 = vadd.f32 %v12948_v63, %v5721_v21  ;;  %v5145_v40 = vsub.f32 %v4953_v57, %v5049_v35  ;;  %v4952_v34 = vmul.f32 0.0078125, %v12851_v52  ;;  %v4993_v38 = vmul.f32 0.0078125, %v12861_v60  ;;  %v13139_v59 = vpop.xlane.xlu1 %4778  ;;  %v15213_v15 = vld [vmem:[#allocation34_spill] sm:$0xff] }
 0x37b   :  { %4804 = vadd.xlane.f32.xlu0 %v4682_v61  ;;  %5918 = vst [vmem:[%s14558_s3 + $0x30] sm:$0xff] %v5822_v3  ;;  %v5820_v6 = vadd.f32 %v12948_v63, %v5720_v31  ;;  %6394 = vrsqrt.f32 %v5435_v55  ;;  %v13119_v61 = vpop.f32.mrb[29].mxu1  ;;  %v5474_v57 = vadd.f32 1e-05, %v5282_v41  ;;  %v4992_v35 = vmul.f32 0.0078125, %v12885_v62  ;;  %v15215_v31 = vld [vmem:[#allocation38_spill] sm:$0xff] }
 0x37c   :  { %5917 = vst [vmem:[%s14558_s3 + $0x28] sm:$0xff] %v5821_v4  ;;  %6396 = vrsqrt.f32 %v5434_v13  ;;  %v5241_v42 = vmax.f32 %v5145_v40, 0.0  ;;  %v13127_v33 = vpop.f32.mrb[30].mxu1  ;;  %v5144_v52 = vsub.f32 %v4952_v34, %v13079_v39  ;;  %v5185_v60 = vsub.f32 %v4993_v38, %v13086_v51  ;;  %v15212_v39 = vld [vmem:[#allocation36_spill] sm:$0xff]  ;;  %v15216_v13 = vld [vmem:[#allocation37_spill] sm:$0xff]  ;;  %v13155_v41 = vpop.xlane.xlu0 %4776 }
 0x37d   :  { %4806 = vadd.xlane.f32.xlu1 %v4683_v17  ;;  %5916 = vst [vmem:[%s14558_s3 + $0x20] sm:$0xff] %v5820_v6  ;;  %6398 = vrsqrt.f32 %v5475_v49  ;;  %v13134_v17 = vpop.f32.mrb[31].mxu1  ;;  %v4723_v56 = vmul.f32 %v12995_v48, %v12995_v48  ;;  %v5184_v46 = vsub.f32 %v4992_v35, %v13090_v58  ;;  %v4680_v7 = vmul.f32 %v12974_v16, %v12974_v16  ;;  %v15220_v38 = vld [vmem:[#allocation41_spill] sm:$0xff] }
 0x37e   :  { %6400 = vrsqrt.f32 %v5474_v57  ;;  %v5433_v62 = vadd.f32 1e-05, %v5241_v42  ;;  %v5281_v43 = vmax.f32 %v5185_v60, 0.0  ;;  %v5339_v29 = vsub.f32 %v15212_v39, %v13007_v23  ;;  %v15221_v42 = vld [vmem:[#allocation19_spill] sm:$0xff]  ;;  %v15224_v39 = vld [vmem:[#allocation45_spill] sm:$0xff] }
 0x37f   :  { %4884 = vadd.xlane.f32.xlu0 %v4722_v12  ;;  %v5240_v12 = vmax.f32 %v5144_v52, 0.0  ;;  %v5280_v51 = vmax.f32 %v5184_v46, 0.0  ;;  %v5338_v21 = vsub.f32 %v15213_v15, %v13010_v20  ;;  %v5379_v44 = vsub.f32 %v15214_v11, %v13019_v10  ;;  %v15217_v20 = vld [vmem:[#allocation12_spill] sm:$0xff]  ;;  %v15218_v10 = vld [vmem:[#allocation11_spill] sm:$0xff]  ;;  %v13175_v52 = vpop.xlane.xlu1 %4858  ;;  %v15225_v11 = vld [vmem:[#allocation46_spill] sm:$0xff] }
 0x380   :  { %6402 = vrsqrt.f32 %v5433_v62  ;;  %v5473_v3 = vadd.f32 1e-05, %v5281_v43  ;;  %v5378_v55 = vsub.f32 %v15215_v31, %v13022_v5  ;;  %v5337_v4 = vsub.f32 %v15216_v13, %v13033_v22  ;;  %v15219_v22 = vld [vmem:[#allocation35_spill] sm:$0xff]  ;;  %v15223_v46 = vld [vmem:[#allocation44_spill] sm:$0xff] }
 0x381   :  { %4886 = vadd.xlane.f32.xlu1 %v4723_v56  ;;  %v5432_v58 = vadd.f32 1e-05, %v5240_v12  ;;  %v4681_v23 = vmul.f32 %v12978_v50, %v12978_v50  ;;  %v5472_v49 = vadd.f32 1e-05, %v5280_v51  ;;  %v13159_v40 = vadd.f32 %v15217_v20, %v10579_v32  ;;  %v15222_v56 = vld [vmem:[#allocation39_spill] sm:$0xff] }
 0x382   :  { %v13163_v6 = vadd.f32 %v15218_v10, %v10579_v32  ;;  %v4720_v5 = vmul.f32 %v12988_v26, %v12988_v26  ;;  %v5336_v34 = vsub.f32 %v15219_v22, %v13036_v45  ;;  %v5377_v57 = vsub.f32 %v15220_v38, %v13043_v28  ;;  %v15226_v13 = vld [vmem:[#allocation47_spill] sm:$0xff] }
 0x383   :  { %4800 = vadd.xlane.f32.xlu0 %v4680_v7  ;;  %6404 = vrsqrt.f32 %v5432_v58  ;;  %v13173_v35 = vadd.f32 %v15221_v42, %v10579_v32  ;;  %v5376_v62 = vsub.f32 %v15222_v56, %v13046_v37  ;;  %v13181_v7 = vadd.f32 %v15223_v46, %v10579_v32  ;;  %v13214_v42 = vpop.xlane.xlu0 %4856 }
 0x384   :  { %6406 = vrsqrt.f32 %v5473_v3  ;;  %v13184_v45 = vmul.f32 0.0078125, %v12893_v2  ;;  %v4721_v43 = vmul.f32 %v13030_v1, %v13030_v1  ;;  %v13190_v51 = vadd.f32 %v15224_v39, %v10579_v32  ;;  %v15227_v2 = vld [vmem:[#allocation48_spill] sm:$0xff] }
 0x385   :  { %4802 = vadd.xlane.f32.xlu1 %v4681_v23  ;;  %v6395_v60 = vpop.eup %6394  ;;  %6408 = vrsqrt.f32 %v5472_v49  ;;  %v13194_v58 = vadd.f32 %v15225_v11, %v10579_v32  ;;  %v13198_v23 = vadd.f32 %v15226_v13, %v10579_v32  ;;  %v13202_v49 = vadd.f32 %v15227_v2, %v10579_v32 }
 0x386   :  { %v6397_v12 = vpop.eup %6396  ;;  %v5627_v15 = vmul.f32 %v6395_v60, %v5339_v29  ;;  %v13205_v20 = vmul.f32 0.0078125, %v12907_v30  ;;  %v13209_v22 = vmul.f32 0.0078125, %v12926_v54  ;;  %v5055_v30 = vmul.f32 %v13184_v45, %v13184_v45 }
 0x387   :  { %4880 = vadd.xlane.f32.xlu0 %v4720_v5  ;;  %v6399_v3 = vpop.eup %6398  ;;  %v5626_v31 = vmul.f32 %v6397_v12, %v5338_v21  ;;  %v13212_v21 = vmul.f32 0.0078125, %v12950_v47  ;;  %v13221_v12 = vmul.f32 0.0078125, %v12960_v18  ;;  %v13226_v47 = vmul.f32 0.0078125, %v12990_v24 }
 0x388   :  { %v6401_v10 = vpop.eup %6400  ;;  %v5727_v29 = vmul.f32 %v12946_v53, %v5627_v15  ;;  %v5667_v5 = vmul.f32 %v6399_v3, %v5379_v44  ;;  %v13229_v39 = vmul.f32 0.0078125, %v13001_v14  ;;  %v13231_v15 = vpop.xlane.xlu1 %4405  ;;  %v13236_v18 = vmul.f32 0.0078125, %v13048_v0 }
 0x389   :  { %4882 = vadd.xlane.f32.xlu1 %v4721_v43  ;;  %v5726_v60 = vmul.f32 %v12946_v53, %v5626_v31  ;;  %v5666_v46 = vmul.f32 %v6401_v10, %v5378_v55  ;;  %v5054_v14 = vmul.f32 %v13205_v20, %v13205_v20  ;;  %v5095_v31 = vmul.f32 %v13209_v22, %v13209_v22 }
 0x38a   :  { %v6403_v44 = vpop.eup %6402  ;;  %v5827_v54 = vadd.f32 %v12948_v63, %v5727_v29  ;;  %v5767_v43 = vmul.f32 %v12946_v53, %v5667_v5  ;;  %v5053_v10 = vmul.f32 %v13221_v12, %v13221_v12  ;;  %v4959_v29 = vmul.f32 0.0078125, %v13073_v19 }
 0x38b   :  { %4427 = vadd.xlane.f32.xlu0 %v13159_v40  ;;  %v5826_v55 = vadd.f32 %v12948_v63, %v5726_v60  ;;  %v5766_v11 = vmul.f32 %v12946_v53, %v5666_v46  ;;  %v5625_v3 = vmul.f32 %v6403_v44, %v5337_v4  ;;  %v5094_v4 = vmul.f32 %v13212_v21, %v13212_v21 }
 0x38c   :  { %5923 = vst [vmem:[%s14558_s3 + $0x58] sm:$0x1] %v5827_v54  ;;  %v5867_v24 = vadd.f32 %v12948_v63, %v5767_v43  ;;  %v5052_v46 = vmul.f32 %v13226_v47, %v13226_v47  ;;  %v5093_v44 = vmul.f32 %v13229_v39, %v13229_v39  ;;  %v4958_v54 = vmul.f32 0.0078125, %v13097_v36  ;;  %v13266_v43 = vpop.xlane.xlu0 %4403 }
 0x38d   :  { %4429 = vadd.xlane.f32.xlu1 %v13173_v35  ;;  %v6405_v13 = vpop.eup %6404  ;;  %5922 = vst [vmem:[%s14558_s3 + $0x50] sm:$0xff] %v5826_v55  ;;  %v5866_v0 = vadd.f32 %v12948_v63, %v5766_v11  ;;  %v5725_v2 = vmul.f32 %v12946_v53, %v5625_v3  ;;  %v5092_v11 = vmul.f32 %v13236_v18, %v13236_v18 }
 0x38e   :  { %v6407_v5 = vpop.eup %6406  ;;  %5963 = vst [vmem:[%s14558_s3 + $0x198] sm:$0x1] %v5867_v24  ;;  %v5624_v60 = vmul.f32 %v6405_v13, %v5336_v34  ;;  %v5151_v3 = vsub.f32 %v4959_v29, %v5055_v30  ;;  %v5150_v13 = vsub.f32 %v4958_v54, %v5054_v14  ;;  %v4957_v30 = vmul.f32 0.0078125, %v13139_v59 }
 0x38f   :  { %4507 = vadd.xlane.f32.xlu0 %v13190_v51  ;;  %v6409_v55 = vpop.eup %6408  ;;  %5962 = vst [vmem:[%s14558_s3 + $0x190] sm:$0xff] %v5866_v0  ;;  %v5825_v19 = vadd.f32 %v12948_v63, %v5725_v2  ;;  %v5665_v34 = vmul.f32 %v6407_v5, %v5377_v57  ;;  %v4999_v0 = vmul.f32 0.0078125, %v13103_v8  ;;  %v13283_v2 = vpop.xlane.xlu1 %4485  ;;  %v4998_v57 = vmul.f32 0.0078125, %v13125_v25 }
 0x390   :  { %v5724_v36 = vmul.f32 %v12946_v53, %v5624_v60  ;;  %v5664_v24 = vmul.f32 %v6409_v55, %v5376_v62  ;;  %v5247_v38 = vmax.f32 %v5151_v3, 0.0  ;;  %v5246_v8 = vmax.f32 %v5150_v13, 0.0 }
 0x391   :  { %4509 = vadd.xlane.f32.xlu1 %v13198_v23  ;;  %5921 = vst [vmem:[%s14558_s3 + $0x48] sm:$0xff] %v5825_v19  ;;  %v5765_v28 = vmul.f32 %v12946_v53, %v5665_v34  ;;  %v5191_v62 = vsub.f32 %v4999_v0, %v5095_v31  ;;  %v5190_v5 = vsub.f32 %v4998_v57, %v5094_v4  ;;  %v4956_v55 = vmul.f32 0.0078125, %v13155_v41  ;;  %v13301_v19 = vpop.xlane.xlu0 %4483 }
 0x392   :  { %v5824_v37 = vadd.f32 %v12948_v63, %v5724_v36  ;;  %v5764_v56 = vmul.f32 %v12946_v53, %v5664_v24  ;;  %v5439_v29 = vadd.f32 1e-05, %v5247_v38  ;;  %v5149_v60 = vsub.f32 %v4957_v30, %v5053_v10 }
 0x393   :  { %4423 = vadd.xlane.f32.xlu0 %v13163_v6  ;;  %v5865_v14 = vadd.f32 %v12948_v63, %v5765_v28  ;;  %v5438_v59 = vadd.f32 1e-05, %v5246_v8  ;;  %v5287_v54 = vmax.f32 %v5191_v62, 0.0  ;;  %v5286_v31 = vmax.f32 %v5190_v5, 0.0  ;;  %v13312_v36 = vpop.xlane.xlu1 %4401 }
 0x394   :  { %5920 = vst [vmem:[%s14558_s3 + $0x40] sm:$0xff] %v5824_v37  ;;  %v5864_v25 = vadd.f32 %v12948_v63, %v5764_v56  ;;  %6410 = vrsqrt.f32 %v5439_v29  ;;  %v5245_v4 = vmax.f32 %v5149_v60, 0.0  ;;  %v4997_v10 = vmul.f32 0.0078125, %v13175_v52  ;;  %v13321_v56 = vpop.f32.mrb[40].mxu0  ;;  %v15228_v60 = vld [vmem:[#allocation23_spill] sm:$0xff] }
 0x395   :  { %4425 = vadd.xlane.f32.xlu1 %v13181_v7  ;;  %5961 = vst [vmem:[%s14558_s3 + $0x188] sm:$0xff] %v5865_v14  ;;  %6412 = vrsqrt.f32 %v5438_v59  ;;  %v5479_v34 = vadd.f32 1e-05, %v5287_v54  ;;  %v5148_v41 = vsub.f32 %v4956_v55, %v5052_v46  ;;  %v4996_v3 = vmul.f32 0.0078125, %v13214_v42  ;;  %v13319_v37 = vpop.xlane.xlu0 %4399  ;;  %v13325_v62 = vpop.f32.mrb[41].mxu0  ;;  %v15229_v55 = vld [vmem:[#allocation21_spill] sm:$0xff] }
 0x396   :  { %5960 = vst [vmem:[%s14558_s3 + $0x180] sm:$0xff] %v5864_v25  ;;  %v4686_v24 = vmul.f32 %v13159_v40, %v13159_v40  ;;  %v5478_v13 = vadd.f32 1e-05, %v5286_v31  ;;  %v5437_v0 = vadd.f32 1e-05, %v5245_v4  ;;  %v5189_v28 = vsub.f32 %v4997_v10, %v5093_v44  ;;  %v13329_v29 = vpop.f32.mrb[42].mxu0 }
 0x397   :  { %4503 = vadd.xlane.f32.xlu0 %v13194_v58  ;;  %6414 = vrsqrt.f32 %v5479_v34  ;;  %v5244_v52 = vmax.f32 %v5148_v41, 0.0  ;;  %v5188_v38 = vsub.f32 %v4996_v3, %v5092_v11  ;;  %v4687_v46 = vmul.f32 %v13173_v35, %v13173_v35  ;;  %v13327_v14 = vpop.xlane.xlu1 %4481  ;;  %v13331_v5 = vpop.f32.mrb[43].mxu0  ;;  %v15230_v34 = vld [vmem:[#allocation42_spill] sm:$0xff] }
 0x398   :  { %6416 = vrsqrt.f32 %v5478_v13  ;;  %v5285_v57 = vmax.f32 %v5189_v28, 0.0  ;;  %v4726_v44 = vmul.f32 %v13190_v51, %v13190_v51  ;;  %v5343_v25 = vsub.f32 %v15228_v60, %v13184_v45  ;;  %v15231_v45 = vld [vmem:[#allocation20_spill] sm:$0xff] }
 0x399   :  { %4505 = vadd.xlane.f32.xlu1 %v13202_v49  ;;  %6418 = vrsqrt.f32 %v5437_v0  ;;  %v5436_v42 = vadd.f32 1e-05, %v5244_v52  ;;  %v5284_v30 = vmax.f32 %v5188_v38, 0.0  ;;  %v4727_v59 = vmul.f32 %v13198_v23, %v13198_v23  ;;  %v15232_v0 = vld [vmem:[#allocation25_spill] sm:$0xff] }
 0x39a   :  { %v5477_v8 = vadd.f32 1e-05, %v5285_v57  ;;  %v5342_v31 = vsub.f32 %v15229_v55, %v13205_v20  ;;  %v4684_v4 = vmul.f32 %v13163_v6, %v13163_v6  ;;  %v5383_v41 = vsub.f32 %v15230_v34, %v13209_v22  ;;  %v15233_v57 = vld [vmem:[#allocation22_spill] sm:$0xff]  ;;  %v15234_v22 = vld [vmem:[#allocation49_spill] sm:$0xff] }
 0x39b   :  { %4812 = vadd.xlane.f32.xlu0 %v4686_v24  ;;  %6420 = vrsqrt.f32 %v5436_v42  ;;  %v5476_v11 = vadd.f32 1e-05, %v5284_v30  ;;  %v13343_v24 = vpop.xlane.xlu0 %4479  ;;  %v5382_v13 = vsub.f32 %v15231_v45, %v13212_v21  ;;  %v5341_v28 = vsub.f32 %v15232_v0, %v13221_v12 }
 0x39c   :  { %6422 = vrsqrt.f32 %v5477_v8  ;;  %v4685_v20 = vmul.f32 %v13181_v7, %v13181_v7  ;;  %v13355_v42 = vadd.f32 %v15234_v22, %v10579_v32  ;;  %v13359_v21 = vmul.f32 0.0078125, %v13231_v15  ;;  %v15235_v8 = vld [vmem:[#allocation43_spill] sm:$0xff] }
 0x39d   :  { %4814 = vadd.xlane.f32.xlu1 %v4687_v46  ;;  %6424 = vrsqrt.f32 %v5476_v11  ;;  %v5340_v46 = vsub.f32 %v15233_v57, %v13226_v47  ;;  %v5381_v11 = vsub.f32 %v15235_v8, %v13229_v39  ;;  %v4724_v60 = vmul.f32 %v13194_v58, %v13194_v58 }
 0x39e   :  { %v6411_v54 = vpop.eup %6410  ;;  %v4725_v39 = vmul.f32 %v13202_v49, %v13202_v49 }
 0x39f   :  { %4892 = vadd.xlane.f32.xlu0 %v4726_v44  ;;  %v6413_v10 = vpop.eup %6412  ;;  %v5631_v3 = vmul.f32 %v6411_v54, %v5343_v25  ;;  %v4791_v44 = vpop.xlane.xlu1 %4790  ;;  %v15236_v54 = vld [vmem:[#allocation51_spill] sm:$0xff] }
 0x3a0   :  { %v5630_v52 = vmul.f32 %v6413_v10, %v5342_v31  ;;  %v13368_v55 = vadd.f32 %v15236_v54, %v10579_v32  ;;  %v4963_v0 = vmul.f32 0.0078125, %v4791_v44  ;;  %v15238_v54 = vld [vmem:[#allocation56_spill] sm:$0xff] }
 0x3a1   :  { %4894 = vadd.xlane.f32.xlu1 %v4727_v59  ;;  %v6415_v38 = vpop.eup %6414  ;;  %v5731_v30 = vmul.f32 %v12946_v53, %v5631_v3 }
 0x3a2   :  { %v6417_v12 = vpop.eup %6416  ;;  %v5730_v25 = vmul.f32 %v12946_v53, %v5630_v52  ;;  %v5671_v47 = vmul.f32 %v6415_v38, %v5383_v41  ;;  %v15237_v38 = vld [vmem:[#allocation24_spill] sm:$0xff] }
 0x3a3   :  { %4808 = vadd.xlane.f32.xlu0 %v4684_v4  ;;  %v6419_v59 = vpop.eup %6418  ;;  %v5831_v15 = vadd.f32 %v12948_v63, %v5731_v30  ;;  %v5670_v31 = vmul.f32 %v6417_v12, %v5382_v13  ;;  %v13372_v4 = vmul.f32 0.0078125, %v13266_v43  ;;  %v5059_v43 = vmul.f32 %v13359_v21, %v13359_v21 }
 0x3a4   :  { %v5830_v10 = vadd.f32 %v12948_v63, %v5730_v25  ;;  %v5771_v34 = vmul.f32 %v12946_v53, %v5671_v47  ;;  %v5629_v41 = vmul.f32 %v6419_v59, %v5341_v28  ;;  %v13385_v13 = vmul.f32 0.0078125, %v13283_v2  ;;  %v4871_v25 = vpop.xlane.xlu1 %4870 }
 0x3a5   :  { %4810 = vadd.xlane.f32.xlu1 %v4685_v20  ;;  %v6421_v3 = vpop.eup %6420  ;;  %5927 = vst [vmem:[%s14558_s3 + $0x78] sm:$0x1] %v5831_v15  ;;  %v5770_v45 = vmul.f32 %v12946_v53, %v5670_v31  ;;  %v4789_v20 = vpop.xlane.xlu0 %4788  ;;  %v5380_v57 = vsub.f32 %v15237_v38, %v13236_v18  ;;  %v5058_v44 = vmul.f32 %v13372_v4, %v13372_v4 }
 0x3a6   :  { %v6423_v52 = vpop.eup %6422  ;;  %5926 = vst [vmem:[%s14558_s3 + $0x70] sm:$0xff] %v5830_v10  ;;  %v5871_v28 = vadd.f32 %v12948_v63, %v5771_v34  ;;  %v5729_v22 = vmul.f32 %v12946_v53, %v5629_v41  ;;  %v5628_v30 = vmul.f32 %v6421_v3, %v5340_v46  ;;  %v4962_v59 = vmul.f32 0.0078125, %v4789_v20 }
 0x3a7   :  { %4888 = vadd.xlane.f32.xlu0 %v4724_v60  ;;  %v6425_v12 = vpop.eup %6424  ;;  %v5870_v2 = vadd.f32 %v12948_v63, %v5770_v45  ;;  %v5669_v8 = vmul.f32 %v6423_v52, %v5381_v11  ;;  %v5155_v60 = vsub.f32 %v4963_v0, %v5059_v43  ;;  %v13405_v11 = vadd.f32 %v15238_v54, %v10579_v32  ;;  %v15239_v45 = vld [vmem:[#allocation59_spill] sm:$0xff] }
 0x3a8   :  { %5967 = vst [vmem:[%s14558_s3 + $0x1b8] sm:$0x1] %v5871_v28  ;;  %v5829_v18 = vadd.f32 %v12948_v63, %v5729_v22  ;;  %v5728_v46 = vmul.f32 %v12946_v53, %v5628_v30  ;;  %v5668_v47 = vmul.f32 %v6425_v12, %v5380_v57  ;;  %v5099_v31 = vmul.f32 %v13385_v13, %v13385_v13  ;;  %v15240_v28 = vld [vmem:[#allocation50_spill] sm:$0xff] }
 0x3a9   :  { %4890 = vadd.xlane.f32.xlu1 %v4725_v39  ;;  %5966 = vst [vmem:[%s14558_s3 + $0x1b0] sm:$0xff] %v5870_v2  ;;  %v5769_v15 = vmul.f32 %v12946_v53, %v5669_v8  ;;  %v5251_v39 = vmax.f32 %v5155_v60, 0.0  ;;  %v5154_v41 = vsub.f32 %v4962_v59, %v5058_v44  ;;  %v5003_v3 = vmul.f32 0.0078125, %v4871_v25  ;;  %v15241_v44 = vld [vmem:[#allocation52_spill] sm:$0xff]  ;;  %v15242_v25 = vld [vmem:[#allocation58_spill] sm:$0xff]  ;;  %v15244_v59 = vld [vmem:[#allocation61_spill] sm:$0xff] }
 0x3aa   :  { %5925 = vst [vmem:[%s14558_s3 + $0x68] sm:$0xff] %v5829_v18  ;;  %v5828_v10 = vadd.f32 %v12948_v63, %v5728_v46  ;;  %v5768_v34 = vmul.f32 %v12946_v53, %v5668_v47  ;;  %v13420_v43 = vadd.f32 %v15239_v45, %v10579_v32  ;;  %v13434_v22 = vadd.f32 %v15240_v28, %v10579_v32 }
 0x3ab   :  { %4435 = vadd.xlane.f32.xlu0 %v13355_v42  ;;  %v5869_v0 = vadd.f32 %v12948_v63, %v5769_v15  ;;  %v5443_v20 = vadd.f32 1e-05, %v5251_v39  ;;  %v5250_v38 = vmax.f32 %v5154_v41, 0.0  ;;  %v5195_v57 = vsub.f32 %v5003_v3, %v5099_v31  ;;  %v13460_v31 = vpop.f32.mrb[32].mxu1  ;;  %v15246_v39 = vld [vmem:[#allocation9_spill] sm:$0xff] }
 0x3ac   :  { %5924 = vst [vmem:[%s14558_s3 + $0x60] sm:$0xff] %v5828_v10  ;;  %v5868_v52 = vadd.f32 %v12948_v63, %v5768_v34  ;;  %v13441_v2 = vmul.f32 0.0078125, %v13301_v19  ;;  %v13446_v60 = vadd.f32 %v15241_v44, %v10579_v32  ;;  %v13450_v18 = vadd.f32 %v15242_v25, %v10579_v32  ;;  %v13466_v41 = vpop.f32.mrb[33].mxu1 }
 0x3ad   :  { %4437 = vadd.xlane.f32.xlu1 %v13368_v55  ;;  %5965 = vst [vmem:[%s14558_s3 + $0x1a8] sm:$0xff] %v5869_v0  ;;  %6426 = vrsqrt.f32 %v5443_v20  ;;  %v5442_v30 = vadd.f32 1e-05, %v5250_v38  ;;  %v5291_v12 = vmax.f32 %v5195_v57, 0.0  ;;  %v4869_v46 = vpop.xlane.xlu0 %4868  ;;  %v13458_v54 = vadd.f32 %v15244_v59, %v10579_v32  ;;  %v13469_v0 = vpop.f32.mrb[34].mxu1  ;;  %v15247_v38 = vld [vmem:[#allocation5_spill] sm:$0xff] }
 0x3ae   :  { %5964 = vst [vmem:[%s14558_s3 + $0x1a0] sm:$0xff] %v5868_v52  ;;  %15243 = vst [vmem:[#allocation31_spill] sm:$0xff] %v13450_v18  ;;  %v5098_v19 = vmul.f32 %v13441_v2, %v13441_v2  ;;  %v5002_v47 = vmul.f32 0.0078125, %v4869_v46  ;;  %v5347_v10 = vsub.f32 %v15246_v39, %v13359_v21  ;;  %v4690_v34 = vmul.f32 %v13355_v42, %v13355_v42  ;;  %v13471_v52 = vpop.f32.mrb[35].mxu1  ;;  %v15248_v46 = vld [vmem:[#allocation16_spill] sm:$0xff] }
 0x3af   :  { %4515 = vadd.xlane.f32.xlu0 %v13405_v11  ;;  %6428 = vrsqrt.f32 %v5442_v30  ;;  %v5483_v8 = vadd.f32 1e-05, %v5291_v12  ;;  %15245 = vst [vmem:[#allocation7_spill] sm:$0xff] %v13458_v54  ;;  %v5346_v57 = vsub.f32 %v15247_v38, %v13372_v4  ;;  %v4691_v21 = vmul.f32 %v13368_v55, %v13368_v55 }
 0x3b0   :  { %v5194_v15 = vsub.f32 %v5002_v47, %v5098_v19  ;;  %v13478_v28 = vmul.f32 0.0078125, %v13312_v36  ;;  %v13483_v44 = vmul.f32 0.0078125, %v13319_v37  ;;  %v5387_v4 = vsub.f32 %v15248_v46, %v13385_v13 }
 0x3b1   :  { %4517 = vadd.xlane.f32.xlu1 %v13420_v43  ;;  %6430 = vrsqrt.f32 %v5483_v8  ;;  %v4730_v8 = vmul.f32 %v13405_v11, %v13405_v11  ;;  %v4731_v36 = vmul.f32 %v13420_v43, %v13420_v43 }
 0x3b2   :  { %v5290_v45 = vmax.f32 %v5194_v15, 0.0  ;;  %v5057_v37 = vmul.f32 %v13478_v28, %v13478_v28  ;;  %v5056_v13 = vmul.f32 %v13483_v44, %v13483_v44 }
 0x3b3   :  { %4431 = vadd.xlane.f32.xlu0 %v13434_v22 }
 0x3b4   :  { %v5482_v30 = vadd.f32 1e-05, %v5290_v45  ;;  %v13497_v45 = vmul.f32 0.0078125, %v13327_v14  ;;  %v4689_v14 = vmul.f32 %v13446_v60, %v13446_v60 }
 0x3b5   :  { %4433 = vadd.xlane.f32.xlu1 %v13446_v60 }
 0x3b6   :  { %6432 = vrsqrt.f32 %v5482_v30 }
 0x3b7   :  { %4511 = vadd.xlane.f32.xlu0 %v13450_v18  ;;  %v6427_v3 = vpop.eup %6426 }
 0x3b8   :  { %v5635_v20 = vmul.f32 %v6427_v3, %v5347_v10 }
 0x3b9   :  { %4513 = vadd.xlane.f32.xlu1 %v13458_v54  ;;  %v6429_v12 = vpop.eup %6428  ;;  %v4787_v15 = vpop.xlane.xlu1 %4786 }
 0x3ba   :  { %v5735_v25 = vmul.f32 %v12946_v53, %v5635_v20  ;;  %v5634_v19 = vmul.f32 %v6429_v12, %v5346_v57  ;;  %v4785_v3 = vpop.xlane.xlu0 %4784  ;;  %v4688_v20 = vmul.f32 %v13434_v22, %v13434_v22 }
 0x3bb   :  { %4820 = vadd.xlane.f32.xlu0 %v4690_v34  ;;  %v6431_v47 = vpop.eup %6430  ;;  %v4961_v34 = vmul.f32 0.0078125, %v4787_v15  ;;  %v4960_v38 = vmul.f32 0.0078125, %v4785_v3  ;;  %v15249_v15 = vld [vmem:[#allocation8_spill] sm:$0xff]  ;;  %v4729_v3 = vmul.f32 %v13458_v54, %v13458_v54 }
 0x3bc   :  { %v5835_v59 = vadd.f32 %v12948_v63, %v5735_v25  ;;  %v5734_v39 = vmul.f32 %v12946_v53, %v5634_v19  ;;  %v5675_v10 = vmul.f32 %v6431_v47, %v5387_v4  ;;  %v5097_v4 = vmul.f32 %v13497_v45, %v13497_v45 }
 0x3bd   :  { %4822 = vadd.xlane.f32.xlu1 %v4691_v21  ;;  %v5153_v30 = vsub.f32 %v4961_v34, %v5057_v37  ;;  %v5152_v12 = vsub.f32 %v4960_v38, %v5056_v13  ;;  %v4728_v19 = vmul.f32 %v13450_v18, %v13450_v18  ;;  %v5386_v37 = vsub.f32 %v15249_v15, %v13441_v2 }
 0x3be   :  { %5931 = vst [vmem:[%s14558_s3 + $0x98] sm:$0x1] %v5835_v59  ;;  %v5834_v57 = vadd.f32 %v12948_v63, %v5734_v39  ;;  %v5775_v21 = vmul.f32 %v12946_v53, %v5675_v10  ;;  %v13525_v13 = vadd.f32 %v12909_v9, %v10579_v32 }
 0x3bf   :  { %4900 = vadd.xlane.f32.xlu0 %v4730_v8  ;;  %v5249_v25 = vmax.f32 %v5153_v30, 0.0  ;;  %v4867_v46 = vpop.xlane.xlu1 %4866  ;;  %v5248_v47 = vmax.f32 %v5152_v12, 0.0  ;;  %v13535_v12 = vadd.f32 %v13111_v27, %v10579_v32  ;;  %v15255_v27 = vld [vmem:[#allocation4_spill] sm:$0xff] }
 0x3c0   :  { %5930 = vst [vmem:[%s14558_s3 + $0x90] sm:$0xff] %v5834_v57  ;;  %v5875_v8 = vadd.f32 %v12948_v63, %v5775_v21  ;;  %v6433_v34 = vpop.eup %6432  ;;  %15250 = vst [vmem:[#allocation27_spill] sm:$0xff] %v13525_v13  ;;  %v15251_v57 = vld [vmem:[#allocation71_spill] sm:$0xff] }
 0x3c1   :  { %4902 = vadd.xlane.f32.xlu1 %v4731_v36  ;;  %v5001_v36 = vmul.f32 0.0078125, %v4867_v46  ;;  %v5441_v59 = vadd.f32 1e-05, %v5249_v25  ;;  %v5440_v39 = vadd.f32 1e-05, %v5248_v47  ;;  %v13529_v21 = vadd.f32 %v15251_v57, %v10579_v32  ;;  %15253 = vst [vmem:[#allocation10_spill] sm:$0xff] %v13535_v12 }
 0x3c2   :  { %5971 = vst [vmem:[%s14558_s3 + $0x1d8] sm:$0x1] %v5875_v8  ;;  %v13548_v8 = vmul.f32 0.0078125, %v13343_v24  ;;  %v5345_v25 = vsub.f32 %v15255_v27, %v13478_v28  ;;  %v15256_v46 = vld [vmem:[#allocation70_spill] sm:$0xff]  ;;  %v15259_v28 = vld [vmem:[#allocation72_spill] sm:$0xff] }
 0x3c3   :  { %4816 = vadd.xlane.f32.xlu0 %v4688_v20  ;;  %v5193_v10 = vsub.f32 %v5001_v36, %v5097_v4  ;;  %6434 = vrsqrt.f32 %v5441_v59  ;;  %v5674_v20 = vmul.f32 %v6433_v34, %v5386_v37  ;;  %15252 = vst [vmem:[#allocation26_spill] sm:$0xff] %v13529_v21  ;;  %v13554_v4 = vadd.f32 %v15256_v46, %v10579_v32 }
 0x3c4   :  { %6436 = vrsqrt.f32 %v5440_v39  ;;  %v5096_v24 = vmul.f32 %v13548_v8, %v13548_v8  ;;  %v13564_v37 = vadd.f32 %v15259_v28, %v10579_v32  ;;  %v13568_v34 = vadd.f32 %v13119_v61, %v10579_v32 }
 0x3c5   :  { %4818 = vadd.xlane.f32.xlu1 %v4689_v14  ;;  %v5289_v38 = vmax.f32 %v5193_v10, 0.0  ;;  %v5774_v2 = vmul.f32 %v12946_v53, %v5674_v20  ;;  %v13540_v14 = vadd.f32 %v13127_v33, %v10579_v32  ;;  %15257 = vst [vmem:[#allocation53_spill] sm:$0xff] %v13554_v4  ;;  %v13581_v61 = vadd.f32 %v13134_v17, %v10579_v32 }
 0x3c6   :  { %15260 = vst [vmem:[#allocation17_spill] sm:$0xff] %v13564_v37  ;;  %15261 = vst [vmem:[#allocation13_spill] sm:$0xff] %v13568_v34  ;;  %v4695_v28 = vmul.f32 %v13529_v21, %v13529_v21 }
 0x3c7   :  { %4896 = vadd.xlane.f32.xlu0 %v4728_v19  ;;  %v5481_v30 = vadd.f32 1e-05, %v5289_v38  ;;  %v5874_v9 = vadd.f32 %v12948_v63, %v5774_v2  ;;  %15254 = vst [vmem:[#allocation32_spill] sm:$0xff] %v13540_v14  ;;  %v15258_v19 = vld [vmem:[#allocation6_spill] sm:$0xff]  ;;  %15263 = vst [vmem:[#allocation33_spill] sm:$0xff] %v13581_v61 }
 0x3c8   :  { %v5344_v47 = vsub.f32 %v15258_v19, %v13483_v44  ;;  %v4414_v19 = vpop.xlane.xlu1 %4413 }
 0x3c9   :  { %4898 = vadd.xlane.f32.xlu1 %v4729_v3  ;;  %6438 = vrsqrt.f32 %v5481_v30  ;;  %5970 = vst [vmem:[%s14558_s3 + $0x1d0] sm:$0xff] %v5874_v9  ;;  %v15262_v3 = vld [vmem:[#allocation15_spill] sm:$0xff] }
 0x3ca   :  { %v5385_v20 = vsub.f32 %v15262_v3, %v13497_v45  ;;  %v4735_v3 = vmul.f32 %v13540_v14, %v13540_v14 }
 0x3cb   :  { %4443 = vadd.xlane.f32.xlu0 %v13525_v13 }
 0x3cc   :  { %v13577_v27 = vpop.f32.mrb[44].mxu0 }
 0x3cd   :  { %4445 = vadd.xlane.f32.xlu1 %v13529_v21  ;;  %v6435_v33 = vpop.eup %6434 }
 0x3ce   :  { %v6437_v36 = vpop.eup %6436  ;;  %v5633_v59 = vmul.f32 %v6435_v33, %v5345_v25  ;;  %v13584_v33 = vpop.f32.mrb[45].mxu0 }
 0x3cf   :  { %4523 = vadd.xlane.f32.xlu0 %v13535_v12  ;;  %v4865_v15 = vpop.xlane.xlu0 %4864  ;;  %v5632_v39 = vmul.f32 %v6437_v36, %v5344_v47  ;;  %v4694_v47 = vmul.f32 %v13525_v13, %v13525_v13  ;;  %v13591_v36 = vpop.f32.mrb[46].mxu0 }
 0x3d0   :  { %v5000_v10 = vmul.f32 0.0078125, %v4865_v15  ;;  %v5733_v44 = vmul.f32 %v12946_v53, %v5633_v59  ;;  %v13598_v15 = vpop.f32.mrb[47].mxu0 }
 0x3d1   :  { %4525 = vadd.xlane.f32.xlu1 %v13540_v14  ;;  %v5732_v38 = vmul.f32 %v12946_v53, %v5632_v39 }
 0x3d2   :  { %v5192_v57 = vsub.f32 %v5000_v10, %v5096_v24  ;;  %v5833_v30 = vadd.f32 %v12948_v63, %v5733_v44  ;;  %v4734_v10 = vmul.f32 %v13535_v12, %v13535_v12 }
 0x3d3   :  { %4439 = vadd.xlane.f32.xlu0 %v13554_v4  ;;  %v6439_v2 = vpop.eup %6438  ;;  %v4412_v9 = vpop.xlane.xlu0 %4411  ;;  %v5832_v25 = vadd.f32 %v12948_v63, %v5732_v38  ;;  %v4692_v38 = vmul.f32 %v13554_v4, %v13554_v4 }
 0x3d4   :  { %v5673_v45 = vmul.f32 %v6439_v2, %v5385_v20  ;;  %v5288_v46 = vmax.f32 %v5192_v57, 0.0  ;;  %5929 = vst [vmem:[%s14558_s3 + $0x88] sm:$0xff] %v5833_v30  ;;  %v4693_v2 = vmul.f32 %v13564_v37, %v13564_v37 }
 0x3d5   :  { %4441 = vadd.xlane.f32.xlu1 %v13564_v37  ;;  %5928 = vst [vmem:[%s14558_s3 + $0x80] sm:$0xff] %v5832_v25  ;;  %v15264_v25 = vld [vmem:[#allocation14_spill] sm:$0xff] }
 0x3d6   :  { %v5773_v17 = vmul.f32 %v12946_v53, %v5673_v45  ;;  %v5480_v59 = vadd.f32 1e-05, %v5288_v46  ;;  %v5384_v45 = vsub.f32 %v15264_v25, %v13548_v8  ;;  %v13616_v46 = vmul.f32 0.0078125, %v4412_v9 }
 0x3d7   :  { %4519 = vadd.xlane.f32.xlu0 %v13568_v34  ;;  %v4492_v39 = vpop.xlane.xlu0 %4491 }
 0x3d8   :  { %v5873_v24 = vadd.f32 %v12948_v63, %v5773_v17  ;;  %6440 = vrsqrt.f32 %v5480_v59  ;;  %v13631_v25 = vmul.f32 0.0078125, %v4492_v39 }
 0x3d9   :  { %4521 = vadd.xlane.f32.xlu1 %v13581_v61 }
 0x3da   :  { %5969 = vst [vmem:[%s14558_s3 + $0x1c8] sm:$0xff] %v5873_v24 }
 0x3db   :  { %4828 = vadd.xlane.f32.xlu0 %v4694_v47  ;;  %v4732_v47 = vmul.f32 %v13568_v34, %v13568_v34 }
 0x3dd   :  { %4830 = vadd.xlane.f32.xlu1 %v4695_v28  ;;  %v13620_v28 = vmul.f32 0.0078125, %v4414_v19  ;;  %v13635_v19 = vadd.f32 %v13329_v29, %v10579_v32  ;;  %v5102_v29 = vmul.f32 %v13631_v25, %v13631_v25 }
 0x3de   :  { %v4494_v44 = vpop.xlane.xlu1 %4493  ;;  %v4408_v20 = vpop.xlane.xlu0 %4407 }
 0x3df   :  { %4908 = vadd.xlane.f32.xlu0 %v4734_v10  ;;  %v13624_v10 = vadd.f32 %v13321_v56, %v10579_v32  ;;  %15266 = vst [vmem:[#allocation18_spill] sm:$0xff] %v13635_v19 }
 0x3e1   :  { %4910 = vadd.xlane.f32.xlu1 %v4735_v3  ;;  %15265 = vst [vmem:[#allocation57_spill] sm:$0xff] %v13624_v10  ;;  %v4733_v3 = vmul.f32 %v13581_v61, %v13581_v61  ;;  %v13643_v61 = vmul.f32 0.0078125, %v4408_v20 }
 0x3e2   :  { %v4410_v57 = vpop.xlane.xlu1 %4409  ;;  %v6441_v17 = vpop.eup %6440 }
 0x3e3   :  { %4824 = vadd.xlane.f32.xlu0 %v4692_v38  ;;  %v5672_v59 = vmul.f32 %v6441_v17, %v5384_v45  ;;  %v5062_v38 = vmul.f32 %v13616_v46, %v13616_v46  ;;  %v5063_v17 = vmul.f32 %v13620_v28, %v13620_v28  ;;  %v13659_v20 = vmul.f32 0.0078125, %v4410_v57 }
 0x3e4   :  { %v4488_v30 = vpop.xlane.xlu0 %4487 }
 0x3e5   :  { %4826 = vadd.xlane.f32.xlu1 %v4693_v2  ;;  %v5772_v9 = vmul.f32 %v12946_v53, %v5672_v59  ;;  %v13641_v59 = vmul.f32 0.0078125, %v4494_v44  ;;  %v13656_v44 = vadd.f32 %v13469_v0, %v10579_v32  ;;  %v5060_v0 = vmul.f32 %v13643_v61, %v13643_v61 }
 0x3e6   :  { %v4490_v24 = vpop.xlane.xlu1 %4489  ;;  %v13670_v57 = vmul.f32 0.0078125, %v4488_v30  ;;  %v5061_v4 = vmul.f32 %v13659_v20, %v13659_v20 }
 0x3e7   :  { %4904 = vadd.xlane.f32.xlu0 %v4732_v47  ;;  %v5872_v56 = vadd.f32 %v12948_v63, %v5772_v9 }
 0x3e8   :  { %v4797_v8 = vpop.xlane.xlu0 %4796 }
 0x3e9   :  { %v4966_v2 = vmul.f32 0.0078125, %v4797_v8  ;;  %4906 = vadd.xlane.f32.xlu1 %v4733_v3  ;;  %5968 = vst [vmem:[%s14558_s3 + $0x1c0] sm:$0xff] %v5872_v56  ;;  %v13652_v3 = vadd.f32 %v13460_v31, %v10579_v32  ;;  %v13663_v56 = vadd.f32 %v13325_v62, %v10579_v32  ;;  %v5103_v31 = vmul.f32 %v13641_v59, %v13641_v59 }
 0x3ea   :  { %v4799_v45 = vpop.xlane.xlu1 %4798 }
 0x3eb   :  { %v5158_v47 = vsub.f32 %v4966_v2, %v5062_v38  ;;  %4451 = vadd.xlane.f32.xlu0 %v13624_v10  ;;  %v4967_v39 = vmul.f32 0.0078125, %v4799_v45  ;;  %15267 = vst [vmem:[#allocation60_spill] sm:$0xff] %v13663_v56 }
 0x3ec   :  { %v4877_v8 = vpop.xlane.xlu0 %4876 }
 0x3ed   :  { %v5254_v9 = vmax.f32 %v5158_v47, 0.0  ;;  %v5006_v38 = vmul.f32 0.0078125, %v4877_v8  ;;  %v5159_v2 = vsub.f32 %v4967_v39, %v5063_v17  ;;  %4453 = vadd.xlane.f32.xlu1 %v13635_v19 }
 0x3ee   :  { %v4879_v34 = vpop.xlane.xlu1 %4878 }
 0x3ef   :  { %v5446_v45 = vadd.f32 1e-05, %v5254_v9  ;;  %v5198_v37 = vsub.f32 %v5006_v38, %v5102_v29  ;;  %4531 = vadd.xlane.f32.xlu0 %v13652_v3  ;;  %v5255_v47 = vmax.f32 %v5159_v2, 0.0  ;;  %v5007_v17 = vmul.f32 0.0078125, %v4879_v34 }
 0x3f0   :  { %v4793_v39 = vpop.xlane.xlu0 %4792  ;;  %v13674_v9 = vadd.f32 %v13331_v5, %v10579_v32  ;;  %v13681_v34 = vadd.f32 %v13466_v41, %v10579_v32 }
 0x3f1   :  { %6442 = vrsqrt.f32 %v5446_v45  ;;  %v5294_v8 = vmax.f32 %v5198_v37, 0.0  ;;  %v4964_v62 = vmul.f32 0.0078125, %v4793_v39  ;;  %v5447_v29 = vadd.f32 1e-05, %v5255_v47  ;;  %4533 = vadd.xlane.f32.xlu1 %v13656_v44 }
 0x3f2   :  { %15268 = vst [vmem:[#allocation63_spill] sm:$0xff] %v13674_v9  ;;  %v5199_v38 = vsub.f32 %v5007_v17, %v5103_v31  ;;  %v4795_v2 = vpop.xlane.xlu1 %4794  ;;  %v13684_v37 = vmul.f32 0.0078125, %v4490_v24  ;;  %v13686_v17 = vpop.f32.mrb[36].mxu1  ;;  %v5100_v39 = vmul.f32 %v13670_v57, %v13670_v57 }
 0x3f3   :  { %v5486_v30 = vadd.f32 1e-05, %v5294_v8  ;;  %v5156_v45 = vsub.f32 %v4964_v62, %v5060_v0  ;;  %4447 = vadd.xlane.f32.xlu0 %v13663_v56  ;;  %6444 = vrsqrt.f32 %v5447_v29  ;;  %v4965_v47 = vmul.f32 0.0078125, %v4795_v2  ;;  %v13690_v12 = vpop.f32.mrb[37].mxu1 }
 0x3f4   :  { %v5295_v5 = vmax.f32 %v5199_v38, 0.0  ;;  %v4873_v31 = vpop.xlane.xlu0 %4872  ;;  %v13693_v24 = vpop.f32.mrb[38].mxu1  ;;  %v13697_v62 = vadd.f32 %v13471_v52, %v10579_v32  ;;  %v4698_v52 = vmul.f32 %v13624_v10, %v13624_v10 }
 0x3f5   :  { %6446 = vrsqrt.f32 %v5486_v30  ;;  %v5252_v14 = vmax.f32 %v5156_v45, 0.0  ;;  %v5004_v41 = vmul.f32 0.0078125, %v4873_v31  ;;  %v5157_v0 = vsub.f32 %v4965_v47, %v5061_v4  ;;  %4449 = vadd.xlane.f32.xlu1 %v13674_v9  ;;  %v13700_v30 = vpop.f32.mrb[39].mxu1 }
 0x3f6   :  { %v5487_v8 = vadd.f32 1e-05, %v5295_v5  ;;  %v4875_v38 = vpop.xlane.xlu1 %4874  ;;  %v5101_v45 = vmul.f32 %v13684_v37, %v13684_v37 }
 0x3f7   :  { %v5444_v29 = vadd.f32 1e-05, %v5252_v14  ;;  %v5196_v2 = vsub.f32 %v5004_v41, %v5100_v39  ;;  %4527 = vadd.xlane.f32.xlu0 %v13681_v34  ;;  %v5253_v4 = vmax.f32 %v5157_v0, 0.0  ;;  %v5005_v5 = vmul.f32 0.0078125, %v4875_v38  ;;  %v15269_v14 = vld [vmem:[#allocation54_spill] sm:$0xff] }
 0x3f8   :  { %6448 = vrsqrt.f32 %v5487_v8  ;;  %v4420_v47 = vpop.xlane.xlu0 %4419  ;;  %v5350_v21 = vsub.f32 %v15269_v14, %v13616_v46  ;;  %v4696_v46 = vmul.f32 %v13663_v56, %v13663_v56 }
 0x3f9   :  { %6450 = vrsqrt.f32 %v5444_v29  ;;  %v5292_v31 = vmax.f32 %v5196_v2, 0.0  ;;  %v5445_v39 = vadd.f32 1e-05, %v5253_v4  ;;  %v5197_v41 = vsub.f32 %v5005_v5, %v5101_v45  ;;  %4529 = vadd.xlane.f32.xlu1 %v13697_v62  ;;  %v15270_v2 = vld [vmem:[#allocation55_spill] sm:$0xff]  ;;  %v15271_v4 = vld [vmem:[#allocation62_spill] sm:$0xff] }
 0x3fa   :  { %v4422_v18 = vpop.xlane.xlu1 %4421  ;;  %v4699_v29 = vmul.f32 %v13635_v19, %v13635_v19  ;;  %v5351_v10 = vsub.f32 %v15270_v2, %v13620_v28  ;;  %v5390_v5 = vsub.f32 %v15271_v4, %v13631_v25  ;;  %v15272_v2 = vld [vmem:[#allocation66_spill] sm:$0xff]  ;;  %v13738_v4 = vadd.f32 %v13591_v36, %v10579_v32 }
 0x3fb   :  { %v6443_v13 = vpop.eup %6442  ;;  %v5484_v54 = vadd.f32 1e-05, %v5292_v31  ;;  %4836 = vadd.xlane.f32.xlu0 %v4698_v52  ;;  %6452 = vrsqrt.f32 %v5445_v39  ;;  %v5293_v0 = vmax.f32 %v5197_v41, 0.0  ;;  %v5391_v25 = vsub.f32 %v15272_v2, %v13641_v59 }
 0x3fc   :  { %v5638_v8 = vmul.f32 %v6443_v13, %v5350_v21  ;;  %v4500_v38 = vpop.xlane.xlu0 %4499  ;;  %15275 = vst [vmem:[#allocation36_spill] sm:$0xff] %v13738_v4 }
 0x3fd   :  { %6454 = vrsqrt.f32 %v5484_v54  ;;  %v6445_v45 = vpop.eup %6444  ;;  %v5485_v13 = vadd.f32 1e-05, %v5293_v0  ;;  %4838 = vadd.xlane.f32.xlu1 %v4699_v29  ;;  %v4697_v54 = vmul.f32 %v13674_v9, %v13674_v9  ;;  %v13728_v0 = vadd.f32 %v13577_v27, %v10579_v32  ;;  %v15274_v29 = vld [vmem:[#allocation65_spill] sm:$0xff] }
 0x3fe   :  { %v5738_v31 = vmul.f32 %v12946_v53, %v5638_v8  ;;  %v5639_v52 = vmul.f32 %v6445_v45, %v5351_v10  ;;  %v13718_v14 = vpop.xlane.xlu1 %4501 }
 0x3ff   :  { %v6447_v21 = vpop.eup %6446  ;;  %4832 = vadd.xlane.f32.xlu0 %v4696_v46  ;;  %6456 = vrsqrt.f32 %v5485_v13  ;;  %15273 = vst [vmem:[#allocation64_spill] sm:$0xff] %v13728_v0  ;;  %v5348_v46 = vsub.f32 %v15274_v29, %v13643_v61 }
 0x400   :  { %v5838_v39 = vadd.f32 %v12948_v63, %v5738_v31  ;;  %v5678_v28 = vmul.f32 %v6447_v21, %v5390_v5  ;;  %v4416_v41 = vpop.xlane.xlu0 %4415  ;;  %v5739_v8 = vmul.f32 %v12946_v53, %v5639_v52  ;;  %v15276_v52 = vld [vmem:[#allocation67_spill] sm:$0xff] }
 0x401   :  { %4834 = vadd.xlane.f32.xlu1 %v4697_v54  ;;  %v13755_v54 = vadd.f32 %v13686_v17, %v10579_v32 }
 0x402   :  { %v6449_v10 = vpop.eup %6448  ;;  %5934 = vst [vmem:[%s14558_s3 + $0xb0] sm:$0xff] %v5838_v39  ;;  %v5778_v45 = vmul.f32 %v12946_v53, %v5678_v28  ;;  %v5839_v5 = vadd.f32 %v12948_v63, %v5739_v8  ;;  %v4418_v31 = vpop.xlane.xlu1 %4417  ;;  %v5349_v39 = vsub.f32 %v15276_v52, %v13659_v20  ;;  %v13751_v28 = vmul.f32 0.0078125, %v4420_v47 }
 0x403   :  { %v6451_v59 = vpop.eup %6450  ;;  %v5679_v27 = vmul.f32 %v6449_v10, %v5391_v25  ;;  %4459 = vadd.xlane.f32.xlu0 %v13728_v0  ;;  %v15277_v25 = vld [vmem:[#allocation68_spill] sm:$0xff]  ;;  %v13765_v10 = vadd.f32 %v13693_v24, %v10579_v32  ;;  %v13779_v24 = vadd.f32 %v13584_v33, %v10579_v32  ;;  %v13787_v52 = vmul.f32 0.0078125, %v4500_v38 }
 0x404   :  { %v5878_v61 = vadd.f32 %v12948_v63, %v5778_v45  ;;  %v5636_v13 = vmul.f32 %v6451_v59, %v5348_v46  ;;  %v13743_v21 = vpop.xlane.xlu0 %4495  ;;  %5935 = vst [vmem:[%s14558_s3 + $0xb8] sm:$0x1] %v5839_v5  ;;  %v5388_v8 = vsub.f32 %v15277_v25, %v13670_v57  ;;  %v13769_v46 = vmul.f32 0.0078125, %v4422_v18  ;;  %v15278_v57 = vld [vmem:[#allocation69_spill] sm:$0xff] }
 0x405   :  { %v5779_v36 = vmul.f32 %v12946_v53, %v5679_v27  ;;  %v6453_v2 = vpop.eup %6452  ;;  %4461 = vadd.xlane.f32.xlu1 %v13738_v4  ;;  %v5389_v59 = vsub.f32 %v15278_v57, %v13684_v37  ;;  %15279 = vst [vmem:[#allocation34_spill] sm:$0xff] %v13779_v24 }
 0x406   :  { %5974 = vst [vmem:[%s14558_s3 + $0x1f0] sm:$0xff] %v5878_v61  ;;  %v5736_v20 = vmul.f32 %v12946_v53, %v5636_v13  ;;  %v5637_v29 = vmul.f32 %v6453_v2, %v5349_v39  ;;  %v13771_v45 = vpop.xlane.xlu1 %4497  ;;  %v5066_v13 = vmul.f32 %v13751_v28, %v13751_v28  ;;  %v13799_v2 = vadd.f32 %v13690_v12, %v10579_v32 }
 0x407   :  { %v6455_v47 = vpop.eup %6454  ;;  %v5879_v17 = vadd.f32 %v12948_v63, %v5779_v36  ;;  %4539 = vadd.xlane.f32.xlu0 %v13755_v54  ;;  %v13795_v36 = vadd.f32 %v13598_v15, %v10579_v32  ;;  %v13808_v15 = vmul.f32 0.0078125, %v13718_v14  ;;  %v13823_v14 = vadd.f32 %v13700_v30, %v10579_v32 }
 0x408   :  { %v5836_v5 = vadd.f32 %v12948_v63, %v5736_v20  ;;  %v5676_v27 = vmul.f32 %v6455_v47, %v5388_v8  ;;  %v4805_v61 = vpop.xlane.xlu0 %4804  ;;  %v5737_v18 = vmul.f32 %v12946_v53, %v5637_v29  ;;  %v5067_v8 = vmul.f32 %v13769_v46, %v13769_v46 }
 0x409   :  { %5975 = vst [vmem:[%s14558_s3 + $0x1f8] sm:$0x1] %v5879_v17  ;;  %v4970_v37 = vmul.f32 0.0078125, %v4805_v61  ;;  %v6457_v39 = vpop.eup %6456  ;;  %4541 = vadd.xlane.f32.xlu1 %v13765_v10  ;;  %v13810_v29 = vmul.f32 0.0078125, %v4416_v41 }
 0x40a   :  { %5932 = vst [vmem:[%s14558_s3 + $0xa0] sm:$0xff] %v5836_v5  ;;  %v5776_v33 = vmul.f32 %v12946_v53, %v5676_v27  ;;  %v5837_v38 = vadd.f32 %v12948_v63, %v5737_v18  ;;  %v5677_v25 = vmul.f32 %v6457_v39, %v5389_v59  ;;  %v4807_v20 = vpop.xlane.xlu1 %4806  ;;  %v5106_v5 = vmul.f32 %v13787_v52, %v13787_v52 }
 0x40b   :  { %v5162_v47 = vsub.f32 %v4970_v37, %v5066_v13  ;;  %4455 = vadd.xlane.f32.xlu0 %v13779_v24  ;;  %v4971_v12 = vmul.f32 0.0078125, %v4807_v20  ;;  %v4702_v18 = vmul.f32 %v13728_v0, %v13728_v0  ;;  %v13829_v37 = vmul.f32 0.0078125, %v4418_v31 }
 0x40c   :  { %v5876_v17 = vadd.f32 %v12948_v63, %v5776_v33  ;;  %v4885_v57 = vpop.xlane.xlu0 %4884  ;;  %5933 = vst [vmem:[%s14558_s3 + $0xa8] sm:$0xff] %v5837_v38  ;;  %v5777_v59 = vmul.f32 %v12946_v53, %v5677_v25  ;;  %v5107_v25 = vmul.f32 %v13808_v15, %v13808_v15  ;;  %v5064_v30 = vmul.f32 %v13810_v29, %v13810_v29 }
 0x40d   :  { %v5258_v27 = vmax.f32 %v5162_v47, 0.0  ;;  %v5010_v61 = vmul.f32 0.0078125, %v4885_v57  ;;  %v5163_v41 = vsub.f32 %v4971_v12, %v5067_v8  ;;  %4457 = vadd.xlane.f32.xlu1 %v13795_v36  ;;  %v13840_v31 = vmul.f32 0.0078125, %v13743_v21 }
 0x40e   :  { %5972 = vst [vmem:[%s14558_s3 + $0x1e0] sm:$0xff] %v5876_v17  ;;  %v5877_v13 = vadd.f32 %v12948_v63, %v5777_v59  ;;  %v4887_v33 = vpop.xlane.xlu1 %4886  ;;  %v6358_v17 = vpop.f32.mrb[40].mxu1  ;;  %v4703_v21 = vmul.f32 %v13738_v4, %v13738_v4 }
 0x40f   :  { %v5450_v39 = vadd.f32 1e-05, %v5258_v27  ;;  %v5202_v38 = vsub.f32 %v5010_v61, %v5106_v5  ;;  %4535 = vadd.xlane.f32.xlu0 %v13799_v2  ;;  %v5259_v8 = vmax.f32 %v5163_v41, 0.0  ;;  %v5011_v20 = vmul.f32 0.0078125, %v4887_v33  ;;  %v4336_v59 = vpop.f32.mrb[41].mxu1 }
 0x410   :  { %v4801_v47 = vpop.xlane.xlu0 %4800  ;;  %5973 = vst [vmem:[%s14558_s3 + $0x1e8] sm:$0xff] %v5877_v13  ;;  %v6359_v61 = vpop.f32.mrb[42].mxu1  ;;  %v4700_v41 = vmul.f32 %v13779_v24, %v13779_v24  ;;  %v5065_v33 = vmul.f32 %v13829_v37, %v13829_v37 }
 0x411   :  { %6458 = vrsqrt.f32 %v5450_v39  ;;  %v5298_v12 = vmax.f32 %v5202_v38, 0.0  ;;  %v4968_v57 = vmul.f32 0.0078125, %v4801_v47  ;;  %v5451_v5 = vadd.f32 1e-05, %v5259_v8  ;;  %4537 = vadd.xlane.f32.xlu1 %v13823_v14  ;;  %v4339_v39 = vpop.f32.mrb[43].mxu1 }
 0x412   :  { %v5203_v27 = vsub.f32 %v5011_v20, %v5107_v25  ;;  %v4803_v13 = vpop.xlane.xlu1 %4802  ;;  %v13850_v38 = vmul.f32 0.0078125, %v13771_v45  ;;  %v5104_v47 = vmul.f32 %v13840_v31, %v13840_v31  ;;  %v4701_v45 = vmul.f32 %v13795_v36, %v13795_v36 }
 0x413   :  { %v5490_v0 = vadd.f32 1e-05, %v5298_v12  ;;  %v5160_v9 = vsub.f32 %v4968_v57, %v5064_v30  ;;  %4844 = vadd.xlane.f32.xlu0 %v4702_v18  ;;  %6460 = vrsqrt.f32 %v5451_v5  ;;  %v4969_v8 = vmul.f32 0.0078125, %v4803_v13 }
 0x414   :  { %v5299_v25 = vmax.f32 %v5203_v27, 0.0  ;;  %v4881_v20 = vpop.xlane.xlu0 %4880  ;;  %v5105_v5 = vmul.f32 %v13850_v38, %v13850_v38 }
 0x415   :  { %6462 = vrsqrt.f32 %v5490_v0  ;;  %v5256_v24 = vmax.f32 %v5160_v9, 0.0  ;;  %v5008_v12 = vmul.f32 0.0078125, %v4881_v20  ;;  %v5161_v30 = vsub.f32 %v4969_v8, %v5065_v33  ;;  %4846 = vadd.xlane.f32.xlu1 %v4703_v21 }
 0x416   :  { %v5491_v56 = vadd.f32 1e-05, %v5299_v25  ;;  %v4883_v4 = vpop.xlane.xlu1 %4882  ;;  %v13859_v9 = vadd.f32 %v6358_v17, %v10579_v32  ;;  %v13864_v8 = vadd.f32 %v6359_v61, %v10579_v32  ;;  %v15282_v61 = vld [vmem:[#allocation30_spill] sm:$0xff] }
 0x417   :  { %v5448_v57 = vadd.f32 1e-05, %v5256_v24  ;;  %v5200_v18 = vsub.f32 %v5008_v12, %v5104_v47  ;;  %4840 = vadd.xlane.f32.xlu0 %v4700_v41  ;;  %v5257_v27 = vmax.f32 %v5161_v30, 0.0  ;;  %v5009_v13 = vmul.f32 0.0078125, %v4883_v4  ;;  %v15280_v24 = vld [vmem:[#allocation28_spill] sm:$0xff]  ;;  %v15281_v12 = vld [vmem:[#allocation29_spill] sm:$0xff] }
 0x418   :  { %6464 = vrsqrt.f32 %v5491_v56  ;;  %v4428_v19 = vpop.xlane.xlu0 %4427  ;;  %v5354_v33 = vsub.f32 %v15280_v24, %v13751_v28  ;;  %v5355_v30 = vsub.f32 %v15281_v12, %v13769_v46  ;;  %v13870_v28 = vadd.f32 %v4336_v59, %v10579_v32 }
 0x419   :  { %6466 = vrsqrt.f32 %v5448_v57  ;;  %v5296_v0 = vmax.f32 %v5200_v18, 0.0  ;;  %v5449_v21 = vadd.f32 1e-05, %v5257_v27  ;;  %v5201_v25 = vsub.f32 %v5009_v13, %v5105_v5  ;;  %4842 = vadd.xlane.f32.xlu1 %v4701_v45 }
 0x41a   :  { %v4430_v56 = vpop.xlane.xlu1 %4429  ;;  %v5394_v18 = vsub.f32 %v15282_v61, %v13787_v52  ;;  %v13879_v59 = vadd.f32 %v4339_v39, %v10579_v32  ;;  %v5395_v52 = vsub.f32 %v12995_v48, %v13808_v15 }
 0x41b   :  { %v6459_v41 = vpop.eup %6458  ;;  %v5488_v20 = vadd.f32 1e-05, %v5296_v0  ;;  %4547 = vadd.xlane.f32.xlu0 %v13859_v9  ;;  %6468 = vrsqrt.f32 %v5449_v21  ;;  %v5297_v47 = vmax.f32 %v5201_v25, 0.0 }
 0x41c   :  { %v5642_v4 = vmul.f32 %v6459_v41, %v5354_v33  ;;  %v4508_v17 = vpop.xlane.xlu0 %4507  ;;  %v5352_v41 = vsub.f32 %v12974_v16, %v13810_v29  ;;  %v5353_v16 = vsub.f32 %v12978_v50, %v13829_v37 }
 0x41d   :  { %6470 = vrsqrt.f32 %v5488_v20  ;;  %v6461_v57 = vpop.eup %6460  ;;  %v5489_v5 = vadd.f32 1e-05, %v5297_v47  ;;  %4549 = vadd.xlane.f32.xlu1 %v13864_v8 }
 0x41e   :  { %v5742_v45 = vmul.f32 %v12946_v53, %v5642_v4  ;;  %v5643_v13 = vmul.f32 %v6461_v57, %v5355_v30  ;;  %v4510_v0 = vpop.xlane.xlu1 %4509  ;;  %v13899_v57 = vmul.f32 0.0078125, %v4428_v19  ;;  %v5393_v19 = vsub.f32 %v13030_v1, %v13850_v38 }
 0x41f   :  { %v6463_v27 = vpop.eup %6462  ;;  %4543 = vadd.xlane.f32.xlu0 %v13870_v28  ;;  %6472 = vrsqrt.f32 %v5489_v5 }
 0x420   :  { %v5842_v46 = vadd.f32 %v12948_v63, %v5742_v45  ;;  %v5682_v24 = vmul.f32 %v6463_v27, %v5394_v18  ;;  %v4424_v33 = vpop.xlane.xlu0 %4423  ;;  %v5743_v21 = vmul.f32 %v12946_v53, %v5643_v13  ;;  %v5392_v18 = vsub.f32 %v12988_v26, %v13840_v31 }
 0x421   :  { %4545 = vadd.xlane.f32.xlu1 %v13879_v59  ;;  %v13908_v27 = vmul.f32 0.0078125, %v4430_v56 }
 0x422   :  { %v6465_v25 = vpop.eup %6464  ;;  %5938 = vst [vmem:[%s14558_s3 + $0xd0] sm:$0xff] %v5842_v46  ;;  %v5782_v20 = vmul.f32 %v12946_v53, %v5682_v24  ;;  %v5843_v4 = vadd.f32 %v12948_v63, %v5743_v21  ;;  %v4426_v12 = vpop.xlane.xlu1 %4425  ;;  %v13919_v21 = vmul.f32 0.0078125, %v4508_v17  ;;  %v13929_v17 = vmul.f32 0.0078125, %v4510_v0 }
 0x423   :  { %v6467_v39 = vpop.eup %6466  ;;  %v5683_v47 = vmul.f32 %v6465_v25, %v5395_v52  ;;  %v5070_v52 = vmul.f32 %v13899_v57, %v13899_v57 }
 0x424   :  { %v5882_v48 = vadd.f32 %v12948_v63, %v5782_v20  ;;  %v5640_v15 = vmul.f32 %v6467_v39, %v5352_v41  ;;  %v4504_v30 = vpop.xlane.xlu0 %4503  ;;  %5939 = vst [vmem:[%s14558_s3 + $0xd8] sm:$0x1] %v5843_v4  ;;  %v5071_v20 = vmul.f32 %v13908_v27, %v13908_v27 }
 0x425   :  { %v5783_v29 = vmul.f32 %v12946_v53, %v5683_v47  ;;  %v6469_v61 = vpop.eup %6468 }
 0x426   :  { %5978 = vst [vmem:[%s14558_s3 + $0x210] sm:$0xff] %v5882_v48  ;;  %v5740_v45 = vmul.f32 %v12946_v53, %v5640_v15  ;;  %v5641_v37 = vmul.f32 %v6469_v61, %v5353_v16  ;;  %v4506_v13 = vpop.xlane.xlu1 %4505  ;;  %v13931_v48 = vmul.f32 0.0078125, %v4424_v33  ;;  %v5110_v61 = vmul.f32 %v13919_v21, %v13919_v21 }
 0x427   :  { %v6471_v5 = vpop.eup %6470  ;;  %v5883_v50 = vadd.f32 %v12948_v63, %v5783_v29  ;;  %v13942_v33 = vmul.f32 0.0078125, %v4426_v12 }
 0x428   :  { %v5840_v46 = vadd.f32 %v12948_v63, %v5740_v45  ;;  %v5680_v24 = vmul.f32 %v6471_v5, %v5392_v18  ;;  %v4813_v26 = vpop.xlane.xlu0 %4812  ;;  %v5741_v31 = vmul.f32 %v12946_v53, %v5641_v37  ;;  %v13944_v5 = vmul.f32 0.0078125, %v4504_v30 }
 0x429   :  { %5979 = vst [vmem:[%s14558_s3 + $0x218] sm:$0x1] %v5883_v50  ;;  %v4974_v56 = vmul.f32 0.0078125, %v4813_v26  ;;  %v6473_v25 = vpop.eup %6472  ;;  %v5068_v12 = vmul.f32 %v13931_v48, %v13931_v48 }
 0x42a   :  { %5936 = vst [vmem:[%s14558_s3 + $0xc0] sm:$0xff] %v5840_v46  ;;  %v5780_v1 = vmul.f32 %v12946_v53, %v5680_v24  ;;  %v5841_v38 = vadd.f32 %v12948_v63, %v5741_v31  ;;  %v5681_v41 = vmul.f32 %v6473_v25, %v5393_v19  ;;  %v4815_v39 = vpop.xlane.xlu1 %4814 }
 0x42b   :  { %v5166_v4 = vsub.f32 %v4974_v56, %v5070_v52  ;;  %v4975_v15 = vmul.f32 0.0078125, %v4815_v39  ;;  %v5111_v52 = vmul.f32 %v13929_v17, %v13929_v17 }
 0x42c   :  { %v5880_v47 = vadd.f32 %v12948_v63, %v5780_v1  ;;  %v4893_v16 = vpop.xlane.xlu0 %4892  ;;  %5937 = vst [vmem:[%s14558_s3 + $0xc8] sm:$0xff] %v5841_v38  ;;  %v5781_v29 = vmul.f32 %v12946_v53, %v5681_v41 }
 0x42d   :  { %v5262_v18 = vmax.f32 %v5166_v4, 0.0  ;;  %v5014_v45 = vmul.f32 0.0078125, %v4893_v16  ;;  %v5167_v50 = vsub.f32 %v4975_v15, %v5071_v20  ;;  %v5069_v4 = vmul.f32 %v13942_v33, %v13942_v33 }
 0x42e   :  { %5976 = vst [vmem:[%s14558_s3 + $0x200] sm:$0xff] %v5880_v47  ;;  %v5881_v37 = vadd.f32 %v12948_v63, %v5781_v29  ;;  %v4895_v26 = vpop.xlane.xlu1 %4894  ;;  %v5108_v29 = vmul.f32 %v13944_v5, %v13944_v5 }
 0x42f   :  { %v5454_v24 = vadd.f32 1e-05, %v5262_v18  ;;  %v5206_v31 = vsub.f32 %v5014_v45, %v5110_v61  ;;  %v5263_v25 = vmax.f32 %v5167_v50, 0.0  ;;  %v5015_v30 = vmul.f32 0.0078125, %v4895_v26 }
 0x430   :  { %v6362_v0 = vpop.f32.mrb[44].mxu1  ;;  %v4809_v1 = vpop.xlane.xlu0 %4808  ;;  %5977 = vst [vmem:[%s14558_s3 + $0x208] sm:$0xff] %v5881_v37 }
 0x431   :  { %v13948_v19 = vadd.f32 %v6362_v0, %v10579_v32  ;;  %v4352_v46 = vpop.f32.mrb[45].mxu1  ;;  %6474 = vrsqrt.f32 %v5454_v24  ;;  %v5302_v20 = vmax.f32 %v5206_v31, 0.0  ;;  %v4972_v39 = vmul.f32 0.0078125, %v4809_v1 }
 0x432   :  { %v6363_v56 = vpop.f32.mrb[46].mxu1  ;;  %v5455_v47 = vadd.f32 1e-05, %v5263_v25  ;;  %v5207_v15 = vsub.f32 %v5015_v30, %v5111_v52  ;;  %v13964_v16 = vadd.f32 %v4352_v46, %v10579_v32  ;;  %v4811_v18 = vpop.xlane.xlu1 %4810  ;;  %v13969_v0 = vmul.f32 0.0078125, %v4506_v13 }
 0x433   :  { %v13958_v38 = vadd.f32 %v6363_v56, %v10579_v32  ;;  %v4355_v41 = vpop.f32.mrb[47].mxu1  ;;  %4555 = vadd.xlane.f32.xlu0 %v13948_v19  ;;  %v5494_v61 = vadd.f32 1e-05, %v5302_v20  ;;  %v5164_v45 = vsub.f32 %v4972_v39, %v5068_v12  ;;  %v4973_v37 = vmul.f32 0.0078125, %v4811_v18 }
 0x434   :  { %6476 = vrsqrt.f32 %v5455_v47  ;;  %v5303_v50 = vmax.f32 %v5207_v15, 0.0  ;;  %v4889_v24 = vpop.xlane.xlu0 %4888  ;;  %v13972_v26 = vadd.f32 %v4355_v41, %v10579_v32  ;;  %v4736_v13 = vmul.f32 %v13681_v34, %v13681_v34 }
 0x435   :  { %4557 = vadd.xlane.f32.xlu1 %v13958_v38  ;;  %6478 = vrsqrt.f32 %v5494_v61  ;;  %v5260_v46 = vmax.f32 %v5164_v45, 0.0  ;;  %v5012_v31 = vmul.f32 0.0078125, %v4889_v24  ;;  %v5165_v56 = vsub.f32 %v4973_v37, %v5069_v4 }
 0x436   :  { %v5495_v52 = vadd.f32 1e-05, %v5303_v50  ;;  %v4891_v25 = vpop.xlane.xlu1 %4890  ;;  %v5109_v1 = vmul.f32 %v13969_v0, %v13969_v0  ;;  %v4737_v39 = vmul.f32 %v13697_v62, %v13697_v62  ;;  %v5358_v47 = vsub.f32 %v13159_v40, %v13899_v57 }
 0x437   :  { %4551 = vadd.xlane.f32.xlu0 %v13964_v16  ;;  %v5452_v12 = vadd.f32 1e-05, %v5260_v46  ;;  %v5204_v30 = vsub.f32 %v5012_v31, %v5108_v29  ;;  %v5261_v32 = vmax.f32 %v5165_v56, 0.0  ;;  %v5013_v41 = vmul.f32 0.0078125, %v4891_v25 }
 0x438   :  { %6480 = vrsqrt.f32 %v5495_v52  ;;  %v4436_v20 = vpop.xlane.xlu0 %4435  ;;  %v4738_v29 = vmul.f32 %v13652_v3, %v13652_v3  ;;  %v5359_v31 = vsub.f32 %v13173_v35, %v13908_v27  ;;  %v4739_v52 = vmul.f32 %v13656_v44, %v13656_v44 }
 0x439   :  { %4553 = vadd.xlane.f32.xlu1 %v13972_v26  ;;  %6482 = vrsqrt.f32 %v5452_v12  ;;  %v5300_v4 = vmax.f32 %v5204_v30, 0.0  ;;  %v5453_v15 = vadd.f32 1e-05, %v5261_v32  ;;  %v5205_v61 = vsub.f32 %v5013_v41, %v5109_v1 }
 0x43a   :  { %v4438_v50 = vpop.xlane.xlu1 %4437  ;;  %v5398_v57 = vsub.f32 %v13190_v51, %v13919_v21  ;;  %v4740_v30 = vmul.f32 %v13799_v2, %v13799_v2  ;;  %v5399_v41 = vsub.f32 %v13198_v23, %v13929_v17  ;;  %v4741_v21 = vmul.f32 %v13823_v14, %v13823_v14 }
 0x43b   :  { %4912 = vadd.xlane.f32.xlu0 %v4736_v13  ;;  %v6475_v18 = vpop.eup %6474  ;;  %v5492_v45 = vadd.f32 1e-05, %v5300_v4  ;;  %6484 = vrsqrt.f32 %v5453_v15  ;;  %v5301_v24 = vmax.f32 %v5205_v61, 0.0  ;;  %v5356_v4 = vsub.f32 %v13163_v6, %v13931_v48 }
 0x43c   :  { %v5646_v37 = vmul.f32 %v6475_v18, %v5358_v47  ;;  %v4516_v46 = vpop.xlane.xlu0 %4515  ;;  %v4742_v17 = vmul.f32 %v13755_v54, %v13755_v54  ;;  %v5357_v6 = vsub.f32 %v13181_v7, %v13942_v33 }
 0x43d   :  { %4914 = vadd.xlane.f32.xlu1 %v4737_v39  ;;  %6486 = vrsqrt.f32 %v5492_v45  ;;  %v5493_v13 = vadd.f32 1e-05, %v5301_v24  ;;  %v4743_v24 = vmul.f32 %v13765_v10, %v13765_v10 }
 0x43e   :  { %v6477_v40 = vpop.eup %6476  ;;  %v5746_v56 = vmul.f32 %v12946_v53, %v5646_v37  ;;  %v4518_v1 = vpop.xlane.xlu1 %4517 }
 0x43f   :  { %4916 = vadd.xlane.f32.xlu0 %v4738_v29  ;;  %v6479_v12 = vpop.eup %6478  ;;  %v5647_v25 = vmul.f32 %v6477_v40, %v5359_v31  ;;  %6488 = vrsqrt.f32 %v5493_v13  ;;  %v14021_v31 = vmul.f32 0.0078125, %v4436_v20  ;;  %v5396_v40 = vsub.f32 %v13194_v58, %v13944_v5 }
 0x440   :  { %v5846_v35 = vadd.f32 %v12948_v63, %v5746_v56  ;;  %v5686_v27 = vmul.f32 %v6479_v12, %v5398_v57  ;;  %v4432_v32 = vpop.xlane.xlu0 %4431  ;;  %v14030_v13 = vmul.f32 0.0078125, %v4438_v50  ;;  %v4744_v20 = vmul.f32 %v13870_v28, %v13870_v28 }
 0x441   :  { %4918 = vadd.xlane.f32.xlu1 %v4739_v52  ;;  %v5747_v51 = vmul.f32 %v12946_v53, %v5647_v25  ;;  %v5397_v58 = vsub.f32 %v13202_v49, %v13969_v0 }
 0x442   :  { %v6481_v39 = vpop.eup %6480  ;;  %5942 = vst [vmem:[%s14558_s3 + $0xf0] sm:$0xff] %v5846_v35  ;;  %v5786_v47 = vmul.f32 %v12946_v53, %v5686_v27  ;;  %v4434_v18 = vpop.xlane.xlu1 %4433  ;;  %v5074_v27 = vmul.f32 %v14021_v31, %v14021_v31 }
 0x443   :  { %4920 = vadd.xlane.f32.xlu0 %v4740_v30  ;;  %v6483_v15 = vpop.eup %6482  ;;  %v5847_v61 = vadd.f32 %v12948_v63, %v5747_v51  ;;  %v5687_v23 = vmul.f32 %v6481_v39, %v5399_v41  ;;  %v4745_v30 = vmul.f32 %v13879_v59, %v13879_v59  ;;  %v14047_v41 = vmul.f32 0.0078125, %v4516_v46 }
 0x444   :  { %v5886_v29 = vadd.f32 %v12948_v63, %v5786_v47  ;;  %v5644_v45 = vmul.f32 %v6483_v15, %v5356_v4  ;;  %v14011_v37 = vpop.xlane.xlu0 %4511  ;;  %v4746_v39 = vmul.f32 %v13859_v9, %v13859_v9  ;;  %v5075_v46 = vmul.f32 %v14030_v13, %v14030_v13 }
 0x445   :  { %4922 = vadd.xlane.f32.xlu1 %v4741_v21  ;;  %5943 = vst [vmem:[%s14558_s3 + $0xf8] sm:$0x1] %v5847_v61  ;;  %v5787_v48 = vmul.f32 %v12946_v53, %v5687_v23  ;;  %v6485_v52 = vpop.eup %6484  ;;  %v4747_v21 = vmul.f32 %v13864_v8, %v13864_v8 }
 0x446   :  { %5982 = vst [vmem:[%s14558_s3 + $0x230] sm:$0xff] %v5886_v29  ;;  %v5744_v7 = vmul.f32 %v12946_v53, %v5644_v45  ;;  %v5645_v56 = vmul.f32 %v6485_v52, %v5357_v6  ;;  %v14034_v12 = vpop.xlane.xlu1 %4513  ;;  %v14063_v29 = vmul.f32 0.0078125, %v4432_v32  ;;  %v4748_v32 = vmul.f32 %v13964_v16, %v13964_v16 }
 0x447   :  { %4924 = vadd.xlane.f32.xlu0 %v4742_v17  ;;  %v6487_v33 = vpop.eup %6486  ;;  %v5887_v57 = vadd.f32 %v12948_v63, %v5787_v48  ;;  %v14061_v17 = vmul.f32 0.0078125, %v4518_v1  ;;  %v4749_v1 = vmul.f32 %v13972_v26, %v13972_v26 }
 0x448   :  { %v5844_v5 = vadd.f32 %v12948_v63, %v5744_v7  ;;  %v5684_v25 = vmul.f32 %v6487_v33, %v5396_v40  ;;  %v4821_v35 = vpop.xlane.xlu0 %4820  ;;  %v5745_v50 = vmul.f32 %v12946_v53, %v5645_v56 }
 0x449   :  { %4926 = vadd.xlane.f32.xlu1 %v4743_v24  ;;  %5983 = vst [vmem:[%s14558_s3 + $0x238] sm:$0x1] %v5887_v57  ;;  %v4978_v49 = vmul.f32 0.0078125, %v4821_v35  ;;  %v6489_v0 = vpop.eup %6488  ;;  %v5114_v24 = vmul.f32 %v14047_v41, %v14047_v41  ;;  %v14079_v57 = vmul.f32 0.0078125, %v4434_v18  ;;  %v14089_v18 = vmul.f32 0.0078125, %v14011_v37 }
 0x44a   :  { %5940 = vst [vmem:[%s14558_s3 + $0xe0] sm:$0xff] %v5844_v5  ;;  %v5784_v51 = vmul.f32 %v12946_v53, %v5684_v25  ;;  %v5845_v4 = vadd.f32 %v12948_v63, %v5745_v50  ;;  %v5685_v47 = vmul.f32 %v6489_v0, %v5397_v58  ;;  %v4823_v15 = vpop.xlane.xlu1 %4822  ;;  %v5115_v5 = vmul.f32 %v14061_v17, %v14061_v17 }
 0x44b   :  { %4928 = vadd.xlane.f32.xlu0 %v4744_v20  ;;  %v5170_v61 = vsub.f32 %v4978_v49, %v5074_v27  ;;  %v4979_v45 = vmul.f32 0.0078125, %v4823_v15  ;;  %v5072_v25 = vmul.f32 %v14063_v29, %v14063_v29  ;;  %v4751_v0 = vmul.f32 %v13958_v38, %v13958_v38 }
 0x44c   :  { %v5884_v23 = vadd.f32 %v12948_v63, %v5784_v51  ;;  %v4901_v6 = vpop.xlane.xlu0 %4900  ;;  %5941 = vst [vmem:[%s14558_s3 + $0xe8] sm:$0xff] %v5845_v4  ;;  %v5785_v48 = vmul.f32 %v12946_v53, %v5685_v47  ;;  %v4750_v4 = vmul.f32 %v13948_v19, %v13948_v19  ;;  %v14098_v37 = vmul.f32 0.0078125, %v14034_v12 }
 0x44d   :  { %4930 = vadd.xlane.f32.xlu1 %v4745_v30  ;;  %v5266_v52 = vmax.f32 %v5170_v61, 0.0  ;;  %v5018_v40 = vmul.f32 0.0078125, %v4901_v6  ;;  %v5171_v7 = vsub.f32 %v4979_v45, %v5075_v46  ;;  %v5112_v6 = vmul.f32 %v14089_v18, %v14089_v18 }
 0x44e   :  { %5980 = vst [vmem:[%s14558_s3 + $0x220] sm:$0xff] %v5884_v23  ;;  %v5885_v33 = vadd.f32 %v12948_v63, %v5785_v48  ;;  %v4903_v20 = vpop.xlane.xlu1 %4902  ;;  %v5113_v12 = vmul.f32 %v14098_v37, %v14098_v37 }
 0x44f   :  { %4932 = vadd.xlane.f32.xlu0 %v4746_v39  ;;  %v5458_v56 = vadd.f32 1e-05, %v5266_v52  ;;  %v5210_v58 = vsub.f32 %v5018_v40, %v5114_v24  ;;  %v5267_v30 = vmax.f32 %v5171_v7, 0.0  ;;  %v5019_v35 = vmul.f32 0.0078125, %v4903_v20 }
 0x450   :  { %v4817_v50 = vpop.xlane.xlu0 %4816  ;;  %5981 = vst [vmem:[%s14558_s3 + $0x228] sm:$0xff] %v5885_v33  ;;  %v5073_v39 = vmul.f32 %v14079_v57, %v14079_v57 }
 0x451   :  { %4934 = vadd.xlane.f32.xlu1 %v4747_v21  ;;  %6490 = vrsqrt.f32 %v5458_v56  ;;  %v5306_v27 = vmax.f32 %v5210_v58, 0.0  ;;  %v4976_v49 = vmul.f32 0.0078125, %v4817_v50  ;;  %v5459_v51 = vadd.f32 1e-05, %v5267_v30 }
 0x452   :  { %v5211_v21 = vsub.f32 %v5019_v35, %v5115_v5  ;;  %v4819_v46 = vpop.xlane.xlu1 %4818  ;;  %v5362_v5 = vsub.f32 %v13355_v42, %v14021_v31 }
 0x453   :  { %4936 = vadd.xlane.f32.xlu0 %v4748_v32  ;;  %v5498_v47 = vadd.f32 1e-05, %v5306_v27  ;;  %v5168_v15 = vsub.f32 %v4976_v49, %v5072_v25  ;;  %6492 = vrsqrt.f32 %v5459_v51  ;;  %v4977_v23 = vmul.f32 0.0078125, %v4819_v46 }
 0x454   :  { %v5307_v61 = vmax.f32 %v5211_v21, 0.0  ;;  %v4897_v45 = vpop.xlane.xlu0 %4896  ;;  %v5363_v21 = vsub.f32 %v13368_v55, %v14030_v13 }
 0x455   :  { %4938 = vadd.xlane.f32.xlu1 %v4749_v1  ;;  %6494 = vrsqrt.f32 %v5498_v47  ;;  %v5264_v48 = vmax.f32 %v5168_v15, 0.0  ;;  %v5016_v24 = vmul.f32 0.0078125, %v4897_v45  ;;  %v5169_v40 = vsub.f32 %v4977_v23, %v5073_v39 }
 0x456   :  { %v5499_v52 = vadd.f32 1e-05, %v5307_v61  ;;  %v4899_v32 = vpop.xlane.xlu1 %4898 }
 0x457   :  { %4940 = vadd.xlane.f32.xlu0 %v4750_v4  ;;  %v5456_v1 = vadd.f32 1e-05, %v5264_v48  ;;  %v5208_v7 = vsub.f32 %v5016_v24, %v5112_v6  ;;  %v5265_v33 = vmax.f32 %v5169_v40, 0.0  ;;  %v5017_v56 = vmul.f32 0.0078125, %v4899_v32 }
 0x458   :  { %6496 = vrsqrt.f32 %v5499_v52  ;;  %v4444_v20 = vpop.xlane.xlu0 %4443  ;;  %v5402_v4 = vsub.f32 %v13405_v11, %v14047_v41  ;;  %v5403_v6 = vsub.f32 %v13420_v43, %v14061_v17  ;;  %v5360_v11 = vsub.f32 %v13434_v22, %v14063_v29 }
 0x459   :  { %4942 = vadd.xlane.f32.xlu1 %v4751_v0  ;;  %6498 = vrsqrt.f32 %v5456_v1  ;;  %v5304_v58 = vmax.f32 %v5208_v7, 0.0  ;;  %v5457_v25 = vadd.f32 1e-05, %v5265_v33  ;;  %v5209_v30 = vsub.f32 %v5017_v56, %v5113_v12  ;;  %v15283_v12 = vld [vmem:[#allocation31_spill] sm:$0xff] }
 0x45a   :  { %v4446_v27 = vpop.xlane.xlu1 %4445  ;;  %v5361_v32 = vsub.f32 %v13446_v60, %v14079_v57  ;;  %v14129_v29 = vmul.f32 0.0078125, %v4444_v20  ;;  %v5400_v33 = vsub.f32 %v15283_v12, %v14089_v18  ;;  %v15284_v20 = vld [vmem:[#allocation7_spill] sm:$0xff] }
 0x45b   :  { %v6491_v35 = vpop.eup %6490  ;;  %v5496_v50 = vadd.f32 1e-05, %v5304_v58  ;;  %6500 = vrsqrt.f32 %v5457_v25  ;;  %v5305_v0 = vmax.f32 %v5209_v30, 0.0  ;;  %v5401_v30 = vsub.f32 %v15284_v20, %v14098_v37 }
 0x45c   :  { %v5650_v49 = vmul.f32 %v6491_v35, %v5362_v5  ;;  %v4524_v51 = vpop.xlane.xlu0 %4523  ;;  %v14138_v5 = vmul.f32 0.0078125, %v4446_v27 }
 0x45d   :  { %6502 = vrsqrt.f32 %v5496_v50  ;;  %v6493_v39 = vpop.eup %6492  ;;  %v5497_v42 = vadd.f32 1e-05, %v5305_v0  ;;  %v5078_v0 = vmul.f32 %v14129_v29, %v14129_v29 }
 0x45e   :  { %v5750_v47 = vmul.f32 %v12946_v53, %v5650_v49  ;;  %v5651_v46 = vmul.f32 %v6493_v39, %v5363_v21  ;;  %v4526_v15 = vpop.xlane.xlu1 %4525  ;;  %v14149_v21 = vmul.f32 0.0078125, %v4524_v51 }
 0x45f   :  { %v6495_v31 = vpop.eup %6494  ;;  %6504 = vrsqrt.f32 %v5497_v42  ;;  %v5079_v42 = vmul.f32 %v14138_v5, %v14138_v5  ;;  %v14159_v51 = vmul.f32 0.0078125, %v4526_v15 }
 0x460   :  { %v5850_v61 = vadd.f32 %v12948_v63, %v5750_v47  ;;  %v5690_v23 = vmul.f32 %v6495_v31, %v5402_v4  ;;  %v4440_v45 = vpop.xlane.xlu0 %4439  ;;  %v5751_v55 = vmul.f32 %v12946_v53, %v5651_v46 }
 0x462   :  { %v6497_v13 = vpop.eup %6496  ;;  %5946 = vst [vmem:[%s14558_s3 + $0x110] sm:$0xff] %v5850_v61  ;;  %v5790_v41 = vmul.f32 %v12946_v53, %v5690_v23  ;;  %v5851_v24 = vadd.f32 %v12948_v63, %v5751_v55  ;;  %v4442_v40 = vpop.xlane.xlu1 %4441  ;;  %v14161_v23 = vmul.f32 0.0078125, %v4440_v45 }
 0x463   :  { %v6499_v48 = vpop.eup %6498  ;;  %v5691_v52 = vmul.f32 %v6497_v13, %v5403_v6 }
 0x464   :  { %v5890_v1 = vadd.f32 %v12948_v63, %v5790_v41  ;;  %v5648_v43 = vmul.f32 %v6499_v48, %v5360_v11  ;;  %v4520_v17 = vpop.xlane.xlu0 %4519  ;;  %5947 = vst [vmem:[%s14558_s3 + $0x118] sm:$0x1] %v5851_v24  ;;  %v5118_v11 = vmul.f32 %v14149_v21, %v14149_v21  ;;  %v14173_v24 = vmul.f32 0.0078125, %v4442_v40 }
 0x465   :  { %v5791_v22 = vmul.f32 %v12946_v53, %v5691_v52  ;;  %v6501_v7 = vpop.eup %6500 }
 0x466   :  { %5986 = vst [vmem:[%s14558_s3 + $0x250] sm:$0xff] %v5890_v1  ;;  %v5748_v56 = vmul.f32 %v12946_v53, %v5648_v43  ;;  %v5649_v57 = vmul.f32 %v6501_v7, %v5361_v32  ;;  %v4522_v25 = vpop.xlane.xlu1 %4521  ;;  %v5119_v32 = vmul.f32 %v14159_v51, %v14159_v51  ;;  %v5077_v20 = vmul.f32 %v14173_v24, %v14173_v24 }
 0x467   :  { %v6503_v58 = vpop.eup %6502  ;;  %v5891_v60 = vadd.f32 %v12948_v63, %v5791_v22  ;;  %v5076_v22 = vmul.f32 %v14161_v23, %v14161_v23 }
 0x468   :  { %v5848_v35 = vadd.f32 %v12948_v63, %v5748_v56  ;;  %v5688_v50 = vmul.f32 %v6503_v58, %v5400_v33  ;;  %v4829_v18 = vpop.xlane.xlu0 %4828  ;;  %v5749_v49 = vmul.f32 %v12946_v53, %v5649_v57  ;;  %v14182_v56 = vmul.f32 0.0078125, %v4520_v17 }
 0x469   :  { %5987 = vst [vmem:[%s14558_s3 + $0x258] sm:$0x1] %v5891_v60  ;;  %v4982_v27 = vmul.f32 0.0078125, %v4829_v18  ;;  %v6505_v39 = vpop.eup %6504  ;;  %v14186_v18 = vmul.f32 0.0078125, %v4522_v25 }
 0x46a   :  { %5944 = vst [vmem:[%s14558_s3 + $0x100] sm:$0xff] %v5848_v35  ;;  %v5788_v37 = vmul.f32 %v12946_v53, %v5688_v50  ;;  %v5849_v4 = vadd.f32 %v12948_v63, %v5749_v49  ;;  %v5689_v47 = vmul.f32 %v6505_v39, %v5401_v30  ;;  %v4831_v31 = vpop.xlane.xlu1 %4830  ;;  %v5116_v17 = vmul.f32 %v14182_v56, %v14182_v56 }
 0x46b   :  { %v5174_v46 = vsub.f32 %v4982_v27, %v5078_v0  ;;  %v4983_v6 = vmul.f32 0.0078125, %v4831_v31 }
 0x46c   :  { %v5888_v61 = vadd.f32 %v12948_v63, %v5788_v37  ;;  %v4909_v55 = vpop.xlane.xlu0 %4908  ;;  %5945 = vst [vmem:[%s14558_s3 + $0x108] sm:$0xff] %v5849_v4  ;;  %v5789_v13 = vmul.f32 %v12946_v53, %v5689_v47 }
 0x46d   :  { %v5270_v41 = vmax.f32 %v5174_v46, 0.0  ;;  %v5022_v48 = vmul.f32 0.0078125, %v4909_v55  ;;  %v5175_v15 = vsub.f32 %v4983_v6, %v5079_v42 }
 0x46e   :  { %5984 = vst [vmem:[%s14558_s3 + $0x240] sm:$0xff] %v5888_v61  ;;  %v5889_v45 = vadd.f32 %v12948_v63, %v5789_v13  ;;  %v4911_v1 = vpop.xlane.xlu1 %4910  ;;  %v5117_v61 = vmul.f32 %v14186_v18, %v14186_v18 }
 0x46f   :  { %v5462_v52 = vadd.f32 1e-05, %v5270_v41  ;;  %v5214_v43 = vsub.f32 %v5022_v48, %v5118_v11  ;;  %v5271_v7 = vmax.f32 %v5175_v15, 0.0  ;;  %v5023_v12 = vmul.f32 0.0078125, %v4911_v1  ;;  %v15285_v11 = vld [vmem:[#allocation27_spill] sm:$0xff] }
 0x470   :  { %v4825_v33 = vpop.xlane.xlu0 %4824  ;;  %5985 = vst [vmem:[%s14558_s3 + $0x248] sm:$0xff] %v5889_v45  ;;  %v5366_v41 = vsub.f32 %v15285_v11, %v14129_v29 }
 0x471   :  { %6506 = vrsqrt.f32 %v5462_v52  ;;  %v5310_v40 = vmax.f32 %v5214_v43, 0.0  ;;  %v4980_v58 = vmul.f32 0.0078125, %v4825_v33  ;;  %v5463_v60 = vadd.f32 1e-05, %v5271_v7  ;;  %v15286_v7 = vld [vmem:[#allocation26_spill] sm:$0xff] }
 0x472   :  { %v5215_v57 = vsub.f32 %v5023_v12, %v5119_v32  ;;  %v4827_v35 = vpop.xlane.xlu1 %4826  ;;  %v5367_v12 = vsub.f32 %v15286_v7, %v14138_v5 }
 0x473   :  { %v5502_v30 = vadd.f32 1e-05, %v5310_v40  ;;  %v5172_v50 = vsub.f32 %v4980_v58, %v5076_v22  ;;  %6508 = vrsqrt.f32 %v5463_v60  ;;  %v4981_v0 = vmul.f32 0.0078125, %v4827_v35  ;;  %v15287_v40 = vld [vmem:[#allocation10_spill] sm:$0xff] }
 0x474   :  { %v5311_v49 = vmax.f32 %v5215_v57, 0.0  ;;  %v4905_v27 = vpop.xlane.xlu0 %4904  ;;  %v5406_v58 = vsub.f32 %v15287_v40, %v14149_v21  ;;  %v15289_v21 = vld [vmem:[#allocation53_spill] sm:$0xff] }
 0x475   :  { %6510 = vrsqrt.f32 %v5502_v30  ;;  %v5268_v39 = vmax.f32 %v5172_v50, 0.0  ;;  %v5020_v37 = vmul.f32 0.0078125, %v4905_v27  ;;  %v5173_v47 = vsub.f32 %v4981_v0, %v5077_v20  ;;  %v15288_v0 = vld [vmem:[#allocation32_spill] sm:$0xff] }
 0x476   :  { %v5503_v4 = vadd.f32 1e-05, %v5311_v49  ;;  %v4907_v31 = vpop.xlane.xlu1 %4906  ;;  %v5407_v5 = vsub.f32 %v15288_v0, %v14159_v51 }
 0x477   :  { %v5460_v42 = vadd.f32 1e-05, %v5268_v39  ;;  %v5212_v46 = vsub.f32 %v5020_v37, %v5116_v17  ;;  %v5269_v25 = vmax.f32 %v5173_v47, 0.0  ;;  %v5021_v6 = vmul.f32 0.0078125, %v4907_v31 }
 0x478   :  { %6512 = vrsqrt.f32 %v5503_v4  ;;  %v4452_v55 = vpop.xlane.xlu0 %4451  ;;  %v5364_v39 = vsub.f32 %v15289_v21, %v14161_v23 }
 0x479   :  { %6514 = vrsqrt.f32 %v5460_v42  ;;  %v5308_v13 = vmax.f32 %v5212_v46, 0.0  ;;  %v5461_v48 = vadd.f32 1e-05, %v5269_v25  ;;  %v5213_v15 = vsub.f32 %v5021_v6, %v5117_v61  ;;  %v15290_v25 = vld [vmem:[#allocation17_spill] sm:$0xff] }
 0x47a   :  { %v4454_v1 = vpop.xlane.xlu1 %4453  ;;  %v5365_v6 = vsub.f32 %v15290_v25, %v14173_v24 }
 0x47b   :  { %v6507_v45 = vpop.eup %6506  ;;  %v5500_v52 = vadd.f32 1e-05, %v5308_v13  ;;  %6516 = vrsqrt.f32 %v5461_v48  ;;  %v5309_v32 = vmax.f32 %v5213_v15, 0.0  ;;  %v14223_v13 = vmul.f32 0.0078125, %v4452_v55 }
 0x47c   :  { %v5654_v43 = vmul.f32 %v6507_v45, %v5366_v41  ;;  %v14194_v22 = vpop.xlane.xlu0 %4531  ;;  %v15291_v41 = vld [vmem:[#allocation13_spill] sm:$0xff] }
 0x47d   :  { %6518 = vrsqrt.f32 %v5500_v52  ;;  %v6509_v33 = vpop.eup %6508  ;;  %v5501_v60 = vadd.f32 1e-05, %v5309_v32  ;;  %v5404_v48 = vsub.f32 %v15291_v41, %v14182_v56  ;;  %v15292_v32 = vld [vmem:[#allocation33_spill] sm:$0xff] }
 0x47e   :  { %v5754_v29 = vmul.f32 %v12946_v53, %v5654_v43  ;;  %v5655_v20 = vmul.f32 %v6509_v33, %v5367_v12  ;;  %v14201_v30 = vpop.xlane.xlu1 %4533  ;;  %v5405_v55 = vsub.f32 %v15292_v32, %v14186_v18  ;;  %v4603_v33 = vmul.f32 0.0078125, %v4454_v1 }
 0x47f   :  { %v6511_v57 = vpop.eup %6510  ;;  %6520 = vrsqrt.f32 %v5501_v60 }
 0x480   :  { %v5854_v35 = vadd.f32 %v12948_v63, %v5754_v29  ;;  %v5694_v50 = vmul.f32 %v6511_v57, %v5406_v58  ;;  %v4448_v49 = vpop.xlane.xlu0 %4447  ;;  %v5755_v27 = vmul.f32 %v12946_v53, %v5655_v20  ;;  %v5082_v58 = vmul.f32 %v14223_v13, %v14223_v13 }
 0x481   :  { %v4600_v29 = vmul.f32 0.0078125, %v4448_v49 }
 0x482   :  { %v6513_v17 = vpop.eup %6512  ;;  %5950 = vst [vmem:[%s14558_s3 + $0x130] sm:$0xff] %v5854_v35  ;;  %v5794_v37 = vmul.f32 %v12946_v53, %v5694_v50  ;;  %v5855_v47 = vadd.f32 %v12948_v63, %v5755_v27  ;;  %v4450_v31 = vpop.xlane.xlu1 %4449 }
 0x483   :  { %v6515_v4 = vpop.eup %6514  ;;  %v5695_v42 = vmul.f32 %v6513_v17, %v5407_v5  ;;  %v5083_v5 = vmul.f32 %v4603_v33, %v4603_v33  ;;  %v4601_v27 = vmul.f32 0.0078125, %v4450_v31 }
 0x484   :  { %v5894_v46 = vadd.f32 %v12948_v63, %v5794_v37  ;;  %v5652_v51 = vmul.f32 %v6515_v4, %v5364_v39  ;;  %v14215_v61 = vpop.xlane.xlu0 %4527  ;;  %5951 = vst [vmem:[%s14558_s3 + $0x138] sm:$0x1] %v5855_v47  ;;  %v5080_v39 = vmul.f32 %v4600_v29, %v4600_v29 }
 0x485   :  { %v5795_v23 = vmul.f32 %v12946_v53, %v5695_v42  ;;  %v6517_v11 = vpop.eup %6516  ;;  %v5081_v25 = vmul.f32 %v4601_v27, %v4601_v27 }
 0x486   :  { %5990 = vst [vmem:[%s14558_s3 + $0x270] sm:$0xff] %v5894_v46  ;;  %v5752_v15 = vmul.f32 %v12946_v53, %v5652_v51  ;;  %v5653_v52 = vmul.f32 %v6517_v11, %v5365_v6  ;;  %v14232_v43 = vpop.xlane.xlu1 %4529 }
 0x487   :  { %v6519_v45 = vpop.eup %6518  ;;  %v5895_v24 = vadd.f32 %v12948_v63, %v5795_v23 }
 0x488   :  { %v5852_v7 = vadd.f32 %v12948_v63, %v5752_v15  ;;  %v5692_v12 = vmul.f32 %v6519_v45, %v5404_v48  ;;  %v4837_v56 = vpop.xlane.xlu0 %4836  ;;  %v5753_v40 = vmul.f32 %v12946_v53, %v5653_v52 }
 0x489   :  { %5991 = vst [vmem:[%s14558_s3 + $0x278] sm:$0x1] %v5895_v24  ;;  %v4986_v60 = vmul.f32 0.0078125, %v4837_v56  ;;  %v6521_v57 = vpop.eup %6520  ;;  %v15293_v56 = vld [vmem:[#allocation57_spill] sm:$0xff] }
 0x48a   :  { %5948 = vst [vmem:[%s14558_s3 + $0x120] sm:$0xff] %v5852_v7  ;;  %v5792_v18 = vmul.f32 %v12946_v53, %v5692_v12  ;;  %v5853_v1 = vadd.f32 %v12948_v63, %v5753_v40  ;;  %v5693_v20 = vmul.f32 %v6521_v57, %v5405_v55  ;;  %v4839_v35 = vpop.xlane.xlu1 %4838  ;;  %v5370_v40 = vsub.f32 %v15293_v56, %v14223_v13 }
 0x48b   :  { %v5178_v50 = vsub.f32 %v4986_v60, %v5082_v58  ;;  %v4987_v17 = vmul.f32 0.0078125, %v4839_v35 }
 0x48c   :  { %v5892_v0 = vadd.f32 %v12948_v63, %v5792_v18  ;;  %v4833_v21 = vpop.xlane.xlu0 %4832  ;;  %5949 = vst [vmem:[%s14558_s3 + $0x128] sm:$0xff] %v5853_v1  ;;  %v5793_v49 = vmul.f32 %v12946_v53, %v5693_v20  ;;  %v15294_v1 = vld [vmem:[#allocation18_spill] sm:$0xff] }
 0x48d   :  { %v5274_v37 = vmax.f32 %v5178_v50, 0.0  ;;  %v4984_v4 = vmul.f32 0.0078125, %v4833_v21  ;;  %v5179_v47 = vsub.f32 %v4987_v17, %v5083_v5  ;;  %v5371_v20 = vsub.f32 %v15294_v1, %v4603_v33 }
 0x48e   :  { %5988 = vst [vmem:[%s14558_s3 + $0x260] sm:$0xff] %v5892_v0  ;;  %v5893_v42 = vadd.f32 %v12948_v63, %v5793_v49  ;;  %v4835_v31 = vpop.xlane.xlu1 %4834  ;;  %v15295_v0 = vld [vmem:[#allocation60_spill] sm:$0xff] }
 0x48f   :  { %v5466_v46 = vadd.f32 1e-05, %v5274_v37  ;;  %v5176_v51 = vsub.f32 %v4984_v4, %v5080_v39  ;;  %v5275_v6 = vmax.f32 %v5179_v47, 0.0  ;;  %v4985_v23 = vmul.f32 0.0078125, %v4835_v31  ;;  %v15296_v37 = vld [vmem:[#allocation63_spill] sm:$0xff] }
 0x490   :  { %v4460_v11 = vpop.xlane.xlu0 %4459  ;;  %5989 = vst [vmem:[%s14558_s3 + $0x268] sm:$0xff] %v5893_v42  ;;  %v5368_v5 = vsub.f32 %v15295_v0, %v4600_v29  ;;  %v5369_v4 = vsub.f32 %v15296_v37, %v4601_v27 }
 0x491   :  { %6522 = vrsqrt.f32 %v5466_v46  ;;  %v5272_v41 = vmax.f32 %v5176_v51, 0.0  ;;  %v5467_v48 = vadd.f32 1e-05, %v5275_v6  ;;  %v5177_v15 = vsub.f32 %v4985_v23, %v5081_v25 }
 0x492   :  { %v4462_v24 = vpop.xlane.xlu1 %4461  ;;  %v4606_v35 = vmul.f32 0.0078125, %v4460_v11 }
 0x493   :  { %v5464_v45 = vadd.f32 1e-05, %v5272_v41  ;;  %6524 = vrsqrt.f32 %v5467_v48  ;;  %v5273_v52 = vmax.f32 %v5177_v15, 0.0  ;;  %v4607_v42 = vmul.f32 0.0078125, %v4462_v24 }
 0x494   :  { %v14260_v32 = vpop.xlane.xlu0 %4539  ;;  %v5086_v33 = vmul.f32 %v4606_v35, %v4606_v35 }
 0x495   :  { %6526 = vrsqrt.f32 %v5464_v45  ;;  %v5465_v55 = vadd.f32 1e-05, %v5273_v52  ;;  %v5087_v15 = vmul.f32 %v4607_v42, %v4607_v42 }
 0x496   :  { %v14262_v7 = vpop.xlane.xlu1 %4541 }
 0x497   :  { %6528 = vrsqrt.f32 %v5465_v55 }
 0x498   :  { %v4456_v12 = vpop.xlane.xlu0 %4455 }
 0x499   :  { %v4604_v51 = vmul.f32 0.0078125, %v4456_v12 }
 0x49a   :  { %v4458_v60 = vpop.xlane.xlu1 %4457 }
 0x49b   :  { %v6523_v58 = vpop.eup %6522  ;;  %v4605_v45 = vmul.f32 0.0078125, %v4458_v60  ;;  %v5084_v12 = vmul.f32 %v4604_v51, %v4604_v51 }
 0x49c   :  { %v5658_v57 = vmul.f32 %v6523_v58, %v5370_v40  ;;  %v14266_v18 = vpop.xlane.xlu0 %4535 }
 0x49d   :  { %v6525_v50 = vpop.eup %6524 }
 0x49e   :  { %v5758_v17 = vmul.f32 %v12946_v53, %v5658_v57  ;;  %v5659_v49 = vmul.f32 %v6525_v50, %v5371_v20  ;;  %v14271_v39 = vpop.xlane.xlu1 %4537  ;;  %v5085_v50 = vmul.f32 %v4605_v45, %v4605_v45 }
 0x49f   :  { %v6527_v21 = vpop.eup %6526 }
 0x4a0   :  { %v5858_v13 = vadd.f32 %v12948_v63, %v5758_v17  ;;  %v5656_v47 = vmul.f32 %v6527_v21, %v5368_v5  ;;  %v4845_v46 = vpop.xlane.xlu0 %4844  ;;  %v5759_v31 = vmul.f32 %v12946_v53, %v5659_v49 }
 0x4a1   :  { %v4990_v25 = vmul.f32 0.0078125, %v4845_v46  ;;  %v6529_v6 = vpop.eup %6528 }
 0x4a2   :  { %5954 = vst [vmem:[%s14558_s3 + $0x150] sm:$0xff] %v5858_v13  ;;  %v5756_v29 = vmul.f32 %v12946_v53, %v5656_v47  ;;  %v5859_v23 = vadd.f32 %v12948_v63, %v5759_v31  ;;  %v5657_v27 = vmul.f32 %v6529_v6, %v5369_v4  ;;  %v4847_v11 = vpop.xlane.xlu1 %4846  ;;  %v15297_v47 = vld [vmem:[#allocation64_spill] sm:$0xff] }
 0x4a3   :  { %v5182_v41 = vsub.f32 %v4990_v25, %v5086_v33  ;;  %v4991_v24 = vmul.f32 0.0078125, %v4847_v11  ;;  %v5374_v46 = vsub.f32 %v15297_v47, %v4606_v35  ;;  %v15299_v11 = vld [vmem:[#allocation34_spill] sm:$0xff]  ;;  %v5373_v35 = vsub.f32 %v13795_v36, %v4605_v45 }
 0x4a4   :  { %v5856_v48 = vadd.f32 %v12948_v63, %v5756_v29  ;;  %v4841_v52 = vpop.xlane.xlu0 %4840  ;;  %5955 = vst [vmem:[%s14558_s3 + $0x158] sm:$0x1] %v5859_v23  ;;  %v5757_v55 = vmul.f32 %v12946_v53, %v5657_v27  ;;  %v15298_v29 = vld [vmem:[#allocation36_spill] sm:$0xff]  ;;  %v14348_v47 = vmul.f32 0.0078125, %v14260_v32  ;;  %v14362_v32 = vmul.f32 0.0078125, %v14266_v18 }
 0x4a5   :  { %v5278_v56 = vmax.f32 %v5182_v41, 0.0  ;;  %v4988_v40 = vmul.f32 0.0078125, %v4841_v52  ;;  %v5183_v58 = vsub.f32 %v4991_v24, %v5087_v15  ;;  %v5375_v23 = vsub.f32 %v15298_v29, %v4607_v42 }
 0x4a6   :  { %5952 = vst [vmem:[%s14558_s3 + $0x140] sm:$0xff] %v5856_v48  ;;  %v5857_v57 = vadd.f32 %v12948_v63, %v5757_v55  ;;  %v4843_v60 = vpop.xlane.xlu1 %4842  ;;  %v5372_v41 = vsub.f32 %v15299_v11, %v4604_v51  ;;  %v14359_v29 = vmul.f32 0.0078125, %v14262_v7  ;;  %v5126_v7 = vmul.f32 %v14348_v47, %v14348_v47 }
 0x4a7   :  { %v5470_v1 = vadd.f32 1e-05, %v5278_v56  ;;  %v5180_v20 = vsub.f32 %v4988_v40, %v5084_v12  ;;  %v5279_v0 = vmax.f32 %v5183_v58, 0.0  ;;  %v4989_v5 = vmul.f32 0.0078125, %v4843_v60 }
 0x4a8   :  { %5953 = vst [vmem:[%s14558_s3 + $0x148] sm:$0xff] %v5857_v57  ;;  %v14294_v31 = vpop.xlane.xlu0 %4547 }
 0x4a9   :  { %6530 = vrsqrt.f32 %v5470_v1  ;;  %v5276_v17 = vmax.f32 %v5180_v20, 0.0  ;;  %v5471_v21 = vadd.f32 1e-05, %v5279_v0  ;;  %v5181_v49 = vsub.f32 %v4989_v5, %v5085_v50 }
 0x4aa   :  { %v14296_v6 = vpop.xlane.xlu1 %4549  ;;  %v14332_v0 = vmul.f32 0.0078125, %v14215_v61 }
 0x4ab   :  { %v5468_v37 = vadd.f32 1e-05, %v5276_v17  ;;  %6532 = vrsqrt.f32 %v5471_v21  ;;  %v5277_v4 = vmax.f32 %v5181_v49, 0.0  ;;  %v14337_v17 = vmul.f32 0.0078125, %v14194_v22 }
 0x4ac   :  { %v14302_v12 = vpop.xlane.xlu0 %4543  ;;  %v14340_v21 = vmul.f32 0.0078125, %v14232_v43  ;;  %v14343_v49 = vmul.f32 0.0078125, %v14201_v30 }
 0x4ad   :  { %6534 = vrsqrt.f32 %v5468_v37  ;;  %v5469_v13 = vadd.f32 1e-05, %v5277_v4  ;;  %v5120_v4 = vmul.f32 %v14332_v0, %v14332_v0 }
 0x4ae   :  { %v14310_v51 = vpop.xlane.xlu1 %4545  ;;  %v5121_v22 = vmul.f32 %v14340_v21, %v14340_v21  ;;  %v5123_v30 = vmul.f32 %v14343_v49, %v14343_v49 }
 0x4af   :  { %6536 = vrsqrt.f32 %v5469_v13 }
 0x4b3   :  { %v6531_v33 = vpop.eup %6530 }
 0x4b4   :  { %v5662_v25 = vmul.f32 %v6531_v33, %v5374_v46  ;;  %v5122_v46 = vmul.f32 %v14337_v17, %v14337_v17 }
 0x4b5   :  { %v6533_v27 = vpop.eup %6532 }
 0x4b6   :  { %v5762_v48 = vmul.f32 %v12946_v53, %v5662_v25  ;;  %v5663_v24 = vmul.f32 %v6533_v27, %v5375_v23  ;;  %v5410_v25 = vsub.f32 %v13652_v3, %v14337_v17  ;;  %v5411_v27 = vsub.f32 %v13656_v44, %v14343_v49 }
 0x4b7   :  { %v6535_v15 = vpop.eup %6534 }
 0x4b8   :  { %v5862_v52 = vadd.f32 %v12948_v63, %v5762_v48  ;;  %v5660_v55 = vmul.f32 %v6535_v15, %v5372_v41  ;;  %v5763_v56 = vmul.f32 %v12946_v53, %v5663_v24  ;;  %v5409_v15 = vsub.f32 %v13697_v62, %v14340_v21 }
 0x4b9   :  { %v6537_v40 = vpop.eup %6536  ;;  %v5408_v24 = vsub.f32 %v13681_v34, %v14332_v0 }
 0x4ba   :  { %5958 = vst [vmem:[%s14558_s3 + $0x170] sm:$0xff] %v5862_v52  ;;  %v5760_v42 = vmul.f32 %v12946_v53, %v5660_v55  ;;  %v5863_v58 = vadd.f32 %v12948_v63, %v5763_v56  ;;  %v5661_v57 = vmul.f32 %v6537_v40, %v5373_v35  ;;  %v14373_v52 = vmul.f32 0.0078125, %v14271_v39 }
 0x4bc   :  { %v5860_v1 = vadd.f32 %v12948_v63, %v5760_v42  ;;  %5959 = vst [vmem:[%s14558_s3 + $0x178] sm:$0x1] %v5863_v58  ;;  %v5761_v36 = vmul.f32 %v12946_v53, %v5661_v57  ;;  %v5127_v42 = vmul.f32 %v14359_v29, %v14359_v29  ;;  %v5414_v57 = vsub.f32 %v13755_v54, %v14348_v47 }
 0x4be   :  { %5956 = vst [vmem:[%s14558_s3 + $0x160] sm:$0xff] %v5860_v1  ;;  %v5861_v60 = vadd.f32 %v12948_v63, %v5761_v36  ;;  %v5124_v1 = vmul.f32 %v14362_v32, %v14362_v32 }
 0x4c0   :  { %v14321_v45 = vpop.xlane.xlu0 %4555  ;;  %5957 = vst [vmem:[%s14558_s3 + $0x168] sm:$0xff] %v5861_v60 }
 0x4c2   :  { %v14324_v20 = vpop.xlane.xlu1 %4557 }
 0x4c4   :  { %v14329_v50 = vpop.xlane.xlu0 %4551 }
 0x4c6   :  { %v14334_v5 = vpop.xlane.xlu1 %4553 }
 0x4c8   :  { %v4913_v37 = vpop.xlane.xlu0 %4912 }
 0x4c9   :  { %v5024_v13 = vmul.f32 0.0078125, %v4913_v37 }
 0x4ca   :  { %v4915_v61 = vpop.xlane.xlu1 %4914 }
 0x4cb   :  { %v5025_v43 = vmul.f32 0.0078125, %v4915_v61  ;;  %v5216_v33 = vsub.f32 %v5024_v13, %v5120_v4  ;;  %v5125_v4 = vmul.f32 %v14373_v52, %v14373_v52  ;;  %v14386_v13 = vmul.f32 0.0078125, %v14296_v6 }
 0x4cc   :  { %v4917_v23 = vpop.xlane.xlu0 %4916  ;;  %v14389_v61 = vmul.f32 0.0078125, %v14294_v31 }
 0x4cd   :  { %v5217_v11 = vsub.f32 %v5025_v43, %v5121_v22  ;;  %v5312_v41 = vmax.f32 %v5216_v33, 0.0  ;;  %v5026_v48 = vmul.f32 0.0078125, %v4917_v23 }
 0x4ce   :  { %v4919_v18 = vpop.xlane.xlu1 %4918 }
 0x4cf   :  { %v5313_v55 = vmax.f32 %v5217_v11, 0.0  ;;  %v5504_v35 = vadd.f32 1e-05, %v5312_v41  ;;  %v5027_v56 = vmul.f32 0.0078125, %v4919_v18  ;;  %v5218_v40 = vsub.f32 %v5026_v48, %v5122_v46 }
 0x4d0   :  { %v4921_v36 = vpop.xlane.xlu0 %4920  ;;  %v5413_v11 = vsub.f32 %v13823_v14, %v14373_v52  ;;  %v14396_v41 = vmul.f32 0.0078125, %v14302_v12 }
 0x4d1   :  { %v5505_v39 = vadd.f32 1e-05, %v5313_v55  ;;  %6538 = vrsqrt.f32 %v5504_v35  ;;  %v5219_v60 = vsub.f32 %v5027_v56, %v5123_v30  ;;  %v5314_v37 = vmax.f32 %v5218_v40, 0.0 }
 0x4d2   :  { %v4923_v46 = vpop.xlane.xlu1 %4922  ;;  %v5028_v22 = vmul.f32 0.0078125, %v4921_v36  ;;  %v5412_v30 = vsub.f32 %v13799_v2, %v14362_v32  ;;  %v14400_v35 = vmul.f32 %v14386_v13, %v14386_v13  ;;  %v5130_v56 = vmul.f32 %v14389_v61, %v14389_v61 }
 0x4d3   :  { %6540 = vrsqrt.f32 %v5505_v39  ;;  %v5315_v43 = vmax.f32 %v5219_v60, 0.0  ;;  %v5506_v33 = vadd.f32 1e-05, %v5314_v37  ;;  %v5029_v23 = vmul.f32 0.0078125, %v4923_v46 }
 0x4d4   :  { %v5220_v6 = vsub.f32 %v5028_v22, %v5124_v1  ;;  %v4925_v48 = vpop.xlane.xlu0 %4924  ;;  %v14405_v40 = vmul.f32 0.0078125, %v14310_v51  ;;  %v5128_v37 = vmul.f32 %v14396_v41, %v14396_v41  ;;  %v14413_v46 = vmul.f32 0.0078125, %v14329_v50 }
 0x4d5   :  { %v5507_v18 = vadd.f32 1e-05, %v5315_v43  ;;  %6542 = vrsqrt.f32 %v5506_v33  ;;  %v5221_v31 = vsub.f32 %v5029_v23, %v5125_v4  ;;  %v5030_v55 = vmul.f32 0.0078125, %v4925_v48 }
 0x4d6   :  { %v5316_v36 = vmax.f32 %v5220_v6, 0.0  ;;  %v4927_v39 = vpop.xlane.xlu1 %4926  ;;  %v14410_v4 = vmul.f32 0.0078125, %v14321_v45  ;;  %v5129_v48 = vmul.f32 %v14405_v40, %v14405_v40  ;;  %v5416_v54 = vsub.f32 %v13870_v28, %v14396_v41 }
 0x4d7   :  { %6544 = vrsqrt.f32 %v5507_v18  ;;  %v5317_v12 = vmax.f32 %v5221_v31, 0.0  ;;  %v5031_v1 = vmul.f32 0.0078125, %v4927_v39  ;;  %v5222_v60 = vsub.f32 %v5030_v55, %v5126_v7 }
 0x4d8   :  { %v5508_v22 = vadd.f32 1e-05, %v5316_v36  ;;  %v4929_v43 = vpop.xlane.xlu0 %4928  ;;  %v14418_v7 = vmul.f32 0.0078125, %v14324_v20  ;;  %v14421_v18 = vmul.f32 0.0078125, %v14334_v5  ;;  %v5132_v39 = vmul.f32 %v14413_v46, %v14413_v46 }
 0x4d9   :  { %v5509_v33 = vadd.f32 1e-05, %v5317_v12  ;;  %v5223_v51 = vsub.f32 %v5031_v1, %v5127_v42  ;;  %v5318_v23 = vmax.f32 %v5222_v60, 0.0  ;;  %v5032_v6 = vmul.f32 0.0078125, %v4929_v43 }
 0x4da   :  { %6546 = vrsqrt.f32 %v5508_v22  ;;  %v4931_v45 = vpop.xlane.xlu1 %4930  ;;  %v14425_v42 = vmul.f32 %v14410_v4, %v14410_v4 }
 0x4db   :  { %v6539_v31 = vpop.eup %6538  ;;  %6548 = vrsqrt.f32 %v5509_v33  ;;  %v5319_v50 = vmax.f32 %v5223_v51, 0.0  ;;  %v5510_v55 = vadd.f32 1e-05, %v5318_v23  ;;  %v5033_v36 = vmul.f32 0.0078125, %v4931_v45 }
 0x4dc   :  { %v5696_v20 = vmul.f32 %v6539_v31, %v5408_v24  ;;  %v5224_v5 = vsub.f32 %v5032_v6, %v5128_v37  ;;  %v4933_v12 = vpop.xlane.xlu0 %4932  ;;  %v5133_v33 = vmul.f32 %v14421_v18, %v14421_v18 }
 0x4dd   :  { %v6541_v1 = vpop.eup %6540  ;;  %v5511_v60 = vadd.f32 1e-05, %v5319_v50  ;;  %6550 = vrsqrt.f32 %v5510_v55  ;;  %v5225_v22 = vsub.f32 %v5033_v36, %v5129_v48  ;;  %v5034_v43 = vmul.f32 0.0078125, %v4933_v12 }
 0x4de   :  { %v5697_v51 = vmul.f32 %v6541_v1, %v5409_v15  ;;  %v5796_v23 = vmul.f32 %v12946_v53, %v5696_v20  ;;  %v5320_v45 = vmax.f32 %v5224_v5, 0.0  ;;  %v4935_v58 = vpop.xlane.xlu1 %4934  ;;  %v5135_v1 = vmul.f32 %v14418_v7, %v14418_v7 }
 0x4df   :  { %v6543_v34 = vpop.eup %6542  ;;  %6552 = vrsqrt.f32 %v5511_v60  ;;  %v5321_v0 = vmax.f32 %v5225_v22, 0.0  ;;  %v5035_v24 = vmul.f32 0.0078125, %v4935_v58  ;;  %v5226_v37 = vsub.f32 %v5034_v43, %v5130_v56 }
 0x4e0   :  { %v5797_v6 = vmul.f32 %v12946_v53, %v5697_v51  ;;  %v5896_v48 = vadd.f32 %v12948_v63, %v5796_v23  ;;  %v5698_v31 = vmul.f32 %v6543_v34, %v5410_v25  ;;  %v5512_v50 = vadd.f32 1e-05, %v5320_v45  ;;  %v4937_v62 = vpop.xlane.xlu0 %4936 }
 0x4e1   :  { %v6545_v21 = vpop.eup %6544  ;;  %v5513_v15 = vadd.f32 1e-05, %v5321_v0  ;;  %v5227_v55 = vsub.f32 %v5035_v24, %v14400_v35  ;;  %v5322_v36 = vmax.f32 %v5226_v37, 0.0  ;;  %v5036_v20 = vmul.f32 0.0078125, %v4937_v62 }
 0x4e2   :  { %v5897_v5 = vadd.f32 %v12948_v63, %v5797_v6  ;;  %5992 = vst [vmem:[%s14558_s3 + $0x280] sm:$0xff] %v5896_v48  ;;  %v5699_v58 = vmul.f32 %v6545_v21, %v5411_v27  ;;  %v5798_v3 = vmul.f32 %v12946_v53, %v5698_v31  ;;  %6554 = vrsqrt.f32 %v5512_v50  ;;  %v4939_v17 = vpop.xlane.xlu1 %4938 }
 0x4e3   :  { %6556 = vrsqrt.f32 %v5513_v15  ;;  %v5323_v25 = vmax.f32 %v5227_v55, 0.0  ;;  %v5514_v56 = vadd.f32 1e-05, %v5322_v36  ;;  %v5037_v35 = vmul.f32 0.0078125, %v4939_v17 }
 0x4e4   :  { %v6547_v12 = vpop.eup %6546  ;;  %5993 = vst [vmem:[%s14558_s3 + $0x288] sm:$0xff] %v5897_v5  ;;  %v5799_v60 = vmul.f32 %v12946_v53, %v5699_v58  ;;  %v5898_v44 = vadd.f32 %v12948_v63, %v5798_v3  ;;  %v5228_v49 = vsub.f32 %v5036_v20, %v5132_v39  ;;  %v4941_v27 = vpop.xlane.xlu0 %4940  ;;  %v15300_v21 = vsub.f32 %v13765_v10, %v14359_v29 }
 0x4e5   :  { %v6549_v22 = vpop.eup %6548  ;;  %v5700_v43 = vmul.f32 %v6547_v12, %v5412_v30  ;;  %v5515_v51 = vadd.f32 1e-05, %v5323_v25  ;;  %6558 = vrsqrt.f32 %v5514_v56  ;;  %v5229_v23 = vsub.f32 %v5037_v35, %v5133_v33 }
 0x4e6   :  { %v5899_v45 = vadd.f32 %v12948_v63, %v5799_v60  ;;  %5994 = vst [vmem:[%s14558_s3 + $0x290] sm:$0xff] %v5898_v44  ;;  %v5701_v34 = vmul.f32 %v6549_v22, %v5413_v11  ;;  %v5324_v39 = vmax.f32 %v5228_v49, 0.0  ;;  %v4943_v0 = vpop.xlane.xlu1 %4942  ;;  %v5038_v24 = vmul.f32 0.0078125, %v4941_v27 }
 0x4e7   :  { %v6551_v37 = vpop.eup %6550  ;;  %v5800_v2 = vmul.f32 %v12946_v53, %v5700_v43  ;;  %6560 = vrsqrt.f32 %v5515_v51  ;;  %v5325_v32 = vmax.f32 %v5229_v23, 0.0  ;;  %v5039_v30 = vmul.f32 0.0078125, %v4943_v0 }
 0x4e8   :  { %5995 = vst [vmem:[%s14558_s3 + $0x298] sm:$0x1] %v5899_v45  ;;  %v5801_v33 = vmul.f32 %v12946_v53, %v5701_v34  ;;  %v5702_v14 = vmul.f32 %v6551_v37, %v5414_v57  ;;  %v5516_v52 = vadd.f32 1e-05, %v5324_v39  ;;  %v5230_v11 = vsub.f32 %v5038_v24, %v14425_v42 }
 0x4e9   :  { %v6553_v6 = vpop.eup %6552  ;;  %v5900_v48 = vadd.f32 %v12948_v63, %v5800_v2  ;;  %v5517_v31 = vadd.f32 1e-05, %v5325_v32  ;;  %v5231_v50 = vsub.f32 %v5039_v30, %v5135_v1  ;;  %v5417_v36 = vsub.f32 %v13879_v59, %v14405_v40 }
 0x4ea   :  { %v5901_v62 = vadd.f32 %v12948_v63, %v5801_v33  ;;  %v5703_v15 = vmul.f32 %v6553_v6, %v15300_v21  ;;  %v5802_v55 = vmul.f32 %v12946_v53, %v5702_v14  ;;  %6562 = vrsqrt.f32 %v5516_v52 }
 0x4eb   :  { %5996 = vst [vmem:[%s14558_s3 + $0x2a0] sm:$0xff] %v5900_v48  ;;  %6564 = vrsqrt.f32 %v5517_v31  ;;  %v5327_v47 = vmax.f32 %v5231_v50, 0.0  ;;  %v5326_v57 = vmax.f32 %v5230_v11, 0.0  ;;  %v5418_v58 = vsub.f32 %v13859_v9, %v14389_v61 }
 0x4ec   :  { %v6555_v42 = vpop.eup %6554  ;;  %5997 = vst [vmem:[%s14558_s3 + $0x2a8] sm:$0xff] %v5901_v62  ;;  %v5803_v10 = vmul.f32 %v12946_v53, %v5703_v15  ;;  %v5902_v29 = vadd.f32 %v12948_v63, %v5802_v55  ;;  %v5419_v25 = vsub.f32 %v13864_v8, %v14386_v13  ;;  %v5420_v44 = vsub.f32 %v13964_v16, %v14413_v46 }
 0x4ed   :  { %v6557_v28 = vpop.eup %6556  ;;  %v5704_v41 = vmul.f32 %v6555_v42, %v5416_v54  ;;  %v5519_v20 = vadd.f32 1e-05, %v5327_v47  ;;  %v5518_v5 = vadd.f32 1e-05, %v5326_v57  ;;  %v5421_v13 = vsub.f32 %v13972_v26, %v14421_v18 }
 0x4ee   :  { %v5903_v3 = vadd.f32 %v12948_v63, %v5803_v10  ;;  %5998 = vst [vmem:[%s14558_s3 + $0x2b0] sm:$0xff] %v5902_v29  ;;  %v5705_v59 = vmul.f32 %v6557_v28, %v5417_v36  ;;  %v5423_v26 = vsub.f32 %v13958_v38, %v14418_v7  ;;  %v5422_v45 = vsub.f32 %v13948_v19, %v14410_v4 }
 0x4ef   :  { %v6559_v40 = vpop.eup %6558  ;;  %v5804_v17 = vmul.f32 %v12946_v53, %v5704_v41  ;;  %6566 = vrsqrt.f32 %v5519_v20 }
 0x4f0   :  { %5999 = vst [vmem:[%s14558_s3 + $0x2b8] sm:$0x1] %v5903_v3  ;;  %v5805_v9 = vmul.f32 %v12946_v53, %v5705_v59  ;;  %v5706_v61 = vmul.f32 %v6559_v40, %v5418_v58  ;;  %6568 = vrsqrt.f32 %v5518_v5 }
 0x4f1   :  { %v6561_v56 = vpop.eup %6560  ;;  %v5904_v35 = vadd.f32 %v12948_v63, %v5804_v17 }
 0x4f2   :  { %v5905_v12 = vadd.f32 %v12948_v63, %v5805_v9  ;;  %v5707_v1 = vmul.f32 %v6561_v56, %v5419_v25  ;;  %v5806_v60 = vmul.f32 %v12946_v53, %v5706_v61 }
 0x4f3   :  { %6000 = vst [vmem:[%s14558_s3 + $0x2c0] sm:$0xff] %v5904_v35 }
 0x4f4   :  { %v6563_v8 = vpop.eup %6562  ;;  %6001 = vst [vmem:[%s14558_s3 + $0x2c8] sm:$0xff] %v5905_v12  ;;  %v5807_v49 = vmul.f32 %v12946_v53, %v5707_v1  ;;  %v5906_v27 = vadd.f32 %v12948_v63, %v5806_v60 }
 0x4f5   :  { %v6565_v22 = vpop.eup %6564  ;;  %v5708_v43 = vmul.f32 %v6563_v8, %v5420_v44 }
 0x4f6   :  { %v5907_v16 = vadd.f32 %v12948_v63, %v5807_v49  ;;  %6002 = vst [vmem:[%s14558_s3 + $0x2d0] sm:$0xff] %v5906_v27  ;;  %v5709_v46 = vmul.f32 %v6565_v22, %v5421_v13 }
 0x4f7   :  { %v5808_v51 = vmul.f32 %v12946_v53, %v5708_v43 }
 0x4f8   :  { %6003 = vst [vmem:[%s14558_s3 + $0x2d8] sm:$0x1] %v5907_v16  ;;  %v5809_v18 = vmul.f32 %v12946_v53, %v5709_v46 }
 0x4f9   :  { %v6567_v23 = vpop.eup %6566  ;;  %v5908_v34 = vadd.f32 %v12948_v63, %v5808_v51 }
 0x4fa   :  { %v6569_v39 = vpop.eup %6568  ;;  %v5909_v0 = vadd.f32 %v12948_v63, %v5809_v18  ;;  %v5711_v24 = vmul.f32 %v6567_v23, %v5423_v26 }
 0x4fb   :  { %6004 = vst [vmem:[%s14558_s3 + $0x2e0] sm:$0xff] %v5908_v34  ;;  %v5710_v38 = vmul.f32 %v6569_v39, %v5422_v45 }
 0x4fc   :  { %6005 = vst [vmem:[%s14558_s3 + $0x2e8] sm:$0xff] %v5909_v0  ;;  %v5811_v7 = vmul.f32 %v12946_v53, %v5711_v24 }
 0x4fd   :  { %v5810_v37 = vmul.f32 %v12946_v53, %v5710_v38 }
 0x4fe   :  { %v5911_v19 = vadd.f32 %v12948_v63, %v5811_v7 }
 0x4ff   :  { %v5910_v4 = vadd.f32 %v12948_v63, %v5810_v37 }
 0x500   :  { %6007 = vst [vmem:[%s14558_s3 + $0x2f8] sm:$0x1] %v5911_v19 }
 0x501   :  { %6006 = vst [vmem:[%s14558_s3 + $0x2f0] sm:$0xff] %v5910_v4 }

</bundles_post_ra>
